<compile_context>
chip_gen: v7x
topology: tpu7x:2x2x1
jax: 0.10.0
libtpu: 0.0.40
codegen_flags: <defaults>
</compile_context>

<pallas_src>
import functools

import jax
import jax.numpy as jnp
from jax.experimental import pallas as pl
from jax.experimental.pallas import tpu as pltpu

DIM_LS = 32  # latent-space channels (dimLS in the PyTorch module)


def _round_up(x, m):
    return (x + m - 1) // m * m


def _cdiv(a, b):
    return -(-a // b)


# ----------------------------------------------------------------------------
# Generation-aware VMEM budgets
# ----------------------------------------------------------------------------
@functools.lru_cache(maxsize=None)
def _vmem_budgets():
    """(per-tile budget, vmem_limit_bytes) -- conservative on v7x, roomy on v5e/v6e."""
    try:
        cap = getattr(pltpu.get_tpu_info(), "vmem_capacity_bytes", 64 * 2**20)
    except Exception:  # pragma: no cover - be conservative if query fails
        cap = 64 * 2**20
    if cap >= 100 * 2**20:           # v5e / v6e: 128 MiB physical VMEM
        return 48 * 2**20, 96 * 2**20
    return 20 * 2**20, 32 * 2**20    # v7x-safe: 64 MiB physical / 32 MiB scoped


# ----------------------------------------------------------------------------
# Pallas kernel: matmul with ReLU fused on the f32 accumulator
# ----------------------------------------------------------------------------
def _matmul_kernel(a_ref, b_ref, o_ref, *, relu):
    acc = jnp.dot(a_ref[...], b_ref[...], preferred_element_type=jnp.float32)
    if relu:
        acc = jnp.maximum(acc, 0.0)          # ReLU on f32 acc (v5e: no bf16 VPU)
    o_ref[...] = acc.astype(o_ref.dtype)     # cast (bf16 intermediates) last


def _pick_tile_m(M, Kp, N, out_bytes, lane_major):
    """M tile: single tile for small layers; otherwise >=2 VMEM-budgeted tiles
    (so both v7x TensorCores get work on the parallel grid axis)."""
    budget, _ = _vmem_budgets()
    gran = 128 if lane_major else 16          # lane granularity vs bf16 sublanes
    per_row = 2 * (Kp * 2 + N * out_bytes)    # db bf16 A row + db out row
    fixed = 2 * Kp * N * 2                    # db bf16 weight tile
    cap = max(gran, (budget - fixed) // max(per_row, 1))
    cap = min(cap, 2048)
    m_r = _round_up(M, gran)
    if M < 256 and m_r <= cap:
        return m_r                            # one tile for the tiny layers
    n_tiles = max(2, _cdiv(m_r, cap))         # >=2 grid steps when M is large
    return _round_up(_cdiv(M, n_tiles), gran)


def pallas_matmul(a, b, *, relu, out_dtype, lane_major):
    """Single Pallas matmul with fused ReLU.

    lane_major=False: a (M, K), b (Kp, N)        -> (M, N)
    lane_major=True : a = A^T (K, M), b = B^T (N, Kp) -> (N, M)   (lane-dense M)
    K is zero-padded up to Kp inside; M is padded to the tile grid.
    """
    a = a.astype(jnp.bfloat16)
    _, vmem_limit = _vmem_budgets()
    kern = functools.partial(_matmul_kernel, relu=relu)
    cparams = pltpu.CompilerParams(
        dimension_semantics=("parallel",), vmem_limit_bytes=vmem_limit)
    out_bytes = jnp.dtype(out_dtype).itemsize

    if lane_major:
        K, M = a.shape
        N, Kp = b.shape
        tile_m = _pick_tile_m(M, Kp, N, out_bytes, True)
        grid = _cdiv(M, tile_m)
        Mp = grid * tile_m
        if Kp != K or Mp != M:
            a = jnp.pad(a, ((0, Kp - K), (0, Mp - M)))
        out = pl.pallas_call(
            kern,
            out_shape=jax.ShapeDtypeStruct((N, Mp), out_dtype),
            grid=(grid,),
            in_specs=[
                pl.BlockSpec((N, Kp), lambda i: (0, 0)),       # B^T resident
                pl.BlockSpec((Kp, tile_m), lambda i: (0, i)),  # A^T tile, M on lanes
            ],
            out_specs=pl.BlockSpec((N, tile_m), lambda i: (0, i)),
            compiler_params=cparams,
        )(b, a)
        return out if Mp == M else out[:, :M]

    M, K = a.shape
    Kp, N = b.shape
    tile_m = _pick_tile_m(M, Kp, N, out_bytes, False)
    grid = _cdiv(M, tile_m)
    Mp = grid * tile_m
    if Kp != K or Mp != M:
        a = jnp.pad(a, ((0, Mp - M), (0, Kp - K)))
    out = pl.pallas_call(
        kern,
        out_shape=jax.ShapeDtypeStruct((Mp, N), out_dtype),
        grid=(grid,),
        in_specs=[
            pl.BlockSpec((tile_m, Kp), lambda i: (i, 0)),
            pl.BlockSpec((Kp, N), lambda i: (0, 0)),           # weights resident
        ],
        out_specs=pl.BlockSpec((tile_m, N), lambda i: (i, 0)),
        compiler_params=cparams,
    )(a, b)
    return out if Mp == M else out[:M]


# ----------------------------------------------------------------------------
# Patch extraction (NHWC).  TODO(synk): fuse into the kernel via manual DMA.
# ----------------------------------------------------------------------------
def _extract_patches(xp, idx_h, idx_w, lane_major):
    """xp: (B, Hp, Wp, C); idx_h: (OH, TH); idx_w: (OW, TW).
    lane_major=False -> A   (B*OH*OW, TH*TW*C)
    lane_major=True  -> A^T (TH*TW*C, B*OH*OW)   (M directly on the lane axis)."""
    p = xp[:, idx_h[:, :, None, None], idx_w[None, None, :, :], :]
    # p: (B, OH, TH, OW, TW, C)
    b, oh, th, ow, tw, c = p.shape
    if lane_major:
        p = jnp.transpose(p, (2, 4, 5, 0, 1, 3))   # (TH, TW, C, B, OH, OW)
        return p.reshape(th * tw * c, b * oh * ow)
    p = jnp.transpose(p, (0, 1, 3, 2, 4, 5))       # (B, OH, OW, TH, TW, C)
    return p.reshape(b * oh * ow, th * tw * c)


# ----------------------------------------------------------------------------
# Sub-pixel (folded) ConvTranspose2d bookkeeping
# ----------------------------------------------------------------------------
def _axis_fold(k, s, p):
    """Per-axis fold metadata for ConvTranspose(stride s, kernel k, padding p):
    each output parity class c reads a stride-1 window of the (un-dilated)
    input; all classes share one window of length T starting at offset Q."""
    pad_l = k - 1 - p
    cls = []
    for c in range(s):
        r = (pad_l - c) % s                       # first flipped-kernel tap
        taps = _cdiv(k - r, s) if r < k else 0
        q = (c + r - pad_l) // s                  # exact by construction
        cls.append((r, taps, q))
    valid = [x for x in cls if x[1] > 0]          # at least the r==0 class
    Q = min(q for _, _, q in valid)
    T = max(q + t for _, t, q in valid) - Q
    lpad = max(0, -Q)
    return dict(cls=cls, Q=Q, T=T, lpad=lpad, start=Q + lpad)


def _fold_convT_weight(w, stride, fold_h, fold_w):
    """w: (Cin, Cout, KH, KW) PyTorch layout -> folded B (Th*Tw*Cin, sh*sw*Cout):
    column block (ch, cw, co) holds the zero-padded sub-kernel of parity (ch, cw)."""
    cin, cout, kh, kw = w.shape
    sh, sw = stride
    wf = jnp.transpose(w[:, :, ::-1, ::-1], (2, 3, 0, 1))   # flipped, (kh,kw,cin,cout)
    Th, Tw = fold_h["T"], fold_w["T"]
    B = jnp.zeros((Th, Tw, cin, sh, sw, cout), w.dtype)
    for ch, (rh, th, qh) in enumerate(fold_h["cls"]):
        if th == 0:
            continue
        off_h = qh - fold_h["Q"]
        for cw, (rw, tw, qw) in enumerate(fold_w["cls"]):
            if tw == 0:
                continue
            off_w = qw - fold_w["Q"]
            sub = wf[rh::sh, rw::sw]                        # (th, tw, cin, cout)
            B = B.at[off_h:off_h + th, off_w:off_w + tw, :, ch, cw, :].set(sub)
    return B.reshape(Th * Tw * cin, sh * sw * cout)


# ----------------------------------------------------------------------------
# AE2D architecture (matches the PyTorch module exactly)
# ----------------------------------------------------------------------------
ENC_CFG = [  # (cin, cout, (kh,kw), (sh,sw), (ph,pw))
    (1, 16, (30, 5), (4, 2), (1, 0)),
    (16, 32, (6, 2), (4, 2), (1, 0)),
    (32, 64, (6, 2), (2, 1), (1, 0)),
    (64, 128, (6, 2), (2, 1), (1, 0)),
    (128, DIM_LS, (6, 2), (1, 1), (1, 0)),
]
DEC_CFG = [  # (cin, cout, (kh,kw), (sh,sw), (ph,pw), (oph,opw), relu)
    (DIM_LS, 128, (27, 3), (1, 1), (1, 0), (0, 0), True),
    (128, 64, (4, 2), (2, 1), (1, 0), (0, 0), True),
    (64, 32, (4, 2), (2, 1), (1, 0), (0, 0), True),
    (32, 16, (4, 2), (2, 2), (1, 0), (0, 0), True),
    (16, 1, (4, 2), (2, 2), (1, 0), (1, 1), False),  # no ReLU on last layer
]


def _build_layer_meta():
    """Static per-layer metadata (no weights involved) -- closed over by the jit."""
    meta = []
    for (cin, cout, k, s, p) in ENC_CFG:
        kh, kw = k
        K = kh * kw * cin
        meta.append(dict(
            kind="conv", cin=cin, cout=cout, kernel=k, stride=s, padding=p,
            K=K, Kp=_round_up(K, 128), n_cols=cout, relu=True,
            out_dtype=jnp.bfloat16, lane_major=cout < 128))
    n_dec = len(DEC_CFG)
    for i, (cin, cout, k, s, p, op, relu) in enumerate(DEC_CFG):
        kh, kw = k
        sh, sw = s
        fh = _axis_fold(kh, sh, p[0])
        fw = _axis_fold(kw, sw, p[1])
        K = fh["T"] * fw["T"] * cin
        n_cols = sh * sw * cout
        meta.append(dict(
            kind="convT", cin=cin, cout=cout, kernel=k, stride=s, padding=p,
            output_padding=op, fold_h=fh, fold_w=fw, K=K, Kp=_round_up(K, 128),
            n_cols=n_cols, relu=relu,
            out_dtype=jnp.float32 if i == n_dec - 1 else jnp.bfloat16,
            lane_major=n_cols < 128))
    return meta


LAYER_META = _build_layer_meta()


def init_params(key):
    """Deterministic synthetic weights (PyTorch-like uniform fan-in scaling),
    in the original PyTorch layouts."""
    enc_ws, dec_ws = [], []
    for cin, cout, (kh, kw), _, _ in ENC_CFG:
        key, sub = jax.random.split(key)
        bound = 1.0 / (cin * kh * kw) ** 0.5
        enc_ws.append(jax.random.uniform(
            sub, (cout, cin, kh, kw), jnp.float32, -bound, bound))
    for cin, cout, (kh, kw), *_ in DEC_CFG:
        key, sub = jax.random.split(key)
        bound = 1.0 / (cout * kh * kw) ** 0.5
        dec_ws.append(jax.random.uniform(
            sub, (cin, cout, kh, kw), jnp.float32, -bound, bound))
    return enc_ws, dec_ws


def prepare_weights(enc_ws, dec_ws):
    """One-time weight prep (hoisted out of the forward): transpose/flip/fold,
    zero-pad K to a multiple of 128, cast to bf16, and pre-transpose to B^T
    (sublane-padded N) for the lane-major (small-cout) layers."""
    mats = []
    for w, meta in zip(list(enc_ws) + list(dec_ws), LAYER_META):
        if meta["kind"] == "conv":
            kh, kw = meta["kernel"]
            b = jnp.transpose(w, (2, 3, 1, 0)).reshape(meta["K"], meta["cout"])
        else:
            b = _fold_convT_weight(w, meta["stride"], meta["fold_h"], meta["fold_w"])
        if meta["Kp"] != meta["K"]:
            b = jnp.pad(b, ((0, meta["Kp"] - meta["K"]), (0, 0)))
        b = b.astype(jnp.bfloat16)
        if meta["lane_major"]:
            b = b.T                                        # (N, Kp)
            n_pad = _round_up(b.shape[0], 8) - b.shape[0]
            if n_pad:
                b = jnp.pad(b, ((0, n_pad), (0, 0)))       # sublane-align small N
        mats.append(b)
    return tuple(mats)


# ----------------------------------------------------------------------------
# Per-layer forward (NHWC activations end-to-end)
# ----------------------------------------------------------------------------
def conv2d_prepped(x, b_mat, meta):
    kh, kw = meta["kernel"]
    sh, sw = meta["stride"]
    ph, pw = meta["padding"]
    n, h, wd, _ = x.shape
    if ph or pw:
        x = jnp.pad(x, ((0, 0), (ph, ph), (pw, pw), (0, 0)))
    oh = (h + 2 * ph - kh) // sh + 1
    ow = (wd + 2 * pw - kw) // sw + 1
    idx_h = (jnp.arange(oh) * sh)[:, None] + jnp.arange(kh)[None, :]
    idx_w = (jnp.arange(ow) * sw)[:, None] + jnp.arange(kw)[None, :]
    a = _extract_patches(x, idx_h, idx_w, meta["lane_major"])
    y = pallas_matmul(a, b_mat, relu=meta["relu"],
                      out_dtype=meta["out_dtype"], lane_major=meta["lane_major"])
    if meta["lane_major"]:
        y = y.T                                            # (N, M) -> (M, N)
    y = y[:, :meta["n_cols"]]
    return y.reshape(n, oh, ow, meta["n_cols"])


def conv_transpose_prepped(x, b_mat, meta):
    """Folded ConvTranspose2d: one stride-1 patch matrix, one Pallas matmul,
    one depth-to-space interleave."""
    kh, kw = meta["kernel"]
    sh, sw = meta["stride"]
    ph, pw = meta["padding"]
    oph, opw = meta["output_padding"]
    fh, fw = meta["fold_h"], meta["fold_w"]
    cout = meta["cout"]
    n, h, wd, _ = x.shape
    oh = (h - 1) * sh - 2 * ph + kh + oph
    ow = (wd - 1) * sw - 2 * pw + kw + opw
    mh, mw = _cdiv(oh, sh), _cdiv(ow, sw)
    rpad_h = max(0, fh["Q"] + mh + fh["T"] - 1 - h)
    rpad_w = max(0, fw["Q"] + mw + fw["T"] - 1 - wd)
    xp = jnp.pad(x, ((0, 0), (fh["lpad"], rpad_h), (fw["lpad"], rpad_w), (0, 0)))
    idx_h = (fh["start"] + jnp.arange(mh))[:, None] + jnp.arange(fh["T"])[None, :]
    idx_w = (fw["start"] + jnp.arange(mw))[:, None] + jnp.arange(fw["T"])[None, :]
    a = _extract_patches(xp, idx_h, idx_w, meta["lane_major"])
    y = pallas_matmul(a, b_mat, relu=meta["relu"],
                      out_dtype=meta["out_dtype"], lane_major=meta["lane_major"])
    if meta["lane_major"]:
        y = y.T
    y = y[:, :meta["n_cols"]]
    # depth-to-space: columns ordered (ch, cw, cout); out[mh*sh+ch, mw*sw+cw] = y[mh, mw]
    y = y.reshape(n, mh, mw, sh, sw, cout)
    y = jnp.transpose(y, (0, 1, 3, 2, 4, 5)).reshape(n, mh * sh, mw * sw, cout)
    return y[:, :oh, :ow, :]


def ae2d_forward(x, mats):
    """x: NCHW in, NCHW out; internally NHWC (bf16 intermediates) end-to-end."""
    h = jnp.transpose(x, (0, 2, 3, 1))                     # NCHW -> NHWC (once)
    for b_mat, meta in zip(mats, LAYER_META):
        if meta["kind"] == "conv":
            h = conv2d_prepped(h, b_mat, meta)
        else:
            h = conv_transpose_prepped(h, b_mat, meta)
    return jnp.transpose(h, (0, 3, 1, 2))                  # NHWC -> NCHW (once)


if __name__ == "__main__":
    # Smallest input H that survives the encoder is 376; W=21 keeps every width
    # positive.  Latent is (N, DIM_LS, 1, 1); decoded output is (N, 1, 401, 21).
    x = jax.random.normal(jax.random.PRNGKey(0), (2, 1, 376, 21), jnp.float32)
    enc_ws, dec_ws = init_params(jax.random.PRNGKey(42))
    mats = prepare_weights(enc_ws, dec_ws)                 # one-time weight prep

    fwd = jax.jit(ae2d_forward)
    out = jax.block_until_ready(fwd(x, mats))

    assert out.shape == (2, 1, 401, 21), out.shape
    assert bool(jnp.all(jnp.isfinite(out)))
    print("KERNEL_OK")
</pallas_src>

<mosaic_0001>
module attributes {stable_mosaic.version = 11 : i64} {
  func.func @_matmul_kernel(%arg0: i32, %arg1: memref<16x256xbf16, #tpu.memory_space<vmem>>, %arg2: memref<256x896xbf16, #tpu.memory_space<vmem>>, %arg3: memref<16x896xbf16, #tpu.memory_space<vmem>>) attributes {dimension_semantics = [#tpu.dimension_semantics<parallel>], iteration_bounds = array<i64: 2>, scalar_prefetch = 0 : i64, scratch_operands = 0 : i64, tpu.core_type = #tpu.core_type<tc>, window_params = [{pipeline_mode = #tpu.pipeline_mode<synchronous>, transform_indices = @transform_0, window_bounds = array<i64: 16, 256>}, {transform_indices = @transform_1, window_bounds = array<i64: 256, 896>}, {transform_indices = @transform_2, window_bounds = array<i64: 16, 896>}]} {
    %c0 = arith.constant 0 : index
    %c0_0 = arith.constant 0 : index
    %0 = vector.load %arg1[%c0, %c0_0] : memref<16x256xbf16, #tpu.memory_space<vmem>>, vector<16x256xbf16>
    %c0_1 = arith.constant 0 : index
    %c0_2 = arith.constant 0 : index
    %1 = vector.load %arg2[%c0_1, %c0_2] : memref<256x896xbf16, #tpu.memory_space<vmem>>, vector<256x896xbf16>
    %cst = arith.constant dense<0.000000e+00> : vector<16x896xf32>
    %2 = tpu.matmul %0, %1, %cst {dimension_numbers = #tpu.dot_dimension_numbers<[1], [0], [0], [1], [0, 0, 1, 1], [], []>} : vector<16x256xbf16>, vector<256x896xbf16>, vector<16x896xf32> -> vector<16x896xf32>
    %cst_3 = arith.constant 0.000000e+00 : f32
    %3 = vector.broadcast %cst_3 : f32 to vector<16x896xf32>
    %4 = arith.maximumf %2, %3 : vector<16x896xf32>
    %5 = arith.truncf %4 : vector<16x896xf32> to vector<16x896xbf16>
    %c0_4 = arith.constant 0 : index
    %c0_5 = arith.constant 0 : index
    %6 = vector.load %arg3[%c0_4, %c0_5] : memref<16x896xbf16, #tpu.memory_space<vmem>>, vector<16x896xbf16>
    tpu.vector_store %arg3[%c0_4, %c0_5], %5 {strides = array<i32>} : memref<16x896xbf16, #tpu.memory_space<vmem>>, vector<16x896xbf16>,
    return
  }
  func.func @transform_0(%arg0: i32) -> (i32, i32) {
    %c0_i32 = arith.constant 0 : i32
    %c0_i32_0 = arith.constant 0 : i32
    %c0_i32_1 = arith.constant 0 : i32
    return %c0_i32, %c0_i32_0 : i32, i32
  }
  func.func @transform_1(%arg0: i32) -> (i32, i32) {
    %c0_i32 = arith.constant 0 : i32
    %c0_i32_0 = arith.constant 0 : i32
    return %c0_i32, %arg0 : i32, i32
  }
  func.func @transform_2(%arg0: i32) -> (i32, i32) {
    %c0_i32 = arith.constant 0 : i32
    %c0_i32_0 = arith.constant 0 : i32
    return %c0_i32, %arg0 : i32, i32
  }
}

module attributes {stable_mosaic.version = 11 : i64} {
  func.func @_matmul_kernel(%arg0: i32, %arg1: memref<32x256xbf16, #tpu.memory_space<vmem>>, %arg2: memref<256x256xbf16, #tpu.memory_space<vmem>>, %arg3: memref<32x256xbf16, #tpu.memory_space<vmem>>) attributes {dimension_semantics = [#tpu.dimension_semantics<parallel>], iteration_bounds = array<i64: 1>, scalar_prefetch = 0 : i64, scratch_operands = 0 : i64, tpu.core_type = #tpu.core_type<tc>, window_params = [{pipeline_mode = #tpu.pipeline_mode<synchronous>, transform_indices = @transform_0, window_bounds = array<i64: 32, 256>}, {transform_indices = @transform_1, window_bounds = array<i64: 256, 256>}, {transform_indices = @transform_2, window_bounds = array<i64: 32, 256>}]} {
    %c0 = arith.constant 0 : index
    %c0_0 = arith.constant 0 : index
    %0 = vector.load %arg1[%c0, %c0_0] : memref<32x256xbf16, #tpu.memory_space<vmem>>, vector<32x256xbf16>
    %c0_1 = arith.constant 0 : index
    %c0_2 = arith.constant 0 : index
    %1 = vector.load %arg2[%c0_1, %c0_2] : memref<256x256xbf16, #tpu.memory_space<vmem>>, vector<256x256xbf16>
    %cst = arith.constant dense<0.000000e+00> : vector<32x256xf32>
    %2 = tpu.matmul %0, %1, %cst {dimension_numbers = #tpu.dot_dimension_numbers<[1], [0], [0], [1], [0, 0, 1, 1], [], []>} : vector<32x256xbf16>, vector<256x256xbf16>, vector<32x256xf32> -> vector<32x256xf32>
    %cst_3 = arith.constant 0.000000e+00 : f32
    %3 = vector.broadcast %cst_3 : f32 to vector<32x256xf32>
    %4 = arith.maximumf %2, %3 : vector<32x256xf32>
    %5 = arith.truncf %4 : vector<32x256xf32> to vector<32x256xbf16>
    %c0_4 = arith.constant 0 : index
    %c0_5 = arith.constant 0 : index
    %6 = vector.load %arg3[%c0_4, %c0_5] : memref<32x256xbf16, #tpu.memory_space<vmem>>, vector<32x256xbf16>
    tpu.vector_store %arg3[%c0_4, %c0_5], %5 {strides = array<i32>} : memref<32x256xbf16, #tpu.memory_space<vmem>>, vector<32x256xbf16>,
    return
  }
  func.func @transform_0(%arg0: i32) -> (i32, i32) {
    %c0_i32 = arith.constant 0 : i32
    %c0_i32_0 = arith.constant 0 : i32
    %c0_i32_1 = arith.constant 0 : i32
    return %c0_i32, %c0_i32_0 : i32, i32
  }
  func.func @transform_1(%arg0: i32) -> (i32, i32) {
    %c0_i32 = arith.constant 0 : i32
    %c0_i32_0 = arith.constant 0 : i32
    return %c0_i32, %arg0 : i32, i32
  }
  func.func @transform_2(%arg0: i32) -> (i32, i32) {
    %c0_i32 = arith.constant 0 : i32
    %c0_i32_0 = arith.constant 0 : i32
    return %c0_i32, %arg0 : i32, i32
  }
}

module attributes {stable_mosaic.version = 11 : i64} {
  func.func @_matmul_kernel(%arg0: i32, %arg1: memref<64x384xbf16, #tpu.memory_space<vmem>>, %arg2: memref<384x128xbf16, #tpu.memory_space<vmem>>, %arg3: memref<64x128xbf16, #tpu.memory_space<vmem>>) attributes {dimension_semantics = [#tpu.dimension_semantics<parallel>], iteration_bounds = array<i64: 1>, scalar_prefetch = 0 : i64, scratch_operands = 0 : i64, tpu.core_type = #tpu.core_type<tc>, window_params = [{pipeline_mode = #tpu.pipeline_mode<synchronous>, transform_indices = @transform_0, window_bounds = array<i64: 64, 384>}, {transform_indices = @transform_1, window_bounds = array<i64: 384, 128>}, {transform_indices = @transform_2, window_bounds = array<i64: 64, 128>}]} {
    %c0 = arith.constant 0 : index
    %c0_0 = arith.constant 0 : index
    %0 = vector.load %arg1[%c0, %c0_0] : memref<64x384xbf16, #tpu.memory_space<vmem>>, vector<64x384xbf16>
    %c0_1 = arith.constant 0 : index
    %c0_2 = arith.constant 0 : index
    %1 = vector.load %arg2[%c0_1, %c0_2] : memref<384x128xbf16, #tpu.memory_space<vmem>>, vector<384x128xbf16>
    %cst = arith.constant dense<0.000000e+00> : vector<64x128xf32>
    %2 = tpu.matmul %0, %1, %cst {dimension_numbers = #tpu.dot_dimension_numbers<[1], [0], [0], [1], [0, 0, 1, 1], [], []>} : vector<64x384xbf16>, vector<384x128xbf16>, vector<64x128xf32> -> vector<64x128xf32>
    %cst_3 = arith.constant 0.000000e+00 : f32
    %3 = vector.broadcast %cst_3 : f32 to vector<64x128xf32>
    %4 = arith.maximumf %2, %3 : vector<64x128xf32>
    %5 = arith.truncf %4 : vector<64x128xf32> to vector<64x128xbf16>
    %c0_4 = arith.constant 0 : index
    %c0_5 = arith.constant 0 : index
    %6 = vector.load %arg3[%c0_4, %c0_5] : memref<64x128xbf16, #tpu.memory_space<vmem>>, vector<64x128xbf16>
    tpu.vector_store %arg3[%c0_4, %c0_5], %5 {strides = array<i32>} : memref<64x128xbf16, #tpu.memory_space<vmem>>, vector<64x128xbf16>,
    return
  }
  func.func @transform_0(%arg0: i32) -> (i32, i32) {
    %c0_i32 = arith.constant 0 : i32
    %c0_i32_0 = arith.constant 0 : i32
    %c0_i32_1 = arith.constant 0 : i32
    return %c0_i32, %c0_i32_0 : i32, i32
  }
  func.func @transform_1(%arg0: i32) -> (i32, i32) {
    %c0_i32 = arith.constant 0 : i32
    %c0_i32_0 = arith.constant 0 : i32
    return %c0_i32, %arg0 : i32, i32
  }
  func.func @transform_2(%arg0: i32) -> (i32, i32) {
    %c0_i32 = arith.constant 0 : i32
    %c0_i32_0 = arith.constant 0 : i32
    return %c0_i32, %arg0 : i32, i32
  }
}

module attributes {stable_mosaic.version = 11 : i64} {
  func.func @_matmul_kernel(%arg0: i32, %arg1: memref<16x768xbf16, #tpu.memory_space<vmem>>, %arg2: memref<768x128xbf16, #tpu.memory_space<vmem>>, %arg3: memref<16x128xbf16, #tpu.memory_space<vmem>>) attributes {dimension_semantics = [#tpu.dimension_semantics<parallel>], iteration_bounds = array<i64: 1>, scalar_prefetch = 0 : i64, scratch_operands = 0 : i64, tpu.core_type = #tpu.core_type<tc>, window_params = [{transform_indices = @transform_0, window_bounds = array<i64: 16, 768>}, {pipeline_mode = #tpu.pipeline_mode<synchronous>, transform_indices = @transform_1, window_bounds = array<i64: 768, 128>}, {transform_indices = @transform_2, window_bounds = array<i64: 16, 128>}]} {
    %c0 = arith.constant 0 : index
    %c0_0 = arith.constant 0 : index
    %0 = vector.load %arg1[%c0, %c0_0] : memref<16x768xbf16, #tpu.memory_space<vmem>>, vector<16x768xbf16>
    %c0_1 = arith.constant 0 : index
    %c0_2 = arith.constant 0 : index
    %1 = vector.load %arg2[%c0_1, %c0_2] : memref<768x128xbf16, #tpu.memory_space<vmem>>, vector<768x128xbf16>
    %cst = arith.constant dense<0.000000e+00> : vector<16x128xf32>
    %2 = tpu.matmul %0, %1, %cst {dimension_numbers = #tpu.dot_dimension_numbers<[1], [0], [0], [1], [0, 0, 1, 1], [], []>} : vector<16x768xbf16>, vector<768x128xbf16>, vector<16x128xf32> -> vector<16x128xf32>
    %cst_3 = arith.constant 0.000000e+00 : f32
    %3 = vector.broadcast %cst_3 : f32 to vector<16x128xf32>
    %4 = arith.maximumf %2, %3 : vector<16x128xf32>
    %5 = arith.truncf %4 : vector<16x128xf32> to vector<16x128xbf16>
    %c0_4 = arith.constant 0 : index
    %c0_5 = arith.constant 0 : index
    %6 = vector.load %arg3[%c0_4, %c0_5] : memref<16x128xbf16, #tpu.memory_space<vmem>>, vector<16x128xbf16>
    tpu.vector_store %arg3[%c0_4, %c0_5], %5 {strides = array<i32>} : memref<16x128xbf16, #tpu.memory_space<vmem>>, vector<16x128xbf16>,
    return
  }
  func.func @transform_0(%arg0: i32) -> (i32, i32) {
    %c0_i32 = arith.constant 0 : i32
    %c0_i32_0 = arith.constant 0 : i32
    return %arg0, %c0_i32 : i32, i32
  }
  func.func @transform_1(%arg0: i32) -> (i32, i32) {
    %c0_i32 = arith.constant 0 : i32
    %c0_i32_0 = arith.constant 0 : i32
    %c0_i32_1 = arith.constant 0 : i32
    return %c0_i32, %c0_i32_0 : i32, i32
  }
  func.func @transform_2(%arg0: i32) -> (i32, i32) {
    %c0_i32 = arith.constant 0 : i32
    %c0_i32_0 = arith.constant 0 : i32
    return %arg0, %c0_i32 : i32, i32
  }
}

module attributes {stable_mosaic.version = 11 : i64} {
  func.func @_matmul_kernel(%arg0: i32, %arg1: memref<32x1536xbf16, #tpu.memory_space<vmem>>, %arg2: memref<1536x128xbf16, #tpu.memory_space<vmem>>, %arg3: memref<32x128xbf16, #tpu.memory_space<vmem>>) attributes {dimension_semantics = [#tpu.dimension_semantics<parallel>], iteration_bounds = array<i64: 1>, scalar_prefetch = 0 : i64, scratch_operands = 0 : i64, tpu.core_type = #tpu.core_type<tc>, window_params = [{pipeline_mode = #tpu.pipeline_mode<synchronous>, transform_indices = @transform_0, window_bounds = array<i64: 32, 1536>}, {transform_indices = @transform_1, window_bounds = array<i64: 1536, 128>}, {transform_indices = @transform_2, window_bounds = array<i64: 32, 128>}]} {
    %c0 = arith.constant 0 : index
    %c0_0 = arith.constant 0 : index
    %0 = vector.load %arg1[%c0, %c0_0] : memref<32x1536xbf16, #tpu.memory_space<vmem>>, vector<32x1536xbf16>
    %c0_1 = arith.constant 0 : index
    %c0_2 = arith.constant 0 : index
    %1 = vector.load %arg2[%c0_1, %c0_2] : memref<1536x128xbf16, #tpu.memory_space<vmem>>, vector<1536x128xbf16>
    %cst = arith.constant dense<0.000000e+00> : vector<32x128xf32>
    %2 = tpu.matmul %0, %1, %cst {dimension_numbers = #tpu.dot_dimension_numbers<[1], [0], [0], [1], [0, 0, 1, 1], [], []>} : vector<32x1536xbf16>, vector<1536x128xbf16>, vector<32x128xf32> -> vector<32x128xf32>
    %cst_3 = arith.constant 0.000000e+00 : f32
    %3 = vector.broadcast %cst_3 : f32 to vector<32x128xf32>
    %4 = arith.maximumf %2, %3 : vector<32x128xf32>
    %5 = arith.truncf %4 : vector<32x128xf32> to vector<32x128xbf16>
    %c0_4 = arith.constant 0 : index
    %c0_5 = arith.constant 0 : index
    %6 = vector.load %arg3[%c0_4, %c0_5] : memref<32x128xbf16, #tpu.memory_space<vmem>>, vector<32x128xbf16>
    tpu.vector_store %arg3[%c0_4, %c0_5], %5 {strides = array<i32>} : memref<32x128xbf16, #tpu.memory_space<vmem>>, vector<32x128xbf16>,
    return
  }
  func.func @transform_0(%arg0: i32) -> (i32, i32) {
    %c0_i32 = arith.constant 0 : i32
    %c0_i32_0 = arith.constant 0 : i32
    %c0_i32_1 = arith.constant 0 : i32
    return %c0_i32, %c0_i32_0 : i32, i32
  }
  func.func @transform_1(%arg0: i32) -> (i32, i32) {
    %c0_i32 = arith.constant 0 : i32
    %c0_i32_0 = arith.constant 0 : i32
    return %c0_i32, %arg0 : i32, i32
  }
  func.func @transform_2(%arg0: i32) -> (i32, i32) {
    %c0_i32 = arith.constant 0 : i32
    %c0_i32_0 = arith.constant 0 : i32
    return %c0_i32, %arg0 : i32, i32
  }
}

module attributes {stable_mosaic.version = 11 : i64} {
  func.func @_matmul_kernel(%arg0: i32, %arg1: memref<160x2688xbf16, #tpu.memory_space<vmem>>, %arg2: memref<2688x128xbf16, #tpu.memory_space<vmem>>, %arg3: memref<160x128xbf16, #tpu.memory_space<vmem>>) attributes {dimension_semantics = [#tpu.dimension_semantics<parallel>], iteration_bounds = array<i64: 1>, scalar_prefetch = 0 : i64, scratch_operands = 0 : i64, tpu.core_type = #tpu.core_type<tc>, window_params = [{transform_indices = @transform_0, window_bounds = array<i64: 160, 2688>}, {pipeline_mode = #tpu.pipeline_mode<synchronous>, transform_indices = @transform_1, window_bounds = array<i64: 2688, 128>}, {transform_indices = @transform_2, window_bounds = array<i64: 160, 128>}]} {
    %c0 = arith.constant 0 : index
    %c0_0 = arith.constant 0 : index
    %0 = vector.load %arg1[%c0, %c0_0] : memref<160x2688xbf16, #tpu.memory_space<vmem>>, vector<160x2688xbf16>
    %c0_1 = arith.constant 0 : index
    %c0_2 = arith.constant 0 : index
    %1 = vector.load %arg2[%c0_1, %c0_2] : memref<2688x128xbf16, #tpu.memory_space<vmem>>, vector<2688x128xbf16>
    %cst = arith.constant dense<0.000000e+00> : vector<160x128xf32>
    %2 = tpu.matmul %0, %1, %cst {dimension_numbers = #tpu.dot_dimension_numbers<[1], [0], [0], [1], [0, 0, 1, 1], [], []>} : vector<160x2688xbf16>, vector<2688x128xbf16>, vector<160x128xf32> -> vector<160x128xf32>
    %cst_3 = arith.constant 0.000000e+00 : f32
    %3 = vector.broadcast %cst_3 : f32 to vector<160x128xf32>
    %4 = arith.maximumf %2, %3 : vector<160x128xf32>
    %5 = arith.truncf %4 : vector<160x128xf32> to vector<160x128xbf16>
    %c0_4 = arith.constant 0 : index
    %c0_5 = arith.constant 0 : index
    %6 = vector.load %arg3[%c0_4, %c0_5] : memref<160x128xbf16, #tpu.memory_space<vmem>>, vector<160x128xbf16>
    tpu.vector_store %arg3[%c0_4, %c0_5], %5 {strides = array<i32>} : memref<160x128xbf16, #tpu.memory_space<vmem>>, vector<160x128xbf16>,
    return
  }
  func.func @transform_0(%arg0: i32) -> (i32, i32) {
    %c0_i32 = arith.constant 0 : i32
    %c0_i32_0 = arith.constant 0 : i32
    return %arg0, %c0_i32 : i32, i32
  }
  func.func @transform_1(%arg0: i32) -> (i32, i32) {
    %c0_i32 = arith.constant 0 : i32
    %c0_i32_0 = arith.constant 0 : i32
    %c0_i32_1 = arith.constant 0 : i32
    return %c0_i32, %c0_i32_0 : i32, i32
  }
  func.func @transform_2(%arg0: i32) -> (i32, i32) {
    %c0_i32 = arith.constant 0 : i32
    %c0_i32_0 = arith.constant 0 : i32
    return %arg0, %c0_i32 : i32, i32
  }
}

module attributes {stable_mosaic.version = 11 : i64} {
  func.func @_matmul_kernel(%arg0: i32, %arg1: memref<208x768xbf16, #tpu.memory_space<vmem>>, %arg2: memref<768x128xbf16, #tpu.memory_space<vmem>>, %arg3: memref<208x128xbf16, #tpu.memory_space<vmem>>) attributes {dimension_semantics = [#tpu.dimension_semantics<parallel>], iteration_bounds = array<i64: 1>, scalar_prefetch = 0 : i64, scratch_operands = 0 : i64, tpu.core_type = #tpu.core_type<tc>, window_params = [{transform_indices = @transform_0, window_bounds = array<i64: 208, 768>}, {pipeline_mode = #tpu.pipeline_mode<synchronous>, transform_indices = @transform_1, window_bounds = array<i64: 768, 128>}, {transform_indices = @transform_2, window_bounds = array<i64: 208, 128>}]} {
    %c0 = arith.constant 0 : index
    %c0_0 = arith.constant 0 : index
    %0 = vector.load %arg1[%c0, %c0_0] : memref<208x768xbf16, #tpu.memory_space<vmem>>, vector<208x768xbf16>
    %c0_1 = arith.constant 0 : index
    %c0_2 = arith.constant 0 : index
    %1 = vector.load %arg2[%c0_1, %c0_2] : memref<768x128xbf16, #tpu.memory_space<vmem>>, vector<768x128xbf16>
    %cst = arith.constant dense<0.000000e+00> : vector<208x128xf32>
    %2 = tpu.matmul %0, %1, %cst {dimension_numbers = #tpu.dot_dimension_numbers<[1], [0], [0], [1], [0, 0, 1, 1], [], []>} : vector<208x768xbf16>, vector<768x128xbf16>, vector<208x128xf32> -> vector<208x128xf32>
    %cst_3 = arith.constant 0.000000e+00 : f32
    %3 = vector.broadcast %cst_3 : f32 to vector<208x128xf32>
    %4 = arith.maximumf %2, %3 : vector<208x128xf32>
    %5 = arith.truncf %4 : vector<208x128xf32> to vector<208x128xbf16>
    %c0_4 = arith.constant 0 : index
    %c0_5 = arith.constant 0 : index
    %6 = vector.load %arg3[%c0_4, %c0_5] : memref<208x128xbf16, #tpu.memory_space<vmem>>, vector<208x128xbf16>
    tpu.vector_store %arg3[%c0_4, %c0_5], %5 {strides = array<i32>} : memref<208x128xbf16, #tpu.memory_space<vmem>>, vector<208x128xbf16>,
    return
  }
  func.func @transform_0(%arg0: i32) -> (i32, i32) {
    %c0_i32 = arith.constant 0 : i32
    %c0_i32_0 = arith.constant 0 : i32
    return %arg0, %c0_i32 : i32, i32
  }
  func.func @transform_1(%arg0: i32) -> (i32, i32) {
    %c0_i32 = arith.constant 0 : i32
    %c0_i32_0 = arith.constant 0 : i32
    %c0_i32_1 = arith.constant 0 : i32
    return %c0_i32, %c0_i32_0 : i32, i32
  }
  func.func @transform_2(%arg0: i32) -> (i32, i32) {
    %c0_i32 = arith.constant 0 : i32
    %c0_i32_0 = arith.constant 0 : i32
    return %arg0, %c0_i32 : i32, i32
  }
}

module attributes {stable_mosaic.version = 11 : i64} {
  func.func @_matmul_kernel(%arg0: i32, %arg1: memref<64x384xbf16, #tpu.memory_space<vmem>>, %arg2: memref<384x256xbf16, #tpu.memory_space<vmem>>, %arg3: memref<64x256xbf16, #tpu.memory_space<vmem>>) attributes {dimension_semantics = [#tpu.dimension_semantics<parallel>], iteration_bounds = array<i64: 2>, scalar_prefetch = 0 : i64, scratch_operands = 0 : i64, tpu.core_type = #tpu.core_type<tc>, window_params = [{pipeline_mode = #tpu.pipeline_mode<synchronous>, transform_indices = @transform_0, window_bounds = array<i64: 64, 384>}, {transform_indices = @transform_1, window_bounds = array<i64: 384, 256>}, {transform_indices = @transform_2, window_bounds = array<i64: 64, 256>}]} {
    %c0 = arith.constant 0 : index
    %c0_0 = arith.constant 0 : index
    %0 = vector.load %arg1[%c0, %c0_0] : memref<64x384xbf16, #tpu.memory_space<vmem>>, vector<64x384xbf16>
    %c0_1 = arith.constant 0 : index
    %c0_2 = arith.constant 0 : index
    %1 = vector.load %arg2[%c0_1, %c0_2] : memref<384x256xbf16, #tpu.memory_space<vmem>>, vector<384x256xbf16>
    %cst = arith.constant dense<0.000000e+00> : vector<64x256xf32>
    %2 = tpu.matmul %0, %1, %cst {dimension_numbers = #tpu.dot_dimension_numbers<[1], [0], [0], [1], [0, 0, 1, 1], [], []>} : vector<64x384xbf16>, vector<384x256xbf16>, vector<64x256xf32> -> vector<64x256xf32>
    %cst_3 = arith.constant 0.000000e+00 : f32
    %3 = vector.broadcast %cst_3 : f32 to vector<64x256xf32>
    %4 = arith.maximumf %2, %3 : vector<64x256xf32>
    %5 = arith.truncf %4 : vector<64x256xf32> to vector<64x256xbf16>
    %c0_4 = arith.constant 0 : index
    %c0_5 = arith.constant 0 : index
    %6 = vector.load %arg3[%c0_4, %c0_5] : memref<64x256xbf16, #tpu.memory_space<vmem>>, vector<64x256xbf16>
    tpu.vector_store %arg3[%c0_4, %c0_5], %5 {strides = array<i32>} : memref<64x256xbf16, #tpu.memory_space<vmem>>, vector<64x256xbf16>,
    return
  }
  func.func @transform_0(%arg0: i32) -> (i32, i32) {
    %c0_i32 = arith.constant 0 : i32
    %c0_i32_0 = arith.constant 0 : i32
    %c0_i32_1 = arith.constant 0 : i32
    return %c0_i32, %c0_i32_0 : i32, i32
  }
  func.func @transform_1(%arg0: i32) -> (i32, i32) {
    %c0_i32 = arith.constant 0 : i32
    %c0_i32_0 = arith.constant 0 : i32
    return %c0_i32, %arg0 : i32, i32
  }
  func.func @transform_2(%arg0: i32) -> (i32, i32) {
    %c0_i32 = arith.constant 0 : i32
    %c0_i32_0 = arith.constant 0 : i32
    return %c0_i32, %arg0 : i32, i32
  }
}

module attributes {stable_mosaic.version = 11 : i64} {
  func.func @_matmul_kernel(%arg0: i32, %arg1: memref<64x128xbf16, #tpu.memory_space<vmem>>, %arg2: memref<128x512xbf16, #tpu.memory_space<vmem>>, %arg3: memref<64x512xbf16, #tpu.memory_space<vmem>>) attributes {dimension_semantics = [#tpu.dimension_semantics<parallel>], iteration_bounds = array<i64: 2>, scalar_prefetch = 0 : i64, scratch_operands = 0 : i64, tpu.core_type = #tpu.core_type<tc>, window_params = [{pipeline_mode = #tpu.pipeline_mode<synchronous>, transform_indices = @transform_0, window_bounds = array<i64: 64, 128>}, {transform_indices = @transform_1, window_bounds = array<i64: 128, 512>}, {transform_indices = @transform_2, window_bounds = array<i64: 64, 512>}]} {
    %c0 = arith.constant 0 : index
    %c0_0 = arith.constant 0 : index
    %0 = vector.load %arg1[%c0, %c0_0] : memref<64x128xbf16, #tpu.memory_space<vmem>>, vector<64x128xbf16>
    %c0_1 = arith.constant 0 : index
    %c0_2 = arith.constant 0 : index
    %1 = vector.load %arg2[%c0_1, %c0_2] : memref<128x512xbf16, #tpu.memory_space<vmem>>, vector<128x512xbf16>
    %cst = arith.constant dense<0.000000e+00> : vector<64x512xf32>
    %2 = tpu.matmul %0, %1, %cst {dimension_numbers = #tpu.dot_dimension_numbers<[1], [0], [0], [1], [0, 0, 1, 1], [], []>} : vector<64x128xbf16>, vector<128x512xbf16>, vector<64x512xf32> -> vector<64x512xf32>
    %cst_3 = arith.constant 0.000000e+00 : f32
    %3 = vector.broadcast %cst_3 : f32 to vector<64x512xf32>
    %4 = arith.maximumf %2, %3 : vector<64x512xf32>
    %5 = arith.truncf %4 : vector<64x512xf32> to vector<64x512xbf16>
    %c0_4 = arith.constant 0 : index
    %c0_5 = arith.constant 0 : index
    %6 = vector.load %arg3[%c0_4, %c0_5] : memref<64x512xbf16, #tpu.memory_space<vmem>>, vector<64x512xbf16>
    tpu.vector_store %arg3[%c0_4, %c0_5], %5 {strides = array<i32>} : memref<64x512xbf16, #tpu.memory_space<vmem>>, vector<64x512xbf16>,
    return
  }
  func.func @transform_0(%arg0: i32) -> (i32, i32) {
    %c0_i32 = arith.constant 0 : i32
    %c0_i32_0 = arith.constant 0 : i32
    %c0_i32_1 = arith.constant 0 : i32
    return %c0_i32, %c0_i32_0 : i32, i32
  }
  func.func @transform_1(%arg0: i32) -> (i32, i32) {
    %c0_i32 = arith.constant 0 : i32
    %c0_i32_0 = arith.constant 0 : i32
    return %c0_i32, %arg0 : i32, i32
  }
  func.func @transform_2(%arg0: i32) -> (i32, i32) {
    %c0_i32 = arith.constant 0 : i32
    %c0_i32_0 = arith.constant 0 : i32
    return %c0_i32, %arg0 : i32, i32
  }
}

module attributes {stable_mosaic.version = 11 : i64} {
  func.func @_matmul_kernel(%arg0: i32, %arg1: memref<8x128xbf16, #tpu.memory_space<vmem>>, %arg2: memref<128x1536xbf16, #tpu.memory_space<vmem>>, %arg3: memref<8x1536xf32, #tpu.memory_space<vmem>>) attributes {dimension_semantics = [#tpu.dimension_semantics<parallel>], iteration_bounds = array<i64: 3>, scalar_prefetch = 0 : i64, scratch_operands = 0 : i64, tpu.core_type = #tpu.core_type<tc>, window_params = [{pipeline_mode = #tpu.pipeline_mode<synchronous>, transform_indices = @transform_0, window_bounds = array<i64: 8, 128>}, {transform_indices = @transform_1, window_bounds = array<i64: 128, 1536>}, {transform_indices = @transform_2, window_bounds = array<i64: 8, 1536>}]} {
    %c0 = arith.constant 0 : index
    %c0_0 = arith.constant 0 : index
    %0 = vector.load %arg1[%c0, %c0_0] : memref<8x128xbf16, #tpu.memory_space<vmem>>, vector<8x128xbf16>
    %c0_1 = arith.constant 0 : index
    %c0_2 = arith.constant 0 : index
    %1 = vector.load %arg2[%c0_1, %c0_2] : memref<128x1536xbf16, #tpu.memory_space<vmem>>, vector<128x1536xbf16>
    %cst = arith.constant dense<0.000000e+00> : vector<8x1536xf32>
    %2 = tpu.matmul %0, %1, %cst {dimension_numbers = #tpu.dot_dimension_numbers<[1], [0], [0], [1], [0, 0, 1, 1], [], []>} : vector<8x128xbf16>, vector<128x1536xbf16>, vector<8x1536xf32> -> vector<8x1536xf32>
    %c0_3 = arith.constant 0 : index
    %c0_4 = arith.constant 0 : index
    %3 = vector.load %arg3[%c0_3, %c0_4] : memref<8x1536xf32, #tpu.memory_space<vmem>>, vector<8x1536xf32>
    tpu.vector_store %arg3[%c0_3, %c0_4], %2 {strides = array<i32>} : memref<8x1536xf32, #tpu.memory_space<vmem>>, vector<8x1536xf32>,
    return
  }
  func.func @transform_0(%arg0: i32) -> (i32, i32) {
    %c0_i32 = arith.constant 0 : i32
    %c0_i32_0 = arith.constant 0 : i32
    %c0_i32_1 = arith.constant 0 : i32
    return %c0_i32, %c0_i32_0 : i32, i32
  }
  func.func @transform_1(%arg0: i32) -> (i32, i32) {
    %c0_i32 = arith.constant 0 : i32
    %c0_i32_0 = arith.constant 0 : i32
    return %c0_i32, %arg0 : i32, i32
  }
  func.func @transform_2(%arg0: i32) -> (i32, i32) {
    %c0_i32 = arith.constant 0 : i32
    %c0_i32_0 = arith.constant 0 : i32
    return %c0_i32, %arg0 : i32, i32
  }
}

</mosaic_0001>

<bundles_post_ra>
// kernel: ae2d_forward.10
= control target key start
LH: loop header
LB: loop body
LE: loop exit
PB: predicated region body
PF: predicated region fallthrough
CT: control target
= control target key end

     0   :  { %s1950_s9 = smov 0   ;;  %s1952_s10 = smov 0   ;;  %s2424_s0 = inlined_call_operand.vmem [shape: bf16[16,256], index: 0, kind: input, shape index: {}]   ;;  %s2425_s1 = inlined_call_operand.vmem [shape: bf16[256,1792], index: 1, kind: input, shape index: {}]   ;;  %s2426_s2 = inlined_call_operand.vmem [shape: bf16[16,1792], index: 2, kind: output, shape index: {}]  }
   0x1   :  { %s1954_s11 = smov 0  }
   0x2 LB: > { %s1490_s12 = sadd.s32 4294967295, %s1933_s11   ;;  %s1967_s13 = sadd.s32 1, %s1933_s11   ;;  %s1933_s11 = sphi %s1954_s11, %s2430_s11   ;;  %s1929_s10 = sphi %s1952_s10, %s2429_s10   ;;  %s1925_s9 = sphi %s1950_s9, %s2428_s9  }
   0x3   : > { %s37_s14 = ssub.s32 %s1933_s11, %s1967_s13  ;;  %s40_s15 = sadd.s32 1, %s1929_s10 }
   0x4   : > { %p38_p0 = scmp.eq.s32.totalorder %s37_s14, 0  ;;  %p47_p1 = scmp.ne.s32.totalorder %s1929_s10, %s1925_s9 }
   0x5   : > { %p48_p2 = scmp.eq.s32.totalorder %s1933_s11, 0  ;;  %p77_p3 = scmp.eq.s32.totalorder %s1490_s12, 1 }
   0x6   : > { %s1978_s16 = scalar_select %p38_p0, %s1929_s10, %s40_s15  }
   0x7   : > { %p49_p4 = por %p48_p2, %p47_p1  ;;  %p1980_p5 = por %p77_p3, %p47_p1 }
   0x8   : > { %p1493_p6 = scmp.ge.s32.totalorder %s1933_s11, 2 }
   0xa   : > { %102 = sbr.rel (%p1493_p6) target bundleno = 91 (0x5b), region = 20 }
  0x11   : > { %105 = sbr.rel (!%p49_p4) target bundleno = 91 (0x5b), region = 24  ;;  %s107_s18 = sand.u32 (%p49_p4), 1, %s1929_s10  }
  0x12   : > { %s1689_s19 = smul.u32 (%p49_p4), 28, %s1933_s11 }
  0x13   : > { %s1721_s20 = smul.u32 (%p49_p4), 896, %s107_s18 }
  0x14   : > { %s1990_s23 = scalar_lea.vmem (%p49_p4), %s2425_s1, %s1689_s19 }
  0x15   : > { %v127_v0 = vld [vmem:[%s1990_s23] sm:$0xff] (%p49_p4)  ;;  %v129_v1 = vld [vmem:[%s1990_s23 + $0x8] sm:$0xff] (%p49_p4)  ;;  %v131_v2 = vld [vmem:[%s1990_s23 + $0x10] sm:$0xff] (%p49_p4)  ;;  %s1995_s24 = scalar_lea.vmem (%p49_p4), [#allocation2], %s1721_s20 }
  0x16   : > { %128 = vst [vmem:[%s1995_s24] sm:$0xff] (%p49_p4), %v127_v0  ;;  %130 = vst [vmem:[%s1995_s24 + $0x8] sm:$0xff] (%p49_p4), %v129_v1  ;;  %v133_v3 = vld [vmem:[%s1990_s23 + $0x38] sm:$0xff] (%p49_p4)  ;;  %v135_v4 = vld [vmem:[%s1990_s23 + $0x40] sm:$0xff] (%p49_p4) }
  0x17   : > { %132 = vst [vmem:[%s1995_s24 + $0x10] sm:$0xff] (%p49_p4), %v131_v2  ;;  %v137_v5 = vld [vmem:[%s1990_s23 + $0x48] sm:$0xff] (%p49_p4)  ;;  %134 = vst [vmem:[%s1995_s24 + $0x1c] sm:$0xff] (%p49_p4), %v133_v3  ;;  %v139_v6 = vld [vmem:[%s1990_s23 + $0x70] sm:$0xff] (%p49_p4) }
  0x18   : > { %136 = vst [vmem:[%s1995_s24 + $0x24] sm:$0xff] %v135_v4  ;;  %138 = vst [vmem:[%s1995_s24 + $0x2c] sm:$0xff] %v137_v5  ;;  %v141_v7 = vld [vmem:[%s1990_s23 + $0x78] sm:$0xff]  ;;  %v143_v8 = vld [vmem:[%s1990_s23 + $0x80] sm:$0xff] }
  0x19   : > { %140 = vst [vmem:[%s1995_s24 + $0x38] sm:$0xff] %v139_v6  ;;  %142 = vst [vmem:[%s1995_s24 + $0x40] sm:$0xff] %v141_v7  ;;  %v145_v9 = vld [vmem:[%s1990_s23 + $0xa8] sm:$0xff]  ;;  %v147_v10 = vld [vmem:[%s1990_s23 + $0xb0] sm:$0xff] }
  0x1a   : > { %144 = vst [vmem:[%s1995_s24 + $0x48] sm:$0xff] %v143_v8  ;;  %v149_v11 = vld [vmem:[%s1990_s23 + $0xb8] sm:$0xff]  ;;  %146 = vst [vmem:[%s1995_s24 + $0x54] sm:$0xff] %v145_v9  ;;  %v151_v12 = vld [vmem:[%s1990_s23 + $0xe0] sm:$0xff] }
  0x1b   : > { %148 = vst [vmem:[%s1995_s24 + $0x5c] sm:$0xff] %v147_v10  ;;  %150 = vst [vmem:[%s1995_s24 + $0x64] sm:$0xff] %v149_v11  ;;  %v153_v13 = vld [vmem:[%s1990_s23 + $0xe8] sm:$0xff]  ;;  %v155_v14 = vld [vmem:[%s1990_s23 + $0xf0] sm:$0xff] }
  0x1c   : > { %152 = vst [vmem:[%s1995_s24 + $0x70] sm:$0xff] %v151_v12  ;;  %154 = vst [vmem:[%s1995_s24 + $0x78] sm:$0xff] %v153_v13  ;;  %v157_v15 = vld [vmem:[%s1990_s23 + $0x118] sm:$0xff]  ;;  %v159_v16 = vld [vmem:[%s1990_s23 + $0x120] sm:$0xff] }
  0x1d   : > { %156 = vst [vmem:[%s1995_s24 + $0x80] sm:$0xff] %v155_v14  ;;  %v161_v17 = vld [vmem:[%s1990_s23 + $0x128] sm:$0xff]  ;;  %158 = vst [vmem:[%s1995_s24 + $0x8c] sm:$0xff] %v157_v15  ;;  %v163_v18 = vld [vmem:[%s1990_s23 + $0x150] sm:$0xff] }
  0x1e   : > { %160 = vst [vmem:[%s1995_s24 + $0x94] sm:$0xff] %v159_v16  ;;  %162 = vst [vmem:[%s1995_s24 + $0x9c] sm:$0xff] %v161_v17  ;;  %v165_v19 = vld [vmem:[%s1990_s23 + $0x158] sm:$0xff]  ;;  %v167_v20 = vld [vmem:[%s1990_s23 + $0x160] sm:$0xff] }
  0x1f   : > { %164 = vst [vmem:[%s1995_s24 + $0xa8] sm:$0xff] %v163_v18  ;;  %166 = vst [vmem:[%s1995_s24 + $0xb0] sm:$0xff] %v165_v19  ;;  %v169_v21 = vld [vmem:[%s1990_s23 + $0x188] sm:$0xff]  ;;  %v171_v22 = vld [vmem:[%s1990_s23 + $0x190] sm:$0xff] }
  0x20   : > { %168 = vst [vmem:[%s1995_s24 + $0xb8] sm:$0xff] %v167_v20  ;;  %v173_v23 = vld [vmem:[%s1990_s23 + $0x198] sm:$0xff]  ;;  %170 = vst [vmem:[%s1995_s24 + $0xc4] sm:$0xff] %v169_v21  ;;  %v175_v24 = vld [vmem:[%s1990_s23 + $0x1c0] sm:$0xff] }
  0x21   : > { %172 = vst [vmem:[%s1995_s24 + $0xcc] sm:$0xff] %v171_v22  ;;  %174 = vst [vmem:[%s1995_s24 + $0xd4] sm:$0xff] %v173_v23  ;;  %v177_v25 = vld [vmem:[%s1990_s23 + $0x1c8] sm:$0xff]  ;;  %v179_v26 = vld [vmem:[%s1990_s23 + $0x1d0] sm:$0xff] }
  0x22   : > { %176 = vst [vmem:[%s1995_s24 + $0xe0] sm:$0xff] %v175_v24  ;;  %178 = vst [vmem:[%s1995_s24 + $0xe8] sm:$0xff] %v177_v25  ;;  %v181_v27 = vld [vmem:[%s1990_s23 + $0x1f8] sm:$0xff]  ;;  %v183_v28 = vld [vmem:[%s1990_s23 + $0x200] sm:$0xff] }
  0x23   : > { %180 = vst [vmem:[%s1995_s24 + $0xf0] sm:$0xff] %v179_v26  ;;  %v185_v29 = vld [vmem:[%s1990_s23 + $0x208] sm:$0xff]  ;;  %182 = vst [vmem:[%s1995_s24 + $0xfc] sm:$0xff] %v181_v27  ;;  %v187_v30 = vld [vmem:[%s1990_s23 + $0x230] sm:$0xff] }
  0x24   : > { %184 = vst [vmem:[%s1995_s24 + $0x104] sm:$0xff] %v183_v28  ;;  %186 = vst [vmem:[%s1995_s24 + $0x10c] sm:$0xff] %v185_v29  ;;  %v189_v31 = vld [vmem:[%s1990_s23 + $0x238] sm:$0xff]  ;;  %v191_v32 = vld [vmem:[%s1990_s23 + $0x240] sm:$0xff] }
  0x25   : > { %188 = vst [vmem:[%s1995_s24 + $0x118] sm:$0xff] %v187_v30  ;;  %190 = vst [vmem:[%s1995_s24 + $0x120] sm:$0xff] %v189_v31  ;;  %v193_v33 = vld [vmem:[%s1990_s23 + $0x268] sm:$0xff]  ;;  %v195_v34 = vld [vmem:[%s1990_s23 + $0x270] sm:$0xff] }
  0x26   : > { %192 = vst [vmem:[%s1995_s24 + $0x128] sm:$0xff] %v191_v32  ;;  %v197_v35 = vld [vmem:[%s1990_s23 + $0x278] sm:$0xff]  ;;  %194 = vst [vmem:[%s1995_s24 + $0x134] sm:$0xff] %v193_v33  ;;  %v199_v36 = vld [vmem:[%s1990_s23 + $0x2a0] sm:$0xff] }
  0x27   : > { %196 = vst [vmem:[%s1995_s24 + $0x13c] sm:$0xff] %v195_v34  ;;  %198 = vst [vmem:[%s1995_s24 + $0x144] sm:$0xff] %v197_v35  ;;  %v201_v37 = vld [vmem:[%s1990_s23 + $0x2a8] sm:$0xff]  ;;  %v203_v38 = vld [vmem:[%s1990_s23 + $0x2b0] sm:$0xff] }
  0x28   : > { %200 = vst [vmem:[%s1995_s24 + $0x150] sm:$0xff] %v199_v36  ;;  %202 = vst [vmem:[%s1995_s24 + $0x158] sm:$0xff] %v201_v37  ;;  %v205_v39 = vld [vmem:[%s1990_s23 + $0x2d8] sm:$0xff]  ;;  %v207_v40 = vld [vmem:[%s1990_s23 + $0x2e0] sm:$0xff] }
  0x29   : > { %204 = vst [vmem:[%s1995_s24 + $0x160] sm:$0xff] %v203_v38  ;;  %v209_v41 = vld [vmem:[%s1990_s23 + $0x2e8] sm:$0xff]  ;;  %206 = vst [vmem:[%s1995_s24 + $0x16c] sm:$0xff] %v205_v39  ;;  %v211_v42 = vld [vmem:[%s1990_s23 + $0x310] sm:$0xff] }
  0x2a   : > { %208 = vst [vmem:[%s1995_s24 + $0x174] sm:$0xff] %v207_v40  ;;  %210 = vst [vmem:[%s1995_s24 + $0x17c] sm:$0xff] %v209_v41  ;;  %v213_v43 = vld [vmem:[%s1990_s23 + $0x318] sm:$0xff]  ;;  %v215_v44 = vld [vmem:[%s1990_s23 + $0x320] sm:$0xff] }
  0x2b   : > { %212 = vst [vmem:[%s1995_s24 + $0x188] sm:$0xff] %v211_v42  ;;  %214 = vst [vmem:[%s1995_s24 + $0x190] sm:$0xff] %v213_v43  ;;  %v217_v45 = vld [vmem:[%s1990_s23 + $0x348] sm:$0xff]  ;;  %v219_v46 = vld [vmem:[%s1990_s23 + $0x350] sm:$0xff] }
  0x2c   : > { %216 = vst [vmem:[%s1995_s24 + $0x198] sm:$0xff] %v215_v44  ;;  %v221_v47 = vld [vmem:[%s1990_s23 + $0x358] sm:$0xff]  ;;  %218 = vst [vmem:[%s1995_s24 + $0x1a4] sm:$0xff] %v217_v45  ;;  %v223_v48 = vld [vmem:[%s1990_s23 + $0x380] sm:$0xff] }
  0x2d   : > { %220 = vst [vmem:[%s1995_s24 + $0x1ac] sm:$0xff] %v219_v46  ;;  %222 = vst [vmem:[%s1995_s24 + $0x1b4] sm:$0xff] %v221_v47  ;;  %v225_v49 = vld [vmem:[%s1990_s23 + $0x388] sm:$0xff]  ;;  %v227_v50 = vld [vmem:[%s1990_s23 + $0x390] sm:$0xff] }
  0x2e   : > { %224 = vst [vmem:[%s1995_s24 + $0x1c0] sm:$0xff] %v223_v48  ;;  %226 = vst [vmem:[%s1995_s24 + $0x1c8] sm:$0xff] %v225_v49  ;;  %v229_v51 = vld [vmem:[%s1990_s23 + $0x3b8] sm:$0xff]  ;;  %v231_v52 = vld [vmem:[%s1990_s23 + $0x3c0] sm:$0xff] }
  0x2f   : > { %228 = vst [vmem:[%s1995_s24 + $0x1d0] sm:$0xff] %v227_v50  ;;  %v233_v53 = vld [vmem:[%s1990_s23 + $0x3c8] sm:$0xff]  ;;  %230 = vst [vmem:[%s1995_s24 + $0x1dc] sm:$0xff] %v229_v51  ;;  %v235_v54 = vld [vmem:[%s1990_s23 + $0x3f0] sm:$0xff] }
  0x30   : > { %232 = vst [vmem:[%s1995_s24 + $0x1e4] sm:$0xff] %v231_v52  ;;  %234 = vst [vmem:[%s1995_s24 + $0x1ec] sm:$0xff] %v233_v53  ;;  %v237_v55 = vld [vmem:[%s1990_s23 + $0x3f8] sm:$0xff]  ;;  %v239_v56 = vld [vmem:[%s1990_s23 + $0x400] sm:$0xff] }
  0x31   : > { %236 = vst [vmem:[%s1995_s24 + $0x1f8] sm:$0xff] %v235_v54  ;;  %238 = vst [vmem:[%s1995_s24 + $0x200] sm:$0xff] %v237_v55  ;;  %v241_v57 = vld [vmem:[%s1990_s23 + $0x428] sm:$0xff]  ;;  %v243_v58 = vld [vmem:[%s1990_s23 + $0x430] sm:$0xff] }
  0x32   : > { %240 = vst [vmem:[%s1995_s24 + $0x208] sm:$0xff] %v239_v56  ;;  %v245_v59 = vld [vmem:[%s1990_s23 + $0x438] sm:$0xff]  ;;  %242 = vst [vmem:[%s1995_s24 + $0x214] sm:$0xff] %v241_v57  ;;  %v247_v60 = vld [vmem:[%s1990_s23 + $0x460] sm:$0xff] }
  0x33   : > { %244 = vst [vmem:[%s1995_s24 + $0x21c] sm:$0xff] %v243_v58  ;;  %246 = vst [vmem:[%s1995_s24 + $0x224] sm:$0xff] %v245_v59  ;;  %v249_v61 = vld [vmem:[%s1990_s23 + $0x468] sm:$0xff]  ;;  %v251_v62 = vld [vmem:[%s1990_s23 + $0x470] sm:$0xff] }
  0x34   : > { %248 = vst [vmem:[%s1995_s24 + $0x230] sm:$0xff] %v247_v60  ;;  %250 = vst [vmem:[%s1995_s24 + $0x238] sm:$0xff] %v249_v61  ;;  %v253_v63 = vld [vmem:[%s1990_s23 + $0x498] sm:$0xff]  ;;  %v255_v0 = vld [vmem:[%s1990_s23 + $0x4a0] sm:$0xff] }
  0x35   : > { %252 = vst [vmem:[%s1995_s24 + $0x240] sm:$0xff] %v251_v62  ;;  %v257_v1 = vld [vmem:[%s1990_s23 + $0x4a8] sm:$0xff]  ;;  %254 = vst [vmem:[%s1995_s24 + $0x24c] sm:$0xff] %v253_v63  ;;  %v259_v2 = vld [vmem:[%s1990_s23 + $0x4d0] sm:$0xff] }
  0x36   : > { %256 = vst [vmem:[%s1995_s24 + $0x254] sm:$0xff] %v255_v0  ;;  %258 = vst [vmem:[%s1995_s24 + $0x25c] sm:$0xff] %v257_v1  ;;  %v261_v3 = vld [vmem:[%s1990_s23 + $0x4d8] sm:$0xff]  ;;  %v263_v4 = vld [vmem:[%s1990_s23 + $0x4e0] sm:$0xff] }
  0x37   : > { %260 = vst [vmem:[%s1995_s24 + $0x268] sm:$0xff] %v259_v2  ;;  %262 = vst [vmem:[%s1995_s24 + $0x270] sm:$0xff] %v261_v3  ;;  %v265_v5 = vld [vmem:[%s1990_s23 + $0x508] sm:$0xff]  ;;  %v267_v6 = vld [vmem:[%s1990_s23 + $0x510] sm:$0xff] }
  0x38   : > { %264 = vst [vmem:[%s1995_s24 + $0x278] sm:$0xff] %v263_v4  ;;  %v269_v7 = vld [vmem:[%s1990_s23 + $0x518] sm:$0xff]  ;;  %266 = vst [vmem:[%s1995_s24 + $0x284] sm:$0xff] %v265_v5  ;;  %v271_v8 = vld [vmem:[%s1990_s23 + $0x540] sm:$0xff] }
  0x39   : > { %268 = vst [vmem:[%s1995_s24 + $0x28c] sm:$0xff] %v267_v6  ;;  %270 = vst [vmem:[%s1995_s24 + $0x294] sm:$0xff] %v269_v7  ;;  %v273_v9 = vld [vmem:[%s1990_s23 + $0x548] sm:$0xff]  ;;  %v275_v10 = vld [vmem:[%s1990_s23 + $0x550] sm:$0xff] }
  0x3a   : > { %272 = vst [vmem:[%s1995_s24 + $0x2a0] sm:$0xff] %v271_v8  ;;  %274 = vst [vmem:[%s1995_s24 + $0x2a8] sm:$0xff] %v273_v9  ;;  %v277_v11 = vld [vmem:[%s1990_s23 + $0x578] sm:$0xff]  ;;  %v279_v12 = vld [vmem:[%s1990_s23 + $0x580] sm:$0xff] }
  0x3b   : > { %276 = vst [vmem:[%s1995_s24 + $0x2b0] sm:$0xff] %v275_v10  ;;  %v281_v13 = vld [vmem:[%s1990_s23 + $0x588] sm:$0xff]  ;;  %278 = vst [vmem:[%s1995_s24 + $0x2bc] sm:$0xff] %v277_v11  ;;  %v283_v14 = vld [vmem:[%s1990_s23 + $0x5b0] sm:$0xff] }
  0x3c   : > { %280 = vst [vmem:[%s1995_s24 + $0x2c4] sm:$0xff] %v279_v12  ;;  %282 = vst [vmem:[%s1995_s24 + $0x2cc] sm:$0xff] %v281_v13  ;;  %v285_v15 = vld [vmem:[%s1990_s23 + $0x5b8] sm:$0xff]  ;;  %v287_v16 = vld [vmem:[%s1990_s23 + $0x5c0] sm:$0xff] }
  0x3d   : > { %284 = vst [vmem:[%s1995_s24 + $0x2d8] sm:$0xff] %v283_v14  ;;  %286 = vst [vmem:[%s1995_s24 + $0x2e0] sm:$0xff] %v285_v15  ;;  %v289_v17 = vld [vmem:[%s1990_s23 + $0x5e8] sm:$0xff]  ;;  %v291_v18 = vld [vmem:[%s1990_s23 + $0x5f0] sm:$0xff] }
  0x3e   : > { %288 = vst [vmem:[%s1995_s24 + $0x2e8] sm:$0xff] %v287_v16  ;;  %v293_v19 = vld [vmem:[%s1990_s23 + $0x5f8] sm:$0xff]  ;;  %290 = vst [vmem:[%s1995_s24 + $0x2f4] sm:$0xff] %v289_v17  ;;  %v295_v20 = vld [vmem:[%s1990_s23 + $0x620] sm:$0xff] }
  0x3f   : > { %292 = vst [vmem:[%s1995_s24 + $0x2fc] sm:$0xff] %v291_v18  ;;  %294 = vst [vmem:[%s1995_s24 + $0x304] sm:$0xff] %v293_v19  ;;  %v297_v21 = vld [vmem:[%s1990_s23 + $0x628] sm:$0xff]  ;;  %v299_v22 = vld [vmem:[%s1990_s23 + $0x630] sm:$0xff] }
  0x40   : > { %296 = vst [vmem:[%s1995_s24 + $0x310] sm:$0xff] %v295_v20  ;;  %298 = vst [vmem:[%s1995_s24 + $0x318] sm:$0xff] %v297_v21  ;;  %v301_v23 = vld [vmem:[%s1990_s23 + $0x658] sm:$0xff]  ;;  %v303_v24 = vld [vmem:[%s1990_s23 + $0x660] sm:$0xff] }
  0x41   : > { %300 = vst [vmem:[%s1995_s24 + $0x320] sm:$0xff] %v299_v22  ;;  %v305_v25 = vld [vmem:[%s1990_s23 + $0x668] sm:$0xff]  ;;  %302 = vst [vmem:[%s1995_s24 + $0x32c] sm:$0xff] %v301_v23  ;;  %v307_v26 = vld [vmem:[%s1990_s23 + $0x690] sm:$0xff] }
  0x42   : > { %304 = vst [vmem:[%s1995_s24 + $0x334] sm:$0xff] %v303_v24  ;;  %306 = vst [vmem:[%s1995_s24 + $0x33c] sm:$0xff] %v305_v25  ;;  %v309_v27 = vld [vmem:[%s1990_s23 + $0x698] sm:$0xff]  ;;  %v311_v28 = vld [vmem:[%s1990_s23 + $0x6a0] sm:$0xff] }
  0x43   : > { %308 = vst [vmem:[%s1995_s24 + $0x348] sm:$0xff] %v307_v26  ;;  %310 = vst [vmem:[%s1995_s24 + $0x350] sm:$0xff] %v309_v27  ;;  %v313_v29 = vld [vmem:[%s1990_s23 + $0x6c8] sm:$0xff]  ;;  %v315_v30 = vld [vmem:[%s1990_s23 + $0x6d0] sm:$0xff] }
  0x44   : > { %312 = vst [vmem:[%s1995_s24 + $0x358] sm:$0xff] %v311_v28  ;;  %v317_v31 = vld [vmem:[%s1990_s23 + $0x6d8] sm:$0xff]  ;;  %314 = vst [vmem:[%s1995_s24 + $0x364] sm:$0xff] %v313_v29  ;;  %v1497_v33 = vld [vmem:[%s1990_s23 + $0x50] sm:$0xf] }
  0x45   : > { %316 = vst [vmem:[%s1995_s24 + $0x36c] sm:$0xff] %v315_v30  ;;  %318 = vst [vmem:[%s1995_s24 + $0x374] sm:$0xff] %v317_v31  ;;  %v1495_v32 = vld [vmem:[%s1990_s23 + $0x18] sm:$0xf]  ;;  %v1499_v34 = vld [vmem:[%s1990_s23 + $0x88] sm:$0xf] }
  0x46   : > { %1496 = vst [vmem:[%s1995_s24 + $0x18] sm:$0xf] %v1495_v32  ;;  %1498 = vst [vmem:[%s1995_s24 + $0x34] sm:$0xf] %v1497_v33  ;;  %v1501_v35 = vld [vmem:[%s1990_s23 + $0xc0] sm:$0xf] }
  0x47   : > { %1500 = vst [vmem:[%s1995_s24 + $0x50] sm:$0xf] %v1499_v34  ;;  %v1503_v36 = vld [vmem:[%s1990_s23 + $0xf8] sm:$0xf]  ;;  %v1505_v37 = vld [vmem:[%s1990_s23 + $0x130] sm:$0xf] }
  0x48   : > { %1502 = vst [vmem:[%s1995_s24 + $0x6c] sm:$0xf] %v1501_v35  ;;  %1504 = vst [vmem:[%s1995_s24 + $0x88] sm:$0xf] %v1503_v36  ;;  %v1507_v38 = vld [vmem:[%s1990_s23 + $0x168] sm:$0xf] }
  0x49   : > { %1506 = vst [vmem:[%s1995_s24 + $0xa4] sm:$0xf] %v1505_v37  ;;  %v1509_v39 = vld [vmem:[%s1990_s23 + $0x1a0] sm:$0xf]  ;;  %v1511_v40 = vld [vmem:[%s1990_s23 + $0x1d8] sm:$0xf] }
  0x4a   : > { %1508 = vst [vmem:[%s1995_s24 + $0xc0] sm:$0xf] %v1507_v38  ;;  %1510 = vst [vmem:[%s1995_s24 + $0xdc] sm:$0xf] %v1509_v39  ;;  %v1513_v41 = vld [vmem:[%s1990_s23 + $0x210] sm:$0xf] }
  0x4b   : > { %1512 = vst [vmem:[%s1995_s24 + $0xf8] sm:$0xf] %v1511_v40  ;;  %v1515_v42 = vld [vmem:[%s1990_s23 + $0x248] sm:$0xf]  ;;  %v1517_v43 = vld [vmem:[%s1990_s23 + $0x280] sm:$0xf] }
  0x4c   : > { %1514 = vst [vmem:[%s1995_s24 + $0x114] sm:$0xf] %v1513_v41  ;;  %1516 = vst [vmem:[%s1995_s24 + $0x130] sm:$0xf] %v1515_v42  ;;  %v1519_v44 = vld [vmem:[%s1990_s23 + $0x2b8] sm:$0xf] }
  0x4d   : > { %1518 = vst [vmem:[%s1995_s24 + $0x14c] sm:$0xf] %v1517_v43  ;;  %v1521_v45 = vld [vmem:[%s1990_s23 + $0x2f0] sm:$0xf]  ;;  %v1523_v46 = vld [vmem:[%s1990_s23 + $0x328] sm:$0xf] }
  0x4e   : > { %1520 = vst [vmem:[%s1995_s24 + $0x168] sm:$0xf] %v1519_v44  ;;  %1522 = vst [vmem:[%s1995_s24 + $0x184] sm:$0xf] %v1521_v45  ;;  %v1525_v47 = vld [vmem:[%s1990_s23 + $0x360] sm:$0xf] }
  0x4f   : > { %1524 = vst [vmem:[%s1995_s24 + $0x1a0] sm:$0xf] %v1523_v46  ;;  %v1527_v48 = vld [vmem:[%s1990_s23 + $0x398] sm:$0xf]  ;;  %v1529_v49 = vld [vmem:[%s1990_s23 + $0x3d0] sm:$0xf] }
  0x50   : > { %1526 = vst [vmem:[%s1995_s24 + $0x1bc] sm:$0xf] %v1525_v47  ;;  %1528 = vst [vmem:[%s1995_s24 + $0x1d8] sm:$0xf] %v1527_v48  ;;  %v1531_v50 = vld [vmem:[%s1990_s23 + $0x408] sm:$0xf] }
  0x51   : > { %1530 = vst [vmem:[%s1995_s24 + $0x1f4] sm:$0xf] %v1529_v49  ;;  %v1533_v51 = vld [vmem:[%s1990_s23 + $0x440] sm:$0xf]  ;;  %v1535_v52 = vld [vmem:[%s1990_s23 + $0x478] sm:$0xf] }
  0x52   : > { %1532 = vst [vmem:[%s1995_s24 + $0x210] sm:$0xf] %v1531_v50  ;;  %1534 = vst [vmem:[%s1995_s24 + $0x22c] sm:$0xf] %v1533_v51  ;;  %v1537_v53 = vld [vmem:[%s1990_s23 + $0x4b0] sm:$0xf] }
  0x53   : > { %1536 = vst [vmem:[%s1995_s24 + $0x248] sm:$0xf] %v1535_v52  ;;  %v1539_v54 = vld [vmem:[%s1990_s23 + $0x4e8] sm:$0xf]  ;;  %v1541_v55 = vld [vmem:[%s1990_s23 + $0x520] sm:$0xf] }
  0x54   : > { %1538 = vst [vmem:[%s1995_s24 + $0x264] sm:$0xf] %v1537_v53  ;;  %1540 = vst [vmem:[%s1995_s24 + $0x280] sm:$0xf] %v1539_v54  ;;  %v1543_v56 = vld [vmem:[%s1990_s23 + $0x558] sm:$0xf] }
  0x55   : > { %1542 = vst [vmem:[%s1995_s24 + $0x29c] sm:$0xf] %v1541_v55  ;;  %v1545_v57 = vld [vmem:[%s1990_s23 + $0x590] sm:$0xf]  ;;  %v1547_v58 = vld [vmem:[%s1990_s23 + $0x5c8] sm:$0xf] }
  0x56   : > { %1544 = vst [vmem:[%s1995_s24 + $0x2b8] sm:$0xf] %v1543_v56  ;;  %1546 = vst [vmem:[%s1995_s24 + $0x2d4] sm:$0xf] %v1545_v57  ;;  %v1549_v59 = vld [vmem:[%s1990_s23 + $0x600] sm:$0xf] }
  0x57   : > { %1548 = vst [vmem:[%s1995_s24 + $0x2f0] sm:$0xf] %v1547_v58  ;;  %v1551_v60 = vld [vmem:[%s1990_s23 + $0x638] sm:$0xf]  ;;  %v1553_v61 = vld [vmem:[%s1990_s23 + $0x670] sm:$0xf] }
  0x58   : > { %1550 = vst [vmem:[%s1995_s24 + $0x30c] sm:$0xf] %v1549_v59  ;;  %1552 = vst [vmem:[%s1995_s24 + $0x328] sm:$0xf] %v1551_v60  ;;  %v1555_v62 = vld [vmem:[%s1990_s23 + $0x6a8] sm:$0xf] }
  0x59   : > { %1554 = vst [vmem:[%s1995_s24 + $0x344] sm:$0xf] %v1553_v61  ;;  %v1557_v63 = vld [vmem:[%s1990_s23 + $0x6e0] sm:$0xf]  ;;  %1556 = vst [vmem:[%s1995_s24 + $0x360] sm:$0xf] %v1555_v62 }
  0x5a   : > { %1558 = vst [vmem:[%s1995_s24 + $0x37c] sm:$0xf] %v1557_v63 }
  0x5b PF: > { %p1559_p7 = scmp.ge.s32.totalorder %s1933_s11, 1  ;;  %p394_p8 = scmp.lt.s32.totalorder %s1933_s11, 3 }
  0x5d   : > { %p395_p9 = pnand %p1559_p7, %p394_p8 }
  0x5e   : > { %s401_s25 = sand.u32 (!%p395_p9), 1, %s1925_s9   ;;  %v2256_v0 = vld [vmem:[%s2424_s0 + $0x4] ss:$8 sps:$4 sm:$0xff] (!%p395_p9)   ;;  %v2326_v60 = vld [vmem:[%s2424_s0] ss:$8 sps:$4 sm:$0xff] (!%p395_p9)  }
  0x5f   : > { %398 = sbr.rel (%p395_p9) target bundleno = 456 (0x1c8), region = 50  ;;  %1172 = vmatprep.mubr.bf16.mxu0 (!%p395_p9), %v2256_v0  ;;  %1215 = vmatprep.mubr.bf16.mxu1 (!%p395_p9), %v2256_v0 }
  0x60   : > { %s1722_s28 = smul.u32 (!%p395_p9), 896, %s401_s25 }
  0x61   : > { %s1723_s4 = smul.u32 (!%p395_p9), 56, %s401_s25 }
  0x62   : > { %s2262_s29 = scalar_lea.vmem (!%p395_p9), [#allocation2], %s1722_s28 }
  0x63   : > { %v1748_v1 = vld [vmem:[%s2262_s29 + $0x4] ss:$28 sps:$4 sm:$0xff] (!%p395_p9)   ;;  %v1751_v3 = vld [vmem:[%s2262_s29 + $0x3c] ss:$28 sps:$4 sm:$0xff] (!%p395_p9)   ;;  %v1754_v5 = vld [vmem:[%s2262_s29 + $0x74] ss:$28 sps:$4 sm:$0xff] (!%p395_p9)  }
  0x64   : > { %v1750_v2 = vld [vmem:[%s2262_s29] ss:$28 sps:$4 sm:$0xff] (!%p395_p9)   ;;  %1140 = vmatprep.subr.bf16.mxu0 (!%p395_p9), %v1748_v1  ;;  %v1753_v4 = vld [vmem:[%s2262_s29 + $0x38] ss:$28 sps:$4 sm:$0xff] (!%p395_p9)   ;;  %v1756_v6 = vld [vmem:[%s2262_s29 + $0x70] ss:$28 sps:$4 sm:$0xff] (!%p395_p9)  }
  0x65   : > { %1141 = vmatpush1.bf16.msra.mxu0 (!%p395_p9), %v1750_v2  ;;  %v1757_v7 = vld [vmem:[%s2262_s29 + $0xac] ss:$28 sps:$4 sm:$0xff] (!%p395_p9)   ;;  %v1760_v10 = vld [vmem:[%s2262_s29 + $0xe4] ss:$28 sps:$4 sm:$0xff] (!%p395_p9)   ;;  %v1781_v15 = vld [vmem:[%s2262_s29 + $0x7c] ss:$28 sps:$4 sm:$0xff] (!%p395_p9)  }
  0x66   : > { %1142 = vmatprep.subr.bf16.mxu0 %v1751_v3  ;;  %v1769_v8 = vld [vmem:[%s2262_s29 + $0xc] ss:$28 sps:$4 sm:$0xff]   ;;  %v1775_v12 = vld [vmem:[%s2262_s29 + $0x44] ss:$28 sps:$4 sm:$0xff]   ;;  %v1763_v16 = vld [vmem:[%s2262_s29 + $0x11c] ss:$28 sps:$4 sm:$0xff]  }
  0x67   : > { %v1759_v9 = vld [vmem:[%s2262_s29 + $0xa8] ss:$28 sps:$4 sm:$0xff]   ;;  %1183 = vmatprep.subr.bf16.mxu1 %v1769_v8  ;;  %v1762_v13 = vld [vmem:[%s2262_s29 + $0xe0] ss:$28 sps:$4 sm:$0xff]   ;;  %v1785_v17 = vld [vmem:[%s2262_s29 + $0x78] ss:$28 sps:$4 sm:$0xff]  }
  0x68   : > { %v1773_v11 = vld [vmem:[%s2262_s29 + $0x8] ss:$28 sps:$4 sm:$0xff]   ;;  %v1779_v14 = vld [vmem:[%s2262_s29 + $0x40] ss:$28 sps:$4 sm:$0xff]   ;;  %v1787_v18 = vld [vmem:[%s2262_s29 + $0xb4] ss:$28 sps:$4 sm:$0xff]  }
  0x69   : > { %1143 = vmatpush1.bf16.msra.mxu0 %v1753_v4  ;;  %1184 = vmatpush1.bf16.msra.mxu1 %v1773_v11  ;;  %v1765_v19 = vld [vmem:[%s2262_s29 + $0x118] ss:$28 sps:$4 sm:$0xff]   ;;  %v1791_v21 = vld [vmem:[%s2262_s29 + $0xb0] ss:$28 sps:$4 sm:$0xff]   ;;  %v1797_v25 = vld [vmem:[%s2262_s29 + $0xe8] ss:$28 sps:$4 sm:$0xff]  }
  0x6a   : > { %1144 = vmatprep.subr.bf16.mxu0 %v1754_v5  ;;  %1185 = vmatprep.subr.bf16.mxu1 %v1775_v12  ;;  %v1766_v20 = vld [vmem:[%s2262_s29 + $0x154] ss:$28 sps:$4 sm:$0xff]   ;;  %v1793_v22 = vld [vmem:[%s2262_s29 + $0xec] ss:$28 sps:$4 sm:$0xff]   ;;  %v1799_v26 = vld [vmem:[%s2262_s29 + $0x124] ss:$28 sps:$4 sm:$0xff]  }
  0x6b   : > { %v1768_v23 = vld [vmem:[%s2262_s29 + $0x150] ss:$28 sps:$4 sm:$0xff]   ;;  %v1774_v27 = vld [vmem:[%s2262_s29 + $0x188] ss:$28 sps:$4 sm:$0xff]   ;;  %v1803_v29 = vld [vmem:[%s2262_s29 + $0x120] ss:$28 sps:$4 sm:$0xff]  }
  0x6c   : > { %v1771_v24 = vld [vmem:[%s2262_s29 + $0x18c] ss:$28 sps:$4 sm:$0xff]   ;;  %v1777_v28 = vld [vmem:[%s2262_s29 + $0x1c4] ss:$28 sps:$4 sm:$0xff]   ;;  %v1805_v30 = vld [vmem:[%s2262_s29 + $0x15c] ss:$28 sps:$4 sm:$0xff]  }
  0x6d   : > { %1145 = vmatpush1.bf16.msra.mxu0 %v1756_v6  ;;  %1186 = vmatpush1.bf16.msra.mxu1 %v1779_v14  ;;  %v1780_v31 = vld [vmem:[%s2262_s29 + $0x1c0] ss:$28 sps:$4 sm:$0xff]   ;;  %v1809_v33 = vld [vmem:[%s2262_s29 + $0x158] ss:$28 sps:$4 sm:$0xff]   ;;  %v1815_v37 = vld [vmem:[%s2262_s29 + $0x190] ss:$28 sps:$4 sm:$0xff]  }
  0x6e   : > { %1146 = vmatprep.subr.bf16.mxu0 %v1757_v7  ;;  %1187 = vmatprep.subr.bf16.mxu1 %v1781_v15  ;;  %v1783_v32 = vld [vmem:[%s2262_s29 + $0x1fc] ss:$28 sps:$4 sm:$0xff]   ;;  %v1811_v34 = vld [vmem:[%s2262_s29 + $0x194] ss:$28 sps:$4 sm:$0xff]   ;;  %v1817_v38 = vld [vmem:[%s2262_s29 + $0x1cc] ss:$28 sps:$4 sm:$0xff]  }
  0x6f   : > { %v1786_v35 = vld [vmem:[%s2262_s29 + $0x1f8] ss:$28 sps:$4 sm:$0xff]   ;;  %v1792_v39 = vld [vmem:[%s2262_s29 + $0x230] ss:$28 sps:$4 sm:$0xff]   ;;  %v1821_v41 = vld [vmem:[%s2262_s29 + $0x1c8] ss:$28 sps:$4 sm:$0xff]  }
  0x70   : > { %v1789_v36 = vld [vmem:[%s2262_s29 + $0x234] ss:$28 sps:$4 sm:$0xff]   ;;  %v1795_v40 = vld [vmem:[%s2262_s29 + $0x26c] ss:$28 sps:$4 sm:$0xff]   ;;  %v1825_v42 = vld [vmem:[%s2262_s29 + $0x204] ss:$28 sps:$4 sm:$0xff]  }
  0x71   : > { %1147 = vmatpush1.bf16.msra.mxu0 %v1759_v9  ;;  %1188 = vmatpush1.bf16.msra.mxu1 %v1785_v17  ;;  %v1798_v43 = vld [vmem:[%s2262_s29 + $0x268] ss:$28 sps:$4 sm:$0xff]   ;;  %v1828_v45 = vld [vmem:[%s2262_s29 + $0x200] ss:$28 sps:$4 sm:$0xff]   ;;  %v1834_v49 = vld [vmem:[%s2262_s29 + $0x238] ss:$28 sps:$4 sm:$0xff]  }
  0x72   : > { %1148 = vmatprep.subr.bf16.mxu0 %v1760_v10  ;;  %1189 = vmatprep.subr.bf16.mxu1 %v1787_v18  ;;  %v1801_v44 = vld [vmem:[%s2262_s29 + $0x2a4] ss:$28 sps:$4 sm:$0xff]   ;;  %v1832_v46 = vld [vmem:[%s2262_s29 + $0x23c] ss:$28 sps:$4 sm:$0xff]   ;;  %v1838_v50 = vld [vmem:[%s2262_s29 + $0x274] ss:$28 sps:$4 sm:$0xff]  }
  0x73   : > { %v1804_v47 = vld [vmem:[%s2262_s29 + $0x2a0] ss:$28 sps:$4 sm:$0xff]   ;;  %v1810_v51 = vld [vmem:[%s2262_s29 + $0x2d8] ss:$28 sps:$4 sm:$0xff]   ;;  %v1840_v53 = vld [vmem:[%s2262_s29 + $0x270] ss:$28 sps:$4 sm:$0xff]  }
  0x74   : > { %v1807_v48 = vld [vmem:[%s2262_s29 + $0x2dc] ss:$28 sps:$4 sm:$0xff]   ;;  %v1813_v52 = vld [vmem:[%s2262_s29 + $0x314] ss:$28 sps:$4 sm:$0xff]   ;;  %v1844_v54 = vld [vmem:[%s2262_s29 + $0x2ac] ss:$28 sps:$4 sm:$0xff]  }
  0x75   : > { %1149 = vmatpush1.bf16.msra.mxu0 %v1762_v13  ;;  %1190 = vmatpush1.bf16.msra.mxu1 %v1791_v21  ;;  %v1816_v55 = vld [vmem:[%s2262_s29 + $0x310] ss:$28 sps:$4 sm:$0xff]   ;;  %v1846_v57 = vld [vmem:[%s2262_s29 + $0x2a8] ss:$28 sps:$4 sm:$0xff]   ;;  %v1852_v62 = vld [vmem:[%s2262_s29 + $0x2e0] ss:$28 sps:$4 sm:$0xff]  }
  0x76   : > { %1150 = vmatprep.subr.bf16.mxu0 %v1763_v16  ;;  %1191 = vmatprep.subr.bf16.mxu1 %v1793_v22  ;;  %v1819_v56 = vld [vmem:[%s2262_s29 + $0x34c] ss:$28 sps:$4 sm:$0xff]   ;;  %v1850_v58 = vld [vmem:[%s2262_s29 + $0x2e4] ss:$28 sps:$4 sm:$0xff]   ;;  %v1831_v61 = vld [vmem:[%s2262_s29 + $0x14] ss:$28 sps:$4 sm:$0xff]  }
  0x77   : > { %v1822_v59 = vld [vmem:[%s2262_s29 + $0x348] ss:$28 sps:$4 sm:$0xff]   ;;  %v1856_v63 = vld [vmem:[%s2262_s29 + $0x31c] ss:$28 sps:$4 sm:$0xff]   ;;  %v1829_v1 = vld [vmem:[%s2262_s29 + $0x10] ss:$28 sps:$4 sm:$0xff]  }
  0x78   : > { %v1837_v2 = vld [vmem:[%s2262_s29 + $0x4c] ss:$28 sps:$4 sm:$0xff]   ;;  %v1858_v3 = vld [vmem:[%s2262_s29 + $0x318] ss:$28 sps:$4 sm:$0xff]   ;;  %v1843_v6 = vld [vmem:[%s2262_s29 + $0x84] ss:$28 sps:$4 sm:$0xff]  }
  0x79   : > { %1151 = vmatpush1.bf16.msra.mxu0 %v1765_v19  ;;  %1192 = vmatpush1.bf16.msra.mxu1 %v1797_v25  ;;  %v1862_v4 = vld [vmem:[%s2262_s29 + $0x354] ss:$28 sps:$4 sm:$0xff]   ;;  %v1835_v5 = vld [vmem:[%s2262_s29 + $0x48] ss:$28 sps:$4 sm:$0xff]   ;;  %v1841_v9 = vld [vmem:[%s2262_s29 + $0x80] ss:$28 sps:$4 sm:$0xff]  }
  0x7a   : > { %1152 = vmatprep.subr.bf16.mxu0 %v1766_v20  ;;  %1193 = vmatprep.subr.bf16.mxu1 %v1799_v26  ;;  %v1864_v7 = vld [vmem:[%s2262_s29 + $0x350] ss:$28 sps:$4 sm:$0xff]   ;;  %v1868_v8 = vld [vmem:[%s2262_s29 + $0x1d8] ss:$28 sps:$4 sm:$0xff]   ;;  %v1878_v16 = vld [vmem:[%s2262_s29 + $0x248] ss:$28 sps:$4 sm:$0xff]  }
  0x7b   : > { %v1849_v10 = vld [vmem:[%s2262_s29 + $0xbc] ss:$28 sps:$4 sm:$0xff]   ;;  %v1873_v12 = vld [vmem:[%s2262_s29 + $0x210] ss:$28 sps:$4 sm:$0xff]   ;;  %v1882_v19 = vld [vmem:[%s2262_s29 + $0x88] ss:$28 sps:$4 sm:$0xff]  }
  0x7c   : > { %v1872_v11 = vld [vmem:[%s2262_s29 + $0x18] ss:$28 sps:$4 sm:$0xff]   ;;  %v1877_v15 = vld [vmem:[%s2262_s29 + $0x50] ss:$28 sps:$4 sm:$0xff]   ;;  %v1883_v20 = vld [vmem:[%s2262_s29 + $0x280] ss:$28 sps:$4 sm:$0xff]  }
  0x7d   : > { %1153 = vmatpush1.bf16.msra.mxu0 %v1768_v23  ;;  %1194 = vmatpush1.bf16.msra.mxu1 %v1803_v29  ;;  %v1847_v13 = vld [vmem:[%s2262_s29 + $0xb8] ss:$28 sps:$4 sm:$0xff]   ;;  %v1853_v17 = vld [vmem:[%s2262_s29 + $0xf0] ss:$28 sps:$4 sm:$0xff]   ;;  %v1859_v21 = vld [vmem:[%s2262_s29 + $0x128] ss:$28 sps:$4 sm:$0xff]  }
  0x7e   : > { %1154 = vmatprep.subr.bf16.mxu0 %v1771_v24  ;;  %1195 = vmatprep.subr.bf16.mxu1 %v1805_v30  ;;  %v1855_v14 = vld [vmem:[%s2262_s29 + $0xf4] ss:$28 sps:$4 sm:$0xff]   ;;  %v1861_v18 = vld [vmem:[%s2262_s29 + $0x12c] ss:$28 sps:$4 sm:$0xff]   ;;  %v1887_v22 = vld [vmem:[%s2262_s29 + $0xc0] ss:$28 sps:$4 sm:$0xff]  }
  0x7f   : > { %v1888_v23 = vld [vmem:[%s2262_s29 + $0x2b8] ss:$28 sps:$4 sm:$0xff]   ;;  %v1865_v24 = vld [vmem:[%s2262_s29 + $0x160] ss:$28 sps:$4 sm:$0xff]   ;;  %v1897_v30 = vld [vmem:[%s2262_s29 + $0x130] ss:$28 sps:$4 sm:$0xff]  }
  0x80   : > { %v1871_v25 = vld [vmem:[%s2262_s29 + $0x19c] ss:$28 sps:$4 sm:$0xff]   ;;  %v1876_v29 = vld [vmem:[%s2262_s29 + $0x1d4] ss:$28 sps:$4 sm:$0xff]   ;;  %s2389_s5 = scalar_lea.vmem [#allocation3], %s1723_s4  ;;  %s1698_s6 = smul.u32 (%p1980_p5), 28, %s1490_s12 }
  0x81   : > { %1155 = vmatpush1.bf16.msra.mxu0 %v1774_v27  ;;  %1196 = vmatpush1.bf16.msra.mxu1 %v1809_v33  ;;  %v1892_v26 = vld [vmem:[%s2262_s29 + $0xf8] ss:$28 sps:$4 sm:$0xff]   ;;  %v1893_v27 = vld [vmem:[%s2262_s29 + $0x2f0] ss:$28 sps:$4 sm:$0xff]  }
  0x82   : > { %1156 = vmatprep.subr.bf16.mxu0 %v1777_v28  ;;  %1197 = vmatprep.subr.bf16.mxu1 %v1811_v34  ;;  %v1869_v28 = vld [vmem:[%s2262_s29 + $0x198] ss:$28 sps:$4 sm:$0xff]   ;;  %v1881_v33 = vld [vmem:[%s2262_s29 + $0x20c] ss:$28 sps:$4 sm:$0xff]   ;;  %s1385_s9 = scalar_lea.vmem (%p1980_p5), %s2426_s2, %s1698_s6 }
  0x83   : > { %v1902_v34 = vld [vmem:[%s2262_s29 + $0x168] ss:$28 sps:$4 sm:$0xff]  }
  0x85   : > { %1157 = vmatpush1.bf16.msra.mxu0 %v1780_v31  ;;  %1198 = vmatpush1.bf16.msra.mxu1 %v1815_v37  ;;  %v1898_v31 = vld [vmem:[%s2262_s29 + $0x328] ss:$28 sps:$4 sm:$0xff]  }
  0x86   : > { %1158 = vmatprep.subr.bf16.mxu0 %v1783_v32  ;;  %1199 = vmatprep.subr.bf16.mxu1 %v1817_v38  ;;  %v1874_v32 = vld [vmem:[%s2262_s29 + $0x1d0] ss:$28 sps:$4 sm:$0xff]   ;;  %v1886_v37 = vld [vmem:[%s2262_s29 + $0x244] ss:$28 sps:$4 sm:$0xff]  }
  0x87   : > { %v1907_v38 = vld [vmem:[%s2262_s29 + $0x1a0] ss:$28 sps:$4 sm:$0xff]  }
  0x89   : > { %1159 = vmatpush1.bf16.msra.mxu0 %v1786_v35  ;;  %1200 = vmatpush1.bf16.msra.mxu1 %v1821_v41  ;;  %v1903_v35 = vld [vmem:[%s2262_s29 + $0x360] ss:$28 sps:$4 sm:$0xff]   ;;  %v1889_v41 = vld [vmem:[%s2262_s29 + $0x278] ss:$28 sps:$4 sm:$0xff]  }
  0x8a   : > { %1160 = vmatprep.subr.bf16.mxu0 %v1789_v36  ;;  %1201 = vmatprep.subr.bf16.mxu1 %v1825_v42  ;;  %v1879_v36 = vld [vmem:[%s2262_s29 + $0x208] ss:$28 sps:$4 sm:$0xff]   ;;  %v1896_v42 = vld [vmem:[%s2262_s29 + $0x2b4] ss:$28 sps:$4 sm:$0xff]  }
  0x8d   : > { %1161 = vmatpush1.bf16.msra.mxu0 %v1792_v39  ;;  %1202 = vmatpush1.bf16.msra.mxu1 %v1828_v45  ;;  %v1884_v39 = vld [vmem:[%s2262_s29 + $0x240] ss:$28 sps:$4 sm:$0xff]   ;;  %v1899_v45 = vld [vmem:[%s2262_s29 + $0x2e8] ss:$28 sps:$4 sm:$0xff]  }
  0x8e   : > { %1162 = vmatprep.subr.bf16.mxu0 %v1795_v40  ;;  %1203 = vmatprep.subr.bf16.mxu1 %v1832_v46  ;;  %v1891_v40 = vld [vmem:[%s2262_s29 + $0x27c] ss:$28 sps:$4 sm:$0xff]   ;;  %v1906_v46 = vld [vmem:[%s2262_s29 + $0x324] ss:$28 sps:$4 sm:$0xff]  }
  0x91   : > { %1163 = vmatpush1.bf16.msra.mxu0 %v1798_v43  ;;  %1204 = vmatpush1.bf16.msra.mxu1 %v1834_v49  ;;  %v1894_v43 = vld [vmem:[%s2262_s29 + $0x2b0] ss:$28 sps:$4 sm:$0xff]   ;;  %v1908_v49 = vld [vmem:[%s2262_s29 + $0x358] ss:$28 sps:$4 sm:$0xff]  }
  0x92   : > { %1164 = vmatprep.subr.bf16.mxu0 %v1801_v44  ;;  %1205 = vmatprep.subr.bf16.mxu1 %v1838_v50  ;;  %v1901_v44 = vld [vmem:[%s2262_s29 + $0x2ec] ss:$28 sps:$4 sm:$0xff]  }
  0x95   : > { %1165 = vmatpush1.bf16.msra.mxu0 %v1804_v47  ;;  %1206 = vmatpush1.bf16.msra.mxu1 %v1840_v53  ;;  %v1904_v47 = vld [vmem:[%s2262_s29 + $0x320] ss:$28 sps:$4 sm:$0xff]  }
  0x96   : > { %1166 = vmatprep.subr.bf16.mxu0 %v1807_v48  ;;  %1207 = vmatprep.subr.bf16.mxu1 %v1844_v54  ;;  %v1910_v48 = vld [vmem:[%s2262_s29 + $0x35c] ss:$28 sps:$4 sm:$0xff]  }
  0x99   : > { %1167 = vmatpush1.bf16.msra.mxu0 %v1810_v51  ;;  %1208 = vmatpush1.bf16.msra.mxu1 %v1846_v57 }
  0x9a   : > { %1168 = vmatprep.subr.bf16.mxu0 %v1813_v52  ;;  %1209 = vmatprep.subr.bf16.mxu1 %v1850_v58 }
  0x9d   : > { %1169 = vmatpush1.bf16.msra.mxu0 %v1816_v55  ;;  %1210 = vmatpush1.bf16.msra.mxu1 %v1852_v62 }
  0x9e   : > { %1170 = vmatprep.subr.bf16.mxu0 %v1819_v56  ;;  %1211 = vmatprep.subr.bf16.mxu1 %v1856_v63 }
  0xa1   : > { %1171 = vmatpush1.bf16.msra.mxu0 %v1822_v59  ;;  %1212 = vmatpush1.bf16.msra.mxu1 %v1858_v3 }
  0xa2   : > { %1226 = vmatprep.subr.bf16.mxu0 %v1831_v61  ;;  %1213 = vmatprep.subr.bf16.mxu1 %v1862_v4 }
  0xa4   : > { %1173 = vmatmul.mubr.bf16.vlgmr.msra.gmra.mrb[0].mxu0 %v2326_v60 }
  0xa5   : > { %1227 = vmatpush1.bf16.msra.mxu0 %v1829_v1  ;;  %1258 = vmatprep.mubr.bf16.mxu0 %v2256_v0 }
  0xa6   : > { %1228 = vmatprep.subr.bf16.mxu0 %v1837_v2  ;;  %1214 = vmatpush1.bf16.msra.mxu1 %v1864_v7 }
  0xa7   : > { %1699 = vmatprep.subr.bf16.mxu1 %v1868_v8 }
  0xa9   : > { %1229 = vmatpush1.bf16.msra.mxu0 %v1835_v5  ;;  %1216 = vmatmul.mubr.bf16.vlgmr.msra.gmra.mrb[0].mxu1 %v2326_v60 }
  0xaa   : > { %1230 = vmatprep.subr.bf16.mxu0 %v1843_v6  ;;  %1700 = vmatpush3.bf16.msra.mxu1 %v1872_v11 }
  0xab   : > { %1301 = vmatprep.mubr.bf16.mxu1 %v2256_v0  ;;  %1701 = vmatprep.subr.bf16.mxu1 %v1873_v12  ;;  %v1867_v0 = vld [vmem:[%s2262_s29 + $0x164] ss:$28 sps:$4 sm:$0xff]  }
  0xad   : > { %1231 = vmatpush1.bf16.msra.mxu0 %v1841_v9 }
  0xae   : > { %1232 = vmatprep.subr.bf16.mxu0 %v1849_v10  ;;  %1702 = vmatpush3.bf16.msra.mxu1 %v1877_v15 }
  0xaf   : > { %1703 = vmatprep.subr.bf16.mxu1 %v1878_v16 }
  0xb1   : > { %1233 = vmatpush1.bf16.msra.mxu0 %v1847_v13 }
  0xb2   : > { %1234 = vmatprep.subr.bf16.mxu0 %v1855_v14  ;;  %1704 = vmatpush3.bf16.msra.mxu1 %v1882_v19 }
  0xb3   : > { %1705 = vmatprep.subr.bf16.mxu1 %v1883_v20 }
  0xb5   : > { %1235 = vmatpush1.bf16.msra.mxu0 %v1853_v17 }
  0xb6   : > { %1236 = vmatprep.subr.bf16.mxu0 %v1861_v18  ;;  %1706 = vmatpush3.bf16.msra.mxu1 %v1887_v22 }
  0xb7   : > { %1707 = vmatprep.subr.bf16.mxu1 %v1888_v23 }
  0xb9   : > { %1237 = vmatpush1.bf16.msra.mxu0 %v1859_v21 }
  0xba   : > { %1238 = vmatprep.subr.bf16.mxu0 %v1867_v0  ;;  %1708 = vmatpush3.bf16.msra.mxu1 %v1892_v26 }
  0xbb   : > { %1709 = vmatprep.subr.bf16.mxu1 %v1893_v27 }
  0xbd   : > { %1239 = vmatpush1.bf16.msra.mxu0 %v1865_v24 }
  0xbe   : > { %1240 = vmatprep.subr.bf16.mxu0 %v1871_v25  ;;  %1710 = vmatpush3.bf16.msra.mxu1 %v1897_v30 }
  0xbf   : > { %1711 = vmatprep.subr.bf16.mxu1 %v1898_v31 }
  0xc1   : > { %1241 = vmatpush1.bf16.msra.mxu0 %v1869_v28 }
  0xc2   : > { %1242 = vmatprep.subr.bf16.mxu0 %v1876_v29  ;;  %1712 = vmatpush3.bf16.msra.mxu1 %v1902_v34 }
  0xc3   : > { %1713 = vmatprep.subr.bf16.mxu1 %v1903_v35 }
  0xc5   : > { %1243 = vmatpush1.bf16.msra.mxu0 %v1874_v32 }
  0xc6   : > { %1244 = vmatprep.subr.bf16.mxu0 %v1881_v33  ;;  %1714 = vmatpush3.bf16.msra.mxu1 %v1907_v38 }
  0xc9   : > { %1245 = vmatpush1.bf16.msra.mxu0 %v1879_v36  ;;  %1302 = vmatmul.mubr.bf16.vlgmr.msra.gmra.mrb[4].mxu1 %v2326_v60 }
  0xca   : > { %1246 = vmatprep.subr.bf16.mxu0 %v1886_v37 }
  0xcd   : > { %1247 = vmatpush1.bf16.msra.mxu0 %v1884_v39 }
  0xce   : > { %1248 = vmatprep.subr.bf16.mxu0 %v1891_v40 }
  0xd1   : > { %1249 = vmatpush1.bf16.msra.mxu0 %v1889_v41 }
  0xd2   : > { %1250 = vmatprep.subr.bf16.mxu0 %v1896_v42 }
  0xd5   : > { %1251 = vmatpush1.bf16.msra.mxu0 %v1894_v43 }
  0xd6   : > { %1252 = vmatprep.subr.bf16.mxu0 %v1901_v44 }
  0xd9   : > { %1253 = vmatpush1.bf16.msra.mxu0 %v1899_v45 }
  0xda   : > { %1254 = vmatprep.subr.bf16.mxu0 %v1906_v46 }
  0xdd   : > { %1255 = vmatpush1.bf16.msra.mxu0 %v1904_v47 }
  0xde   : > { %1256 = vmatprep.subr.bf16.mxu0 %v1910_v48 }
  0xe1   : > { %1257 = vmatpush1.bf16.msra.mxu0 %v1908_v49 }
  0xe4   : > { %1259 = vmatmul.mubr.bf16.vlgmr.msra.gmra.mrb[4].mxu0 %v2326_v60 }
 0x177   : > { %v1174_v50 = vpop.f32.mrb[0].mxu0 }
 0x178   : > { %v1310_v51 = vmax.f32 %v1174_v50, 0.0  ;;  %v1176_v52 = vpop.f32.mrb[1].mxu0 }
 0x179   : > { %v1311_v53 = vmax.f32 %v1176_v52, 0.0  ;;  %v1178_v54 = vpop.f32.mrb[2].mxu0 }
 0x17a   : > { %v1317_v55 = vmax.f32 %v1178_v54, 0.0  ;;  %v1180_v56 = vpop.f32.mrb[3].mxu0 }
 0x17b   : > { %v1690_v57 = vpack.c.bf16 %v1311_v53, %v1310_v51  ;;  %v1318_v58 = vmax.f32 %v1180_v56, 0.0 }
 0x17c   : > { %v1217_v60 = vpop.f32.mrb[0].mxu1 }
 0x17d   : > { %1368 = vst [vmem:[%s2389_s5] sm:$0xff] %v1690_v57  ;;  %v1694_v59 = vpack.c.bf16 %v1318_v58, %v1317_v55  ;;  %v1312_v61 = vmax.f32 %v1217_v60, 0.0  ;;  %v1219_v62 = vpop.f32.mrb[1].mxu1 }
 0x17e   : > { %v1313_v63 = vmax.f32 %v1219_v62, 0.0  ;;  %v1221_v1 = vpop.f32.mrb[2].mxu1 }
 0x17f   : > { %1372 = vst [vmem:[%s2389_s5 + $0x1c] sm:$0xff] %v1694_v59  ;;  %v1319_v2 = vmax.f32 %v1221_v1, 0.0  ;;  %v1223_v3 = vpop.f32.mrb[3].mxu1 }
 0x180   : > { %v1691_v4 = vpack.c.bf16 %v1313_v63, %v1312_v61  ;;  %v1320_v5 = vmax.f32 %v1223_v3, 0.0 }
 0x182   : > { %1369 = vst [vmem:[%s2389_s5 + $0x8] sm:$0xff] %v1691_v4  ;;  %v1695_v6 = vpack.c.bf16 %v1320_v5, %v1319_v2 }
 0x184   : > { %1373 = vst [vmem:[%s2389_s5 + $0x24] sm:$0xff] %v1695_v6  ;;  %v1400_v26 = vld [vmem:[%s2389_s5] sm:$0xff] (%p1980_p5) }
 0x185   : > { %1401 = vst [vmem:[%s1385_s9] sm:$0xff] (%p1980_p5), %v1400_v26 }
 0x186   : > { %v1406_v29 = vld [vmem:[%s2389_s5 + $0x1c] sm:$0xff] (%p1980_p5) }
 0x187   : > { %1407 = vst [vmem:[%s1385_s9 + $0x38] sm:$0xff] (%p1980_p5), %v1406_v29 }
 0x189   : > { %v1402_v27 = vld [vmem:[%s2389_s5 + $0x8] sm:$0xff] (%p1980_p5) }
 0x18a   : > { %1403 = vst [vmem:[%s1385_s9 + $0x8] sm:$0xff] (%p1980_p5), %v1402_v27 }
 0x18b   : > { %v1408_v30 = vld [vmem:[%s2389_s5 + $0x24] sm:$0xff] (%p1980_p5) }
 0x18c   : > { %1409 = vst [vmem:[%s1385_s9 + $0x40] sm:$0xff] (%p1980_p5), %v1408_v30 }
 0x19c   : > { %v1715_v7 = vpop.f32.mrb[4].mxu1 }
 0x19d   : > { %v1716_v8 = vpop.f32.mrb[5].mxu1 }
 0x19e   : > { %v1717_v9 = vadd.f32 %v1716_v8, %v1715_v7  ;;  %v1718_v10 = vpop.f32.mrb[6].mxu1 }
 0x19f   : > { %v1719_v11 = vpop.f32.mrb[7].mxu1 }
 0x1a0   : > { %v1316_v12 = vmax.f32 %v1717_v9, 0.0  ;;  %v1720_v13 = vadd.f32 %v1719_v11, %v1718_v10 }
 0x1a2   : > { %v1693_v14 = vpack.c.bf16 %v1316_v12, %v1316_v12  ;;  %v1323_v15 = vmax.f32 %v1720_v13, 0.0 }
 0x1a4   : > { %1371 = vst [vmem:[%s2389_s5 + $0x18] sm:$0xf] %v1693_v14  ;;  %v1697_v16 = vpack.c.bf16 %v1323_v15, %v1323_v15 }
 0x1a6   : > { %1375 = vst [vmem:[%s2389_s5 + $0x34] sm:$0xf] %v1697_v16 }
 0x1ab   : > { %v1683_v32 = vld [vmem:[%s2389_s5 + $0x18] sm:$0xf] (%p1980_p5) }
 0x1ac   : > { %1684 = vst [vmem:[%s1385_s9 + $0x18] sm:$0xf] (%p1980_p5), %v1683_v32 }
 0x1ad   : > { %v1685_v33 = vld [vmem:[%s2389_s5 + $0x34] sm:$0xf] (%p1980_p5) }
 0x1ae   : > { %1686 = vst [vmem:[%s1385_s9 + $0x50] sm:$0xf] (%p1980_p5), %v1685_v33 }
 0x1b7   : > { %v1260_v17 = vpop.f32.mrb[4].mxu0 }
 0x1b8   : > { %v1314_v18 = vmax.f32 %v1260_v17, 0.0  ;;  %v1262_v19 = vpop.f32.mrb[5].mxu0 }
 0x1b9   : > { %v1315_v20 = vmax.f32 %v1262_v19, 0.0  ;;  %v1264_v21 = vpop.f32.mrb[6].mxu0  ;;  %1382 = sbr.rel (!%p1980_p5) target bundleno = 456 (0x1c8), region = 58 }
 0x1ba   : > { %v1321_v0 = vmax.f32 %v1264_v21, 0.0  ;;  %v1266_v22 = vpop.f32.mrb[7].mxu0 }
 0x1bb   : > { %v1692_v23 = vpack.c.bf16 %v1315_v20, %v1314_v18  ;;  %v1322_v24 = vmax.f32 %v1266_v22, 0.0 }
 0x1bd   : > { %1370 = vst [vmem:[%s2389_s5 + $0x10] sm:$0xff] %v1692_v23  ;;  %v1696_v25 = vpack.c.bf16 %v1322_v24, %v1321_v0 }
 0x1bf   : > { %1374 = vst [vmem:[%s2389_s5 + $0x2c] sm:$0xff] %v1696_v25 }
 0x1c4   : > { %v1404_v28 = vld [vmem:[%s2389_s5 + $0x10] sm:$0xff] }
 0x1c5   : > { %1405 = vst [vmem:[%s1385_s9 + $0x10] sm:$0xff] %v1404_v28 }
 0x1c6   : > { %v1410_v31 = vld [vmem:[%s2389_s5 + $0x2c] sm:$0xff] }
 0x1c7   : > { %1411 = vst [vmem:[%s1385_s9 + $0x48] sm:$0xff] %v1410_v31 }
 0x1c8 PF: > { %p9_p10 = scmp.ge.s32.totalorder %s1967_s13, 4   ;;  %s2428_s9 = smov %s1929_s10 }
 0x1c9   : > { %s2429_s10 = smov %s1978_s16  ;;  %s2430_s11 = smov %s1967_s13 }
 0x1ca   :  { %11 = sbr.rel (!%p9_p10) target bundleno = 2 (0x2), region = 127 }

// kernel: ae2d_forward.11
= control target key start
LH: loop header
LB: loop body
LE: loop exit
PB: predicated region body
PF: predicated region fallthrough
CT: control target
= control target key end

     0   :  { %s585_s1 = inlined_call_operand.vmem [shape: bf16[256,256], index: 1, kind: input, shape index: {}]   ;;  %s586_s0 = inlined_call_operand.vmem [shape: bf16[32,256], index: 0, kind: input, shape index: {}]   ;;  %s587_s2 = inlined_call_operand.vmem [shape: bf16[32,256], index: 2, kind: output, shape index: {}]  }
   0x1   :  { %v396_v0 = vld [vmem:[%s585_s1 + $0x4] ss:$8 sps:$4 sm:$0xff]   ;;  %v398_v1 = vld [vmem:[%s585_s1] ss:$8 sps:$4 sm:$0xff]   ;;  %v399_v2 = vld [vmem:[%s585_s1 + $0x14] ss:$8 sps:$4 sm:$0xff]  }
   0x2   :  { %227 = vmatprep.subr.bf16.mxu0 %v396_v0  ;;  %364 = vmatprep.subr.bf16.mxu1 %v396_v0  ;;  %v401_v3 = vld [vmem:[%s585_s1 + $0x10] ss:$8 sps:$4 sm:$0xff]   ;;  %v402_v4 = vld [vmem:[%s585_s1 + $0x24] ss:$8 sps:$4 sm:$0xff]   ;;  %v404_v5 = vld [vmem:[%s585_s1 + $0x20] ss:$8 sps:$4 sm:$0xff]  }
   0x3   :  { %228 = vmatpush1.bf16.msra.mxu0 %v398_v1  ;;  %380 = vmatpush1.bf16.msra.mxu1 %v398_v1  ;;  %v405_v6 = vld [vmem:[%s585_s1 + $0x34] ss:$8 sps:$4 sm:$0xff]   ;;  %v407_v7 = vld [vmem:[%s585_s1 + $0x30] ss:$8 sps:$4 sm:$0xff]   ;;  %v408_v8 = vld [vmem:[%s585_s1 + $0x44] ss:$8 sps:$4 sm:$0xff]  }
   0x4   :  { %229 = vmatprep.subr.bf16.mxu0 %v399_v2  ;;  %365 = vmatprep.subr.bf16.mxu1 %v399_v2  ;;  %v410_v9 = vld [vmem:[%s585_s1 + $0x40] ss:$8 sps:$4 sm:$0xff]   ;;  %v411_v10 = vld [vmem:[%s585_s1 + $0x54] ss:$8 sps:$4 sm:$0xff]   ;;  %v413_v11 = vld [vmem:[%s585_s1 + $0x50] ss:$8 sps:$4 sm:$0xff]  }
   0x5   :  { %v414_v12 = vld [vmem:[%s585_s1 + $0x64] ss:$8 sps:$4 sm:$0xff]   ;;  %v416_v14 = vld [vmem:[%s585_s1 + $0x60] ss:$8 sps:$4 sm:$0xff]   ;;  %v449_v15 = vld [vmem:[%s586_s0 + $0x14] ss:$8 sps:$4 sm:$0xff]  }
   0x6   :  { %v446_v13 = vld [vmem:[%s586_s0 + $0x4] ss:$8 sps:$4 sm:$0xff]   ;;  %v417_v16 = vld [vmem:[%s585_s1 + $0x74] ss:$8 sps:$4 sm:$0xff]   ;;  %269 = vmatprep.mubr.bf16.mxu1 %v449_v15  ;;  %v419_v17 = vld [vmem:[%s585_s1 + $0x70] ss:$8 sps:$4 sm:$0xff]  }
   0x7   :  { %230 = vmatpush1.bf16.msra.mxu0 %v401_v3  ;;  %381 = vmatpush1.bf16.msra.mxu1 %v401_v3  ;;  %v420_v18 = vld [vmem:[%s585_s1 + $0x84] ss:$8 sps:$4 sm:$0xff]   ;;  %v422_v19 = vld [vmem:[%s585_s1 + $0x80] ss:$8 sps:$4 sm:$0xff]   ;;  %v423_v20 = vld [vmem:[%s585_s1 + $0x94] ss:$8 sps:$4 sm:$0xff]  }
   0x8   :  { %231 = vmatprep.subr.bf16.mxu0 %v402_v4  ;;  %366 = vmatprep.subr.bf16.mxu1 %v402_v4  ;;  %v425_v21 = vld [vmem:[%s585_s1 + $0x90] ss:$8 sps:$4 sm:$0xff]   ;;  %v426_v22 = vld [vmem:[%s585_s1 + $0xa4] ss:$8 sps:$4 sm:$0xff]   ;;  %v428_v23 = vld [vmem:[%s585_s1 + $0xa0] ss:$8 sps:$4 sm:$0xff]  }
   0x9   :  { %259 = vmatprep.mubr.bf16.mxu0 %v446_v13  ;;  %v429_v24 = vld [vmem:[%s585_s1 + $0xb4] ss:$8 sps:$4 sm:$0xff]   ;;  %v431_v25 = vld [vmem:[%s585_s1 + $0xb0] ss:$8 sps:$4 sm:$0xff]   ;;  %v432_v26 = vld [vmem:[%s585_s1 + $0xc4] ss:$8 sps:$4 sm:$0xff]  }
   0xa   :  { %v434_v27 = vld [vmem:[%s585_s1 + $0xc0] ss:$8 sps:$4 sm:$0xff]   ;;  %v435_v28 = vld [vmem:[%s585_s1 + $0xd4] ss:$8 sps:$4 sm:$0xff]   ;;  %v437_v29 = vld [vmem:[%s585_s1 + $0xd0] ss:$8 sps:$4 sm:$0xff]  }
   0xb   :  { %232 = vmatpush1.bf16.msra.mxu0 %v404_v5  ;;  %382 = vmatpush1.bf16.msra.mxu1 %v404_v5  ;;  %v438_v30 = vld [vmem:[%s585_s1 + $0xe4] ss:$8 sps:$4 sm:$0xff]   ;;  %v440_v31 = vld [vmem:[%s585_s1 + $0xe0] ss:$8 sps:$4 sm:$0xff]   ;;  %v441_v32 = vld [vmem:[%s585_s1 + $0xf4] ss:$8 sps:$4 sm:$0xff]  }
   0xc   :  { %233 = vmatprep.subr.bf16.mxu0 %v405_v6  ;;  %367 = vmatprep.subr.bf16.mxu1 %v405_v6  ;;  %v443_v33 = vld [vmem:[%s585_s1 + $0xf0] ss:$8 sps:$4 sm:$0xff]   ;;  %v444_v34 = vld [vmem:[%s586_s0] ss:$8 sps:$4 sm:$0xff]  }
   0xd   :  { %v447_v35 = vld [vmem:[%s586_s0 + $0x10] ss:$8 sps:$4 sm:$0xff]  }
   0xf   :  { %234 = vmatpush1.bf16.msra.mxu0 %v407_v7  ;;  %383 = vmatpush1.bf16.msra.mxu1 %v407_v7 }
  0x10   :  { %235 = vmatprep.subr.bf16.mxu0 %v408_v8  ;;  %368 = vmatprep.subr.bf16.mxu1 %v408_v8 }
  0x13   :  { %236 = vmatpush1.bf16.msra.mxu0 %v410_v9  ;;  %384 = vmatpush1.bf16.msra.mxu1 %v410_v9 }
  0x14   :  { %237 = vmatprep.subr.bf16.mxu0 %v411_v10  ;;  %369 = vmatprep.subr.bf16.mxu1 %v411_v10 }
  0x17   :  { %238 = vmatpush1.bf16.msra.mxu0 %v413_v11  ;;  %385 = vmatpush1.bf16.msra.mxu1 %v413_v11 }
  0x18   :  { %239 = vmatprep.subr.bf16.mxu0 %v414_v12  ;;  %370 = vmatprep.subr.bf16.mxu1 %v414_v12 }
  0x1b   :  { %240 = vmatpush1.bf16.msra.mxu0 %v416_v14  ;;  %386 = vmatpush1.bf16.msra.mxu1 %v416_v14 }
  0x1c   :  { %241 = vmatprep.subr.bf16.mxu0 %v417_v16  ;;  %371 = vmatprep.subr.bf16.mxu1 %v417_v16 }
  0x1f   :  { %242 = vmatpush1.bf16.msra.mxu0 %v419_v17  ;;  %387 = vmatpush1.bf16.msra.mxu1 %v419_v17 }
  0x20   :  { %243 = vmatprep.subr.bf16.mxu0 %v420_v18  ;;  %372 = vmatprep.subr.bf16.mxu1 %v420_v18 }
  0x23   :  { %244 = vmatpush1.bf16.msra.mxu0 %v422_v19  ;;  %388 = vmatpush1.bf16.msra.mxu1 %v422_v19 }
  0x24   :  { %245 = vmatprep.subr.bf16.mxu0 %v423_v20  ;;  %373 = vmatprep.subr.bf16.mxu1 %v423_v20 }
  0x27   :  { %246 = vmatpush1.bf16.msra.mxu0 %v425_v21  ;;  %389 = vmatpush1.bf16.msra.mxu1 %v425_v21 }
  0x28   :  { %247 = vmatprep.subr.bf16.mxu0 %v426_v22  ;;  %374 = vmatprep.subr.bf16.mxu1 %v426_v22 }
  0x2b   :  { %248 = vmatpush1.bf16.msra.mxu0 %v428_v23  ;;  %390 = vmatpush1.bf16.msra.mxu1 %v428_v23 }
  0x2c   :  { %249 = vmatprep.subr.bf16.mxu0 %v429_v24  ;;  %375 = vmatprep.subr.bf16.mxu1 %v429_v24 }
  0x2f   :  { %250 = vmatpush1.bf16.msra.mxu0 %v431_v25  ;;  %391 = vmatpush1.bf16.msra.mxu1 %v431_v25 }
  0x30   :  { %251 = vmatprep.subr.bf16.mxu0 %v432_v26  ;;  %376 = vmatprep.subr.bf16.mxu1 %v432_v26 }
  0x33   :  { %252 = vmatpush1.bf16.msra.mxu0 %v434_v27  ;;  %392 = vmatpush1.bf16.msra.mxu1 %v434_v27 }
  0x34   :  { %253 = vmatprep.subr.bf16.mxu0 %v435_v28  ;;  %377 = vmatprep.subr.bf16.mxu1 %v435_v28 }
  0x37   :  { %254 = vmatpush1.bf16.msra.mxu0 %v437_v29  ;;  %393 = vmatpush1.bf16.msra.mxu1 %v437_v29 }
  0x38   :  { %255 = vmatprep.subr.bf16.mxu0 %v438_v30  ;;  %378 = vmatprep.subr.bf16.mxu1 %v438_v30 }
  0x3b   :  { %256 = vmatpush1.bf16.msra.mxu0 %v440_v31  ;;  %394 = vmatpush1.bf16.msra.mxu1 %v440_v31 }
  0x3c   :  { %257 = vmatprep.subr.bf16.mxu0 %v441_v32  ;;  %379 = vmatprep.subr.bf16.mxu1 %v441_v32 }
  0x3f   :  { %258 = vmatpush1.bf16.msra.mxu0 %v443_v33  ;;  %395 = vmatpush1.bf16.msra.mxu1 %v443_v33 }
  0x42   :  { %260 = vmatmul.mubr.bf16.vlgmr.msra.gmra.mrb[0].mxu0 %v444_v34  ;;  %270 = vmatmul.mubr.bf16.vlgmr.msra.gmra.mrb[0].mxu1 %v447_v35 }
 0x115   :  { %v261_v36 = vpop.f32.mrb[0].mxu0  ;;  %v271_v37 = vpop.f32.mrb[0].mxu1 }
 0x116   :  { %v280_v38 = vmax.f32 %v261_v36, 0.0  ;;  %v284_v39 = vmax.f32 %v271_v37, 0.0  ;;  %v263_v40 = vpop.f32.mrb[1].mxu0  ;;  %v273_v41 = vpop.f32.mrb[1].mxu1 }
 0x117   :  { %v281_v42 = vmax.f32 %v263_v40, 0.0  ;;  %v285_v43 = vmax.f32 %v273_v41, 0.0  ;;  %v265_v44 = vpop.f32.mrb[2].mxu0  ;;  %v275_v45 = vpop.f32.mrb[2].mxu1 }
 0x118   :  { %v282_v46 = vmax.f32 %v265_v44, 0.0  ;;  %v286_v47 = vmax.f32 %v275_v45, 0.0  ;;  %v267_v48 = vpop.f32.mrb[3].mxu0  ;;  %v277_v49 = vpop.f32.mrb[3].mxu1 }
 0x119   :  { %v360_v50 = vpack.c.bf16 %v281_v42, %v280_v38  ;;  %v362_v51 = vpack.c.bf16 %v285_v43, %v284_v39  ;;  %v283_v52 = vmax.f32 %v267_v48, 0.0  ;;  %v287_v53 = vmax.f32 %v277_v49, 0.0 }
 0x11b   :  { %312 = vst [vmem:[%s587_s2] sm:$0xff] %v360_v50  ;;  %314 = vst [vmem:[%s587_s2 + $0x10] sm:$0xff] %v362_v51  ;;  %v361_v54 = vpack.c.bf16 %v283_v52, %v282_v46  ;;  %v363_v55 = vpack.c.bf16 %v287_v53, %v286_v47 }
 0x11d   :  { %313 = vst [vmem:[%s587_s2 + $0x8] sm:$0xff] %v361_v54  ;;  %315 = vst [vmem:[%s587_s2 + $0x18] sm:$0xff] %v363_v55 }

// kernel: ae2d_forward.12
= control target key start
LH: loop header
LB: loop body
LE: loop exit
PB: predicated region body
PF: predicated region fallthrough
CT: control target
= control target key end

     0   :  { %s792_s1 = inlined_call_operand.vmem [shape: bf16[384,128], index: 1, kind: input, shape index: {}]   ;;  %s793_s0 = inlined_call_operand.vmem [shape: bf16[64,384], index: 0, kind: input, shape index: {}]   ;;  %s794_s2 = inlined_call_operand.vmem [shape: bf16[64,128], index: 2, kind: output, shape index: {}]  }
   0x1   :  { %v617_v0 = vld [vmem:[%s792_s1 + $0x40] sm:$0xff]   ;;  %v620_v3 = vld [vmem:[%s792_s1 + $0x48] sm:$0xff]   ;;  %v623_v6 = vld [vmem:[%s792_s1 + $0x50] sm:$0xff]  }
   0x2   :  { %v618_v1 = vld [vmem:[%s792_s1] sm:$0xff]   ;;  %541 = vmatprep.subr.bf16.mxu0 %v617_v0  ;;  %v621_v4 = vld [vmem:[%s792_s1 + $0x8] sm:$0xff]   ;;  %v624_v7 = vld [vmem:[%s792_s1 + $0x10] sm:$0xff]  }
   0x3   :  { %v619_v2 = vld [vmem:[%s792_s1 + $0x80] sm:$0xff]   ;;  %542 = vmatpush3.bf16.msra.mxu0 %v618_v1  ;;  %v622_v5 = vld [vmem:[%s792_s1 + $0x88] sm:$0xff]   ;;  %v625_v8 = vld [vmem:[%s792_s1 + $0x90] sm:$0xff]  }
   0x4   :  { %593 = vmatprep.subr.bf16.mxu1 %v619_v2  ;;  %543 = vmatprep.subr.bf16.mxu0 %v620_v3  ;;  %v626_v9 = vld [vmem:[%s792_s1 + $0x58] sm:$0xff]   ;;  %v629_v12 = vld [vmem:[%s792_s1 + $0x60] sm:$0xff]   ;;  %v632_v15 = vld [vmem:[%s792_s1 + $0x68] sm:$0xff]  }
   0x5   :  { %594 = vmatpush3.bf16.msra.mxu1 %v619_v2  ;;  %v627_v10 = vld [vmem:[%s792_s1 + $0x18] sm:$0xff]   ;;  %v631_v13 = vld [vmem:[%s792_s1 + $0xa0] sm:$0xff]   ;;  %v634_v16 = vld [vmem:[%s792_s1 + $0xa8] sm:$0xff]  }
   0x6   :  { %595 = vmatprep.subr.bf16.mxu1 %v622_v5  ;;  %v628_v11 = vld [vmem:[%s792_s1 + $0x98] sm:$0xff]   ;;  %v630_v14 = vld [vmem:[%s792_s1 + $0x20] sm:$0xff]   ;;  %v633_v17 = vld [vmem:[%s792_s1 + $0x28] sm:$0xff]  }
   0x7   :  { %544 = vmatpush3.bf16.msra.mxu0 %v621_v4  ;;  %v635_v18 = vld [vmem:[%s792_s1 + $0x70] sm:$0xff]   ;;  %v638_v21 = vld [vmem:[%s792_s1 + $0x78] sm:$0xff]   ;;  %v641_v26 = vld [vmem:[%s793_s0] ss:$12 sps:$4 sm:$0xff]  }
   0x8   :  { %545 = vmatprep.subr.bf16.mxu0 %v623_v6  ;;  %v636_v19 = vld [vmem:[%s792_s1 + $0x30] sm:$0xff]   ;;  %v640_v22 = vld [vmem:[%s792_s1 + $0xb8] sm:$0xff]   ;;  %v645_v28 = vld [vmem:[%s793_s0 + $0x20] ss:$12 sps:$4 sm:$0xff]  }
   0x9   :  { %596 = vmatpush3.bf16.msra.mxu1 %v622_v5  ;;  %v637_v20 = vld [vmem:[%s792_s1 + $0xb0] sm:$0xff]   ;;  %v639_v25 = vld [vmem:[%s792_s1 + $0x38] sm:$0xff]  }
   0xa   :  { %597 = vmatprep.subr.bf16.mxu1 %v625_v8  ;;  %v643_v23 = vld [vmem:[%s793_s0 + $0x4] ss:$12 sps:$4 sm:$0xff]   ;;  %v644_v24 = vld [vmem:[%s793_s0 + $0x8] ss:$12 sps:$4 sm:$0xff]   ;;  %v654_v34 = vld [vmem:[%s793_s0 + $0x4c] ss:$12 sps:$4 sm:$0xff]  }
   0xb   :  { %546 = vmatpush3.bf16.msra.mxu0 %v624_v7  ;;  %316 = vmatprep.mubr.bf16.mxu0 %v643_v23  ;;  %v646_v27 = vld [vmem:[%s793_s0 + $0x1c] ss:$12 sps:$4 sm:$0xff]   ;;  %v652_v29 = vld [vmem:[%s793_s0 + $0x38] ss:$12 sps:$4 sm:$0xff]   ;;  %v649_v31 = vld [vmem:[%s793_s0 + $0x34] ss:$12 sps:$4 sm:$0xff]  }
   0xc   :  { %547 = vmatprep.subr.bf16.mxu0 %v626_v9  ;;  %609 = vmatprep.mubr.bf16.mxu1 %v644_v24  ;;  %v648_v30 = vld [vmem:[%s793_s0 + $0x18] ss:$12 sps:$4 sm:$0xff]   ;;  %v653_v32 = vld [vmem:[%s793_s0 + $0x50] ss:$12 sps:$4 sm:$0xff]   ;;  %v656_v35 = vld [vmem:[%s793_s0 + $0x48] ss:$12 sps:$4 sm:$0xff]  }
   0xd   :  { %598 = vmatpush3.bf16.msra.mxu1 %v625_v8  ;;  %v651_v33 = vld [vmem:[%s793_s0 + $0x30] ss:$12 sps:$4 sm:$0xff]  }
   0xe   :  { %599 = vmatprep.subr.bf16.mxu1 %v628_v11 }
   0xf   :  { %548 = vmatpush3.bf16.msra.mxu0 %v627_v10 }
  0x10   :  { %549 = vmatprep.subr.bf16.mxu0 %v629_v12 }
  0x11   :  { %600 = vmatpush3.bf16.msra.mxu1 %v628_v11 }
  0x12   :  { %601 = vmatprep.subr.bf16.mxu1 %v631_v13 }
  0x13   :  { %550 = vmatpush3.bf16.msra.mxu0 %v630_v14 }
  0x14   :  { %551 = vmatprep.subr.bf16.mxu0 %v632_v15 }
  0x15   :  { %602 = vmatpush3.bf16.msra.mxu1 %v631_v13 }
  0x16   :  { %603 = vmatprep.subr.bf16.mxu1 %v634_v16 }
  0x17   :  { %552 = vmatpush3.bf16.msra.mxu0 %v633_v17 }
  0x18   :  { %553 = vmatprep.subr.bf16.mxu0 %v635_v18 }
  0x19   :  { %604 = vmatpush3.bf16.msra.mxu1 %v634_v16 }
  0x1a   :  { %605 = vmatprep.subr.bf16.mxu1 %v637_v20 }
  0x1b   :  { %554 = vmatpush3.bf16.msra.mxu0 %v636_v19 }
  0x1c   :  { %555 = vmatprep.subr.bf16.mxu0 %v638_v21 }
  0x1d   :  { %606 = vmatpush3.bf16.msra.mxu1 %v637_v20 }
  0x1e   :  { %607 = vmatprep.subr.bf16.mxu1 %v640_v22 }
  0x1f   :  { %556 = vmatpush3.bf16.msra.mxu0 %v639_v25 }
  0x21   :  { %608 = vmatpush3.bf16.msra.mxu1 %v640_v22 }
  0x22   :  { %317 = vmatmul.mubr.bf16.vlgmr.msra.gmra.mrb[0].mxu0 %v641_v26 }
  0x23   :  { %324 = vmatprep.mubr.bf16.mxu0 %v646_v27 }
  0x24   :  { %610 = vmatmul.mubr.bf16.vlgmr.msra.gmra.mrb[0].mxu1 %v645_v28 }
  0x25   :  { %613 = vmatprep.mubr.bf16.mxu1 %v652_v29 }
  0x2a   :  { %325 = vmatmul.mubr.bf16.gmra.mrb[4].mxu0 %v648_v30 }
  0x2b   :  { %332 = vmatprep.mubr.bf16.mxu0 %v649_v31 }
  0x2c   :  { %614 = vmatmul.mubr.bf16.gmra.mrb[4].mxu1 %v653_v32 }
  0x32   :  { %333 = vmatmul.mubr.bf16.gmra.mrb[8].mxu0 %v651_v33 }
  0x33   :  { %340 = vmatprep.mubr.bf16.mxu0 %v654_v34 }
  0x3a   :  { %341 = vmatmul.mubr.bf16.gmra.mrb[12].mxu0 %v656_v35 }
  0xf5   :  { %v557_v36 = vpop.f32.mrb[0].mxu0 }
  0xf6   :  { %v558_v37 = vpop.f32.mrb[1].mxu0 }
  0xf7   :  { %v559_v38 = vadd.f32 %v558_v37, %v557_v36  ;;  %v560_v39 = vpop.f32.mrb[2].mxu0  ;;  %v611_v40 = vpop.f32.mrb[0].mxu1 }
  0xf8   :  { %v561_v41 = vpop.f32.mrb[3].mxu0  ;;  %v383_v42 = vpop.f32.mrb[1].mxu1 }
  0xf9   :  { %v562_v43 = vadd.f32 %v561_v41, %v560_v39  ;;  %v384_v44 = vadd.f32 %v559_v38, %v383_v42  ;;  %v612_v45 = vpop.f32.mrb[2].mxu1 }
  0xfa   :  { %v386_v46 = vpop.f32.mrb[3].mxu1 }
  0xfb   :  { %v387_v47 = vadd.f32 %v562_v43, %v386_v46  ;;  %v414_v48 = vmax.f32 %v384_v44, 0.0 }
  0xfd   :  { %v415_v49 = vmax.f32 %v387_v47, 0.0  ;;  %v563_v50 = vpop.f32.mrb[4].mxu0 }
  0xfe   :  { %v564_v51 = vpop.f32.mrb[5].mxu0 }
  0xff   :  { %v521_v52 = vpack.c.bf16 %v415_v49, %v414_v48  ;;  %v565_v53 = vadd.f32 %v564_v51, %v563_v50  ;;  %v566_v54 = vpop.f32.mrb[6].mxu0  ;;  %v615_v55 = vpop.f32.mrb[4].mxu1 }
 0x100   :  { %v567_v56 = vpop.f32.mrb[7].mxu0  ;;  %v399_v57 = vpop.f32.mrb[5].mxu1 }
 0x101   :  { %522 = vst [vmem:[%s794_s2] sm:$0xff] %v521_v52   ;;  %v392_v58 = vadd.f32 %v611_v40, %v565_v53  ;;  %v568_v59 = vadd.f32 %v567_v56, %v566_v54  ;;  %v616_v60 = vpop.f32.mrb[6].mxu1 }
 0x102   :  { %v402_v61 = vpop.f32.mrb[7].mxu1 }
 0x103   :  { %v395_v62 = vadd.f32 %v612_v45, %v568_v59  ;;  %v416_v63 = vmax.f32 %v392_v58, 0.0 }
 0x105   :  { %v417_v0 = vmax.f32 %v395_v62, 0.0  ;;  %v569_v1 = vpop.f32.mrb[8].mxu0 }
 0x106   :  { %v570_v2 = vpop.f32.mrb[9].mxu0 }
 0x107   :  { %v526_v3 = vpack.c.bf16 %v417_v0, %v416_v63  ;;  %v571_v4 = vadd.f32 %v570_v2, %v569_v1  ;;  %v572_v5 = vpop.f32.mrb[10].mxu0 }
 0x108   :  { %v573_v6 = vpop.f32.mrb[11].mxu0 }
 0x109   :  { %538 = vst [vmem:[%s794_s2 + $0x8] sm:$0xff] %v526_v3   ;;  %v574_v7 = vadd.f32 %v573_v6, %v572_v5  ;;  %v400_v8 = vadd.f32 %v571_v4, %v399_v57 }
 0x10b   :  { %v403_v9 = vadd.f32 %v574_v7, %v402_v61  ;;  %v418_v10 = vmax.f32 %v400_v8, 0.0 }
 0x10d   :  { %v419_v11 = vmax.f32 %v403_v9, 0.0  ;;  %v575_v12 = vpop.f32.mrb[12].mxu0 }
 0x10e   :  { %v576_v13 = vpop.f32.mrb[13].mxu0 }
 0x10f   :  { %v531_v14 = vpack.c.bf16 %v419_v11, %v418_v10  ;;  %v577_v15 = vadd.f32 %v576_v13, %v575_v12  ;;  %v578_v16 = vpop.f32.mrb[14].mxu0 }
 0x110   :  { %v579_v17 = vpop.f32.mrb[15].mxu0 }
 0x111   :  { %539 = vst [vmem:[%s794_s2 + $0x10] sm:$0xff] %v531_v14   ;;  %v408_v18 = vadd.f32 %v615_v55, %v577_v15  ;;  %v580_v19 = vadd.f32 %v579_v17, %v578_v16 }
 0x113   :  { %v411_v20 = vadd.f32 %v616_v60, %v580_v19  ;;  %v420_v21 = vmax.f32 %v408_v18, 0.0 }
 0x115   :  { %v421_v22 = vmax.f32 %v411_v20, 0.0 }
 0x117   :  { %v536_v23 = vpack.c.bf16 %v421_v22, %v420_v21 }
 0x119   :  { %540 = vst [vmem:[%s794_s2 + $0x18] sm:$0xff] %v536_v23  }

// kernel: ae2d_forward.13
= control target key start
LH: loop header
LB: loop body
LE: loop exit
PB: predicated region body
PF: predicated region fallthrough
CT: control target
= control target key end

     0   :  { %s937_s1 = inlined_call_operand.vmem [shape: bf16[768,128], index: 1, kind: input, shape index: {}]   ;;  %s938_s0 = inlined_call_operand.vmem [shape: bf16[16,768], index: 0, kind: input, shape index: {}]   ;;  %s939_s2 = inlined_call_operand.vmem [shape: bf16[16,128], index: 2, kind: output, shape index: {}]  }
   0x1   :  { %v700_v0 = vld [vmem:[%s937_s1 + $0x40] sm:$0xff]   ;;  %v704_v4 = vld [vmem:[%s937_s1 + $0x48] sm:$0xff]   ;;  %v708_v8 = vld [vmem:[%s937_s1 + $0x50] sm:$0xff]  }
   0x2   :  { %v701_v1 = vld [vmem:[%s937_s1 + $0xc0] sm:$0xff]   ;;  %634 = vmatprep.subr.bf16.mxu0 %v700_v0  ;;  %v705_v5 = vld [vmem:[%s937_s1 + $0xc8] sm:$0xff]   ;;  %v709_v9 = vld [vmem:[%s937_s1 + $0xd0] sm:$0xff]  }
   0x3   :  { %v702_v2 = vld [vmem:[%s937_s1] sm:$0xff]   ;;  %656 = vmatprep.subr.bf16.mxu1 %v701_v1  ;;  %v706_v6 = vld [vmem:[%s937_s1 + $0x8] sm:$0xff]   ;;  %v710_v10 = vld [vmem:[%s937_s1 + $0x10] sm:$0xff]  }
   0x4   :  { %v703_v3 = vld [vmem:[%s937_s1 + $0x80] sm:$0xff]   ;;  %635 = vmatpush3.bf16.msra.mxu0 %v702_v2  ;;  %v707_v7 = vld [vmem:[%s937_s1 + $0x88] sm:$0xff]   ;;  %v711_v11 = vld [vmem:[%s937_s1 + $0x90] sm:$0xff]  }
   0x5   :  { %657 = vmatpush3.bf16.msra.mxu1 %v703_v3  ;;  %636 = vmatprep.subr.bf16.mxu0 %v704_v4  ;;  %v712_v12 = vld [vmem:[%s937_s1 + $0x58] sm:$0xff]   ;;  %v716_v16 = vld [vmem:[%s937_s1 + $0x60] sm:$0xff]   ;;  %v720_v20 = vld [vmem:[%s937_s1 + $0x68] sm:$0xff]  }
   0x6   :  { %658 = vmatprep.subr.bf16.mxu1 %v705_v5  ;;  %v713_v13 = vld [vmem:[%s937_s1 + $0xd8] sm:$0xff]   ;;  %v717_v17 = vld [vmem:[%s937_s1 + $0xe0] sm:$0xff]   ;;  %v721_v21 = vld [vmem:[%s937_s1 + $0xe8] sm:$0xff]  }
   0x7   :  { %v714_v14 = vld [vmem:[%s937_s1 + $0x18] sm:$0xff]   ;;  %v718_v18 = vld [vmem:[%s937_s1 + $0x20] sm:$0xff]   ;;  %v722_v22 = vld [vmem:[%s937_s1 + $0x28] sm:$0xff]  }
   0x8   :  { %637 = vmatpush3.bf16.msra.mxu0 %v706_v6  ;;  %v715_v15 = vld [vmem:[%s937_s1 + $0x98] sm:$0xff]   ;;  %v719_v19 = vld [vmem:[%s937_s1 + $0xa0] sm:$0xff]   ;;  %v723_v23 = vld [vmem:[%s937_s1 + $0xa8] sm:$0xff]  }
   0x9   :  { %659 = vmatpush3.bf16.msra.mxu1 %v707_v7  ;;  %638 = vmatprep.subr.bf16.mxu0 %v708_v8  ;;  %v724_v24 = vld [vmem:[%s937_s1 + $0x70] sm:$0xff]   ;;  %v728_v28 = vld [vmem:[%s937_s1 + $0x78] sm:$0xff]   ;;  %v735_v34 = vld [vmem:[%s938_s0 + $0x8] ss:$24 sps:$4 sm:$0xff]  }
   0xa   :  { %660 = vmatprep.subr.bf16.mxu1 %v709_v9  ;;  %v725_v25 = vld [vmem:[%s937_s1 + $0xf0] sm:$0xff]   ;;  %v729_v29 = vld [vmem:[%s937_s1 + $0xf8] sm:$0xff]   ;;  %v737_v35 = vld [vmem:[%s938_s0 + $0xc] ss:$24 sps:$4 sm:$0xff]  }
   0xb   :  { %v726_v26 = vld [vmem:[%s937_s1 + $0x30] sm:$0xff]   ;;  %v730_v30 = vld [vmem:[%s937_s1 + $0x38] sm:$0xff]   ;;  %v738_v36 = vld [vmem:[%s937_s1 + $0x140] sm:$0xff]   ;;  %505 = vmatprep.mubr.bf16.mxu1 %v737_v35 }
   0xc   :  { %639 = vmatpush3.bf16.msra.mxu0 %v710_v10  ;;  %v727_v27 = vld [vmem:[%s937_s1 + $0xb0] sm:$0xff]   ;;  %v731_v31 = vld [vmem:[%s937_s1 + $0xb8] sm:$0xff]   ;;  %v739_v37 = vld [vmem:[%s937_s1 + $0x100] sm:$0xff]  }
   0xd   :  { %661 = vmatpush3.bf16.msra.mxu1 %v711_v11  ;;  %640 = vmatprep.subr.bf16.mxu0 %v712_v12  ;;  %v732_v32 = vld [vmem:[%s938_s0] ss:$24 sps:$4 sm:$0xff]   ;;  %v734_v33 = vld [vmem:[%s938_s0 + $0x4] ss:$24 sps:$4 sm:$0xff]   ;;  %v740_v38 = vld [vmem:[%s937_s1 + $0x148] sm:$0xff]  }
   0xe   :  { %662 = vmatprep.subr.bf16.mxu1 %v713_v13  ;;  %464 = vmatprep.mubr.bf16.mxu0 %v734_v33  ;;  %v741_v39 = vld [vmem:[%s937_s1 + $0x108] sm:$0xff]   ;;  %v742_v40 = vld [vmem:[%s937_s1 + $0x150] sm:$0xff]   ;;  %v744_v42 = vld [vmem:[%s937_s1 + $0x158] sm:$0xff]  }
   0xf   :  { %v743_v41 = vld [vmem:[%s937_s1 + $0x110] sm:$0xff]   ;;  %v745_v43 = vld [vmem:[%s937_s1 + $0x118] sm:$0xff]   ;;  %v746_v44 = vld [vmem:[%s937_s1 + $0x160] sm:$0xff]  }
  0x10   :  { %641 = vmatpush3.bf16.msra.mxu0 %v714_v14  ;;  %v747_v45 = vld [vmem:[%s937_s1 + $0x120] sm:$0xff]   ;;  %v748_v46 = vld [vmem:[%s937_s1 + $0x168] sm:$0xff]   ;;  %v750_v49 = vld [vmem:[%s937_s1 + $0x170] sm:$0xff]  }
  0x11   :  { %663 = vmatpush3.bf16.msra.mxu1 %v715_v15  ;;  %642 = vmatprep.subr.bf16.mxu0 %v716_v16  ;;  %v756_v47 = vld [vmem:[%s938_s0 + $0x14] ss:$24 sps:$4 sm:$0xff]   ;;  %v752_v51 = vld [vmem:[%s937_s1 + $0x178] sm:$0xff]   ;;  %v754_v53 = vld [vmem:[%s938_s0 + $0x10] ss:$24 sps:$4 sm:$0xff]  }
  0x12   :  { %664 = vmatprep.subr.bf16.mxu1 %v717_v17  ;;  %v749_v48 = vld [vmem:[%s937_s1 + $0x128] sm:$0xff]   ;;  %v751_v50 = vld [vmem:[%s937_s1 + $0x130] sm:$0xff]   ;;  %v753_v52 = vld [vmem:[%s937_s1 + $0x138] sm:$0xff]  }
  0x14   :  { %643 = vmatpush3.bf16.msra.mxu0 %v718_v18 }
  0x15   :  { %665 = vmatpush3.bf16.msra.mxu1 %v719_v19  ;;  %644 = vmatprep.subr.bf16.mxu0 %v720_v20 }
  0x16   :  { %666 = vmatprep.subr.bf16.mxu1 %v721_v21 }
  0x18   :  { %645 = vmatpush3.bf16.msra.mxu0 %v722_v22 }
  0x19   :  { %667 = vmatpush3.bf16.msra.mxu1 %v723_v23  ;;  %646 = vmatprep.subr.bf16.mxu0 %v724_v24 }
  0x1a   :  { %668 = vmatprep.subr.bf16.mxu1 %v725_v25 }
  0x1c   :  { %647 = vmatpush3.bf16.msra.mxu0 %v726_v26 }
  0x1d   :  { %669 = vmatpush3.bf16.msra.mxu1 %v727_v27  ;;  %648 = vmatprep.subr.bf16.mxu0 %v728_v28 }
  0x1e   :  { %670 = vmatprep.subr.bf16.mxu1 %v729_v29 }
  0x20   :  { %649 = vmatpush3.bf16.msra.mxu0 %v730_v30 }
  0x21   :  { %671 = vmatpush3.bf16.msra.mxu1 %v731_v31  ;;  %678 = vmatprep.subr.bf16.mxu0 %v738_v36 }
  0x23   :  { %465 = vmatmul.mubr.bf16.vlgmr.msra.gmra.mrb[0].mxu0 %v732_v32 }
  0x24   :  { %506 = vmatmul.mubr.bf16.vlgmr.msra.gmra.mrb[0].mxu1 %v735_v34  ;;  %679 = vmatpush3.bf16.msra.mxu0 %v739_v37 }
  0x25   :  { %680 = vmatprep.subr.bf16.mxu0 %v740_v38  ;;  %546 = vmatprep.mubr.bf16.mxu0 %v756_v47 }
  0x28   :  { %681 = vmatpush3.bf16.msra.mxu0 %v741_v39 }
  0x29   :  { %682 = vmatprep.subr.bf16.mxu0 %v742_v40 }
  0x2c   :  { %683 = vmatpush3.bf16.msra.mxu0 %v743_v41 }
  0x2d   :  { %684 = vmatprep.subr.bf16.mxu0 %v744_v42 }
  0x30   :  { %685 = vmatpush3.bf16.msra.mxu0 %v745_v43 }
  0x31   :  { %686 = vmatprep.subr.bf16.mxu0 %v746_v44 }
  0x34   :  { %687 = vmatpush3.bf16.msra.mxu0 %v747_v45 }
  0x35   :  { %688 = vmatprep.subr.bf16.mxu0 %v748_v46 }
  0x38   :  { %689 = vmatpush3.bf16.msra.mxu0 %v749_v48 }
  0x39   :  { %690 = vmatprep.subr.bf16.mxu0 %v750_v49 }
  0x3c   :  { %691 = vmatpush3.bf16.msra.mxu0 %v751_v50 }
  0x3d   :  { %692 = vmatprep.subr.bf16.mxu0 %v752_v51 }
  0x40   :  { %693 = vmatpush3.bf16.msra.mxu0 %v753_v52 }
  0x43   :  { %547 = vmatmul.mubr.bf16.vlgmr.msra.gmra.mrb[4].mxu0 %v754_v53 }
  0xf6   :  { %v650_v54 = vpop.f32.mrb[0].mxu0 }
  0xf7   :  { %v672_v55 = vpop.f32.mrb[0].mxu1  ;;  %v651_v56 = vpop.f32.mrb[1].mxu0 }
  0xf8   :  { %v652_v57 = vadd.f32 %v651_v56, %v650_v54  ;;  %v673_v58 = vpop.f32.mrb[1].mxu1  ;;  %v653_v59 = vpop.f32.mrb[2].mxu0 }
  0xf9   :  { %v674_v60 = vadd.f32 %v673_v58, %v672_v55  ;;  %v675_v61 = vpop.f32.mrb[2].mxu1  ;;  %v654_v62 = vpop.f32.mrb[3].mxu0 }
  0xfa   :  { %v655_v63 = vadd.f32 %v654_v62, %v653_v59  ;;  %v676_v0 = vpop.f32.mrb[3].mxu1 }
  0xfb   :  { %v508_v1 = vadd.f32 %v674_v60, %v652_v57  ;;  %v677_v2 = vadd.f32 %v676_v0, %v675_v61 }
  0xfd   :  { %v511_v3 = vadd.f32 %v677_v2, %v655_v63 }
 0x116   :  { %v694_v4 = vpop.f32.mrb[4].mxu0 }
 0x117   :  { %v695_v5 = vpop.f32.mrb[5].mxu0 }
 0x118   :  { %v696_v6 = vadd.f32 %v695_v5, %v694_v4  ;;  %v697_v7 = vpop.f32.mrb[6].mxu0 }
 0x119   :  { %v698_v8 = vpop.f32.mrb[7].mxu0 }
 0x11a   :  { %v549_v9 = vadd.f32 %v696_v6, %v508_v1  ;;  %v699_v10 = vadd.f32 %v698_v8, %v697_v7 }
 0x11c   :  { %v552_v11 = vadd.f32 %v699_v10, %v511_v3  ;;  %v555_v12 = vmax.f32 %v549_v9, 0.0 }
 0x11e   :  { %v556_v13 = vmax.f32 %v552_v11, 0.0 }
 0x120   :  { %v632_v14 = vpack.c.bf16 %v556_v13, %v555_v12 }
 0x122   :  { %633 = vst [vmem:[%s939_s2] sm:$0xff] %v632_v14  }

// kernel: ae2d_forward.14
= control target key start
LH: loop header
LB: loop body
LE: loop exit
PB: predicated region body
PF: predicated region fallthrough
CT: control target
= control target key end

     0   :  { %s2066_s1 = inlined_call_operand.vmem [shape: bf16[1536,128], index: 1, kind: input, shape index: {}]   ;;  %s2067_s0 = inlined_call_operand.vmem [shape: bf16[32,1536], index: 0, kind: input, shape index: {}]   ;;  %s2068_s2 = inlined_call_operand.vmem [shape: bf16[32,128], index: 2, kind: output, shape index: {}]  }
   0x1   :  { %v1553_v0 = vld [vmem:[%s2066_s1 + $0x40] sm:$0xff]   ;;  %v1557_v4 = vld [vmem:[%s2066_s1 + $0x48] sm:$0xff]   ;;  %v1561_v8 = vld [vmem:[%s2066_s1 + $0x50] sm:$0xff]  }
   0x2   :  { %v1554_v1 = vld [vmem:[%s2066_s1 + $0xc0] sm:$0xff]   ;;  %1385 = vmatprep.subr.bf16.mxu0 %v1553_v0  ;;  %v1558_v5 = vld [vmem:[%s2066_s1 + $0xc8] sm:$0xff]   ;;  %v1562_v9 = vld [vmem:[%s2066_s1 + $0xd0] sm:$0xff]  }
   0x3   :  { %v1555_v2 = vld [vmem:[%s2066_s1] sm:$0xff]   ;;  %1413 = vmatprep.subr.bf16.mxu1 %v1554_v1  ;;  %v1559_v6 = vld [vmem:[%s2066_s1 + $0x8] sm:$0xff]   ;;  %v1563_v10 = vld [vmem:[%s2066_s1 + $0x10] sm:$0xff]  }
   0x4   :  { %v1556_v3 = vld [vmem:[%s2066_s1 + $0x80] sm:$0xff]   ;;  %1386 = vmatpush3.bf16.msra.mxu0 %v1555_v2  ;;  %v1560_v7 = vld [vmem:[%s2066_s1 + $0x88] sm:$0xff]   ;;  %v1564_v11 = vld [vmem:[%s2066_s1 + $0x90] sm:$0xff]  }
   0x5   :  { %1414 = vmatpush3.bf16.msra.mxu1 %v1556_v3  ;;  %1387 = vmatprep.subr.bf16.mxu0 %v1557_v4  ;;  %v1565_v12 = vld [vmem:[%s2066_s1 + $0x58] sm:$0xff]   ;;  %v1569_v16 = vld [vmem:[%s2066_s1 + $0x60] sm:$0xff]   ;;  %v1573_v20 = vld [vmem:[%s2066_s1 + $0x68] sm:$0xff]  }
   0x6   :  { %1415 = vmatprep.subr.bf16.mxu1 %v1558_v5  ;;  %v1566_v13 = vld [vmem:[%s2066_s1 + $0xd8] sm:$0xff]   ;;  %v1570_v17 = vld [vmem:[%s2066_s1 + $0xe0] sm:$0xff]   ;;  %v1574_v21 = vld [vmem:[%s2066_s1 + $0xe8] sm:$0xff]  }
   0x7   :  { %v1567_v14 = vld [vmem:[%s2066_s1 + $0x18] sm:$0xff]   ;;  %v1571_v18 = vld [vmem:[%s2066_s1 + $0x20] sm:$0xff]   ;;  %v1575_v22 = vld [vmem:[%s2066_s1 + $0x28] sm:$0xff]  }
   0x8   :  { %1388 = vmatpush3.bf16.msra.mxu0 %v1559_v6  ;;  %v1568_v15 = vld [vmem:[%s2066_s1 + $0x98] sm:$0xff]   ;;  %v1572_v19 = vld [vmem:[%s2066_s1 + $0xa0] sm:$0xff]   ;;  %v1576_v23 = vld [vmem:[%s2066_s1 + $0xa8] sm:$0xff]  }
   0x9   :  { %1416 = vmatpush3.bf16.msra.mxu1 %v1560_v7  ;;  %1389 = vmatprep.subr.bf16.mxu0 %v1561_v8  ;;  %v1577_v24 = vld [vmem:[%s2066_s1 + $0x70] sm:$0xff]   ;;  %v1581_v28 = vld [vmem:[%s2066_s1 + $0x78] sm:$0xff]   ;;  %v1591_v36 = vld [vmem:[%s2066_s1 + $0x140] sm:$0xff]  }
   0xa   :  { %1417 = vmatprep.subr.bf16.mxu1 %v1562_v9  ;;  %v1578_v25 = vld [vmem:[%s2066_s1 + $0xf0] sm:$0xff]   ;;  %v1582_v29 = vld [vmem:[%s2066_s1 + $0xf8] sm:$0xff]   ;;  %v1592_v37 = vld [vmem:[%s2066_s1 + $0x1c0] sm:$0xff]  }
   0xb   :  { %v1579_v26 = vld [vmem:[%s2066_s1 + $0x30] sm:$0xff]   ;;  %v1583_v30 = vld [vmem:[%s2066_s1 + $0x38] sm:$0xff]   ;;  %v1593_v38 = vld [vmem:[%s2066_s1 + $0x100] sm:$0xff]  }
   0xc   :  { %1390 = vmatpush3.bf16.msra.mxu0 %v1563_v10  ;;  %v1580_v27 = vld [vmem:[%s2066_s1 + $0xb0] sm:$0xff]   ;;  %v1584_v31 = vld [vmem:[%s2066_s1 + $0xb8] sm:$0xff]   ;;  %v1594_v39 = vld [vmem:[%s2066_s1 + $0x180] sm:$0xff]  }
   0xd   :  { %1418 = vmatpush3.bf16.msra.mxu1 %v1564_v11  ;;  %1391 = vmatprep.subr.bf16.mxu0 %v1565_v12  ;;  %v1585_v32 = vld [vmem:[%s2067_s0] ss:$48 sps:$4 sm:$0xff]   ;;  %v1587_v33 = vld [vmem:[%s2067_s0 + $0x4] ss:$48 sps:$4 sm:$0xff]   ;;  %v1588_v34 = vld [vmem:[%s2067_s0 + $0x8] ss:$48 sps:$4 sm:$0xff]  }
   0xe   :  { %1419 = vmatprep.subr.bf16.mxu1 %v1566_v13  ;;  %v1590_v35 = vld [vmem:[%s2067_s0 + $0xc] ss:$48 sps:$4 sm:$0xff]   ;;  %956 = vmatprep.mubr.bf16.mxu0 %v1587_v33  ;;  %v1599_v44 = vld [vmem:[%s2066_s1 + $0x150] sm:$0xff]   ;;  %v1607_v52 = vld [vmem:[%s2066_s1 + $0x160] sm:$0xff]  }
   0xf   :  { %1005 = vmatprep.mubr.bf16.mxu1 %v1590_v35  ;;  %v1595_v40 = vld [vmem:[%s2066_s1 + $0x148] sm:$0xff]   ;;  %v1600_v45 = vld [vmem:[%s2066_s1 + $0x1d0] sm:$0xff]   ;;  %v1603_v48 = vld [vmem:[%s2066_s1 + $0x158] sm:$0xff]  }
  0x10   :  { %1392 = vmatpush3.bf16.msra.mxu0 %v1567_v14  ;;  %v1596_v41 = vld [vmem:[%s2066_s1 + $0x1c8] sm:$0xff]   ;;  %v1601_v46 = vld [vmem:[%s2066_s1 + $0x110] sm:$0xff]   ;;  %v1604_v49 = vld [vmem:[%s2066_s1 + $0x1d8] sm:$0xff]  }
  0x11   :  { %1420 = vmatpush3.bf16.msra.mxu1 %v1568_v15  ;;  %1393 = vmatprep.subr.bf16.mxu0 %v1569_v16  ;;  %v1597_v42 = vld [vmem:[%s2066_s1 + $0x108] sm:$0xff]   ;;  %v1602_v47 = vld [vmem:[%s2066_s1 + $0x190] sm:$0xff]   ;;  %v1605_v50 = vld [vmem:[%s2066_s1 + $0x118] sm:$0xff]  }
  0x12   :  { %1421 = vmatprep.subr.bf16.mxu1 %v1570_v17  ;;  %v1598_v43 = vld [vmem:[%s2066_s1 + $0x188] sm:$0xff]   ;;  %v1606_v51 = vld [vmem:[%s2066_s1 + $0x198] sm:$0xff]   ;;  %v1608_v53 = vld [vmem:[%s2066_s1 + $0x1e0] sm:$0xff]  }
  0x13   :  { %v1609_v54 = vld [vmem:[%s2066_s1 + $0x120] sm:$0xff]   ;;  %v1611_v56 = vld [vmem:[%s2066_s1 + $0x168] sm:$0xff]   ;;  %v1621_v0 = vld [vmem:[%s2066_s1 + $0x170] sm:$0xff]  }
  0x14   :  { %1394 = vmatpush3.bf16.msra.mxu0 %v1571_v18  ;;  %v1610_v55 = vld [vmem:[%s2066_s1 + $0x1a0] sm:$0xff]   ;;  %v1612_v57 = vld [vmem:[%s2066_s1 + $0x1e8] sm:$0xff]   ;;  %v1622_v1 = vld [vmem:[%s2066_s1 + $0x1f0] sm:$0xff]  }
  0x15   :  { %1422 = vmatpush3.bf16.msra.mxu1 %v1572_v19  ;;  %1395 = vmatprep.subr.bf16.mxu0 %v1573_v20  ;;  %v1613_v58 = vld [vmem:[%s2067_s0 + $0x64] ss:$48 sps:$4 sm:$0xff]   ;;  %v1615_v59 = vld [vmem:[%s2067_s0 + $0x6c] ss:$48 sps:$4 sm:$0xff]   ;;  %v1619_v62 = vld [vmem:[%s2067_s0 + $0x60] ss:$48 sps:$4 sm:$0xff]  }
  0x16   :  { %1423 = vmatprep.subr.bf16.mxu1 %v1574_v21  ;;  %v1617_v60 = vld [vmem:[%s2066_s1 + $0x128] sm:$0xff]   ;;  %v1623_v2 = vld [vmem:[%s2066_s1 + $0x130] sm:$0xff]   ;;  %v1625_v4 = vld [vmem:[%s2066_s1 + $0x178] sm:$0xff]  }
  0x17   :  { %v1618_v61 = vld [vmem:[%s2066_s1 + $0x1a8] sm:$0xff]   ;;  %v1624_v3 = vld [vmem:[%s2066_s1 + $0x1b0] sm:$0xff]   ;;  %v1626_v5 = vld [vmem:[%s2066_s1 + $0x1f8] sm:$0xff]  }
  0x18   :  { %1396 = vmatpush3.bf16.msra.mxu0 %v1575_v22  ;;  %v1620_v63 = vld [vmem:[%s2067_s0 + $0x68] ss:$48 sps:$4 sm:$0xff]   ;;  %v1629_v8 = vld [vmem:[%s2067_s0 + $0x10] ss:$48 sps:$4 sm:$0xff]   ;;  %v1631_v9 = vld [vmem:[%s2067_s0 + $0x14] ss:$48 sps:$4 sm:$0xff]  }
  0x19   :  { %1424 = vmatpush3.bf16.msra.mxu1 %v1576_v23  ;;  %1397 = vmatprep.subr.bf16.mxu0 %v1577_v24  ;;  %v1627_v6 = vld [vmem:[%s2066_s1 + $0x138] sm:$0xff]   ;;  %v1635_v12 = vld [vmem:[%s2066_s1 + $0x240] sm:$0xff]   ;;  %v1639_v16 = vld [vmem:[%s2066_s1 + $0x248] sm:$0xff]  }
  0x1a   :  { %1425 = vmatprep.subr.bf16.mxu1 %v1578_v25  ;;  %v1628_v7 = vld [vmem:[%s2066_s1 + $0x1b8] sm:$0xff]   ;;  %v1636_v13 = vld [vmem:[%s2066_s1 + $0x2c0] sm:$0xff]   ;;  %v1640_v17 = vld [vmem:[%s2066_s1 + $0x2c8] sm:$0xff]  }
  0x1b   :  { %v1632_v10 = vld [vmem:[%s2067_s0 + $0x18] ss:$48 sps:$4 sm:$0xff]   ;;  %v1634_v11 = vld [vmem:[%s2067_s0 + $0x1c] ss:$48 sps:$4 sm:$0xff]   ;;  %v1637_v14 = vld [vmem:[%s2066_s1 + $0x200] sm:$0xff]  }
  0x1c   :  { %1398 = vmatpush3.bf16.msra.mxu0 %v1579_v26  ;;  %v1638_v15 = vld [vmem:[%s2066_s1 + $0x280] sm:$0xff]   ;;  %v1641_v18 = vld [vmem:[%s2066_s1 + $0x208] sm:$0xff]   ;;  %v1646_v22 = vld [vmem:[%s2066_s1 + $0x250] sm:$0xff]  }
  0x1d   :  { %1426 = vmatpush3.bf16.msra.mxu1 %v1580_v27  ;;  %1399 = vmatprep.subr.bf16.mxu0 %v1581_v28  ;;  %v1642_v19 = vld [vmem:[%s2066_s1 + $0x288] sm:$0xff]   ;;  %v1643_v20 = vld [vmem:[%s2067_s0 + $0x74] ss:$48 sps:$4 sm:$0xff]   ;;  %v1645_v21 = vld [vmem:[%s2067_s0 + $0x70] ss:$48 sps:$4 sm:$0xff]  }
  0x1e   :  { %1427 = vmatprep.subr.bf16.mxu1 %v1582_v29  ;;  %v1647_v23 = vld [vmem:[%s2066_s1 + $0x2d0] sm:$0xff]   ;;  %v1648_v24 = vld [vmem:[%s2067_s0 + $0x7c] ss:$48 sps:$4 sm:$0xff]   ;;  %v1652_v27 = vld [vmem:[%s2067_s0 + $0x78] ss:$48 sps:$4 sm:$0xff]  }
  0x1f   :  { %v1650_v25 = vld [vmem:[%s2066_s1 + $0x210] sm:$0xff]   ;;  %v1653_v28 = vld [vmem:[%s2066_s1 + $0x258] sm:$0xff]   ;;  %v1658_v33 = vld [vmem:[%s2066_s1 + $0x2e0] sm:$0xff]  }
  0x20   :  { %1400 = vmatpush3.bf16.msra.mxu0 %v1583_v30  ;;  %v1651_v26 = vld [vmem:[%s2066_s1 + $0x290] sm:$0xff]   ;;  %v1654_v29 = vld [vmem:[%s2066_s1 + $0x2d8] sm:$0xff]   ;;  %v1660_v35 = vld [vmem:[%s2066_s1 + $0x2a0] sm:$0xff]  }
  0x21   :  { %1428 = vmatpush3.bf16.msra.mxu1 %v1584_v31  ;;  %1441 = vmatprep.subr.bf16.mxu0 %v1591_v36  ;;  %v1655_v30 = vld [vmem:[%s2066_s1 + $0x218] sm:$0xff]   ;;  %v1661_v36 = vld [vmem:[%s2066_s1 + $0x268] sm:$0xff]  }
  0x22   :  { %1469 = vmatprep.subr.bf16.mxu1 %v1592_v37  ;;  %v1656_v31 = vld [vmem:[%s2066_s1 + $0x298] sm:$0xff]   ;;  %v1662_v37 = vld [vmem:[%s2066_s1 + $0x2e8] sm:$0xff]  }
  0x23   :  { %957 = vmatmul.mubr.bf16.vlgmr.msra.gmra.mrb[0].mxu0 %v1585_v32  ;;  %v1657_v32 = vld [vmem:[%s2066_s1 + $0x260] sm:$0xff]  }
  0x24   :  { %1006 = vmatmul.mubr.bf16.vlgmr.msra.gmra.mrb[0].mxu1 %v1588_v34  ;;  %1442 = vmatpush3.bf16.msra.mxu0 %v1593_v38  ;;  %v1659_v34 = vld [vmem:[%s2066_s1 + $0x220] sm:$0xff]   ;;  %v1663_v38 = vld [vmem:[%s2066_s1 + $0x228] sm:$0xff]  }
  0x25   :  { %1470 = vmatpush3.bf16.msra.mxu1 %v1594_v39  ;;  %1443 = vmatprep.subr.bf16.mxu0 %v1595_v40  ;;  %v1664_v39 = vld [vmem:[%s2066_s1 + $0x2a8] sm:$0xff]   ;;  %v1665_v40 = vld [vmem:[%s2066_s1 + $0x270] sm:$0xff]  }
  0x26   :  { %1471 = vmatprep.subr.bf16.mxu1 %v1596_v41  ;;  %964 = vmatprep.mubr.bf16.mxu0 %v1613_v58  ;;  %v1666_v41 = vld [vmem:[%s2066_s1 + $0x2f0] sm:$0xff]  }
  0x27   :  { %1013 = vmatprep.mubr.bf16.mxu1 %v1615_v59 }
  0x28   :  { %1444 = vmatpush3.bf16.msra.mxu0 %v1597_v42  ;;  %v1667_v42 = vld [vmem:[%s2066_s1 + $0x230] sm:$0xff]  }
  0x29   :  { %1472 = vmatpush3.bf16.msra.mxu1 %v1598_v43  ;;  %1445 = vmatprep.subr.bf16.mxu0 %v1599_v44  ;;  %v1668_v43 = vld [vmem:[%s2066_s1 + $0x2b0] sm:$0xff]   ;;  %v1669_v44 = vld [vmem:[%s2066_s1 + $0x278] sm:$0xff]  }
  0x2a   :  { %1473 = vmatprep.subr.bf16.mxu1 %v1600_v45  ;;  %v1670_v45 = vld [vmem:[%s2066_s1 + $0x2f8] sm:$0xff]  }
  0x2b   :  { %965 = vmatmul.mubr.bf16.gmra.mrb[4].mxu0 %v1619_v62 }
  0x2c   :  { %1446 = vmatpush3.bf16.msra.mxu0 %v1601_v46  ;;  %1014 = vmatmul.mubr.bf16.gmra.mrb[4].mxu1 %v1620_v63  ;;  %v1671_v46 = vld [vmem:[%s2066_s1 + $0x238] sm:$0xff]  }
  0x2d   :  { %1474 = vmatpush3.bf16.msra.mxu1 %v1602_v47  ;;  %1447 = vmatprep.subr.bf16.mxu0 %v1603_v48  ;;  %v1672_v47 = vld [vmem:[%s2066_s1 + $0x2b8] sm:$0xff]   ;;  %v1673_v48 = vld [vmem:[%s2067_s0 + $0x20] ss:$48 sps:$4 sm:$0xff]  }
  0x2e   :  { %1475 = vmatprep.subr.bf16.mxu1 %v1604_v49  ;;  %1054 = vmatprep.mubr.bf16.mxu0 %v1631_v9  ;;  %v1675_v49 = vld [vmem:[%s2067_s0 + $0x24] ss:$48 sps:$4 sm:$0xff]  }
  0x2f   :  { %1103 = vmatprep.mubr.bf16.mxu1 %v1634_v11 }
  0x30   :  { %1448 = vmatpush3.bf16.msra.mxu0 %v1605_v50  ;;  %v1676_v50 = vld [vmem:[%s2067_s0 + $0x28] ss:$48 sps:$4 sm:$0xff]  }
  0x31   :  { %1476 = vmatpush3.bf16.msra.mxu1 %v1606_v51  ;;  %1449 = vmatprep.subr.bf16.mxu0 %v1607_v52  ;;  %v1678_v51 = vld [vmem:[%s2067_s0 + $0x2c] ss:$48 sps:$4 sm:$0xff]   ;;  %v1679_v52 = vld [vmem:[%s2067_s0 + $0x84] ss:$48 sps:$4 sm:$0xff]  }
  0x32   :  { %1477 = vmatprep.subr.bf16.mxu1 %v1608_v53  ;;  %v1681_v53 = vld [vmem:[%s2067_s0 + $0x8c] ss:$48 sps:$4 sm:$0xff]  }
  0x34   :  { %1450 = vmatpush3.bf16.msra.mxu0 %v1609_v54  ;;  %v1683_v54 = vld [vmem:[%s2067_s0 + $0x80] ss:$48 sps:$4 sm:$0xff]  }
  0x35   :  { %1478 = vmatpush3.bf16.msra.mxu1 %v1610_v55  ;;  %1451 = vmatprep.subr.bf16.mxu0 %v1611_v56  ;;  %v1684_v55 = vld [vmem:[%s2067_s0 + $0x88] ss:$48 sps:$4 sm:$0xff]  }
  0x36   :  { %1479 = vmatprep.subr.bf16.mxu1 %v1612_v57 }
  0x38   :  { %1452 = vmatpush3.bf16.msra.mxu0 %v1617_v60 }
  0x39   :  { %1480 = vmatpush3.bf16.msra.mxu1 %v1618_v61  ;;  %1453 = vmatprep.subr.bf16.mxu0 %v1621_v0 }
  0x3a   :  { %1481 = vmatprep.subr.bf16.mxu1 %v1622_v1 }
  0x3c   :  { %1454 = vmatpush3.bf16.msra.mxu0 %v1623_v2 }
  0x3d   :  { %1482 = vmatpush3.bf16.msra.mxu1 %v1624_v3  ;;  %1455 = vmatprep.subr.bf16.mxu0 %v1625_v4 }
  0x3e   :  { %1483 = vmatprep.subr.bf16.mxu1 %v1626_v5 }
  0x40   :  { %1456 = vmatpush3.bf16.msra.mxu0 %v1627_v6 }
  0x41   :  { %1484 = vmatpush3.bf16.msra.mxu1 %v1628_v7  ;;  %1497 = vmatprep.subr.bf16.mxu0 %v1635_v12 }
  0x42   :  { %1525 = vmatprep.subr.bf16.mxu1 %v1636_v13 }
  0x43   :  { %1055 = vmatmul.mubr.bf16.vlgmr.msra.gmra.mrb[8].mxu0 %v1629_v8 }
  0x44   :  { %1104 = vmatmul.mubr.bf16.vlgmr.msra.gmra.mrb[8].mxu1 %v1632_v10  ;;  %1498 = vmatpush3.bf16.msra.mxu0 %v1637_v14 }
  0x45   :  { %1526 = vmatpush3.bf16.msra.mxu1 %v1638_v15  ;;  %1499 = vmatprep.subr.bf16.mxu0 %v1639_v16 }
  0x46   :  { %1527 = vmatprep.subr.bf16.mxu1 %v1640_v17  ;;  %1062 = vmatprep.mubr.bf16.mxu0 %v1643_v20 }
  0x47   :  { %1111 = vmatprep.mubr.bf16.mxu1 %v1648_v24 }
  0x48   :  { %1500 = vmatpush3.bf16.msra.mxu0 %v1641_v18 }
  0x49   :  { %1528 = vmatpush3.bf16.msra.mxu1 %v1642_v19  ;;  %1501 = vmatprep.subr.bf16.mxu0 %v1646_v22 }
  0x4a   :  { %1529 = vmatprep.subr.bf16.mxu1 %v1647_v23 }
  0x4b   :  { %1063 = vmatmul.mubr.bf16.gmra.mrb[12].mxu0 %v1645_v21 }
  0x4c   :  { %1502 = vmatpush3.bf16.msra.mxu0 %v1650_v25  ;;  %1112 = vmatmul.mubr.bf16.gmra.mrb[12].mxu1 %v1652_v27 }
  0x4d   :  { %1530 = vmatpush3.bf16.msra.mxu1 %v1651_v26  ;;  %1503 = vmatprep.subr.bf16.mxu0 %v1653_v28 }
  0x4e   :  { %1531 = vmatprep.subr.bf16.mxu1 %v1654_v29  ;;  %1152 = vmatprep.mubr.bf16.mxu0 %v1675_v49 }
  0x4f   :  { %1201 = vmatprep.mubr.bf16.mxu1 %v1678_v51 }
  0x50   :  { %1504 = vmatpush3.bf16.msra.mxu0 %v1655_v30 }
  0x51   :  { %1532 = vmatpush3.bf16.msra.mxu1 %v1656_v31  ;;  %1505 = vmatprep.subr.bf16.mxu0 %v1657_v32 }
  0x52   :  { %1533 = vmatprep.subr.bf16.mxu1 %v1658_v33 }
  0x54   :  { %1506 = vmatpush3.bf16.msra.mxu0 %v1659_v34 }
  0x55   :  { %1534 = vmatpush3.bf16.msra.mxu1 %v1660_v35  ;;  %1507 = vmatprep.subr.bf16.mxu0 %v1661_v36 }
  0x56   :  { %1535 = vmatprep.subr.bf16.mxu1 %v1662_v37 }
  0x58   :  { %1508 = vmatpush3.bf16.msra.mxu0 %v1663_v38 }
  0x59   :  { %1536 = vmatpush3.bf16.msra.mxu1 %v1664_v39  ;;  %1509 = vmatprep.subr.bf16.mxu0 %v1665_v40 }
  0x5a   :  { %1537 = vmatprep.subr.bf16.mxu1 %v1666_v41 }
  0x5c   :  { %1510 = vmatpush3.bf16.msra.mxu0 %v1667_v42 }
  0x5d   :  { %1538 = vmatpush3.bf16.msra.mxu1 %v1668_v43  ;;  %1511 = vmatprep.subr.bf16.mxu0 %v1669_v44 }
  0x5e   :  { %1539 = vmatprep.subr.bf16.mxu1 %v1670_v45 }
  0x60   :  { %1512 = vmatpush3.bf16.msra.mxu0 %v1671_v46 }
  0x61   :  { %1540 = vmatpush3.bf16.msra.mxu1 %v1672_v47 }
  0x63   :  { %1153 = vmatmul.mubr.bf16.vlgmr.msra.gmra.mrb[16].mxu0 %v1673_v48 }
  0x64   :  { %1202 = vmatmul.mubr.bf16.vlgmr.msra.gmra.mrb[16].mxu1 %v1676_v50  ;;  %1160 = vmatprep.mubr.bf16.mxu0 %v1679_v52 }
  0x65   :  { %1209 = vmatprep.mubr.bf16.mxu1 %v1681_v53 }
  0x6b   :  { %1161 = vmatmul.mubr.bf16.gmra.mrb[20].mxu0 %v1683_v54 }
  0x6c   :  { %1210 = vmatmul.mubr.bf16.gmra.mrb[20].mxu1 %v1684_v55 }
  0xf6   :  { %v1401_v56 = vpop.f32.mrb[0].mxu0 }
  0xf7   :  { %v1429_v57 = vpop.f32.mrb[0].mxu1  ;;  %v1402_v58 = vpop.f32.mrb[1].mxu0 }
  0xf8   :  { %v1403_v59 = vadd.f32 %v1402_v58, %v1401_v56  ;;  %v1430_v60 = vpop.f32.mrb[1].mxu1  ;;  %v1404_v61 = vpop.f32.mrb[2].mxu0 }
  0xf9   :  { %v1431_v62 = vadd.f32 %v1430_v60, %v1429_v57  ;;  %v1432_v63 = vpop.f32.mrb[2].mxu1  ;;  %v1405_v0 = vpop.f32.mrb[3].mxu0 }
  0xfa   :  { %v1406_v1 = vadd.f32 %v1405_v0, %v1404_v61  ;;  %v1433_v2 = vpop.f32.mrb[3].mxu1 }
  0xfb   :  { %v1008_v3 = vadd.f32 %v1431_v62, %v1403_v59  ;;  %v1434_v4 = vadd.f32 %v1433_v2, %v1432_v63 }
  0xfd   :  { %v1011_v5 = vadd.f32 %v1434_v4, %v1406_v1 }
  0xfe   :  { %v1407_v6 = vpop.f32.mrb[4].mxu0 }
  0xff   :  { %v1435_v7 = vpop.f32.mrb[4].mxu1  ;;  %v1408_v8 = vpop.f32.mrb[5].mxu0 }
 0x100   :  { %v1409_v9 = vadd.f32 %v1408_v8, %v1407_v6  ;;  %v1436_v10 = vpop.f32.mrb[5].mxu1  ;;  %v1410_v11 = vpop.f32.mrb[6].mxu0 }
 0x101   :  { %v1437_v12 = vadd.f32 %v1436_v10, %v1435_v7  ;;  %v1438_v13 = vpop.f32.mrb[6].mxu1  ;;  %v1411_v14 = vpop.f32.mrb[7].mxu0 }
 0x102   :  { %v1412_v15 = vadd.f32 %v1411_v14, %v1410_v11  ;;  %v1439_v16 = vpop.f32.mrb[7].mxu1 }
 0x103   :  { %v1016_v17 = vadd.f32 %v1437_v12, %v1409_v9  ;;  %v1440_v18 = vadd.f32 %v1439_v16, %v1438_v13 }
 0x105   :  { %v1019_v19 = vadd.f32 %v1440_v18, %v1412_v15 }
 0x116   :  { %v1457_v20 = vpop.f32.mrb[8].mxu0 }
 0x117   :  { %v1485_v21 = vpop.f32.mrb[8].mxu1  ;;  %v1458_v22 = vpop.f32.mrb[9].mxu0 }
 0x118   :  { %v1459_v23 = vadd.f32 %v1458_v22, %v1457_v20  ;;  %v1486_v24 = vpop.f32.mrb[9].mxu1  ;;  %v1460_v25 = vpop.f32.mrb[10].mxu0 }
 0x119   :  { %v1487_v26 = vadd.f32 %v1486_v24, %v1485_v21  ;;  %v1488_v27 = vpop.f32.mrb[10].mxu1  ;;  %v1461_v28 = vpop.f32.mrb[11].mxu0 }
 0x11a   :  { %v1057_v29 = vadd.f32 %v1459_v23, %v1008_v3  ;;  %v1462_v30 = vadd.f32 %v1461_v28, %v1460_v25  ;;  %v1489_v31 = vpop.f32.mrb[11].mxu1 }
 0x11b   :  { %v1490_v32 = vadd.f32 %v1489_v31, %v1488_v27 }
 0x11c   :  { %v1106_v33 = vadd.f32 %v1487_v26, %v1057_v29  ;;  %v1060_v34 = vadd.f32 %v1462_v30, %v1011_v5 }
 0x11e   :  { %v1109_v35 = vadd.f32 %v1490_v32, %v1060_v34  ;;  %v1463_v36 = vpop.f32.mrb[12].mxu0 }
 0x11f   :  { %v1464_v37 = vpop.f32.mrb[13].mxu0  ;;  %v1491_v43 = vpop.f32.mrb[12].mxu1 }
 0x120   :  { %v1465_v38 = vadd.f32 %v1464_v37, %v1463_v36  ;;  %v1466_v39 = vpop.f32.mrb[14].mxu0  ;;  %v1492_v45 = vpop.f32.mrb[13].mxu1 }
 0x121   :  { %v1467_v40 = vpop.f32.mrb[15].mxu0  ;;  %v1493_v46 = vadd.f32 %v1492_v45, %v1491_v43  ;;  %v1494_v47 = vpop.f32.mrb[14].mxu1 }
 0x122   :  { %v1065_v41 = vadd.f32 %v1465_v38, %v1016_v17  ;;  %v1468_v42 = vadd.f32 %v1467_v40, %v1466_v39  ;;  %v1495_v48 = vpop.f32.mrb[15].mxu1 }
 0x123   :  { %v1496_v50 = vadd.f32 %v1495_v48, %v1494_v47 }
 0x124   :  { %v1068_v44 = vadd.f32 %v1468_v42, %v1019_v19  ;;  %v1114_v49 = vadd.f32 %v1493_v46, %v1065_v41 }
 0x126   :  { %v1117_v51 = vadd.f32 %v1496_v50, %v1068_v44 }
 0x136   :  { %v1513_v52 = vpop.f32.mrb[16].mxu0 }
 0x137   :  { %v1514_v53 = vpop.f32.mrb[17].mxu0  ;;  %v1541_v54 = vpop.f32.mrb[16].mxu1 }
 0x138   :  { %v1515_v55 = vadd.f32 %v1514_v53, %v1513_v52  ;;  %v1516_v56 = vpop.f32.mrb[18].mxu0  ;;  %v1542_v57 = vpop.f32.mrb[17].mxu1 }
 0x139   :  { %v1517_v58 = vpop.f32.mrb[19].mxu0  ;;  %v1543_v60 = vadd.f32 %v1542_v57, %v1541_v54  ;;  %v1544_v61 = vpop.f32.mrb[18].mxu1 }
 0x13a   :  { %v1155_v59 = vadd.f32 %v1515_v55, %v1106_v33  ;;  %v1518_v62 = vadd.f32 %v1517_v58, %v1516_v56  ;;  %v1545_v63 = vpop.f32.mrb[19].mxu1 }
 0x13b   :  { %v1546_v2 = vadd.f32 %v1545_v63, %v1544_v61 }
 0x13c   :  { %v1204_v0 = vadd.f32 %v1543_v60, %v1155_v59  ;;  %v1158_v1 = vadd.f32 %v1518_v62, %v1109_v35 }
 0x13e   :  { %v1207_v3 = vadd.f32 %v1546_v2, %v1158_v1  ;;  %v1519_v4 = vpop.f32.mrb[20].mxu0  ;;  %v1218_v6 = vmax.f32 %v1204_v0, 0.0 }
 0x13f   :  { %v1520_v5 = vpop.f32.mrb[21].mxu0  ;;  %v1547_v8 = vpop.f32.mrb[20].mxu1 }
 0x140   :  { %v1219_v7 = vmax.f32 %v1207_v3, 0.0  ;;  %v1521_v9 = vadd.f32 %v1520_v5, %v1519_v4  ;;  %v1522_v10 = vpop.f32.mrb[22].mxu0  ;;  %v1548_v11 = vpop.f32.mrb[21].mxu1 }
 0x141   :  { %v1523_v12 = vpop.f32.mrb[23].mxu0  ;;  %v1549_v15 = vadd.f32 %v1548_v11, %v1547_v8  ;;  %v1550_v16 = vpop.f32.mrb[22].mxu1 }
 0x142   :  { %v1377_v13 = vpack.c.bf16 %v1219_v7, %v1218_v6  ;;  %v1163_v14 = vadd.f32 %v1521_v9, %v1114_v49  ;;  %v1524_v17 = vadd.f32 %v1523_v12, %v1522_v10  ;;  %v1551_v18 = vpop.f32.mrb[23].mxu1 }
 0x143   :  { %v1552_v21 = vadd.f32 %v1551_v18, %v1550_v16 }
 0x144   :  { %1378 = vst [vmem:[%s2068_s2] sm:$0xff] %v1377_v13   ;;  %v1212_v19 = vadd.f32 %v1549_v15, %v1163_v14  ;;  %v1166_v20 = vadd.f32 %v1524_v17, %v1117_v51 }
 0x146   :  { %v1215_v22 = vadd.f32 %v1552_v21, %v1166_v20  ;;  %v1220_v23 = vmax.f32 %v1212_v19, 0.0 }
 0x148   :  { %v1221_v24 = vmax.f32 %v1215_v22, 0.0 }
 0x14a   :  { %v1382_v25 = vpack.c.bf16 %v1221_v24, %v1220_v23 }
 0x14c   :  { %1384 = vst [vmem:[%s2068_s2 + $0x8] sm:$0xff] %v1382_v25  }

// kernel: ae2d_forward.15
= control target key start
LH: loop header
LB: loop body
LE: loop exit
PB: predicated region body
PF: predicated region fallthrough
CT: control target
= control target key end

     0   :  { %s7255_s1 = inlined_call_operand.vmem [shape: bf16[2688,128], index: 1, kind: input, shape index: {}]   ;;  %s7256_s0 = inlined_call_operand.vmem [shape: bf16[160,2688], index: 0, kind: input, shape index: {}]   ;;  %s7257_s2 = inlined_call_operand.vmem [shape: bf16[160,128], index: 2, kind: output, shape index: {}]  }
   0x1   :  { %v5310_v0 = vld [vmem:[%s7255_s1 + $0x40] sm:$0xff]   ;;  %v5314_v4 = vld [vmem:[%s7255_s1 + $0x48] sm:$0xff]   ;;  %v5318_v8 = vld [vmem:[%s7255_s1 + $0x50] sm:$0xff]  }
   0x2   :  { %v5311_v1 = vld [vmem:[%s7255_s1 + $0xc0] sm:$0xff]   ;;  %4480 = vmatprep.subr.bf16.mxu0 %v5310_v0  ;;  %v5315_v5 = vld [vmem:[%s7255_s1 + $0xc8] sm:$0xff]   ;;  %v5319_v9 = vld [vmem:[%s7255_s1 + $0xd0] sm:$0xff]  }
   0x3   :  { %v5312_v2 = vld [vmem:[%s7255_s1] sm:$0xff]   ;;  %4556 = vmatprep.subr.bf16.mxu1 %v5311_v1  ;;  %v5316_v6 = vld [vmem:[%s7255_s1 + $0x8] sm:$0xff]   ;;  %v5320_v10 = vld [vmem:[%s7255_s1 + $0x10] sm:$0xff]  }
   0x4   :  { %v5313_v3 = vld [vmem:[%s7255_s1 + $0x80] sm:$0xff]   ;;  %4481 = vmatpush3.bf16.msra.mxu0 %v5312_v2  ;;  %v5317_v7 = vld [vmem:[%s7255_s1 + $0x88] sm:$0xff]   ;;  %v5321_v11 = vld [vmem:[%s7255_s1 + $0x90] sm:$0xff]  }
   0x5   :  { %4557 = vmatpush3.bf16.msra.mxu1 %v5313_v3  ;;  %4482 = vmatprep.subr.bf16.mxu0 %v5314_v4  ;;  %v5322_v12 = vld [vmem:[%s7255_s1 + $0x58] sm:$0xff]   ;;  %v5326_v16 = vld [vmem:[%s7255_s1 + $0x60] sm:$0xff]   ;;  %v5330_v20 = vld [vmem:[%s7255_s1 + $0x68] sm:$0xff]  }
   0x6   :  { %4558 = vmatprep.subr.bf16.mxu1 %v5315_v5  ;;  %v5323_v13 = vld [vmem:[%s7255_s1 + $0xd8] sm:$0xff]   ;;  %v5327_v17 = vld [vmem:[%s7255_s1 + $0xe0] sm:$0xff]   ;;  %v5331_v21 = vld [vmem:[%s7255_s1 + $0xe8] sm:$0xff]  }
   0x7   :  { %v5324_v14 = vld [vmem:[%s7255_s1 + $0x18] sm:$0xff]   ;;  %v5328_v18 = vld [vmem:[%s7255_s1 + $0x20] sm:$0xff]   ;;  %v5332_v22 = vld [vmem:[%s7255_s1 + $0x28] sm:$0xff]  }
   0x8   :  { %4483 = vmatpush3.bf16.msra.mxu0 %v5316_v6  ;;  %v5325_v15 = vld [vmem:[%s7255_s1 + $0x98] sm:$0xff]   ;;  %v5329_v19 = vld [vmem:[%s7255_s1 + $0xa0] sm:$0xff]   ;;  %v5333_v23 = vld [vmem:[%s7255_s1 + $0xa8] sm:$0xff]  }
   0x9   :  { %4559 = vmatpush3.bf16.msra.mxu1 %v5317_v7  ;;  %4484 = vmatprep.subr.bf16.mxu0 %v5318_v8  ;;  %v5334_v24 = vld [vmem:[%s7255_s1 + $0x70] sm:$0xff]   ;;  %v5338_v28 = vld [vmem:[%s7255_s1 + $0x78] sm:$0xff]   ;;  %v5347_v35 = vld [vmem:[%s7256_s0 + $0xc] ss:$84 sps:$4 sm:$0xff]  }
   0xa   :  { %4560 = vmatprep.subr.bf16.mxu1 %v5319_v9  ;;  %v5335_v25 = vld [vmem:[%s7255_s1 + $0xf0] sm:$0xff]   ;;  %v5339_v29 = vld [vmem:[%s7255_s1 + $0xf8] sm:$0xff]   ;;  %v5348_v36 = vld [vmem:[%s7255_s1 + $0x140] sm:$0xff]   ;;  %2781 = vmatprep.mubr.bf16.mxu1 %v5347_v35 }
   0xb   :  { %v5336_v26 = vld [vmem:[%s7255_s1 + $0x30] sm:$0xff]   ;;  %v5340_v30 = vld [vmem:[%s7255_s1 + $0x38] sm:$0xff]   ;;  %v5349_v37 = vld [vmem:[%s7255_s1 + $0x100] sm:$0xff]  }
   0xc   :  { %4485 = vmatpush3.bf16.msra.mxu0 %v5320_v10  ;;  %v5337_v27 = vld [vmem:[%s7255_s1 + $0xb0] sm:$0xff]   ;;  %v5341_v31 = vld [vmem:[%s7255_s1 + $0xb8] sm:$0xff]   ;;  %v5350_v38 = vld [vmem:[%s7256_s0 + $0xac] ss:$84 sps:$4 sm:$0xff]  }
   0xd   :  { %4561 = vmatpush3.bf16.msra.mxu1 %v5321_v11  ;;  %4486 = vmatprep.subr.bf16.mxu0 %v5322_v12  ;;  %v5342_v32 = vld [vmem:[%s7256_s0] ss:$84 sps:$4 sm:$0xff]   ;;  %v5344_v33 = vld [vmem:[%s7256_s0 + $0x4] ss:$84 sps:$4 sm:$0xff]   ;;  %v5345_v34 = vld [vmem:[%s7256_s0 + $0x8] ss:$84 sps:$4 sm:$0xff]  }
   0xe   :  { %4562 = vmatprep.subr.bf16.mxu1 %v5323_v13  ;;  %2668 = vmatprep.mubr.bf16.mxu0 %v5344_v33  ;;  %v5352_v39 = vld [vmem:[%s7256_s0 + $0xb4] ss:$84 sps:$4 sm:$0xff]   ;;  %v5355_v41 = vld [vmem:[%s7256_s0 + $0xb0] ss:$84 sps:$4 sm:$0xff]   ;;  %v5365_v50 = vld [vmem:[%s7256_s0 + $0x158] ss:$84 sps:$4 sm:$0xff]  }
   0xf   :  { %v5354_v40 = vld [vmem:[%s7256_s0 + $0xa8] ss:$84 sps:$4 sm:$0xff]   ;;  %v5356_v42 = vld [vmem:[%s7255_s1 + $0x1c0] sm:$0xff]   ;;  %v5368_v52 = vld [vmem:[%s7255_s1 + $0x150] sm:$0xff]  }
  0x10   :  { %4487 = vmatpush3.bf16.msra.mxu0 %v5324_v14  ;;  %v5357_v43 = vld [vmem:[%s7255_s1 + $0x180] sm:$0xff]   ;;  %v5358_v44 = vld [vmem:[%s7255_s1 + $0x148] sm:$0xff]   ;;  %v5362_v47 = vld [vmem:[%s7256_s0 + $0x15c] ss:$84 sps:$4 sm:$0xff]  }
  0x11   :  { %4563 = vmatpush3.bf16.msra.mxu1 %v5325_v15  ;;  %4488 = vmatprep.subr.bf16.mxu0 %v5326_v16  ;;  %v5359_v45 = vld [vmem:[%s7255_s1 + $0x108] sm:$0xff]   ;;  %v5364_v48 = vld [vmem:[%s7256_s0 + $0x150] ss:$84 sps:$4 sm:$0xff]   ;;  %v5378_v59 = vld [vmem:[%s7255_s1 + $0x158] sm:$0xff]  }
  0x12   :  { %4564 = vmatprep.subr.bf16.mxu1 %v5327_v17  ;;  %v5360_v46 = vld [vmem:[%s7256_s0 + $0x154] ss:$84 sps:$4 sm:$0xff]   ;;  %v5370_v54 = vld [vmem:[%s7256_s0 + $0x1fc] ss:$84 sps:$4 sm:$0xff]   ;;  %v5372_v55 = vld [vmem:[%s7256_s0 + $0x204] ss:$84 sps:$4 sm:$0xff]  }
  0x13   :  { %v5366_v49 = vld [vmem:[%s7255_s1 + $0x1c8] sm:$0xff]   ;;  %v5369_v53 = vld [vmem:[%s7255_s1 + $0x110] sm:$0xff]   ;;  %v5379_v61 = vld [vmem:[%s7256_s0 + $0x2a4] ss:$84 sps:$4 sm:$0xff]  }
  0x14   :  { %4489 = vmatpush3.bf16.msra.mxu0 %v5328_v18  ;;  %v5367_v51 = vld [vmem:[%s7255_s1 + $0x188] sm:$0xff]   ;;  %v5376_v56 = vld [vmem:[%s7255_s1 + $0x1d0] sm:$0xff]   ;;  %v5383_v63 = vld [vmem:[%s7255_s1 + $0x118] sm:$0xff]  }
  0x15   :  { %4565 = vmatpush3.bf16.msra.mxu1 %v5329_v19  ;;  %4490 = vmatprep.subr.bf16.mxu0 %v5330_v20  ;;  %v5374_v57 = vld [vmem:[%s7256_s0 + $0x1f8] ss:$84 sps:$4 sm:$0xff]   ;;  %v5377_v58 = vld [vmem:[%s7255_s1 + $0x190] sm:$0xff]   ;;  %v5385_v2 = vld [vmem:[%s7256_s0 + $0x2a8] ss:$84 sps:$4 sm:$0xff]  }
  0x16   :  { %4566 = vmatprep.subr.bf16.mxu1 %v5331_v21  ;;  %v5375_v60 = vld [vmem:[%s7256_s0 + $0x200] ss:$84 sps:$4 sm:$0xff]   ;;  %v5386_v0 = vld [vmem:[%s7255_s1 + $0x1d8] sm:$0xff]   ;;  %v5393_v11 = vld [vmem:[%s7256_s0 + $0x350] ss:$84 sps:$4 sm:$0xff]  }
  0x17   :  { %v5381_v62 = vld [vmem:[%s7256_s0 + $0x2ac] ss:$84 sps:$4 sm:$0xff]   ;;  %v5391_v4 = vld [vmem:[%s7255_s1 + $0x198] sm:$0xff]   ;;  %v5389_v7 = vld [vmem:[%s7256_s0 + $0x354] ss:$84 sps:$4 sm:$0xff]  }
  0x18   :  { %4491 = vmatpush3.bf16.msra.mxu0 %v5332_v22  ;;  %v5384_v1 = vld [vmem:[%s7256_s0 + $0x2a0] ss:$84 sps:$4 sm:$0xff]   ;;  %v5392_v9 = vld [vmem:[%s7256_s0 + $0x348] ss:$84 sps:$4 sm:$0xff]   ;;  %v5400_v20 = vld [vmem:[%s7256_s0 + $0x3f0] ss:$84 sps:$4 sm:$0xff]  }
  0x19   :  { %4567 = vmatpush3.bf16.msra.mxu1 %v5333_v23  ;;  %4492 = vmatprep.subr.bf16.mxu0 %v5334_v24  ;;  %v5387_v3 = vld [vmem:[%s7256_s0 + $0x34c] ss:$84 sps:$4 sm:$0xff]   ;;  %v5396_v14 = vld [vmem:[%s7256_s0 + $0x3f4] ss:$84 sps:$4 sm:$0xff]   ;;  %v5398_v15 = vld [vmem:[%s7256_s0 + $0x3fc] ss:$84 sps:$4 sm:$0xff]  }
  0x1a   :  { %4568 = vmatprep.subr.bf16.mxu1 %v5335_v25  ;;  %v5394_v5 = vld [vmem:[%s7255_s1 + $0x160] sm:$0xff]   ;;  %v5404_v12 = vld [vmem:[%s7255_s1 + $0x168] sm:$0xff]   ;;  %v5414_v18 = vld [vmem:[%s7255_s1 + $0x170] sm:$0xff]  }
  0x1b   :  { %v5395_v6 = vld [vmem:[%s7255_s1 + $0x120] sm:$0xff]   ;;  %v5405_v13 = vld [vmem:[%s7255_s1 + $0x128] sm:$0xff]   ;;  %v5415_v19 = vld [vmem:[%s7255_s1 + $0x130] sm:$0xff]  }
  0x1c   :  { %4493 = vmatpush3.bf16.msra.mxu0 %v5336_v26  ;;  %v5402_v8 = vld [vmem:[%s7255_s1 + $0x1e0] sm:$0xff]   ;;  %v5412_v16 = vld [vmem:[%s7255_s1 + $0x1e8] sm:$0xff]   ;;  %v5406_v22 = vld [vmem:[%s7256_s0 + $0x49c] ss:$84 sps:$4 sm:$0xff]  }
  0x1d   :  { %4569 = vmatpush3.bf16.msra.mxu1 %v5337_v27  ;;  %4494 = vmatprep.subr.bf16.mxu0 %v5338_v28  ;;  %v5403_v10 = vld [vmem:[%s7255_s1 + $0x1a0] sm:$0xff]   ;;  %v5413_v17 = vld [vmem:[%s7255_s1 + $0x1a8] sm:$0xff]   ;;  %v5422_v24 = vld [vmem:[%s7255_s1 + $0x1f0] sm:$0xff]  }
  0x1e   :  { %4570 = vmatprep.subr.bf16.mxu1 %v5339_v29  ;;  %v5401_v21 = vld [vmem:[%s7256_s0 + $0x3f8] ss:$84 sps:$4 sm:$0xff]   ;;  %v5423_v25 = vld [vmem:[%s7255_s1 + $0x1b0] sm:$0xff]  }
  0x1f   :  { %v5408_v23 = vld [vmem:[%s7256_s0 + $0x4a4] ss:$84 sps:$4 sm:$0xff]   ;;  %v5411_v28 = vld [vmem:[%s7256_s0 + $0x4a0] ss:$84 sps:$4 sm:$0xff]  }
  0x20   :  { %4495 = vmatpush3.bf16.msra.mxu0 %v5340_v30  ;;  %v5424_v26 = vld [vmem:[%s7255_s1 + $0x178] sm:$0xff]   ;;  %v5420_v35 = vld [vmem:[%s7256_s0 + $0x540] ss:$84 sps:$4 sm:$0xff]  }
  0x21   :  { %4571 = vmatpush3.bf16.msra.mxu1 %v5341_v31  ;;  %4632 = vmatprep.subr.bf16.mxu0 %v5348_v36  ;;  %v5410_v27 = vld [vmem:[%s7256_s0 + $0x498] ss:$84 sps:$4 sm:$0xff]   ;;  %v5421_v36 = vld [vmem:[%s7256_s0 + $0x548] ss:$84 sps:$4 sm:$0xff]  }
  0x22   :  { %4708 = vmatprep.subr.bf16.mxu1 %v5356_v42  ;;  %v5429_v29 = vld [vmem:[%s7255_s1 + $0x138] sm:$0xff]   ;;  %v5418_v31 = vld [vmem:[%s7256_s0 + $0x54c] ss:$84 sps:$4 sm:$0xff]   ;;  %v5436_v42 = vld [vmem:[%s7256_s0 + $0x14] ss:$84 sps:$4 sm:$0xff]  }
  0x23   :  { %2669 = vmatmul.mubr.bf16.vlgmr.msra.gmra.mrb[0].mxu0 %v5342_v32  ;;  %v5416_v30 = vld [vmem:[%s7256_s0 + $0x544] ss:$84 sps:$4 sm:$0xff]  }
  0x24   :  { %2782 = vmatmul.mubr.bf16.vlgmr.msra.gmra.mrb[0].mxu1 %v5345_v34  ;;  %4633 = vmatpush3.bf16.msra.mxu0 %v5349_v37  ;;  %v5432_v32 = vld [vmem:[%s7255_s1 + $0x1f8] sm:$0xff]   ;;  %v5440_v34 = vld [vmem:[%s7255_s1 + $0x240] sm:$0xff]  }
  0x25   :  { %2676 = vmatprep.mubr.bf16.mxu0 %v5350_v38  ;;  %2789 = vmatprep.mubr.bf16.mxu1 %v5352_v39  ;;  %v5433_v33 = vld [vmem:[%s7255_s1 + $0x1b8] sm:$0xff]   ;;  %v5425_v37 = vld [vmem:[%s7256_s0 + $0x5ec] ss:$84 sps:$4 sm:$0xff]   ;;  %v5427_v38 = vld [vmem:[%s7256_s0 + $0x5f4] ss:$84 sps:$4 sm:$0xff]  }
  0x26   :  { %4709 = vmatpush3.bf16.msra.mxu1 %v5357_v43  ;;  %4634 = vmatprep.subr.bf16.mxu0 %v5358_v44  ;;  %v5448_v39 = vld [vmem:[%s7255_s1 + $0x2c0] sm:$0xff]   ;;  %v5439_v43 = vld [vmem:[%s7256_s0 + $0x1c] ss:$84 sps:$4 sm:$0xff]  }
  0x27   :  { %4710 = vmatprep.subr.bf16.mxu1 %v5366_v49  ;;  %v5434_v44 = vld [vmem:[%s7256_s0 + $0x10] ss:$84 sps:$4 sm:$0xff]  }
  0x28   :  { %4635 = vmatpush3.bf16.msra.mxu0 %v5359_v45  ;;  %v5437_v45 = vld [vmem:[%s7256_s0 + $0x18] ss:$84 sps:$4 sm:$0xff]   ;;  %v5449_v49 = vld [vmem:[%s7255_s1 + $0x280] sm:$0xff]  }
  0x29   :  { %4636 = vmatprep.subr.bf16.mxu0 %v5368_v52  ;;  %v5451_v52 = vld [vmem:[%s7255_s1 + $0x208] sm:$0xff]  }
  0x2a   :  { %4711 = vmatpush3.bf16.msra.mxu1 %v5367_v51  ;;  %v5458_v51 = vld [vmem:[%s7255_s1 + $0x2c8] sm:$0xff]  }
  0x2b   :  { %2677 = vmatmul.mubr.bf16.gmra.mrb[4].mxu0 %v5354_v40  ;;  %4712 = vmatprep.subr.bf16.mxu1 %v5376_v56  ;;  %v5430_v40 = vld [vmem:[%s7256_s0 + $0x5e8] ss:$84 sps:$4 sm:$0xff]   ;;  %v5452_v56 = vld [vmem:[%s7256_s0 + $0x164] ss:$84 sps:$4 sm:$0xff]  }
  0x2c   :  { %2790 = vmatmul.mubr.bf16.gmra.mrb[4].mxu1 %v5355_v41  ;;  %2684 = vmatprep.mubr.bf16.mxu0 %v5360_v46  ;;  %v5431_v41 = vld [vmem:[%s7256_s0 + $0x5f0] ss:$84 sps:$4 sm:$0xff]  }
  0x2d   :  { %2797 = vmatprep.mubr.bf16.mxu1 %v5362_v47  ;;  %4637 = vmatpush3.bf16.msra.mxu0 %v5369_v53  ;;  %v5441_v46 = vld [vmem:[%s7255_s1 + $0x200] sm:$0xff]   ;;  %v5442_v47 = vld [vmem:[%s7256_s0 + $0xbc] ss:$84 sps:$4 sm:$0xff]   ;;  %v5446_v53 = vld [vmem:[%s7256_s0 + $0xb8] ss:$84 sps:$4 sm:$0xff]  }
  0x2e   :  { %4713 = vmatpush3.bf16.msra.mxu1 %v5377_v58  ;;  %4638 = vmatprep.subr.bf16.mxu0 %v5378_v59  ;;  %v5468_v58 = vld [vmem:[%s7255_s1 + $0x2d0] sm:$0xff]   ;;  %v5454_v59 = vld [vmem:[%s7256_s0 + $0x16c] ss:$84 sps:$4 sm:$0xff]  }
  0x2f   :  { %4714 = vmatprep.subr.bf16.mxu1 %v5386_v0  ;;  %v5456_v0 = vld [vmem:[%s7256_s0 + $0x160] ss:$84 sps:$4 sm:$0xff]  }
  0x31   :  { %4639 = vmatpush3.bf16.msra.mxu0 %v5383_v63  ;;  %v5478_v63 = vld [vmem:[%s7255_s1 + $0x2d8] sm:$0xff]  }
  0x32   :  { %4715 = vmatpush3.bf16.msra.mxu1 %v5391_v4  ;;  %4640 = vmatprep.subr.bf16.mxu0 %v5394_v5  ;;  %v5462_v4 = vld [vmem:[%s7256_s0 + $0x20c] ss:$84 sps:$4 sm:$0xff]  }
  0x33   :  { %2685 = vmatmul.mubr.bf16.gmra.mrb[8].mxu0 %v5364_v48  ;;  %4716 = vmatprep.subr.bf16.mxu1 %v5402_v8  ;;  %v5444_v48 = vld [vmem:[%s7256_s0 + $0xc4] ss:$84 sps:$4 sm:$0xff]  }
  0x34   :  { %2798 = vmatmul.mubr.bf16.gmra.mrb[8].mxu1 %v5365_v50  ;;  %2692 = vmatprep.mubr.bf16.mxu0 %v5370_v54  ;;  %v5450_v50 = vld [vmem:[%s7255_s1 + $0x248] sm:$0xff]   ;;  %v5460_v54 = vld [vmem:[%s7255_s1 + $0x250] sm:$0xff]   ;;  %v5486_v5 = vld [vmem:[%s7255_s1 + $0x260] sm:$0xff]  }
  0x35   :  { %2805 = vmatprep.mubr.bf16.mxu1 %v5372_v55  ;;  %4641 = vmatpush3.bf16.msra.mxu0 %v5395_v6  ;;  %v5447_v55 = vld [vmem:[%s7256_s0 + $0xc0] ss:$84 sps:$4 sm:$0xff]  }
  0x36   :  { %4717 = vmatpush3.bf16.msra.mxu1 %v5403_v10  ;;  %4642 = vmatprep.subr.bf16.mxu0 %v5404_v12  ;;  %v5464_v6 = vld [vmem:[%s7256_s0 + $0x214] ss:$84 sps:$4 sm:$0xff]   ;;  %v5487_v8 = vld [vmem:[%s7255_s1 + $0x220] sm:$0xff]  }
  0x37   :  { %4718 = vmatprep.subr.bf16.mxu1 %v5412_v16  ;;  %v5496_v10 = vld [vmem:[%s7255_s1 + $0x268] sm:$0xff]  }
  0x38   :  { %v5466_v12 = vld [vmem:[%s7256_s0 + $0x208] ss:$84 sps:$4 sm:$0xff]  }
  0x39   :  { %4643 = vmatpush3.bf16.msra.mxu0 %v5405_v13  ;;  %v5504_v13 = vld [vmem:[%s7255_s1 + $0x2e8] sm:$0xff]  }
  0x3a   :  { %4719 = vmatpush3.bf16.msra.mxu1 %v5413_v17  ;;  %4644 = vmatprep.subr.bf16.mxu0 %v5414_v18  ;;  %v5505_v16 = vld [vmem:[%s7255_s1 + $0x2a8] sm:$0xff]   ;;  %v5506_v17 = vld [vmem:[%s7255_s1 + $0x270] sm:$0xff]  }
  0x3b   :  { %2693 = vmatmul.mubr.bf16.gmra.mrb[12].mxu0 %v5374_v57  ;;  %4720 = vmatprep.subr.bf16.mxu1 %v5422_v24  ;;  %v5459_v57 = vld [vmem:[%s7255_s1 + $0x288] sm:$0xff]   ;;  %v5473_v18 = vld [vmem:[%s7256_s0 + $0x2bc] ss:$84 sps:$4 sm:$0xff]  }
  0x3c   :  { %2806 = vmatmul.mubr.bf16.gmra.mrb[12].mxu1 %v5375_v60  ;;  %2700 = vmatprep.mubr.bf16.mxu0 %v5379_v61  ;;  %v5461_v60 = vld [vmem:[%s7255_s1 + $0x210] sm:$0xff]   ;;  %v5477_v24 = vld [vmem:[%s7256_s0 + $0x2b8] ss:$84 sps:$4 sm:$0xff]  }
  0x3d   :  { %2813 = vmatprep.mubr.bf16.mxu1 %v5381_v62  ;;  %4645 = vmatpush3.bf16.msra.mxu0 %v5415_v19  ;;  %v5469_v61 = vld [vmem:[%s7255_s1 + $0x290] sm:$0xff]   ;;  %v5470_v62 = vld [vmem:[%s7255_s1 + $0x258] sm:$0xff]  }
  0x3e   :  { %4721 = vmatpush3.bf16.msra.mxu1 %v5423_v25  ;;  %4646 = vmatprep.subr.bf16.mxu0 %v5424_v26  ;;  %v5507_v19 = vld [vmem:[%s7255_s1 + $0x230] sm:$0xff]   ;;  %v5481_v26 = vld [vmem:[%s7256_s0 + $0x364] ss:$84 sps:$4 sm:$0xff]  }
  0x3f   :  { %4722 = vmatprep.subr.bf16.mxu1 %v5432_v32  ;;  %v5479_v25 = vld [vmem:[%s7256_s0 + $0x35c] ss:$84 sps:$4 sm:$0xff]   ;;  %v5532_v32 = vld [vmem:[%s7255_s1 + $0x340] sm:$0xff]  }
  0x41   :  { %4647 = vmatpush3.bf16.msra.mxu0 %v5429_v29  ;;  %v5525_v29 = vld [vmem:[%s7255_s1 + $0x2b8] sm:$0xff]  }
  0x42   :  { %4723 = vmatpush3.bf16.msra.mxu1 %v5433_v33  ;;  %4784 = vmatprep.subr.bf16.mxu0 %v5440_v34  ;;  %v5488_v33 = vld [vmem:[%s7256_s0 + $0x404] ss:$84 sps:$4 sm:$0xff]   ;;  %v5490_v34 = vld [vmem:[%s7256_s0 + $0x40c] ss:$84 sps:$4 sm:$0xff]  }
  0x43   :  { %2701 = vmatmul.mubr.bf16.gmra.mrb[16].mxu0 %v5384_v1  ;;  %4860 = vmatprep.subr.bf16.mxu1 %v5448_v39  ;;  %v5475_v1 = vld [vmem:[%s7255_s1 + $0x218] sm:$0xff]   ;;  %v5500_v39 = vld [vmem:[%s7256_s0 + $0x4b4] ss:$84 sps:$4 sm:$0xff]  }
  0x44   :  { %2814 = vmatmul.mubr.bf16.gmra.mrb[16].mxu1 %v5385_v2  ;;  %2708 = vmatprep.mubr.bf16.mxu0 %v5387_v3  ;;  %v5483_v2 = vld [vmem:[%s7255_s1 + $0x298] sm:$0xff]  }
  0x45   :  { %2821 = vmatprep.mubr.bf16.mxu1 %v5389_v7  ;;  %v5457_v3 = vld [vmem:[%s7256_s0 + $0x168] ss:$84 sps:$4 sm:$0xff]   ;;  %v5494_v7 = vld [vmem:[%s7255_s1 + $0x2e0] sm:$0xff]  }
  0x4b   :  { %2709 = vmatmul.mubr.bf16.gmra.mrb[20].mxu0 %v5392_v9  ;;  %v5495_v9 = vld [vmem:[%s7255_s1 + $0x2a0] sm:$0xff]  }
  0x4c   :  { %2822 = vmatmul.mubr.bf16.gmra.mrb[20].mxu1 %v5393_v11  ;;  %2716 = vmatprep.mubr.bf16.mxu0 %v5396_v14  ;;  %v5497_v11 = vld [vmem:[%s7255_s1 + $0x228] sm:$0xff]   ;;  %v5467_v14 = vld [vmem:[%s7256_s0 + $0x210] ss:$84 sps:$4 sm:$0xff]  }
  0x4d   :  { %2829 = vmatprep.mubr.bf16.mxu1 %v5398_v15  ;;  %v5471_v15 = vld [vmem:[%s7256_s0 + $0x2b4] ss:$84 sps:$4 sm:$0xff]  }
  0x53   :  { %2717 = vmatmul.mubr.bf16.gmra.mrb[24].mxu0 %v5400_v20  ;;  %v5514_v20 = vld [vmem:[%s7255_s1 + $0x2f0] sm:$0xff]  }
  0x54   :  { %2830 = vmatmul.mubr.bf16.gmra.mrb[24].mxu1 %v5401_v21  ;;  %2724 = vmatprep.mubr.bf16.mxu0 %v5406_v22  ;;  %v5476_v21 = vld [vmem:[%s7256_s0 + $0x2b0] ss:$84 sps:$4 sm:$0xff]  }
  0x55   :  { %2837 = vmatprep.mubr.bf16.mxu1 %v5408_v23  ;;  %v5515_v22 = vld [vmem:[%s7255_s1 + $0x2b0] sm:$0xff]   ;;  %v5516_v23 = vld [vmem:[%s7255_s1 + $0x278] sm:$0xff]  }
  0x5b   :  { %2725 = vmatmul.mubr.bf16.gmra.mrb[28].mxu0 %v5410_v27  ;;  %v5521_v27 = vld [vmem:[%s7255_s1 + $0x238] sm:$0xff]  }
  0x5c   :  { %2838 = vmatmul.mubr.bf16.gmra.mrb[28].mxu1 %v5411_v28  ;;  %2732 = vmatprep.mubr.bf16.mxu0 %v5416_v30  ;;  %v5524_v28 = vld [vmem:[%s7255_s1 + $0x2f8] sm:$0xff]  }
  0x5d   :  { %2845 = vmatprep.mubr.bf16.mxu1 %v5418_v31  ;;  %v5484_v30 = vld [vmem:[%s7256_s0 + $0x358] ss:$84 sps:$4 sm:$0xff]   ;;  %v5485_v31 = vld [vmem:[%s7256_s0 + $0x360] ss:$84 sps:$4 sm:$0xff]  }
  0x63   :  { %2733 = vmatmul.mubr.bf16.gmra.mrb[32].mxu0 %v5420_v35  ;;  %v5540_v35 = vld [vmem:[%s7255_s1 + $0x3c0] sm:$0xff]  }
  0x64   :  { %2846 = vmatmul.mubr.bf16.gmra.mrb[32].mxu1 %v5421_v36  ;;  %2740 = vmatprep.mubr.bf16.mxu0 %v5425_v37  ;;  %v5492_v36 = vld [vmem:[%s7256_s0 + $0x400] ss:$84 sps:$4 sm:$0xff]   ;;  %v5493_v37 = vld [vmem:[%s7256_s0 + $0x408] ss:$84 sps:$4 sm:$0xff]  }
  0x65   :  { %2853 = vmatprep.mubr.bf16.mxu1 %v5427_v38  ;;  %v5498_v38 = vld [vmem:[%s7256_s0 + $0x4ac] ss:$84 sps:$4 sm:$0xff]  }
  0x6b   :  { %2741 = vmatmul.mubr.bf16.gmra.mrb[36].mxu0 %v5430_v40  ;;  %v5502_v40 = vld [vmem:[%s7256_s0 + $0x4a8] ss:$84 sps:$4 sm:$0xff]  }
  0x6c   :  { %2854 = vmatmul.mubr.bf16.gmra.mrb[36].mxu1 %v5431_v41  ;;  %2894 = vmatprep.mubr.bf16.mxu0 %v5436_v42  ;;  %v5503_v41 = vld [vmem:[%s7256_s0 + $0x4b0] ss:$84 sps:$4 sm:$0xff]   ;;  %v5508_v42 = vld [vmem:[%s7256_s0 + $0x554] ss:$84 sps:$4 sm:$0xff]  }
  0x6d   :  { %3007 = vmatprep.mubr.bf16.mxu1 %v5439_v43  ;;  %v5510_v43 = vld [vmem:[%s7256_s0 + $0x55c] ss:$84 sps:$4 sm:$0xff]  }
  0x73   :  { %2895 = vmatmul.mubr.bf16.vlgmr.msra.gmra.mrb[40].mxu0 %v5434_v44  ;;  %v5512_v44 = vld [vmem:[%s7256_s0 + $0x550] ss:$84 sps:$4 sm:$0xff]  }
  0x74   :  { %3008 = vmatmul.mubr.bf16.vlgmr.msra.gmra.mrb[40].mxu1 %v5437_v45  ;;  %4785 = vmatpush3.bf16.msra.mxu0 %v5441_v46  ;;  %v5513_v45 = vld [vmem:[%s7256_s0 + $0x558] ss:$84 sps:$4 sm:$0xff]   ;;  %v5517_v46 = vld [vmem:[%s7256_s0 + $0x5fc] ss:$84 sps:$4 sm:$0xff]  }
  0x75   :  { %2902 = vmatprep.mubr.bf16.mxu0 %v5442_v47  ;;  %3015 = vmatprep.mubr.bf16.mxu1 %v5444_v48  ;;  %v5519_v47 = vld [vmem:[%s7256_s0 + $0x604] ss:$84 sps:$4 sm:$0xff]  }
  0x76   :  { %4861 = vmatpush3.bf16.msra.mxu1 %v5449_v49  ;;  %4786 = vmatprep.subr.bf16.mxu0 %v5450_v50  ;;  %v5522_v48 = vld [vmem:[%s7256_s0 + $0x5f8] ss:$84 sps:$4 sm:$0xff]   ;;  %v5523_v49 = vld [vmem:[%s7256_s0 + $0x600] ss:$84 sps:$4 sm:$0xff]  }
  0x77   :  { %4862 = vmatprep.subr.bf16.mxu1 %v5458_v51  ;;  %v5528_v50 = vld [vmem:[%s7256_s0 + $0x24] ss:$84 sps:$4 sm:$0xff]   ;;  %v5531_v51 = vld [vmem:[%s7256_s0 + $0x2c] ss:$84 sps:$4 sm:$0xff]  }
  0x78   :  { %4787 = vmatpush3.bf16.msra.mxu0 %v5451_v52  ;;  %v5526_v52 = vld [vmem:[%s7256_s0 + $0x20] ss:$84 sps:$4 sm:$0xff]  }
  0x79   :  { %4788 = vmatprep.subr.bf16.mxu0 %v5460_v54  ;;  %v5533_v54 = vld [vmem:[%s7255_s1 + $0x300] sm:$0xff]  }
  0x7a   :  { %4863 = vmatpush3.bf16.msra.mxu1 %v5459_v57  ;;  %v5541_v57 = vld [vmem:[%s7255_s1 + $0x380] sm:$0xff]  }
  0x7b   :  { %2903 = vmatmul.mubr.bf16.gmra.mrb[44].mxu0 %v5446_v53  ;;  %4864 = vmatprep.subr.bf16.mxu1 %v5468_v58  ;;  %v5529_v53 = vld [vmem:[%s7256_s0 + $0x28] ss:$84 sps:$4 sm:$0xff]  }
  0x7c   :  { %3016 = vmatmul.mubr.bf16.gmra.mrb[44].mxu1 %v5447_v55  ;;  %2910 = vmatprep.mubr.bf16.mxu0 %v5452_v56  ;;  %v5534_v55 = vld [vmem:[%s7256_s0 + $0xcc] ss:$84 sps:$4 sm:$0xff]   ;;  %v5536_v56 = vld [vmem:[%s7256_s0 + $0xd4] ss:$84 sps:$4 sm:$0xff]  }
  0x7d   :  { %3023 = vmatprep.mubr.bf16.mxu1 %v5454_v59  ;;  %4789 = vmatpush3.bf16.msra.mxu0 %v5461_v60  ;;  %v5542_v58 = vld [vmem:[%s7255_s1 + $0x348] sm:$0xff]  }
  0x7e   :  { %4865 = vmatpush3.bf16.msra.mxu1 %v5469_v61  ;;  %4790 = vmatprep.subr.bf16.mxu0 %v5470_v62  ;;  %v5550_v59 = vld [vmem:[%s7255_s1 + $0x3c8] sm:$0xff]   ;;  %v5552_v62 = vld [vmem:[%s7255_s1 + $0x350] sm:$0xff]  }
  0x7f   :  { %4866 = vmatprep.subr.bf16.mxu1 %v5478_v63  ;;  %v5543_v60 = vld [vmem:[%s7255_s1 + $0x308] sm:$0xff]   ;;  %v5539_v63 = vld [vmem:[%s7256_s0 + $0xd0] ss:$84 sps:$4 sm:$0xff]  }
  0x80   :  { %v5538_v61 = vld [vmem:[%s7256_s0 + $0xc8] ss:$84 sps:$4 sm:$0xff]  }
  0x81   :  { %4791 = vmatpush3.bf16.msra.mxu0 %v5475_v1  ;;  %v5551_v1 = vld [vmem:[%s7255_s1 + $0x388] sm:$0xff]  }
  0x82   :  { %4867 = vmatpush3.bf16.msra.mxu1 %v5483_v2  ;;  %4792 = vmatprep.subr.bf16.mxu0 %v5486_v5  ;;  %v5546_v2 = vld [vmem:[%s7256_s0 + $0x17c] ss:$84 sps:$4 sm:$0xff]  }
  0x83   :  { %2911 = vmatmul.mubr.bf16.gmra.mrb[48].mxu0 %v5456_v0  ;;  %4868 = vmatprep.subr.bf16.mxu1 %v5494_v7  ;;  %v5544_v0 = vld [vmem:[%s7256_s0 + $0x174] ss:$84 sps:$4 sm:$0xff]   ;;  %v5570_v7 = vld [vmem:[%s7255_s1 + $0x3d8] sm:$0xff]  }
  0x84   :  { %3024 = vmatmul.mubr.bf16.gmra.mrb[48].mxu1 %v5457_v3  ;;  %2918 = vmatprep.mubr.bf16.mxu0 %v5462_v4  ;;  %v5560_v3 = vld [vmem:[%s7255_s1 + $0x3d0] sm:$0xff]  }
  0x85   :  { %3031 = vmatprep.mubr.bf16.mxu1 %v5464_v6  ;;  %4793 = vmatpush3.bf16.msra.mxu0 %v5487_v8  ;;  %v5553_v4 = vld [vmem:[%s7255_s1 + $0x310] sm:$0xff]   ;;  %v5562_v6 = vld [vmem:[%s7255_s1 + $0x358] sm:$0xff]  }
  0x86   :  { %4869 = vmatpush3.bf16.msra.mxu1 %v5495_v9  ;;  %4794 = vmatprep.subr.bf16.mxu0 %v5496_v10  ;;  %v5561_v5 = vld [vmem:[%s7255_s1 + $0x390] sm:$0xff]   ;;  %v5567_v8 = vld [vmem:[%s7255_s1 + $0x318] sm:$0xff]  }
  0x87   :  { %4870 = vmatprep.subr.bf16.mxu1 %v5504_v13  ;;  %v5548_v9 = vld [vmem:[%s7256_s0 + $0x170] ss:$84 sps:$4 sm:$0xff]   ;;  %v5575_v10 = vld [vmem:[%s7255_s1 + $0x398] sm:$0xff]  }
  0x88   :  { %v5578_v13 = vld [vmem:[%s7255_s1 + $0x360] sm:$0xff]  }
  0x89   :  { %4795 = vmatpush3.bf16.msra.mxu0 %v5497_v11  ;;  %v5549_v11 = vld [vmem:[%s7256_s0 + $0x178] ss:$84 sps:$4 sm:$0xff]  }
  0x8a   :  { %4871 = vmatpush3.bf16.msra.mxu1 %v5505_v16  ;;  %4796 = vmatprep.subr.bf16.mxu0 %v5506_v17  ;;  %v5579_v16 = vld [vmem:[%s7255_s1 + $0x320] sm:$0xff]  }
  0x8b   :  { %2919 = vmatmul.mubr.bf16.gmra.mrb[52].mxu0 %v5466_v12  ;;  %4872 = vmatprep.subr.bf16.mxu1 %v5514_v20  ;;  %v5554_v12 = vld [vmem:[%s7256_s0 + $0x21c] ss:$84 sps:$4 sm:$0xff]   ;;  %v5587_v17 = vld [vmem:[%s7255_s1 + $0x3a0] sm:$0xff]   ;;  %v5558_v20 = vld [vmem:[%s7256_s0 + $0x218] ss:$84 sps:$4 sm:$0xff]  }
  0x8c   :  { %3032 = vmatmul.mubr.bf16.gmra.mrb[52].mxu1 %v5467_v14  ;;  %2926 = vmatprep.mubr.bf16.mxu0 %v5471_v15  ;;  %v5586_v14 = vld [vmem:[%s7255_s1 + $0x3e0] sm:$0xff]  }
  0x8d   :  { %3039 = vmatprep.mubr.bf16.mxu1 %v5473_v18  ;;  %4797 = vmatpush3.bf16.msra.mxu0 %v5507_v19  ;;  %v5556_v15 = vld [vmem:[%s7256_s0 + $0x224] ss:$84 sps:$4 sm:$0xff]   ;;  %v5588_v18 = vld [vmem:[%s7255_s1 + $0x368] sm:$0xff]  }
  0x8e   :  { %4873 = vmatpush3.bf16.msra.mxu1 %v5515_v22  ;;  %4798 = vmatprep.subr.bf16.mxu0 %v5516_v23  ;;  %v5596_v19 = vld [vmem:[%s7255_s1 + $0x3e8] sm:$0xff]   ;;  %v5559_v23 = vld [vmem:[%s7256_s0 + $0x220] ss:$84 sps:$4 sm:$0xff]  }
  0x8f   :  { %4874 = vmatprep.subr.bf16.mxu1 %v5524_v28  ;;  %v5597_v22 = vld [vmem:[%s7255_s1 + $0x3a8] sm:$0xff]   ;;  %v5599_v28 = vld [vmem:[%s7255_s1 + $0x330] sm:$0xff]  }
  0x91   :  { %4799 = vmatpush3.bf16.msra.mxu0 %v5521_v27  ;;  %v5606_v27 = vld [vmem:[%s7255_s1 + $0x3f0] sm:$0xff]  }
  0x92   :  { %4875 = vmatpush3.bf16.msra.mxu1 %v5525_v29  ;;  %4936 = vmatprep.subr.bf16.mxu0 %v5532_v32  ;;  %v5607_v29 = vld [vmem:[%s7255_s1 + $0x3b0] sm:$0xff]   ;;  %v5613_v32 = vld [vmem:[%s7255_s1 + $0x338] sm:$0xff]  }
  0x93   :  { %2927 = vmatmul.mubr.bf16.gmra.mrb[56].mxu0 %v5476_v21  ;;  %5012 = vmatprep.subr.bf16.mxu1 %v5540_v35  ;;  %v5589_v21 = vld [vmem:[%s7255_s1 + $0x328] sm:$0xff]  }
  0x94   :  { %3040 = vmatmul.mubr.bf16.gmra.mrb[56].mxu1 %v5477_v24  ;;  %2934 = vmatprep.mubr.bf16.mxu0 %v5479_v25  ;;  %v5563_v24 = vld [vmem:[%s7256_s0 + $0x2c4] ss:$84 sps:$4 sm:$0xff]   ;;  %v5598_v25 = vld [vmem:[%s7255_s1 + $0x370] sm:$0xff]   ;;  %v5569_v35 = vld [vmem:[%s7256_s0 + $0x2c8] ss:$84 sps:$4 sm:$0xff]  }
  0x95   :  { %3047 = vmatprep.mubr.bf16.mxu1 %v5481_v26  ;;  %v5565_v26 = vld [vmem:[%s7256_s0 + $0x2cc] ss:$84 sps:$4 sm:$0xff]  }
  0x9b   :  { %2935 = vmatmul.mubr.bf16.gmra.mrb[60].mxu0 %v5484_v30  ;;  %v5608_v30 = vld [vmem:[%s7255_s1 + $0x378] sm:$0xff]  }
  0x9c   :  { %3048 = vmatmul.mubr.bf16.gmra.mrb[60].mxu1 %v5485_v31  ;;  %2942 = vmatprep.mubr.bf16.mxu0 %v5488_v33  ;;  %v5616_v31 = vld [vmem:[%s7255_s1 + $0x3f8] sm:$0xff]   ;;  %v5568_v33 = vld [vmem:[%s7256_s0 + $0x2c0] ss:$84 sps:$4 sm:$0xff]  }
  0x9d   :  { %3055 = vmatprep.mubr.bf16.mxu1 %v5490_v34  ;;  %v5617_v34 = vld [vmem:[%s7255_s1 + $0x3b8] sm:$0xff]  }
  0xa3   :  { %2943 = vmatmul.mubr.bf16.gmra.mrb[64].mxu0 %v5492_v36  ;;  %v5624_v36 = vld [vmem:[%s7255_s1 + $0x440] sm:$0xff]  }
  0xa4   :  { %3056 = vmatmul.mubr.bf16.gmra.mrb[64].mxu1 %v5493_v37  ;;  %2950 = vmatprep.mubr.bf16.mxu0 %v5498_v38  ;;  %v5632_v37 = vld [vmem:[%s7255_s1 + $0x4c0] sm:$0xff]  }
  0xa5   :  { %3063 = vmatprep.mubr.bf16.mxu1 %v5500_v39  ;;  %v5571_v38 = vld [vmem:[%s7256_s0 + $0x36c] ss:$84 sps:$4 sm:$0xff]   ;;  %v5573_v39 = vld [vmem:[%s7256_s0 + $0x374] ss:$84 sps:$4 sm:$0xff]  }
  0xab   :  { %2951 = vmatmul.mubr.bf16.gmra.mrb[68].mxu0 %v5502_v40  ;;  %v5576_v40 = vld [vmem:[%s7256_s0 + $0x368] ss:$84 sps:$4 sm:$0xff]  }
  0xac   :  { %3064 = vmatmul.mubr.bf16.gmra.mrb[68].mxu1 %v5503_v41  ;;  %2958 = vmatprep.mubr.bf16.mxu0 %v5508_v42  ;;  %v5577_v41 = vld [vmem:[%s7256_s0 + $0x370] ss:$84 sps:$4 sm:$0xff]   ;;  %v5580_v42 = vld [vmem:[%s7256_s0 + $0x414] ss:$84 sps:$4 sm:$0xff]  }
  0xad   :  { %3071 = vmatprep.mubr.bf16.mxu1 %v5510_v43  ;;  %v5582_v43 = vld [vmem:[%s7256_s0 + $0x41c] ss:$84 sps:$4 sm:$0xff]  }
  0xb3   :  { %2959 = vmatmul.mubr.bf16.gmra.mrb[72].mxu0 %v5512_v44  ;;  %v5584_v44 = vld [vmem:[%s7256_s0 + $0x410] ss:$84 sps:$4 sm:$0xff]  }
  0xb4   :  { %3072 = vmatmul.mubr.bf16.gmra.mrb[72].mxu1 %v5513_v45  ;;  %2966 = vmatprep.mubr.bf16.mxu0 %v5517_v46  ;;  %v5585_v45 = vld [vmem:[%s7256_s0 + $0x418] ss:$84 sps:$4 sm:$0xff]   ;;  %v5590_v46 = vld [vmem:[%s7256_s0 + $0x4bc] ss:$84 sps:$4 sm:$0xff]  }
  0xb5   :  { %3079 = vmatprep.mubr.bf16.mxu1 %v5519_v47  ;;  %v5592_v47 = vld [vmem:[%s7256_s0 + $0x4c4] ss:$84 sps:$4 sm:$0xff]  }
  0xbb   :  { %2967 = vmatmul.mubr.bf16.gmra.mrb[76].mxu0 %v5522_v48  ;;  %v5594_v48 = vld [vmem:[%s7256_s0 + $0x4b8] ss:$84 sps:$4 sm:$0xff]  }
  0xbc   :  { %3080 = vmatmul.mubr.bf16.gmra.mrb[76].mxu1 %v5523_v49  ;;  %3120 = vmatprep.mubr.bf16.mxu0 %v5528_v50  ;;  %v5595_v50 = vld [vmem:[%s7256_s0 + $0x4c0] ss:$84 sps:$4 sm:$0xff]  }
  0xbd   :  { %3233 = vmatprep.mubr.bf16.mxu1 %v5531_v51 }
  0xc3   :  { %3121 = vmatmul.mubr.bf16.vlgmr.msra.gmra.mrb[80].mxu0 %v5526_v52 }
  0xc4   :  { %3234 = vmatmul.mubr.bf16.vlgmr.msra.gmra.mrb[80].mxu1 %v5529_v53  ;;  %4937 = vmatpush3.bf16.msra.mxu0 %v5533_v54 }
  0xc5   :  { %3128 = vmatprep.mubr.bf16.mxu0 %v5534_v55  ;;  %3241 = vmatprep.mubr.bf16.mxu1 %v5536_v56  ;;  %v5600_v56 = vld [vmem:[%s7256_s0 + $0x564] ss:$84 sps:$4 sm:$0xff]  }
  0xc6   :  { %5013 = vmatpush3.bf16.msra.mxu1 %v5541_v57  ;;  %4938 = vmatprep.subr.bf16.mxu0 %v5542_v58 }
  0xc7   :  { %5014 = vmatprep.subr.bf16.mxu1 %v5550_v59 }
  0xc8   :  { %4939 = vmatpush3.bf16.msra.mxu0 %v5543_v60  ;;  %v5602_v60 = vld [vmem:[%s7256_s0 + $0x56c] ss:$84 sps:$4 sm:$0xff]  }
  0xc9   :  { %4940 = vmatprep.subr.bf16.mxu0 %v5552_v62 }
  0xca   :  { %5015 = vmatpush3.bf16.msra.mxu1 %v5551_v1 }
  0xcb   :  { %3129 = vmatmul.mubr.bf16.gmra.mrb[84].mxu0 %v5538_v61  ;;  %5016 = vmatprep.subr.bf16.mxu1 %v5560_v3 }
  0xcc   :  { %3242 = vmatmul.mubr.bf16.gmra.mrb[84].mxu1 %v5539_v63  ;;  %3136 = vmatprep.mubr.bf16.mxu0 %v5544_v0 }
  0xcd   :  { %3249 = vmatprep.mubr.bf16.mxu1 %v5546_v2  ;;  %4941 = vmatpush3.bf16.msra.mxu0 %v5553_v4 }
  0xce   :  { %5017 = vmatpush3.bf16.msra.mxu1 %v5561_v5  ;;  %4942 = vmatprep.subr.bf16.mxu0 %v5562_v6  ;;  %v5604_v5 = vld [vmem:[%s7256_s0 + $0x560] ss:$84 sps:$4 sm:$0xff]  }
  0xcf   :  { %5018 = vmatprep.subr.bf16.mxu1 %v5570_v7 }
  0xd1   :  { %4943 = vmatpush3.bf16.msra.mxu0 %v5567_v8 }
  0xd2   :  { %5019 = vmatpush3.bf16.msra.mxu1 %v5575_v10  ;;  %4944 = vmatprep.subr.bf16.mxu0 %v5578_v13  ;;  %v5609_v10 = vld [vmem:[%s7256_s0 + $0x60c] ss:$84 sps:$4 sm:$0xff]  }
  0xd3   :  { %3137 = vmatmul.mubr.bf16.gmra.mrb[88].mxu0 %v5548_v9  ;;  %5020 = vmatprep.subr.bf16.mxu1 %v5586_v14  ;;  %v5605_v9 = vld [vmem:[%s7256_s0 + $0x568] ss:$84 sps:$4 sm:$0xff]  }
  0xd4   :  { %3250 = vmatmul.mubr.bf16.gmra.mrb[88].mxu1 %v5549_v11  ;;  %3144 = vmatprep.mubr.bf16.mxu0 %v5554_v12  ;;  %v5611_v14 = vld [vmem:[%s7256_s0 + $0x614] ss:$84 sps:$4 sm:$0xff]  }
  0xd5   :  { %3257 = vmatprep.mubr.bf16.mxu1 %v5556_v15  ;;  %4945 = vmatpush3.bf16.msra.mxu0 %v5579_v16 }
  0xd6   :  { %5021 = vmatpush3.bf16.msra.mxu1 %v5587_v17  ;;  %4946 = vmatprep.subr.bf16.mxu0 %v5588_v18 }
  0xd7   :  { %5022 = vmatprep.subr.bf16.mxu1 %v5596_v19 }
  0xd9   :  { %4947 = vmatpush3.bf16.msra.mxu0 %v5589_v21  ;;  %v5614_v21 = vld [vmem:[%s7256_s0 + $0x608] ss:$84 sps:$4 sm:$0xff]  }
  0xda   :  { %5023 = vmatpush3.bf16.msra.mxu1 %v5597_v22  ;;  %4948 = vmatprep.subr.bf16.mxu0 %v5598_v25 }
  0xdb   :  { %3145 = vmatmul.mubr.bf16.gmra.mrb[92].mxu0 %v5558_v20  ;;  %5024 = vmatprep.subr.bf16.mxu1 %v5606_v27 }
  0xdc   :  { %3258 = vmatmul.mubr.bf16.gmra.mrb[92].mxu1 %v5559_v23  ;;  %3152 = vmatprep.mubr.bf16.mxu0 %v5563_v24  ;;  %v5615_v24 = vld [vmem:[%s7256_s0 + $0x610] ss:$84 sps:$4 sm:$0xff]  }
  0xdd   :  { %3265 = vmatprep.mubr.bf16.mxu1 %v5565_v26  ;;  %4949 = vmatpush3.bf16.msra.mxu0 %v5599_v28  ;;  %v5620_v28 = vld [vmem:[%s7256_s0 + $0x34] ss:$84 sps:$4 sm:$0xff]  }
  0xde   :  { %5025 = vmatpush3.bf16.msra.mxu1 %v5607_v29  ;;  %4950 = vmatprep.subr.bf16.mxu0 %v5608_v30  ;;  %v5623_v29 = vld [vmem:[%s7256_s0 + $0x3c] ss:$84 sps:$4 sm:$0xff]  }
  0xdf   :  { %5026 = vmatprep.subr.bf16.mxu1 %v5616_v31 }
  0xe1   :  { %4951 = vmatpush3.bf16.msra.mxu0 %v5613_v32 }
  0xe2   :  { %5027 = vmatpush3.bf16.msra.mxu1 %v5617_v34  ;;  %5088 = vmatprep.subr.bf16.mxu0 %v5624_v36 }
  0xe3   :  { %3153 = vmatmul.mubr.bf16.gmra.mrb[96].mxu0 %v5568_v33  ;;  %5164 = vmatprep.subr.bf16.mxu1 %v5632_v37 }
  0xe4   :  { %3266 = vmatmul.mubr.bf16.gmra.mrb[96].mxu1 %v5569_v35  ;;  %3160 = vmatprep.mubr.bf16.mxu0 %v5571_v38 }
  0xe5   :  { %3273 = vmatprep.mubr.bf16.mxu1 %v5573_v39  ;;  %v5618_v39 = vld [vmem:[%s7256_s0 + $0x30] ss:$84 sps:$4 sm:$0xff]  }
  0xeb   :  { %3161 = vmatmul.mubr.bf16.gmra.mrb[100].mxu0 %v5576_v40 }
  0xec   :  { %3274 = vmatmul.mubr.bf16.gmra.mrb[100].mxu1 %v5577_v41  ;;  %3168 = vmatprep.mubr.bf16.mxu0 %v5580_v42  ;;  %v5621_v42 = vld [vmem:[%s7256_s0 + $0x38] ss:$84 sps:$4 sm:$0xff]  }
  0xed   :  { %3281 = vmatprep.mubr.bf16.mxu1 %v5582_v43 }
  0xf3   :  { %3169 = vmatmul.mubr.bf16.gmra.mrb[104].mxu0 %v5584_v44 }
  0xf4   :  { %3282 = vmatmul.mubr.bf16.gmra.mrb[104].mxu1 %v5585_v45  ;;  %3176 = vmatprep.mubr.bf16.mxu0 %v5590_v46  ;;  %v5625_v46 = vld [vmem:[%s7255_s1 + $0x400] sm:$0xff]  }
  0xf5   :  { %3289 = vmatprep.mubr.bf16.mxu1 %v5592_v47  ;;  %v5626_v47 = vld [vmem:[%s7256_s0 + $0xdc] ss:$84 sps:$4 sm:$0xff]  }
  0xf6   :  { %v4496_v49 = vpop.f32.mrb[0].mxu0 }
  0xf7   :  { %v4572_v51 = vpop.f32.mrb[0].mxu1  ;;  %v4497_v52 = vpop.f32.mrb[1].mxu0 }
  0xf8   :  { %v4498_v53 = vadd.f32 %v4497_v52, %v4496_v49  ;;  %v4573_v54 = vpop.f32.mrb[1].mxu1  ;;  %v4499_v55 = vpop.f32.mrb[2].mxu0  ;;  %v5633_v52 = vld [vmem:[%s7255_s1 + $0x480] sm:$0xff]  }
  0xf9   :  { %v4574_v57 = vadd.f32 %v4573_v54, %v4572_v51  ;;  %v4575_v58 = vpop.f32.mrb[2].mxu1  ;;  %v4500_v59 = vpop.f32.mrb[3].mxu0  ;;  %v5628_v51 = vld [vmem:[%s7256_s0 + $0xe4] ss:$84 sps:$4 sm:$0xff]  }
  0xfa   :  { %v4501_v61 = vadd.f32 %v4500_v59, %v4499_v55  ;;  %v4576_v62 = vpop.f32.mrb[3].mxu1  ;;  %v5635_v59 = vld [vmem:[%s7255_s1 + $0x408] sm:$0xff]  }
  0xfb   :  { %v6535_v63 = vadd.f32 %v4574_v57, %v4498_v53  ;;  %v4577_v0 = vadd.f32 %v4576_v62, %v4575_v58  ;;  %3177 = vmatmul.mubr.bf16.gmra.mrb[108].mxu0 %v5594_v48  ;;  %v5634_v53 = vld [vmem:[%s7255_s1 + $0x448] sm:$0xff]   ;;  %v5644_v62 = vld [vmem:[%s7255_s1 + $0x450] sm:$0xff]  }
  0xfc   :  { %3290 = vmatmul.mubr.bf16.gmra.mrb[108].mxu1 %v5595_v50  ;;  %3184 = vmatprep.mubr.bf16.mxu0 %v5600_v56  ;;  %v5642_v58 = vld [vmem:[%s7255_s1 + $0x4c8] sm:$0xff]  }
  0xfd   :  { %v6537_v1 = vadd.f32 %v4577_v0, %v4501_v61  ;;  %3297 = vmatprep.mubr.bf16.mxu1 %v5602_v60  ;;  %v5630_v61 = vld [vmem:[%s7256_s0 + $0xd8] ss:$84 sps:$4 sm:$0xff]  }
  0xfe   :  { %v4502_v2 = vpop.f32.mrb[4].mxu0 }
  0xff   :  { %v4578_v3 = vpop.f32.mrb[4].mxu1  ;;  %v4503_v4 = vpop.f32.mrb[5].mxu0 }
 0x100   :  { %v4504_v6 = vadd.f32 %v4503_v4, %v4502_v2  ;;  %v4579_v7 = vpop.f32.mrb[5].mxu1  ;;  %v4505_v8 = vpop.f32.mrb[6].mxu0  ;;  %v5631_v2 = vld [vmem:[%s7256_s0 + $0xe0] ss:$84 sps:$4 sm:$0xff]  }
 0x101   :  { %v4580_v11 = vadd.f32 %v4579_v7, %v4578_v3  ;;  %v4581_v12 = vpop.f32.mrb[6].mxu1  ;;  %v4506_v13 = vpop.f32.mrb[7].mxu0  ;;  %v5643_v3 = vld [vmem:[%s7255_s1 + $0x488] sm:$0xff]  }
 0x102   :  { %v4507_v15 = vadd.f32 %v4506_v13, %v4505_v8  ;;  %v4582_v16 = vpop.f32.mrb[7].mxu1 }
 0x103   :  { %v6551_v17 = vadd.f32 %v4580_v11, %v4504_v6  ;;  %v4583_v18 = vadd.f32 %v4582_v16, %v4581_v12  ;;  %3185 = vmatmul.mubr.bf16.gmra.mrb[112].mxu0 %v5604_v5  ;;  %v5652_v6 = vld [vmem:[%s7255_s1 + $0x4d0] sm:$0xff]   ;;  %v5638_v11 = vld [vmem:[%s7256_s0 + $0x18c] ss:$84 sps:$4 sm:$0xff]  }
 0x104   :  { %3298 = vmatmul.mubr.bf16.gmra.mrb[112].mxu1 %v5605_v9  ;;  %3192 = vmatprep.mubr.bf16.mxu0 %v5609_v10  ;;  %v5636_v10 = vld [vmem:[%s7256_s0 + $0x184] ss:$84 sps:$4 sm:$0xff]   ;;  %v5653_v16 = vld [vmem:[%s7255_s1 + $0x490] sm:$0xff]  }
 0x105   :  { %v6553_v19 = vadd.f32 %v4583_v18, %v4507_v15  ;;  %3305 = vmatprep.mubr.bf16.mxu1 %v5611_v14  ;;  %v5645_v15 = vld [vmem:[%s7255_s1 + $0x410] sm:$0xff]  }
 0x106   :  { %v4508_v20 = vpop.f32.mrb[8].mxu0 }
 0x107   :  { %v4584_v22 = vpop.f32.mrb[8].mxu1  ;;  %v4509_v23 = vpop.f32.mrb[9].mxu0 }
 0x108   :  { %v4510_v25 = vadd.f32 %v4509_v23, %v4508_v20  ;;  %v4585_v26 = vpop.f32.mrb[9].mxu1  ;;  %v4511_v27 = vpop.f32.mrb[10].mxu0 }
 0x109   :  { %v4586_v30 = vadd.f32 %v4585_v26, %v4584_v22  ;;  %v4587_v31 = vpop.f32.mrb[10].mxu1  ;;  %v4512_v32 = vpop.f32.mrb[11].mxu0 }
 0x10a   :  { %v4513_v33 = vadd.f32 %v4512_v32, %v4511_v27  ;;  %v4588_v34 = vpop.f32.mrb[11].mxu1  ;;  %v5640_v27 = vld [vmem:[%s7256_s0 + $0x180] ss:$84 sps:$4 sm:$0xff]  }
 0x10b   :  { %v6567_v35 = vadd.f32 %v4586_v30, %v4510_v25  ;;  %v4589_v36 = vadd.f32 %v4588_v34, %v4587_v31  ;;  %3193 = vmatmul.mubr.bf16.gmra.mrb[116].mxu0 %v5614_v21  ;;  %v5654_v21 = vld [vmem:[%s7255_s1 + $0x458] sm:$0xff]   ;;  %v5646_v31 = vld [vmem:[%s7256_s0 + $0x22c] ss:$84 sps:$4 sm:$0xff]  }
 0x10c   :  { %3306 = vmatmul.mubr.bf16.gmra.mrb[116].mxu1 %v5615_v24  ;;  %3346 = vmatprep.mubr.bf16.mxu0 %v5620_v28  ;;  %v5662_v24 = vld [vmem:[%s7255_s1 + $0x4d8] sm:$0xff]   ;;  %v5670_v32 = vld [vmem:[%s7255_s1 + $0x460] sm:$0xff]  }
 0x10d   :  { %v6569_v37 = vadd.f32 %v4589_v36, %v4513_v33  ;;  %3459 = vmatprep.mubr.bf16.mxu1 %v5623_v29  ;;  %v5659_v25 = vld [vmem:[%s7255_s1 + $0x418] sm:$0xff]   ;;  %v5648_v36 = vld [vmem:[%s7256_s0 + $0x234] ss:$84 sps:$4 sm:$0xff]  }
 0x10e   :  { %v4514_v38 = vpop.f32.mrb[12].mxu0  ;;  %v5667_v28 = vld [vmem:[%s7255_s1 + $0x498] sm:$0xff]  }
 0x10f   :  { %v4590_v40 = vpop.f32.mrb[12].mxu1  ;;  %v4515_v41 = vpop.f32.mrb[13].mxu0  ;;  %v5641_v30 = vld [vmem:[%s7256_s0 + $0x188] ss:$84 sps:$4 sm:$0xff]  }
 0x110   :  { %v4516_v43 = vadd.f32 %v4515_v41, %v4514_v38  ;;  %v4591_v44 = vpop.f32.mrb[13].mxu1  ;;  %v4517_v45 = vpop.f32.mrb[14].mxu0  ;;  %v5678_v38 = vld [vmem:[%s7255_s1 + $0x4e0] sm:$0xff]  }
 0x111   :  { %v4592_v48 = vadd.f32 %v4591_v44, %v4590_v40  ;;  %v4593_v49 = vpop.f32.mrb[14].mxu1  ;;  %v4518_v50 = vpop.f32.mrb[15].mxu0 }
 0x112   :  { %v4519_v54 = vadd.f32 %v4518_v50, %v4517_v45  ;;  %v4594_v55 = vpop.f32.mrb[15].mxu1 }
 0x113   :  { %v6592_v56 = vadd.f32 %v4592_v48, %v4516_v43  ;;  %v4595_v57 = vadd.f32 %v4594_v55, %v4593_v49  ;;  %3347 = vmatmul.mubr.bf16.vlgmr.msra.gmra.mrb[120].mxu0 %v5618_v39  ;;  %v5680_v49 = vld [vmem:[%s7255_s1 + $0x468] sm:$0xff]  }
 0x114   :  { %3460 = vmatmul.mubr.bf16.vlgmr.msra.gmra.mrb[120].mxu1 %v5621_v42  ;;  %5089 = vmatpush3.bf16.msra.mxu0 %v5625_v46  ;;  %v5671_v42 = vld [vmem:[%s7255_s1 + $0x420] sm:$0xff]   ;;  %v5650_v55 = vld [vmem:[%s7256_s0 + $0x228] ss:$84 sps:$4 sm:$0xff]  }
 0x115   :  { %v6600_v60 = vadd.f32 %v4595_v57, %v4519_v54  ;;  %3354 = vmatprep.mubr.bf16.mxu0 %v5626_v47  ;;  %3467 = vmatprep.mubr.bf16.mxu1 %v5628_v51  ;;  %v5679_v46 = vld [vmem:[%s7255_s1 + $0x4a0] sm:$0xff]   ;;  %v5689_v57 = vld [vmem:[%s7255_s1 + $0x4a8] sm:$0xff]  }
 0x116   :  { %v4520_v0 = vpop.f32.mrb[16].mxu0  ;;  %5165 = vmatpush3.bf16.msra.mxu1 %v5633_v52  ;;  %5090 = vmatprep.subr.bf16.mxu0 %v5634_v53  ;;  %v5688_v52 = vld [vmem:[%s7255_s1 + $0x4e8] sm:$0xff]  }
 0x117   :  { %v4596_v4 = vpop.f32.mrb[16].mxu1  ;;  %v4521_v5 = vpop.f32.mrb[17].mxu0  ;;  %5166 = vmatprep.subr.bf16.mxu1 %v5642_v58  ;;  %v5681_v53 = vld [vmem:[%s7255_s1 + $0x428] sm:$0xff]  }
 0x118   :  { %v4522_v7 = vadd.f32 %v4521_v5, %v4520_v0  ;;  %v4597_v8 = vpop.f32.mrb[17].mxu1  ;;  %v4523_v9 = vpop.f32.mrb[18].mxu0  ;;  %5091 = vmatpush3.bf16.msra.mxu0 %v5635_v59  ;;  %v5651_v59 = vld [vmem:[%s7256_s0 + $0x230] ss:$84 sps:$4 sm:$0xff]  }
 0x119   :  { %v4598_v12 = vadd.f32 %v4597_v8, %v4596_v4  ;;  %v4599_v13 = vpop.f32.mrb[18].mxu1  ;;  %v4524_v14 = vpop.f32.mrb[19].mxu0  ;;  %5092 = vmatprep.subr.bf16.mxu0 %v5644_v62  ;;  %v5690_v62 = vld [vmem:[%s7255_s1 + $0x470] sm:$0xff]  }
 0x11a   :  { %v4525_v18 = vadd.f32 %v4524_v14, %v4523_v9  ;;  %v4600_v20 = vpop.f32.mrb[19].mxu1  ;;  %5167 = vmatpush3.bf16.msra.mxu1 %v5643_v3  ;;  %v5657_v3 = vld [vmem:[%s7256_s0 + $0x2dc] ss:$84 sps:$4 sm:$0xff]  }
 0x11b   :  { %v6632_v22 = vadd.f32 %v4598_v12, %v4522_v7  ;;  %v4601_v23 = vadd.f32 %v4600_v20, %v4599_v13  ;;  %3355 = vmatmul.mubr.bf16.gmra.mrb[124].mxu0 %v5630_v61  ;;  %5168 = vmatprep.subr.bf16.mxu1 %v5652_v6  ;;  %v5655_v61 = vld [vmem:[%s7256_s0 + $0x2d4] ss:$84 sps:$4 sm:$0xff]   ;;  %v5708_v20 = vld [vmem:[%s7255_s1 + $0x4f8] sm:$0xff]  }
 0x11c   :  { %3468 = vmatmul.mubr.bf16.gmra.mrb[124].mxu1 %v5631_v2  ;;  %3362 = vmatprep.mubr.bf16.mxu0 %v5636_v10  ;;  %v5698_v4 = vld [vmem:[%s7255_s1 + $0x4f0] sm:$0xff]  }
 0x11d   :  { %v6640_v26 = vadd.f32 %v4601_v23, %v4525_v18  ;;  %3475 = vmatprep.mubr.bf16.mxu1 %v5638_v11  ;;  %5093 = vmatpush3.bf16.msra.mxu0 %v5645_v15  ;;  %v5691_v8 = vld [vmem:[%s7255_s1 + $0x430] sm:$0xff]   ;;  %v5700_v15 = vld [vmem:[%s7255_s1 + $0x478] sm:$0xff]  }
 0x11e   :  { %v4526_v29 = vpop.f32.mrb[20].mxu0  ;;  %5169 = vmatpush3.bf16.msra.mxu1 %v5653_v16  ;;  %5094 = vmatprep.subr.bf16.mxu0 %v5654_v21  ;;  %v5699_v12 = vld [vmem:[%s7255_s1 + $0x4b0] sm:$0xff]   ;;  %v5705_v21 = vld [vmem:[%s7255_s1 + $0x438] sm:$0xff]  }
 0x11f   :  { %v4602_v33 = vpop.f32.mrb[20].mxu1  ;;  %v4527_v34 = vpop.f32.mrb[21].mxu0  ;;  %5170 = vmatprep.subr.bf16.mxu1 %v5662_v24  ;;  %v5709_v24 = vld [vmem:[%s7255_s1 + $0x4b8] sm:$0xff]  }
 0x120   :  { %v4528_v39 = vadd.f32 %v4527_v34, %v4526_v29  ;;  %v4603_v40 = vpop.f32.mrb[21].mxu1  ;;  %v4529_v41 = vpop.f32.mrb[22].mxu0 }
 0x121   :  { %v4604_v43 = vadd.f32 %v4603_v40, %v4602_v33  ;;  %v4605_v44 = vpop.f32.mrb[22].mxu1  ;;  %v4530_v45 = vpop.f32.mrb[23].mxu0  ;;  %5095 = vmatpush3.bf16.msra.mxu0 %v5659_v25 }
 0x122   :  { %v4531_v47 = vadd.f32 %v4530_v45, %v4529_v41  ;;  %v4606_v48 = vpop.f32.mrb[23].mxu1  ;;  %5171 = vmatpush3.bf16.msra.mxu1 %v5667_v28  ;;  %5096 = vmatprep.subr.bf16.mxu0 %v5670_v32  ;;  %v5665_v41 = vld [vmem:[%s7256_s0 + $0x384] ss:$84 sps:$4 sm:$0xff]  }
 0x123   :  { %v6672_v50 = vadd.f32 %v4604_v43, %v4528_v39  ;;  %v4607_v51 = vadd.f32 %v4606_v48, %v4605_v44  ;;  %3363 = vmatmul.mubr.bf16.gmra.mrb[128].mxu0 %v5640_v27  ;;  %5172 = vmatprep.subr.bf16.mxu1 %v5678_v38  ;;  %v6728_v27 = vld [vmem:[%s7255_s1 + $0x500] sm:$0xff]  }
 0x124   :  { %3476 = vmatmul.mubr.bf16.gmra.mrb[128].mxu1 %v5641_v30  ;;  %3370 = vmatprep.mubr.bf16.mxu0 %v5646_v31  ;;  %v5660_v30 = vld [vmem:[%s7256_s0 + $0x2d0] ss:$84 sps:$4 sm:$0xff]   ;;  %v5661_v31 = vld [vmem:[%s7256_s0 + $0x2d8] ss:$84 sps:$4 sm:$0xff]  }
 0x125   :  { %v6680_v54 = vadd.f32 %v4607_v51, %v4531_v47  ;;  %3483 = vmatprep.mubr.bf16.mxu1 %v5648_v36  ;;  %5097 = vmatpush3.bf16.msra.mxu0 %v5671_v42  ;;  %v5663_v36 = vld [vmem:[%s7256_s0 + $0x37c] ss:$84 sps:$4 sm:$0xff]   ;;  %v5668_v47 = vld [vmem:[%s7256_s0 + $0x378] ss:$84 sps:$4 sm:$0xff]  }
 0x126   :  { %v4532_v58 = vpop.f32.mrb[24].mxu0  ;;  %5173 = vmatpush3.bf16.msra.mxu1 %v5679_v46  ;;  %5098 = vmatprep.subr.bf16.mxu0 %v5680_v49  ;;  %v5669_v49 = vld [vmem:[%s7256_s0 + $0x380] ss:$84 sps:$4 sm:$0xff]   ;;  %v5672_v51 = vld [vmem:[%s7256_s0 + $0x424] ss:$84 sps:$4 sm:$0xff]  }
 0x127   :  { %v4608_v0 = vpop.f32.mrb[24].mxu1  ;;  %v4533_v2 = vpop.f32.mrb[25].mxu0  ;;  %5174 = vmatprep.subr.bf16.mxu1 %v5688_v52 }
 0x128   :  { %v4534_v5 = vadd.f32 %v4533_v2, %v4532_v58  ;;  %v4609_v6 = vpop.f32.mrb[25].mxu1  ;;  %v4535_v7 = vpop.f32.mrb[26].mxu0 }
 0x129   :  { %v4610_v9 = vadd.f32 %v4609_v6, %v4608_v0  ;;  %v4611_v10 = vpop.f32.mrb[26].mxu1  ;;  %v4536_v11 = vpop.f32.mrb[27].mxu0  ;;  %5099 = vmatpush3.bf16.msra.mxu0 %v5681_v53  ;;  %v5674_v0 = vld [vmem:[%s7256_s0 + $0x42c] ss:$84 sps:$4 sm:$0xff]  }
 0x12a   :  { %v4537_v13 = vadd.f32 %v4536_v11, %v4535_v7  ;;  %v4612_v14 = vpop.f32.mrb[27].mxu1  ;;  %5175 = vmatpush3.bf16.msra.mxu1 %v5689_v57  ;;  %5100 = vmatprep.subr.bf16.mxu0 %v5690_v62 }
 0x12b   :  { %v6712_v16 = vadd.f32 %v4610_v9, %v4534_v5  ;;  %v4613_v18 = vadd.f32 %v4612_v14, %v4611_v10  ;;  %3371 = vmatmul.mubr.bf16.gmra.mrb[132].mxu0 %v5650_v55  ;;  %5176 = vmatprep.subr.bf16.mxu1 %v5698_v4  ;;  %v5676_v10 = vld [vmem:[%s7256_s0 + $0x420] ss:$84 sps:$4 sm:$0xff]   ;;  %v5677_v14 = vld [vmem:[%s7256_s0 + $0x428] ss:$84 sps:$4 sm:$0xff]  }
 0x12c   :  { %3484 = vmatmul.mubr.bf16.gmra.mrb[132].mxu1 %v5651_v59  ;;  %3378 = vmatprep.mubr.bf16.mxu0 %v5655_v61 }
 0x12d   :  { %v6720_v23 = vadd.f32 %v4613_v18, %v4537_v13  ;;  %3491 = vmatprep.mubr.bf16.mxu1 %v5657_v3  ;;  %5101 = vmatpush3.bf16.msra.mxu0 %v5691_v8 }
 0x12e   :  { %v4538_v25 = vpop.f32.mrb[28].mxu0  ;;  %5177 = vmatpush3.bf16.msra.mxu1 %v5699_v12  ;;  %5102 = vmatprep.subr.bf16.mxu0 %v5700_v15  ;;  %v5682_v15 = vld [vmem:[%s7256_s0 + $0x4cc] ss:$84 sps:$4 sm:$0xff]  }
 0x12f   :  { %v4614_v28 = vpop.f32.mrb[28].mxu1  ;;  %v4539_v29 = vpop.f32.mrb[29].mxu0  ;;  %5178 = vmatprep.subr.bf16.mxu1 %v5708_v20 }
 0x130   :  { %v4540_v32 = vadd.f32 %v4539_v29, %v4538_v25  ;;  %v4615_v33 = vpop.f32.mrb[29].mxu1  ;;  %v4541_v34 = vpop.f32.mrb[30].mxu0 }
 0x131   :  { %v4616_v38 = vadd.f32 %v4615_v33, %v4614_v28  ;;  %v4617_v39 = vpop.f32.mrb[30].mxu1  ;;  %v4542_v40 = vpop.f32.mrb[31].mxu0  ;;  %5103 = vmatpush3.bf16.msra.mxu0 %v5705_v21 }
 0x132   :  { %v4543_v42 = vadd.f32 %v4542_v40, %v4541_v34  ;;  %v4618_v43 = vpop.f32.mrb[31].mxu1  ;;  %5179 = vmatpush3.bf16.msra.mxu1 %v5709_v24  ;;  %5258 = vmatprep.subr.bf16.mxu0 %v6728_v27  ;;  %v5684_v24 = vld [vmem:[%s7256_s0 + $0x4d4] ss:$84 sps:$4 sm:$0xff]  }
 0x133   :  { %v6743_v44 = vadd.f32 %v4616_v38, %v4540_v32  ;;  %v4619_v45 = vadd.f32 %v4618_v43, %v4617_v39  ;;  %3379 = vmatmul.mubr.bf16.gmra.mrb[136].mxu0 %v5660_v30  ;;  %5294 = vmatprep.subr.bf16.mxu1 %v6728_v27 }
 0x134   :  { %3492 = vmatmul.mubr.bf16.gmra.mrb[136].mxu1 %v5661_v31  ;;  %3386 = vmatprep.mubr.bf16.mxu0 %v5663_v36  ;;  %v5686_v36 = vld [vmem:[%s7256_s0 + $0x4c8] ss:$84 sps:$4 sm:$0xff]  }
 0x135   :  { %v6746_v46 = vadd.f32 %v4619_v45, %v4543_v42  ;;  %3499 = vmatprep.mubr.bf16.mxu1 %v5665_v41  ;;  %v5687_v41 = vld [vmem:[%s7256_s0 + $0x4d0] ss:$84 sps:$4 sm:$0xff]   ;;  %v5692_v42 = vld [vmem:[%s7256_s0 + $0x574] ss:$84 sps:$4 sm:$0xff]  }
 0x136   :  { %v4544_v48 = vpop.f32.mrb[32].mxu0 }
 0x137   :  { %v4620_v52 = vpop.f32.mrb[32].mxu1  ;;  %v4545_v53 = vpop.f32.mrb[33].mxu0 }
 0x138   :  { %v4546_v55 = vadd.f32 %v4545_v53, %v4544_v48  ;;  %v4621_v57 = vpop.f32.mrb[33].mxu1  ;;  %v4547_v58 = vpop.f32.mrb[34].mxu0  ;;  %v5694_v48 = vld [vmem:[%s7256_s0 + $0x57c] ss:$84 sps:$4 sm:$0xff]  }
 0x139   :  { %v4622_v59 = vadd.f32 %v4621_v57, %v4620_v52  ;;  %v4623_v61 = vpop.f32.mrb[34].mxu1  ;;  %v4548_v62 = vpop.f32.mrb[35].mxu0 }
 0x13a   :  { %v4549_v2 = vadd.f32 %v4548_v62, %v4547_v58  ;;  %v4624_v3 = vpop.f32.mrb[35].mxu1 }
 0x13b   :  { %v6760_v4 = vadd.f32 %v4622_v59, %v4546_v55  ;;  %v4625_v5 = vadd.f32 %v4624_v3, %v4623_v61  ;;  %3387 = vmatmul.mubr.bf16.gmra.mrb[140].mxu0 %v5668_v47 }
 0x13c   :  { %3500 = vmatmul.mubr.bf16.gmra.mrb[140].mxu1 %v5669_v49  ;;  %3394 = vmatprep.mubr.bf16.mxu0 %v5672_v51 }
 0x13d   :  { %v6762_v6 = vadd.f32 %v4625_v5, %v4549_v2  ;;  %3507 = vmatprep.mubr.bf16.mxu1 %v5674_v0  ;;  %v5701_v5 = vld [vmem:[%s7256_s0 + $0x61c] ss:$84 sps:$4 sm:$0xff]  }
 0x13e   :  { %v4550_v7 = vpop.f32.mrb[36].mxu0 }
 0x13f   :  { %v4626_v8 = vpop.f32.mrb[36].mxu1  ;;  %v4551_v9 = vpop.f32.mrb[37].mxu0 }
 0x140   :  { %v4552_v11 = vadd.f32 %v4551_v9, %v4550_v7  ;;  %v4627_v12 = vpop.f32.mrb[37].mxu1  ;;  %v4553_v13 = vpop.f32.mrb[38].mxu0 }
 0x141   :  { %v4628_v18 = vadd.f32 %v4627_v12, %v4626_v8  ;;  %v4629_v20 = vpop.f32.mrb[38].mxu1  ;;  %v4554_v21 = vpop.f32.mrb[39].mxu0 }
 0x142   :  { %v4555_v25 = vadd.f32 %v4554_v21, %v4553_v13  ;;  %v4630_v28 = vpop.f32.mrb[39].mxu1 }
 0x143   :  { %v6776_v29 = vadd.f32 %v4628_v18, %v4552_v11  ;;  %v4631_v30 = vadd.f32 %v4630_v28, %v4629_v20  ;;  %3395 = vmatmul.mubr.bf16.gmra.mrb[144].mxu0 %v5676_v10  ;;  %v5703_v10 = vld [vmem:[%s7256_s0 + $0x624] ss:$84 sps:$4 sm:$0xff]  }
 0x144   :  { %3508 = vmatmul.mubr.bf16.gmra.mrb[144].mxu1 %v5677_v14  ;;  %3402 = vmatprep.mubr.bf16.mxu0 %v5682_v15 }
 0x145   :  { %v6778_v31 = vadd.f32 %v4631_v30, %v4555_v25  ;;  %3515 = vmatprep.mubr.bf16.mxu1 %v5684_v24 }
 0x146   :  { %v4648_v32 = vpop.f32.mrb[40].mxu0 }
 0x147   :  { %v4649_v33 = vpop.f32.mrb[41].mxu0  ;;  %v4724_v34 = vpop.f32.mrb[40].mxu1 }
 0x148   :  { %v4650_v38 = vadd.f32 %v4649_v33, %v4648_v32  ;;  %v4651_v39 = vpop.f32.mrb[42].mxu0  ;;  %v4725_v40 = vpop.f32.mrb[41].mxu1  ;;  %v5712_v33 = vld [vmem:[%s7256_s0 + $0x44] ss:$84 sps:$4 sm:$0xff]  }
 0x149   :  { %v4652_v43 = vpop.f32.mrb[43].mxu0  ;;  %v4726_v45 = vadd.f32 %v4725_v40, %v4724_v34  ;;  %v4727_v47 = vpop.f32.mrb[42].mxu1 }
 0x14a   :  { %v2897_v49 = vadd.f32 %v4650_v38, %v6535_v63  ;;  %v4653_v51 = vadd.f32 %v4652_v43, %v4651_v39  ;;  %v4728_v52 = vpop.f32.mrb[43].mxu1  ;;  %v5696_v63 = vld [vmem:[%s7256_s0 + $0x570] ss:$84 sps:$4 sm:$0xff]   ;;  %v5715_v39 = vld [vmem:[%s7256_s0 + $0x4c] ss:$84 sps:$4 sm:$0xff]  }
 0x14b   :  { %v4729_v53 = vadd.f32 %v4728_v52, %v4727_v47  ;;  %3403 = vmatmul.mubr.bf16.gmra.mrb[148].mxu0 %v5686_v36 }
 0x14c   :  { %v2900_v55 = vadd.f32 %v4653_v51, %v6537_v1  ;;  %v6794_v57 = vadd.f32 %v4726_v45, %v2897_v49  ;;  %3516 = vmatmul.mubr.bf16.gmra.mrb[148].mxu1 %v5687_v41  ;;  %3410 = vmatprep.mubr.bf16.mxu0 %v5692_v42  ;;  %v5697_v1 = vld [vmem:[%s7256_s0 + $0x578] ss:$84 sps:$4 sm:$0xff]  }
 0x14d   :  { %3523 = vmatprep.mubr.bf16.mxu1 %v5694_v48 }
 0x14e   :  { %v6796_v58 = vadd.f32 %v4729_v53, %v2900_v55  ;;  %v4654_v59 = vpop.f32.mrb[44].mxu0 }
 0x14f   :  { %v4655_v61 = vpop.f32.mrb[45].mxu0  ;;  %v4730_v62 = vpop.f32.mrb[44].mxu1 }
 0x150   :  { %v4656_v0 = vadd.f32 %v4655_v61, %v4654_v59  ;;  %v4657_v2 = vpop.f32.mrb[46].mxu0  ;;  %v4731_v3 = vpop.f32.mrb[45].mxu1 }
 0x151   :  { %v4658_v7 = vpop.f32.mrb[47].mxu0  ;;  %v4732_v8 = vadd.f32 %v4731_v3, %v4730_v62  ;;  %v4733_v9 = vpop.f32.mrb[46].mxu1 }
 0x152   :  { %v2905_v11 = vadd.f32 %v4656_v0, %v6551_v17  ;;  %v4659_v12 = vadd.f32 %v4658_v7, %v4657_v2  ;;  %v4734_v13 = vpop.f32.mrb[47].mxu1  ;;  %v5706_v17 = vld [vmem:[%s7256_s0 + $0x618] ss:$84 sps:$4 sm:$0xff]   ;;  %v5719_v2 = vld [vmem:[%s7256_s0 + $0xf4] ss:$84 sps:$4 sm:$0xff]  }
 0x153   :  { %v4735_v14 = vadd.f32 %v4734_v13, %v4733_v9  ;;  %3411 = vmatmul.mubr.bf16.gmra.mrb[152].mxu0 %v5696_v63  ;;  %v5717_v0 = vld [vmem:[%s7256_s0 + $0xec] ss:$84 sps:$4 sm:$0xff]  }
 0x154   :  { %v2908_v15 = vadd.f32 %v4659_v12, %v6553_v19  ;;  %v6812_v18 = vadd.f32 %v4732_v8, %v2905_v11  ;;  %3524 = vmatmul.mubr.bf16.gmra.mrb[152].mxu1 %v5697_v1  ;;  %3418 = vmatprep.mubr.bf16.mxu0 %v5701_v5  ;;  %v5707_v19 = vld [vmem:[%s7256_s0 + $0x620] ss:$84 sps:$4 sm:$0xff]   ;;  %v5723_v7 = vld [vmem:[%s7255_s1 + $0x508] sm:$0xff]  }
 0x155   :  { %3531 = vmatprep.mubr.bf16.mxu1 %v5703_v10 }
 0x156   :  { %v6814_v20 = vadd.f32 %v4735_v14, %v2908_v15  ;;  %v4660_v21 = vpop.f32.mrb[48].mxu0 }
 0x157   :  { %v4661_v24 = vpop.f32.mrb[49].mxu0  ;;  %v4736_v25 = vpop.f32.mrb[48].mxu1 }
 0x158   :  { %v4662_v28 = vadd.f32 %v4661_v24, %v4660_v21  ;;  %v4663_v30 = vpop.f32.mrb[50].mxu0  ;;  %v4737_v32 = vpop.f32.mrb[49].mxu1 }
 0x159   :  { %v4664_v34 = vpop.f32.mrb[51].mxu0  ;;  %v4738_v36 = vadd.f32 %v4737_v32, %v4736_v25  ;;  %v4739_v38 = vpop.f32.mrb[50].mxu1  ;;  %v5722_v25 = vld [vmem:[%s7256_s0 + $0xf0] ss:$84 sps:$4 sm:$0xff]  }
 0x15a   :  { %v2913_v40 = vadd.f32 %v4662_v28, %v6567_v35  ;;  %v4665_v41 = vadd.f32 %v4664_v34, %v4663_v30  ;;  %v4740_v42 = vpop.f32.mrb[51].mxu1  ;;  %v5710_v35 = vld [vmem:[%s7256_s0 + $0x40] ss:$84 sps:$4 sm:$0xff]   ;;  %v5726_v32 = vld [vmem:[%s7256_s0 + $0x19c] ss:$84 sps:$4 sm:$0xff]  }
 0x15b   :  { %v4741_v43 = vadd.f32 %v4740_v42, %v4739_v38  ;;  %3419 = vmatmul.mubr.bf16.gmra.mrb[156].mxu0 %v5706_v17  ;;  %v5750_v42 = vld [vmem:[%s7255_s1 + $0x520] sm:$0xff]  }
 0x15c   :  { %v2916_v45 = vadd.f32 %v4665_v41, %v6569_v37  ;;  %v6830_v47 = vadd.f32 %v4738_v36, %v2913_v40  ;;  %3532 = vmatmul.mubr.bf16.gmra.mrb[156].mxu1 %v5707_v19  ;;  %3572 = vmatprep.mubr.bf16.mxu0 %v5712_v33  ;;  %v5713_v37 = vld [vmem:[%s7256_s0 + $0x48] ss:$84 sps:$4 sm:$0xff]  }
 0x15d   :  { %3685 = vmatprep.mubr.bf16.mxu1 %v5715_v39  ;;  %v5737_v36 = vld [vmem:[%s7255_s1 + $0x518] sm:$0xff]  }
 0x15e   :  { %v6832_v48 = vadd.f32 %v4741_v43, %v2916_v45  ;;  %v4666_v49 = vpop.f32.mrb[52].mxu0 }
 0x15f   :  { %v4667_v51 = vpop.f32.mrb[53].mxu0  ;;  %v4742_v52 = vpop.f32.mrb[52].mxu1 }
 0x160   :  { %v4668_v53 = vadd.f32 %v4667_v51, %v4666_v49  ;;  %v4669_v55 = vpop.f32.mrb[54].mxu0  ;;  %v4743_v59 = vpop.f32.mrb[53].mxu1 }
 0x161   :  { %v4670_v61 = vpop.f32.mrb[55].mxu0  ;;  %v4744_v62 = vadd.f32 %v4743_v59, %v4742_v52  ;;  %v4745_v63 = vpop.f32.mrb[54].mxu1 }
 0x162   :  { %v2921_v3 = vadd.f32 %v4668_v53, %v6592_v56  ;;  %v4671_v1 = vadd.f32 %v4670_v61, %v4669_v55  ;;  %v4746_v5 = vpop.f32.mrb[55].mxu1  ;;  %v5730_v56 = vld [vmem:[%s7255_s1 + $0x510] sm:$0xff]   ;;  %v5733_v61 = vld [vmem:[%s7256_s0 + $0x244] ss:$84 sps:$4 sm:$0xff]  }
 0x163   :  { %v4747_v8 = vadd.f32 %v4746_v5, %v4745_v63  ;;  %3573 = vmatmul.mubr.bf16.vlgmr.msra.gmra.mrb[160].mxu0 %v5710_v35  ;;  %v5729_v35 = vld [vmem:[%s7256_s0 + $0x198] ss:$84 sps:$4 sm:$0xff]   ;;  %v5731_v53 = vld [vmem:[%s7256_s0 + $0x23c] ss:$84 sps:$4 sm:$0xff]  }
 0x164   :  { %v2924_v9 = vadd.f32 %v4671_v1, %v6600_v60  ;;  %v6851_v10 = vadd.f32 %v4744_v62, %v2921_v3  ;;  %3686 = vmatmul.mubr.bf16.vlgmr.msra.gmra.mrb[160].mxu1 %v5713_v37  ;;  %5259 = vmatpush3.bf16.msra.mxu0 %v6728_v27  ;;  %v5721_v60 = vld [vmem:[%s7256_s0 + $0xe8] ss:$84 sps:$4 sm:$0xff]  }
 0x165   :  { %3580 = vmatprep.mubr.bf16.mxu0 %v5717_v0  ;;  %3693 = vmatprep.mubr.bf16.mxu1 %v5719_v2  ;;  %v5757_v2 = vld [vmem:[%s7255_s1 + $0x528] sm:$0xff]  }
 0x166   :  { %v6857_v11 = vadd.f32 %v4747_v8, %v2924_v9  ;;  %v4672_v12 = vpop.f32.mrb[56].mxu0  ;;  %5302 = vmatpush3.bf16.msra.mxu1 %v6728_v27  ;;  %5260 = vmatprep.subr.bf16.mxu0 %v5723_v7  ;;  %v5724_v27 = vld [vmem:[%s7256_s0 + $0x194] ss:$84 sps:$4 sm:$0xff]  }
 0x167   :  { %v4673_v13 = vpop.f32.mrb[57].mxu0  ;;  %v4748_v14 = vpop.f32.mrb[56].mxu1  ;;  %5295 = vmatprep.subr.bf16.mxu1 %v5723_v7  ;;  %v5764_v8 = vld [vmem:[%s7255_s1 + $0x530] sm:$0xff]  }
 0x168   :  { %v4674_v15 = vadd.f32 %v4673_v13, %v4672_v12  ;;  %v4675_v21 = vpop.f32.mrb[58].mxu0  ;;  %v4749_v24 = vpop.f32.mrb[57].mxu1  ;;  %5261 = vmatpush3.bf16.msra.mxu0 %v5723_v7 }
 0x169   :  { %v4676_v17 = vpop.f32.mrb[59].mxu0  ;;  %v4750_v28 = vadd.f32 %v4749_v24, %v4748_v14  ;;  %v4751_v30 = vpop.f32.mrb[58].mxu1  ;;  %5262 = vmatprep.subr.bf16.mxu0 %v5730_v56 }
 0x16a   :  { %v2929_v19 = vadd.f32 %v4674_v15, %v6632_v22  ;;  %v4677_v33 = vadd.f32 %v4676_v17, %v4675_v21  ;;  %v4752_v34 = vpop.f32.mrb[59].mxu1  ;;  %5303 = vmatpush3.bf16.msra.mxu1 %v5723_v7  ;;  %v5738_v15 = vld [vmem:[%s7256_s0 + $0x2e4] ss:$84 sps:$4 sm:$0xff]  }
 0x16b   :  { %v4753_v38 = vadd.f32 %v4752_v34, %v4751_v30  ;;  %3581 = vmatmul.mubr.bf16.gmra.mrb[164].mxu0 %v5721_v60  ;;  %5296 = vmatprep.subr.bf16.mxu1 %v5730_v56  ;;  %v5736_v60 = vld [vmem:[%s7256_s0 + $0x240] ss:$84 sps:$4 sm:$0xff]  }
 0x16c   :  { %v2932_v39 = vadd.f32 %v4677_v33, %v6640_v26  ;;  %v6877_v40 = vadd.f32 %v4750_v28, %v2929_v19  ;;  %3694 = vmatmul.mubr.bf16.gmra.mrb[164].mxu1 %v5722_v25  ;;  %3588 = vmatprep.mubr.bf16.mxu0 %v5724_v27  ;;  %v5728_v26 = vld [vmem:[%s7256_s0 + $0x190] ss:$84 sps:$4 sm:$0xff]   ;;  %v5740_v27 = vld [vmem:[%s7256_s0 + $0x2ec] ss:$84 sps:$4 sm:$0xff]  }
 0x16d   :  { %3701 = vmatprep.mubr.bf16.mxu1 %v5726_v32  ;;  %5263 = vmatpush3.bf16.msra.mxu0 %v5730_v56  ;;  %v5771_v32 = vld [vmem:[%s7255_s1 + $0x538] sm:$0xff]  }
 0x16e   :  { %v6879_v41 = vadd.f32 %v4753_v38, %v2932_v39  ;;  %v4678_v22 = vpop.f32.mrb[60].mxu0  ;;  %5304 = vmatpush3.bf16.msra.mxu1 %v5730_v56  ;;  %5264 = vmatprep.subr.bf16.mxu0 %v5737_v36 }
 0x16f   :  { %v4679_v43 = vpop.f32.mrb[61].mxu0  ;;  %v4754_v45 = vpop.f32.mrb[60].mxu1  ;;  %5297 = vmatprep.subr.bf16.mxu1 %v5737_v36 }
 0x170   :  { %v4680_v49 = vadd.f32 %v4679_v43, %v4678_v22  ;;  %v4681_v51 = vpop.f32.mrb[62].mxu0  ;;  %v4755_v52 = vpop.f32.mrb[61].mxu1  ;;  %v5742_v22 = vld [vmem:[%s7256_s0 + $0x2e0] ss:$84 sps:$4 sm:$0xff]  }
 0x171   :  { %v4682_v55 = vpop.f32.mrb[63].mxu0  ;;  %v4756_v59 = vadd.f32 %v4755_v52, %v4754_v45  ;;  %v4757_v37 = vpop.f32.mrb[62].mxu1  ;;  %5265 = vmatpush3.bf16.msra.mxu0 %v5737_v36  ;;  %v5743_v45 = vld [vmem:[%s7256_s0 + $0x2e8] ss:$84 sps:$4 sm:$0xff]  }
 0x172   :  { %v2937_v62 = vadd.f32 %v4680_v49, %v6672_v50  ;;  %v4683_v63 = vadd.f32 %v4682_v55, %v4681_v51  ;;  %v4758_v0 = vpop.f32.mrb[63].mxu1  ;;  %5305 = vmatpush3.bf16.msra.mxu1 %v5737_v36  ;;  %5266 = vmatprep.subr.bf16.mxu0 %v5750_v42 }
 0x173   :  { %v4759_v3 = vadd.f32 %v4758_v0, %v4757_v37  ;;  %3589 = vmatmul.mubr.bf16.gmra.mrb[168].mxu0 %v5728_v26  ;;  %5298 = vmatprep.subr.bf16.mxu1 %v5750_v42  ;;  %v5744_v26 = vld [vmem:[%s7256_s0 + $0x38c] ss:$84 sps:$4 sm:$0xff]  }
 0x174   :  { %v2940_v1 = vadd.f32 %v4683_v63, %v6680_v54  ;;  %v6901_v5 = vadd.f32 %v4756_v59, %v2937_v62  ;;  %3702 = vmatmul.mubr.bf16.gmra.mrb[168].mxu1 %v5729_v35  ;;  %3596 = vmatprep.mubr.bf16.mxu0 %v5731_v53  ;;  %v5735_v54 = vld [vmem:[%s7256_s0 + $0x238] ss:$84 sps:$4 sm:$0xff]   ;;  %v5746_v35 = vld [vmem:[%s7256_s0 + $0x394] ss:$84 sps:$4 sm:$0xff]  }
 0x175   :  { %3709 = vmatprep.mubr.bf16.mxu1 %v5733_v61  ;;  %5267 = vmatpush3.bf16.msra.mxu0 %v5750_v42 }
 0x176   :  { %v6903_v50 = vadd.f32 %v4759_v3, %v2940_v1  ;;  %v4684_v7 = vpop.f32.mrb[64].mxu0  ;;  %5306 = vmatpush3.bf16.msra.mxu1 %v5750_v42  ;;  %5268 = vmatprep.subr.bf16.mxu0 %v5757_v2 }
 0x177   :  { %v4685_v9 = vpop.f32.mrb[65].mxu0  ;;  %v4760_v56 = vpop.f32.mrb[64].mxu1  ;;  %5299 = vmatprep.subr.bf16.mxu1 %v5757_v2 }
 0x178   :  { %v4686_v12 = vadd.f32 %v4685_v9, %v4684_v7  ;;  %v4687_v13 = vpop.f32.mrb[66].mxu0  ;;  %v4761_v14 = vpop.f32.mrb[65].mxu1  ;;  %v5751_v9 = vld [vmem:[%s7256_s0 + $0x434] ss:$84 sps:$4 sm:$0xff]  }
 0x179   :  { %v4688_v21 = vpop.f32.mrb[67].mxu0  ;;  %v4762_v24 = vadd.f32 %v4761_v14, %v4760_v56  ;;  %v4763_v25 = vpop.f32.mrb[66].mxu1  ;;  %5269 = vmatpush3.bf16.msra.mxu0 %v5757_v2 }
 0x17a   :  { %v2945_v17 = vadd.f32 %v4686_v12, %v6712_v16  ;;  %v4689_v28 = vadd.f32 %v4688_v21, %v4687_v13  ;;  %v4764_v30 = vpop.f32.mrb[67].mxu1  ;;  %5307 = vmatpush3.bf16.msra.mxu1 %v5757_v2  ;;  %5270 = vmatprep.subr.bf16.mxu0 %v5764_v8  ;;  %v5753_v13 = vld [vmem:[%s7256_s0 + $0x43c] ss:$84 sps:$4 sm:$0xff]  }
 0x17b   :  { %v4765_v19 = vadd.f32 %v4764_v30, %v4763_v25  ;;  %3597 = vmatmul.mubr.bf16.gmra.mrb[172].mxu0 %v5735_v54  ;;  %5300 = vmatprep.subr.bf16.mxu1 %v5764_v8 }
 0x17c   :  { %v2948_v33 = vadd.f32 %v4689_v28, %v6720_v23  ;;  %v6925_v34 = vadd.f32 %v4762_v24, %v2945_v17  ;;  %3710 = vmatmul.mubr.bf16.gmra.mrb[172].mxu1 %v5736_v60  ;;  %3604 = vmatprep.mubr.bf16.mxu0 %v5738_v15 }
 0x17d   :  { %3717 = vmatprep.mubr.bf16.mxu1 %v5740_v27  ;;  %5271 = vmatpush3.bf16.msra.mxu0 %v5764_v8 }
 0x17e   :  { %v6927_v16 = vadd.f32 %v4765_v19, %v2948_v33  ;;  %v4690_v36 = vpop.f32.mrb[68].mxu0  ;;  %5308 = vmatpush3.bf16.msra.mxu1 %v5764_v8  ;;  %5272 = vmatprep.subr.bf16.mxu0 %v5771_v32 }
 0x17f   :  { %v4691_v38 = vpop.f32.mrb[69].mxu0  ;;  %v4766_v39 = vpop.f32.mrb[68].mxu1  ;;  %5301 = vmatprep.subr.bf16.mxu1 %v5771_v32 }
 0x180   :  { %v4692_v42 = vadd.f32 %v4691_v38, %v4690_v36  ;;  %v4693_v23 = vpop.f32.mrb[70].mxu0  ;;  %v4767_v43 = vpop.f32.mrb[69].mxu1  ;;  %v5758_v36 = vld [vmem:[%s7256_s0 + $0x4dc] ss:$84 sps:$4 sm:$0xff]  }
 0x181   :  { %v4694_v49 = vpop.f32.mrb[71].mxu0  ;;  %v4768_v51 = vadd.f32 %v4767_v43, %v4766_v39  ;;  %v4769_v52 = vpop.f32.mrb[70].mxu1  ;;  %5273 = vmatpush3.bf16.msra.mxu0 %v5771_v32 }
 0x182   :  { %v2953_v53 = vadd.f32 %v4692_v42, %v6743_v44  ;;  %v4695_v55 = vadd.f32 %v4694_v49, %v4693_v23  ;;  %v4770_v59 = vpop.f32.mrb[71].mxu1  ;;  %5309 = vmatpush3.bf16.msra.mxu1 %v5771_v32  ;;  %v5748_v44 = vld [vmem:[%s7256_s0 + $0x388] ss:$84 sps:$4 sm:$0xff]   ;;  %v5760_v42 = vld [vmem:[%s7256_s0 + $0x4e4] ss:$84 sps:$4 sm:$0xff]  }
 0x183   :  { %v4771_v37 = vadd.f32 %v4770_v59, %v4769_v52  ;;  %3605 = vmatmul.mubr.bf16.gmra.mrb[176].mxu0 %v5742_v22 }
 0x184   :  { %v2956_v61 = vadd.f32 %v4695_v55, %v6746_v46  ;;  %v6943_v62 = vadd.f32 %v4768_v51, %v2953_v53  ;;  %3718 = vmatmul.mubr.bf16.gmra.mrb[176].mxu1 %v5743_v45  ;;  %3612 = vmatprep.mubr.bf16.mxu0 %v5744_v26  ;;  %v5749_v46 = vld [vmem:[%s7256_s0 + $0x390] ss:$84 sps:$4 sm:$0xff]  }
 0x185   :  { %3725 = vmatprep.mubr.bf16.mxu1 %v5746_v35 }
 0x186   :  { %v6945_v63 = vadd.f32 %v4771_v37, %v2956_v61  ;;  %v4696_v0 = vpop.f32.mrb[72].mxu0 }
 0x187   :  { %v4697_v2 = vpop.f32.mrb[73].mxu0  ;;  %v4772_v3 = vpop.f32.mrb[72].mxu1 }
 0x188   :  { %v4698_v1 = vadd.f32 %v4697_v2, %v4696_v0  ;;  %v4699_v7 = vpop.f32.mrb[74].mxu0  ;;  %v4773_v8 = vpop.f32.mrb[73].mxu1  ;;  %v5765_v0 = vld [vmem:[%s7256_s0 + $0x584] ss:$84 sps:$4 sm:$0xff]  }
 0x189   :  { %v4700_v56 = vpop.f32.mrb[75].mxu0  ;;  %v4774_v54 = vadd.f32 %v4773_v8, %v4772_v3  ;;  %v4775_v12 = vpop.f32.mrb[74].mxu1 }
 0x18a   :  { %v2961_v14 = vadd.f32 %v4698_v1, %v6760_v4  ;;  %v4701_v60 = vadd.f32 %v4700_v56, %v4699_v7  ;;  %v4776_v15 = vpop.f32.mrb[75].mxu1  ;;  %v5755_v4 = vld [vmem:[%s7256_s0 + $0x430] ss:$84 sps:$4 sm:$0xff]   ;;  %v5767_v1 = vld [vmem:[%s7256_s0 + $0x58c] ss:$84 sps:$4 sm:$0xff]  }
 0x18b   :  { %v4777_v21 = vadd.f32 %v4776_v15, %v4775_v12  ;;  %3613 = vmatmul.mubr.bf16.gmra.mrb[180].mxu0 %v5748_v44 }
 0x18c   :  { %v2964_v24 = vadd.f32 %v4701_v60, %v6762_v6  ;;  %v6961_v25 = vadd.f32 %v4774_v54, %v2961_v14  ;;  %3726 = vmatmul.mubr.bf16.gmra.mrb[180].mxu1 %v5749_v46  ;;  %3620 = vmatprep.mubr.bf16.mxu0 %v5751_v9  ;;  %v5756_v6 = vld [vmem:[%s7256_s0 + $0x438] ss:$84 sps:$4 sm:$0xff]  }
 0x18d   :  { %3733 = vmatprep.mubr.bf16.mxu1 %v5753_v13 }
 0x18e   :  { %v6963_v27 = vadd.f32 %v4777_v21, %v2964_v24  ;;  %v4702_v17 = vpop.f32.mrb[76].mxu0 }
 0x18f   :  { %v4703_v28 = vpop.f32.mrb[77].mxu0  ;;  %v4778_v30 = vpop.f32.mrb[76].mxu1 }
 0x190   :  { %v4704_v32 = vadd.f32 %v4703_v28, %v4702_v17  ;;  %v4705_v19 = vpop.f32.mrb[78].mxu0  ;;  %v4779_v33 = vpop.f32.mrb[77].mxu1  ;;  %v5772_v17 = vld [vmem:[%s7256_s0 + $0x62c] ss:$84 sps:$4 sm:$0xff]  }
 0x191   :  { %v4706_v38 = vpop.f32.mrb[79].mxu0  ;;  %v4780_v39 = vadd.f32 %v4779_v33, %v4778_v30  ;;  %v4781_v22 = vpop.f32.mrb[78].mxu1 }
 0x192   :  { %v2969_v23 = vadd.f32 %v4704_v32, %v6776_v29  ;;  %v4707_v43 = vadd.f32 %v4706_v38, %v4705_v19  ;;  %v4782_v45 = vpop.f32.mrb[79].mxu1  ;;  %v5762_v29 = vld [vmem:[%s7256_s0 + $0x4d8] ss:$84 sps:$4 sm:$0xff]   ;;  %v5774_v32 = vld [vmem:[%s7256_s0 + $0x634] ss:$84 sps:$4 sm:$0xff]  }
 0x193   :  { %v4783_v26 = vadd.f32 %v4782_v45, %v4781_v22  ;;  %3621 = vmatmul.mubr.bf16.gmra.mrb[184].mxu0 %v5755_v4 }
 0x194   :  { %v2972_v49 = vadd.f32 %v4707_v43, %v6778_v31  ;;  %v6979_v51 = vadd.f32 %v4780_v39, %v2969_v23  ;;  %3734 = vmatmul.mubr.bf16.gmra.mrb[184].mxu1 %v5756_v6  ;;  %3628 = vmatprep.mubr.bf16.mxu0 %v5758_v36  ;;  %v5763_v31 = vld [vmem:[%s7256_s0 + $0x4e0] ss:$84 sps:$4 sm:$0xff]  }
 0x195   :  { %3741 = vmatprep.mubr.bf16.mxu1 %v5760_v42 }
 0x196   :  { %v6981_v52 = vadd.f32 %v4783_v26, %v2972_v49  ;;  %v4800_v35 = vpop.f32.mrb[80].mxu0 }
 0x197   :  { %v4801_v53 = vpop.f32.mrb[81].mxu0  ;;  %v4876_v55 = vpop.f32.mrb[80].mxu1 }
 0x198   :  { %v4802_v59 = vadd.f32 %v4801_v53, %v4800_v35  ;;  %v4803_v37 = vpop.f32.mrb[82].mxu0  ;;  %v4877_v61 = vpop.f32.mrb[81].mxu1  ;;  %v5778_v35 = vld [vmem:[%s7256_s0 + $0x50] ss:$84 sps:$4 sm:$0xff]  }
 0x199   :  { %v4804_v2 = vpop.f32.mrb[83].mxu0  ;;  %v4878_v3 = vadd.f32 %v4877_v61, %v4876_v55  ;;  %v4879_v44 = vpop.f32.mrb[82].mxu1 }
 0x19a   :  { %v3123_v7 = vadd.f32 %v4802_v59, %v6794_v57  ;;  %v4805_v8 = vadd.f32 %v4804_v2, %v4803_v37  ;;  %v4880_v46 = vpop.f32.mrb[83].mxu1  ;;  %v5769_v57 = vld [vmem:[%s7256_s0 + $0x580] ss:$84 sps:$4 sm:$0xff]  }
 0x19b   :  { %v4881_v9 = vadd.f32 %v4880_v46, %v4879_v44  ;;  %3629 = vmatmul.mubr.bf16.gmra.mrb[188].mxu0 %v5762_v29  ;;  %v5779_v59 = vld [vmem:[%s7256_s0 + $0x440] ss:$84 sps:$4 sm:$0xff]  }
 0x19c   :  { %v3126_v56 = vadd.f32 %v4805_v8, %v6796_v58  ;;  %v6997_v54 = vadd.f32 %v4878_v3, %v3123_v7  ;;  %3742 = vmatmul.mubr.bf16.gmra.mrb[188].mxu1 %v5763_v31  ;;  %3636 = vmatprep.mubr.bf16.mxu0 %v5765_v0  ;;  %v5770_v58 = vld [vmem:[%s7256_s0 + $0x588] ss:$84 sps:$4 sm:$0xff]  }
 0x19d   :  { %3749 = vmatprep.mubr.bf16.mxu1 %v5767_v1 }
 0x19e   :  { %v6999_v12 = vadd.f32 %v4881_v9, %v3126_v56  ;;  %v4806_v13 = vpop.f32.mrb[84].mxu0 }
 0x19f   :  { %v4807_v14 = vpop.f32.mrb[85].mxu0  ;;  %v4882_v60 = vpop.f32.mrb[84].mxu1 }
 0x1a0   :  { %v4808_v15 = vadd.f32 %v4807_v14, %v4806_v13  ;;  %v4809_v21 = vpop.f32.mrb[86].mxu0  ;;  %v4883_v24 = vpop.f32.mrb[85].mxu1  ;;  %v5782_v13 = vld [vmem:[%s7256_s0 + $0x1a0] ss:$84 sps:$4 sm:$0xff]  }
 0x1a1   :  { %v4810_v28 = vpop.f32.mrb[87].mxu0  ;;  %v4884_v30 = vadd.f32 %v4883_v24, %v4882_v60  ;;  %v4885_v4 = vpop.f32.mrb[86].mxu1 }
 0x1a2   :  { %v3131_v19 = vadd.f32 %v4808_v15, %v6812_v18  ;;  %v4811_v33 = vadd.f32 %v4810_v28, %v4809_v21  ;;  %v4886_v6 = vpop.f32.mrb[87].mxu1  ;;  %v5776_v18 = vld [vmem:[%s7256_s0 + $0x628] ss:$84 sps:$4 sm:$0xff]   ;;  %v5783_v15 = vld [vmem:[%s7256_s0 + $0x590] ss:$84 sps:$4 sm:$0xff]  }
 0x1a3   :  { %v4887_v36 = vadd.f32 %v4886_v6, %v4885_v4  ;;  %3637 = vmatmul.mubr.bf16.gmra.mrb[192].mxu0 %v5769_v57 }
 0x1a4   :  { %v3134_v38 = vadd.f32 %v4811_v33, %v6814_v20  ;;  %v7015_v39 = vadd.f32 %v4884_v30, %v3131_v19  ;;  %3750 = vmatmul.mubr.bf16.gmra.mrb[192].mxu1 %v5770_v58  ;;  %3644 = vmatprep.mubr.bf16.mxu0 %v5772_v17  ;;  %v5777_v20 = vld [vmem:[%s7256_s0 + $0x630] ss:$84 sps:$4 sm:$0xff]  }
 0x1a5   :  { %3757 = vmatprep.mubr.bf16.mxu1 %v5774_v32 }
 0x1a6   :  { %v7017_v22 = vadd.f32 %v4887_v36, %v3134_v38  ;;  %v4812_v42 = vpop.f32.mrb[88].mxu0 }
 0x1a7   :  { %v4813_v23 = vpop.f32.mrb[89].mxu0  ;;  %v4888_v43 = vpop.f32.mrb[88].mxu1 }
 0x1a8   :  { %v4814_v45 = vadd.f32 %v4813_v23, %v4812_v42  ;;  %v4815_v26 = vpop.f32.mrb[90].mxu0  ;;  %v4889_v49 = vpop.f32.mrb[89].mxu1  ;;  %v5786_v42 = vld [vmem:[%s7256_s0 + $0x2f0] ss:$84 sps:$4 sm:$0xff]  }
 0x1a9   :  { %v4816_v53 = vpop.f32.mrb[91].mxu0  ;;  %v4890_v55 = vadd.f32 %v4889_v49, %v4888_v43  ;;  %v4891_v29 = vpop.f32.mrb[90].mxu1 }
 0x1aa   :  { %v3139_v37 = vadd.f32 %v4814_v45, %v6830_v47  ;;  %v4817_v61 = vadd.f32 %v4816_v53, %v4815_v26  ;;  %v4892_v31 = vpop.f32.mrb[91].mxu1  ;;  %v5780_v47 = vld [vmem:[%s7256_s0 + $0xf8] ss:$84 sps:$4 sm:$0xff]  }
 0x1ab   :  { %v4893_v0 = vadd.f32 %v4892_v31, %v4891_v29  ;;  %3645 = vmatmul.mubr.bf16.gmra.mrb[196].mxu0 %v5776_v18 }
 0x1ac   :  { %v3142_v2 = vadd.f32 %v4817_v61, %v6832_v48  ;;  %v7033_v3 = vadd.f32 %v4890_v55, %v3139_v37  ;;  %3758 = vmatmul.mubr.bf16.gmra.mrb[196].mxu1 %v5777_v20  ;;  %5274 = vmatprep.mubr.bf16.mxu0 %v5778_v35  ;;  %v5781_v48 = vld [vmem:[%s7256_s0 + $0x4e8] ss:$84 sps:$4 sm:$0xff]   ;;  %v5787_v61 = vld [vmem:[%s7256_s0 + $0x398] ss:$84 sps:$4 sm:$0xff]  }
 0x1ad   :  { %5286 = vmatprep.mubr.bf16.mxu1 %v5779_v59 }
 0x1ae   :  { %v7035_v44 = vadd.f32 %v4893_v0, %v3142_v2  ;;  %v4818_v1 = vpop.f32.mrb[92].mxu0 }
 0x1af   :  { %v4819_v7 = vpop.f32.mrb[93].mxu0  ;;  %v4894_v8 = vpop.f32.mrb[92].mxu1 }
 0x1b0   :  { %v4820_v46 = vadd.f32 %v4819_v7, %v4818_v1  ;;  %v4821_v9 = vpop.f32.mrb[94].mxu0  ;;  %v4895_v56 = vpop.f32.mrb[93].mxu1 }
 0x1b1   :  { %v4822_v14 = vpop.f32.mrb[95].mxu0  ;;  %v4896_v60 = vadd.f32 %v4895_v56, %v4894_v8  ;;  %v4897_v57 = vpop.f32.mrb[94].mxu1 }
 0x1b2   :  { %v3147_v21 = vadd.f32 %v4820_v46, %v6851_v10  ;;  %v4823_v24 = vadd.f32 %v4822_v14, %v4821_v9  ;;  %v4898_v58 = vpop.f32.mrb[95].mxu1  ;;  %v5784_v10 = vld [vmem:[%s7256_s0 + $0x248] ss:$84 sps:$4 sm:$0xff]  }
 0x1b3   :  { %v4899_v17 = vadd.f32 %v4898_v58, %v4897_v57  ;;  %5275 = vmatmul.mubr.bf16.vlgmr.msra.gmra.mrb[200].mxu0 %v5780_v47 }
 0x1b4   :  { %v3150_v28 = vadd.f32 %v4823_v24, %v6857_v11  ;;  %v7051_v30 = vadd.f32 %v4896_v60, %v3147_v21  ;;  %5287 = vmatmul.mubr.bf16.vlgmr.msra.gmra.mrb[200].mxu1 %v5781_v48  ;;  %5278 = vmatprep.mubr.bf16.mxu0 %v5782_v13  ;;  %v5785_v11 = vld [vmem:[%s7256_s0 + $0x638] ss:$84 sps:$4 sm:$0xff]  }
 0x1b5   :  { %5290 = vmatprep.mubr.bf16.mxu1 %v5783_v15 }
 0x1b6   :  { %v7053_v4 = vadd.f32 %v4899_v17, %v3150_v28  ;;  %v4824_v32 = vpop.f32.mrb[96].mxu0 }
 0x1b7   :  { %v4825_v19 = vpop.f32.mrb[97].mxu0  ;;  %v4900_v33 = vpop.f32.mrb[96].mxu1 }
 0x1b8   :  { %v4826_v6 = vadd.f32 %v4825_v19, %v4824_v32  ;;  %v4827_v36 = vpop.f32.mrb[98].mxu0  ;;  %v4901_v38 = vpop.f32.mrb[97].mxu1 }
 0x1b9   :  { %v4828_v23 = vpop.f32.mrb[99].mxu0  ;;  %v4902_v43 = vadd.f32 %v4901_v38, %v4900_v33  ;;  %v4903_v18 = vpop.f32.mrb[98].mxu1 }
 0x1ba   :  { %v3155_v45 = vadd.f32 %v4826_v6, %v6877_v40  ;;  %v4829_v26 = vadd.f32 %v4828_v23, %v4827_v36  ;;  %v4904_v49 = vpop.f32.mrb[99].mxu1 }
 0x1bb   :  { %v4905_v20 = vadd.f32 %v4904_v49, %v4903_v18  ;;  %5279 = vmatmul.mubr.bf16.gmra.mrb[204].mxu0 %v5784_v10 }
 0x1bc   :  { %v3158_v35 = vadd.f32 %v4829_v26, %v6879_v41  ;;  %v7066_v53 = vadd.f32 %v4902_v43, %v3155_v45  ;;  %5291 = vmatmul.mubr.bf16.gmra.mrb[204].mxu1 %v5785_v11  ;;  %5282 = vmatprep.mubr.bf16.mxu0 %v5786_v42 }
 0x1be   :  { %v7068_v55 = vadd.f32 %v4905_v20, %v3158_v35  ;;  %v4830_v29 = vpop.f32.mrb[100].mxu0 }
 0x1bf   :  { %v4831_v59 = vpop.f32.mrb[101].mxu0  ;;  %v4906_v37 = vpop.f32.mrb[100].mxu1 }
 0x1c0   :  { %v4832_v40 = vadd.f32 %v4831_v59, %v4830_v29  ;;  %v4833_v31 = vpop.f32.mrb[102].mxu0  ;;  %v4907_v0 = vpop.f32.mrb[101].mxu1 }
 0x1c1   :  { %v4834_v2 = vpop.f32.mrb[103].mxu0  ;;  %v4908_v1 = vadd.f32 %v4907_v0, %v4906_v37  ;;  %v4909_v7 = vpop.f32.mrb[102].mxu1 }
 0x1c2   :  { %v3163_v41 = vadd.f32 %v4832_v40, %v6901_v5  ;;  %v4835_v8 = vadd.f32 %v4834_v2, %v4833_v31  ;;  %v4910_v47 = vpop.f32.mrb[103].mxu1 }
 0x1c3   :  { %v4911_v46 = vadd.f32 %v4910_v47, %v4909_v7  ;;  %5283 = vmatmul.mubr.bf16.gmra.mrb[208].mxu0 %v5787_v61 }
 0x1c4   :  { %v3166_v9 = vadd.f32 %v4835_v8, %v6903_v50  ;;  %v7075_v56 = vadd.f32 %v4908_v1, %v3163_v41 }
 0x1c6   :  { %v7077_v48 = vadd.f32 %v4911_v46, %v3166_v9  ;;  %v4836_v13 = vpop.f32.mrb[104].mxu0 }
 0x1c7   :  { %v4837_v14 = vpop.f32.mrb[105].mxu0  ;;  %v4912_v60 = vpop.f32.mrb[104].mxu1 }
 0x1c8   :  { %v4838_v57 = vadd.f32 %v4837_v14, %v4836_v13  ;;  %v4839_v15 = vpop.f32.mrb[106].mxu0  ;;  %v4913_v21 = vpop.f32.mrb[105].mxu1 }
 0x1c9   :  { %v4840_v24 = vpop.f32.mrb[107].mxu0  ;;  %v4914_v58 = vadd.f32 %v4913_v21, %v4912_v60  ;;  %v4915_v17 = vpop.f32.mrb[106].mxu1 }
 0x1ca   :  { %v3171_v5 = vadd.f32 %v4838_v57, %v6925_v34  ;;  %v4841_v28 = vadd.f32 %v4840_v24, %v4839_v15  ;;  %v4916_v32 = vpop.f32.mrb[107].mxu1 }
 0x1cb   :  { %v4917_v19 = vadd.f32 %v4916_v32, %v4915_v17 }
 0x1cc   :  { %v3174_v50 = vadd.f32 %v4841_v28, %v6927_v16  ;;  %v7081_v33 = vadd.f32 %v4914_v58, %v3171_v5 }
 0x1ce   :  { %v7083_v10 = vadd.f32 %v4917_v19, %v3174_v50  ;;  %v4842_v6 = vpop.f32.mrb[108].mxu0 }
 0x1cf   :  { %v4843_v36 = vpop.f32.mrb[109].mxu0  ;;  %v4918_v38 = vpop.f32.mrb[108].mxu1 }
 0x1d0   :  { %v4844_v11 = vadd.f32 %v4843_v36, %v4842_v6  ;;  %v4845_v42 = vpop.f32.mrb[110].mxu0  ;;  %v4919_v23 = vpop.f32.mrb[109].mxu1 }
 0x1d1   :  { %v4846_v43 = vpop.f32.mrb[111].mxu0  ;;  %v4920_v18 = vadd.f32 %v4919_v23, %v4918_v38  ;;  %v4921_v45 = vpop.f32.mrb[110].mxu1 }
 0x1d2   :  { %v3179_v34 = vadd.f32 %v4844_v11, %v6943_v62  ;;  %v4847_v26 = vadd.f32 %v4846_v43, %v4845_v42  ;;  %v4922_v49 = vpop.f32.mrb[111].mxu1 }
 0x1d3   :  { %v4923_v20 = vadd.f32 %v4922_v49, %v4921_v45 }
 0x1d4   :  { %v3182_v16 = vadd.f32 %v4847_v26, %v6945_v63  ;;  %v7087_v35 = vadd.f32 %v4920_v18, %v3179_v34 }
 0x1d6   :  { %v7089_v29 = vadd.f32 %v4923_v20, %v3182_v16  ;;  %v4848_v59 = vpop.f32.mrb[112].mxu0 }
 0x1d7   :  { %v4849_v37 = vpop.f32.mrb[113].mxu0  ;;  %v4924_v61 = vpop.f32.mrb[112].mxu1 }
 0x1d8   :  { %v4850_v40 = vadd.f32 %v4849_v37, %v4848_v59  ;;  %v4851_v31 = vpop.f32.mrb[114].mxu0  ;;  %v4925_v0 = vpop.f32.mrb[113].mxu1 }
 0x1d9   :  { %v4852_v2 = vpop.f32.mrb[115].mxu0  ;;  %v4926_v1 = vadd.f32 %v4925_v0, %v4924_v61  ;;  %v4927_v7 = vpop.f32.mrb[114].mxu1 }
 0x1da   :  { %v3187_v62 = vadd.f32 %v4850_v40, %v6961_v25  ;;  %v4853_v41 = vadd.f32 %v4852_v2, %v4851_v31  ;;  %v4928_v8 = vpop.f32.mrb[115].mxu1 }
 0x1db   :  { %v4929_v47 = vadd.f32 %v4928_v8, %v4927_v7 }
 0x1dc   :  { %v3190_v63 = vadd.f32 %v4853_v41, %v6963_v27  ;;  %v7093_v46 = vadd.f32 %v4926_v1, %v3187_v62 }
 0x1de   :  { %v7095_v9 = vadd.f32 %v4929_v47, %v3190_v63  ;;  %v4854_v13 = vpop.f32.mrb[116].mxu0 }
 0x1df   :  { %v4855_v14 = vpop.f32.mrb[117].mxu0  ;;  %v4930_v60 = vpop.f32.mrb[116].mxu1 }
 0x1e0   :  { %v4856_v57 = vadd.f32 %v4855_v14, %v4854_v13  ;;  %v4857_v15 = vpop.f32.mrb[118].mxu0  ;;  %v4931_v21 = vpop.f32.mrb[117].mxu1 }
 0x1e1   :  { %v4858_v24 = vpop.f32.mrb[119].mxu0  ;;  %v4932_v58 = vadd.f32 %v4931_v21, %v4930_v60  ;;  %v4933_v17 = vpop.f32.mrb[118].mxu1 }
 0x1e2   :  { %v3195_v25 = vadd.f32 %v4856_v57, %v6979_v51  ;;  %v4859_v5 = vadd.f32 %v4858_v24, %v4857_v15  ;;  %v4934_v28 = vpop.f32.mrb[119].mxu1 }
 0x1e3   :  { %v4935_v32 = vadd.f32 %v4934_v28, %v4933_v17 }
 0x1e4   :  { %v3198_v27 = vadd.f32 %v4859_v5, %v6981_v52  ;;  %v7099_v19 = vadd.f32 %v4932_v58, %v3195_v25 }
 0x1e6   :  { %v7101_v50 = vadd.f32 %v4935_v32, %v3198_v27  ;;  %v4952_v6 = vpop.f32.mrb[120].mxu0 }
 0x1e7   :  { %v4953_v36 = vpop.f32.mrb[121].mxu0  ;;  %v5028_v38 = vpop.f32.mrb[120].mxu1 }
 0x1e8   :  { %v4954_v11 = vadd.f32 %v4953_v36, %v4952_v6  ;;  %v4955_v42 = vpop.f32.mrb[122].mxu0  ;;  %v5029_v23 = vpop.f32.mrb[121].mxu1 }
 0x1e9   :  { %v4956_v43 = vpop.f32.mrb[123].mxu0  ;;  %v5030_v18 = vadd.f32 %v5029_v23, %v5028_v38  ;;  %v5031_v45 = vpop.f32.mrb[122].mxu1 }
 0x1ea   :  { %v3349_v51 = vadd.f32 %v4954_v11, %v6997_v54  ;;  %v4957_v34 = vadd.f32 %v4956_v43, %v4955_v42  ;;  %v5032_v26 = vpop.f32.mrb[123].mxu1 }
 0x1eb   :  { %v5033_v49 = vadd.f32 %v5032_v26, %v5031_v45 }
 0x1ec   :  { %v3352_v52 = vadd.f32 %v4957_v34, %v6999_v12  ;;  %v7105_v20 = vadd.f32 %v5030_v18, %v3349_v51 }
 0x1ee   :  { %v7107_v16 = vadd.f32 %v5033_v49, %v3352_v52  ;;  %v4958_v59 = vpop.f32.mrb[124].mxu0 }
 0x1ef   :  { %v4959_v37 = vpop.f32.mrb[125].mxu0  ;;  %v5034_v61 = vpop.f32.mrb[124].mxu1 }
 0x1f0   :  { %v4960_v40 = vadd.f32 %v4959_v37, %v4958_v59  ;;  %v4961_v31 = vpop.f32.mrb[126].mxu0  ;;  %v5035_v0 = vpop.f32.mrb[125].mxu1 }
 0x1f1   :  { %v4962_v2 = vpop.f32.mrb[127].mxu0  ;;  %v5036_v1 = vadd.f32 %v5035_v0, %v5034_v61  ;;  %v5037_v7 = vpop.f32.mrb[126].mxu1 }
 0x1f2   :  { %v3357_v54 = vadd.f32 %v4960_v40, %v7015_v39  ;;  %v4963_v62 = vadd.f32 %v4962_v2, %v4961_v31  ;;  %v5038_v41 = vpop.f32.mrb[127].mxu1 }
 0x1f3   :  { %v5039_v8 = vadd.f32 %v5038_v41, %v5037_v7 }
 0x1f4   :  { %v3360_v12 = vadd.f32 %v4963_v62, %v7017_v22  ;;  %v7111_v47 = vadd.f32 %v5036_v1, %v3357_v54 }
 0x1f6   :  { %v7113_v63 = vadd.f32 %v5039_v8, %v3360_v12  ;;  %v4964_v13 = vpop.f32.mrb[128].mxu0 }
 0x1f7   :  { %v4965_v14 = vpop.f32.mrb[129].mxu0  ;;  %v5040_v60 = vpop.f32.mrb[128].mxu1 }
 0x1f8   :  { %v4966_v57 = vadd.f32 %v4965_v14, %v4964_v13  ;;  %v4967_v15 = vpop.f32.mrb[130].mxu0  ;;  %v5041_v21 = vpop.f32.mrb[129].mxu1 }
 0x1f9   :  { %v4968_v24 = vpop.f32.mrb[131].mxu0  ;;  %v5042_v58 = vadd.f32 %v5041_v21, %v5040_v60  ;;  %v5043_v17 = vpop.f32.mrb[130].mxu1 }
 0x1fa   :  { %v3365_v39 = vadd.f32 %v4966_v57, %v7033_v3  ;;  %v4969_v25 = vadd.f32 %v4968_v24, %v4967_v15  ;;  %v5044_v5 = vpop.f32.mrb[131].mxu1 }
 0x1fb   :  { %v5045_v28 = vadd.f32 %v5044_v5, %v5043_v17 }
 0x1fc   :  { %v3368_v22 = vadd.f32 %v4969_v25, %v7035_v44  ;;  %v7117_v32 = vadd.f32 %v5042_v58, %v3365_v39 }
 0x1fe   :  { %v7119_v27 = vadd.f32 %v5045_v28, %v3368_v22  ;;  %v4970_v6 = vpop.f32.mrb[132].mxu0 }
 0x1ff   :  { %v4971_v36 = vpop.f32.mrb[133].mxu0  ;;  %v5046_v38 = vpop.f32.mrb[132].mxu1 }
 0x200   :  { %v4972_v11 = vadd.f32 %v4971_v36, %v4970_v6  ;;  %v4973_v42 = vpop.f32.mrb[134].mxu0  ;;  %v5047_v23 = vpop.f32.mrb[133].mxu1 }
 0x201   :  { %v4974_v43 = vpop.f32.mrb[135].mxu0  ;;  %v5048_v18 = vadd.f32 %v5047_v23, %v5046_v38  ;;  %v5049_v45 = vpop.f32.mrb[134].mxu1 }
 0x202   :  { %v3373_v3 = vadd.f32 %v4972_v11, %v7051_v30  ;;  %v4975_v51 = vadd.f32 %v4974_v43, %v4973_v42  ;;  %v5050_v34 = vpop.f32.mrb[135].mxu1 }
 0x203   :  { %v5051_v26 = vadd.f32 %v5050_v34, %v5049_v45 }
 0x204   :  { %v3376_v44 = vadd.f32 %v4975_v51, %v7053_v4  ;;  %v7123_v49 = vadd.f32 %v5048_v18, %v3373_v3 }
 0x206   :  { %v7125_v52 = vadd.f32 %v5051_v26, %v3376_v44  ;;  %v4976_v59 = vpop.f32.mrb[136].mxu0 }
 0x207   :  { %v4977_v37 = vpop.f32.mrb[137].mxu0  ;;  %v5052_v61 = vpop.f32.mrb[136].mxu1 }
 0x208   :  { %v4978_v40 = vadd.f32 %v4977_v37, %v4976_v59  ;;  %v4979_v31 = vpop.f32.mrb[138].mxu0  ;;  %v5053_v0 = vpop.f32.mrb[137].mxu1 }
 0x209   :  { %v4980_v2 = vpop.f32.mrb[139].mxu0  ;;  %v5054_v1 = vadd.f32 %v5053_v0, %v5052_v61  ;;  %v5055_v7 = vpop.f32.mrb[138].mxu1 }
 0x20a   :  { %v3381_v30 = vadd.f32 %v4978_v40, %v7066_v53  ;;  %v4981_v54 = vadd.f32 %v4980_v2, %v4979_v31  ;;  %v5056_v62 = vpop.f32.mrb[139].mxu1 }
 0x20b   :  { %v5057_v41 = vadd.f32 %v5056_v62, %v5055_v7 }
 0x20c   :  { %v3384_v4 = vadd.f32 %v4981_v54, %v7068_v55  ;;  %v7129_v8 = vadd.f32 %v5054_v1, %v3381_v30 }
 0x20e   :  { %v7131_v12 = vadd.f32 %v5057_v41, %v3384_v4  ;;  %v4982_v13 = vpop.f32.mrb[140].mxu0 }
 0x20f   :  { %v4983_v14 = vpop.f32.mrb[141].mxu0  ;;  %v5058_v60 = vpop.f32.mrb[140].mxu1 }
 0x210   :  { %v4984_v57 = vadd.f32 %v4983_v14, %v4982_v13  ;;  %v4985_v15 = vpop.f32.mrb[142].mxu0  ;;  %v5059_v21 = vpop.f32.mrb[141].mxu1 }
 0x211   :  { %v4986_v24 = vpop.f32.mrb[143].mxu0  ;;  %v5060_v58 = vadd.f32 %v5059_v21, %v5058_v60  ;;  %v5061_v17 = vpop.f32.mrb[142].mxu1 }
 0x212   :  { %v3389_v53 = vadd.f32 %v4984_v57, %v7075_v56  ;;  %v4987_v39 = vadd.f32 %v4986_v24, %v4985_v15  ;;  %v5062_v25 = vpop.f32.mrb[143].mxu1 }
 0x213   :  { %v5063_v5 = vadd.f32 %v5062_v25, %v5061_v17 }
 0x214   :  { %v3392_v55 = vadd.f32 %v4987_v39, %v7077_v48  ;;  %v7135_v28 = vadd.f32 %v5060_v58, %v3389_v53 }
 0x216   :  { %v7137_v22 = vadd.f32 %v5063_v5, %v3392_v55  ;;  %v4988_v6 = vpop.f32.mrb[144].mxu0 }
 0x217   :  { %v4989_v36 = vpop.f32.mrb[145].mxu0  ;;  %v5064_v38 = vpop.f32.mrb[144].mxu1 }
 0x218   :  { %v4990_v11 = vadd.f32 %v4989_v36, %v4988_v6  ;;  %v4991_v42 = vpop.f32.mrb[146].mxu0  ;;  %v5065_v23 = vpop.f32.mrb[145].mxu1 }
 0x219   :  { %v4992_v43 = vpop.f32.mrb[147].mxu0  ;;  %v5066_v18 = vadd.f32 %v5065_v23, %v5064_v38  ;;  %v5067_v45 = vpop.f32.mrb[146].mxu1 }
 0x21a   :  { %v3397_v56 = vadd.f32 %v4990_v11, %v7081_v33  ;;  %v4993_v3 = vadd.f32 %v4992_v43, %v4991_v42  ;;  %v5068_v51 = vpop.f32.mrb[147].mxu1 }
 0x21b   :  { %v5069_v34 = vadd.f32 %v5068_v51, %v5067_v45 }
 0x21c   :  { %v3400_v48 = vadd.f32 %v4993_v3, %v7083_v10  ;;  %v7141_v26 = vadd.f32 %v5066_v18, %v3397_v56 }
 0x21e   :  { %v7143_v44 = vadd.f32 %v5069_v34, %v3400_v48  ;;  %v4994_v59 = vpop.f32.mrb[148].mxu0 }
 0x21f   :  { %v4995_v37 = vpop.f32.mrb[149].mxu0  ;;  %v5070_v61 = vpop.f32.mrb[148].mxu1 }
 0x220   :  { %v4996_v40 = vadd.f32 %v4995_v37, %v4994_v59  ;;  %v4997_v31 = vpop.f32.mrb[150].mxu0  ;;  %v5071_v0 = vpop.f32.mrb[149].mxu1 }
 0x221   :  { %v4998_v2 = vpop.f32.mrb[151].mxu0  ;;  %v5072_v1 = vadd.f32 %v5071_v0, %v5070_v61  ;;  %v5073_v7 = vpop.f32.mrb[150].mxu1 }
 0x222   :  { %v3405_v33 = vadd.f32 %v4996_v40, %v7087_v35  ;;  %v4999_v30 = vadd.f32 %v4998_v2, %v4997_v31  ;;  %v5074_v54 = vpop.f32.mrb[151].mxu1 }
 0x223   :  { %v5075_v62 = vadd.f32 %v5074_v54, %v5073_v7 }
 0x224   :  { %v3408_v10 = vadd.f32 %v4999_v30, %v7089_v29  ;;  %v7147_v41 = vadd.f32 %v5072_v1, %v3405_v33 }
 0x226   :  { %v7149_v4 = vadd.f32 %v5075_v62, %v3408_v10  ;;  %v5000_v13 = vpop.f32.mrb[152].mxu0 }
 0x227   :  { %v5001_v14 = vpop.f32.mrb[153].mxu0  ;;  %v5076_v60 = vpop.f32.mrb[152].mxu1 }
 0x228   :  { %v5002_v57 = vadd.f32 %v5001_v14, %v5000_v13  ;;  %v5003_v15 = vpop.f32.mrb[154].mxu0  ;;  %v5077_v21 = vpop.f32.mrb[153].mxu1 }
 0x229   :  { %v5004_v24 = vpop.f32.mrb[155].mxu0  ;;  %v5078_v58 = vadd.f32 %v5077_v21, %v5076_v60  ;;  %v5079_v17 = vpop.f32.mrb[154].mxu1 }
 0x22a   :  { %v3413_v35 = vadd.f32 %v5002_v57, %v7093_v46  ;;  %v5005_v53 = vadd.f32 %v5004_v24, %v5003_v15  ;;  %v5080_v39 = vpop.f32.mrb[155].mxu1 }
 0x22b   :  { %v5081_v25 = vadd.f32 %v5080_v39, %v5079_v17 }
 0x22c   :  { %v3416_v29 = vadd.f32 %v5005_v53, %v7095_v9  ;;  %v7153_v5 = vadd.f32 %v5078_v58, %v3413_v35 }
 0x22e   :  { %v7155_v55 = vadd.f32 %v5081_v25, %v3416_v29  ;;  %v5006_v6 = vpop.f32.mrb[156].mxu0 }
 0x22f   :  { %v5007_v36 = vpop.f32.mrb[157].mxu0  ;;  %v5082_v38 = vpop.f32.mrb[156].mxu1 }
 0x230   :  { %v5008_v11 = vadd.f32 %v5007_v36, %v5006_v6  ;;  %v5009_v42 = vpop.f32.mrb[158].mxu0  ;;  %v5083_v23 = vpop.f32.mrb[157].mxu1 }
 0x231   :  { %v5010_v43 = vpop.f32.mrb[159].mxu0  ;;  %v5084_v18 = vadd.f32 %v5083_v23, %v5082_v38  ;;  %v5085_v45 = vpop.f32.mrb[158].mxu1 }
 0x232   :  { %v3421_v46 = vadd.f32 %v5008_v11, %v7099_v19  ;;  %v5011_v56 = vadd.f32 %v5010_v43, %v5009_v42  ;;  %v5086_v3 = vpop.f32.mrb[159].mxu1 }
 0x233   :  { %v5087_v51 = vadd.f32 %v5086_v3, %v5085_v45 }
 0x234   :  { %v3424_v9 = vadd.f32 %v5011_v56, %v7101_v50  ;;  %v7159_v34 = vadd.f32 %v5084_v18, %v3421_v46 }
 0x236   :  { %v7161_v48 = vadd.f32 %v5087_v51, %v3424_v9  ;;  %v5104_v59 = vpop.f32.mrb[160].mxu0 }
 0x237   :  { %v5105_v37 = vpop.f32.mrb[161].mxu0  ;;  %v5180_v61 = vpop.f32.mrb[160].mxu1 }
 0x238   :  { %v5106_v40 = vadd.f32 %v5105_v37, %v5104_v59  ;;  %v5107_v31 = vpop.f32.mrb[162].mxu0  ;;  %v5181_v0 = vpop.f32.mrb[161].mxu1 }
 0x239   :  { %v5108_v2 = vpop.f32.mrb[163].mxu0  ;;  %v5182_v1 = vadd.f32 %v5181_v0, %v5180_v61  ;;  %v5183_v7 = vpop.f32.mrb[162].mxu1 }
 0x23a   :  { %v3575_v19 = vadd.f32 %v5106_v40, %v7105_v20  ;;  %v5109_v33 = vadd.f32 %v5108_v2, %v5107_v31  ;;  %v5184_v30 = vpop.f32.mrb[163].mxu1 }
 0x23b   :  { %v5185_v54 = vadd.f32 %v5184_v30, %v5183_v7 }
 0x23c   :  { %v3578_v50 = vadd.f32 %v5109_v33, %v7107_v16  ;;  %v7165_v62 = vadd.f32 %v5182_v1, %v3575_v19 }
 0x23e   :  { %v5110_v10 = vpop.f32.mrb[164].mxu0  ;;  %v7167_v13 = vadd.f32 %v5185_v54, %v3578_v50 }
 0x23f   :  { %v5111_v14 = vpop.f32.mrb[165].mxu0  ;;  %v5186_v60 = vpop.f32.mrb[164].mxu1 }
 0x240   :  { %v5112_v57 = vadd.f32 %v5111_v14, %v5110_v10  ;;  %v5113_v15 = vpop.f32.mrb[166].mxu0  ;;  %v5187_v21 = vpop.f32.mrb[165].mxu1 }
 0x241   :  { %v5114_v24 = vpop.f32.mrb[167].mxu0  ;;  %v5188_v58 = vadd.f32 %v5187_v21, %v5186_v60  ;;  %v5189_v17 = vpop.f32.mrb[166].mxu1 }
 0x242   :  { %v3583_v20 = vadd.f32 %v5112_v57, %v7111_v47  ;;  %v5115_v35 = vadd.f32 %v5114_v24, %v5113_v15  ;;  %v5190_v53 = vpop.f32.mrb[167].mxu1 }
 0x243   :  { %v5191_v39 = vadd.f32 %v5190_v53, %v5189_v17 }
 0x244   :  { %v3586_v16 = vadd.f32 %v5115_v35, %v7113_v63  ;;  %v7171_v25 = vadd.f32 %v5188_v58, %v3583_v20 }
 0x246   :  { %v5116_v29 = vpop.f32.mrb[168].mxu0  ;;  %v7173_v6 = vadd.f32 %v5191_v39, %v3586_v16 }
 0x247   :  { %v5117_v36 = vpop.f32.mrb[169].mxu0  ;;  %v5192_v38 = vpop.f32.mrb[168].mxu1 }
 0x248   :  { %v5118_v11 = vadd.f32 %v5117_v36, %v5116_v29  ;;  %v5119_v42 = vpop.f32.mrb[170].mxu0  ;;  %v5193_v23 = vpop.f32.mrb[169].mxu1 }
 0x249   :  { %v5120_v43 = vpop.f32.mrb[171].mxu0  ;;  %v5194_v18 = vadd.f32 %v5193_v23, %v5192_v38  ;;  %v5195_v45 = vpop.f32.mrb[170].mxu1 }
 0x24a   :  { %v3591_v47 = vadd.f32 %v5118_v11, %v7117_v32  ;;  %v5121_v46 = vadd.f32 %v5120_v43, %v5119_v42  ;;  %v5196_v56 = vpop.f32.mrb[171].mxu1 }
 0x24b   :  { %v5197_v3 = vadd.f32 %v5196_v56, %v5195_v45 }
 0x24c   :  { %v3594_v63 = vadd.f32 %v5121_v46, %v7119_v27  ;;  %v7177_v51 = vadd.f32 %v5194_v18, %v3591_v47 }
 0x24e   :  { %v5122_v9 = vpop.f32.mrb[172].mxu0  ;;  %v7179_v59 = vadd.f32 %v5197_v3, %v3594_v63 }
 0x24f   :  { %v5123_v37 = vpop.f32.mrb[173].mxu0  ;;  %v5198_v61 = vpop.f32.mrb[172].mxu1 }
 0x250   :  { %v5124_v40 = vadd.f32 %v5123_v37, %v5122_v9  ;;  %v5125_v31 = vpop.f32.mrb[174].mxu0  ;;  %v5199_v0 = vpop.f32.mrb[173].mxu1 }
 0x251   :  { %v5126_v2 = vpop.f32.mrb[175].mxu0  ;;  %v5200_v1 = vadd.f32 %v5199_v0, %v5198_v61  ;;  %v5201_v7 = vpop.f32.mrb[174].mxu1 }
 0x252   :  { %v3599_v32 = vadd.f32 %v5124_v40, %v7123_v49  ;;  %v5127_v19 = vadd.f32 %v5126_v2, %v5125_v31  ;;  %v5202_v33 = vpop.f32.mrb[175].mxu1 }
 0x253   :  { %v5203_v30 = vadd.f32 %v5202_v33, %v5201_v7 }
 0x254   :  { %v3602_v27 = vadd.f32 %v5127_v19, %v7125_v52  ;;  %v7183_v54 = vadd.f32 %v5200_v1, %v3599_v32 }
 0x256   :  { %v5128_v50 = vpop.f32.mrb[176].mxu0  ;;  %v7185_v10 = vadd.f32 %v5203_v30, %v3602_v27 }
 0x257   :  { %v5129_v14 = vpop.f32.mrb[177].mxu0  ;;  %v5204_v60 = vpop.f32.mrb[176].mxu1 }
 0x258   :  { %v5130_v57 = vadd.f32 %v5129_v14, %v5128_v50  ;;  %v5131_v15 = vpop.f32.mrb[178].mxu0  ;;  %v5205_v21 = vpop.f32.mrb[177].mxu1 }
 0x259   :  { %v5132_v24 = vpop.f32.mrb[179].mxu0  ;;  %v5206_v58 = vadd.f32 %v5205_v21, %v5204_v60  ;;  %v5207_v17 = vpop.f32.mrb[178].mxu1 }
 0x25a   :  { %v3607_v49 = vadd.f32 %v5130_v57, %v7129_v8  ;;  %v5133_v20 = vadd.f32 %v5132_v24, %v5131_v15  ;;  %v5208_v35 = vpop.f32.mrb[179].mxu1 }
 0x25b   :  { %v5209_v53 = vadd.f32 %v5208_v35, %v5207_v17 }
 0x25c   :  { %v3610_v52 = vadd.f32 %v5133_v20, %v7131_v12  ;;  %v7189_v39 = vadd.f32 %v5206_v58, %v3607_v49 }
 0x25e   :  { %v5134_v16 = vpop.f32.mrb[180].mxu0  ;;  %v7191_v29 = vadd.f32 %v5209_v53, %v3610_v52 }
 0x25f   :  { %v5135_v36 = vpop.f32.mrb[181].mxu0  ;;  %v5210_v38 = vpop.f32.mrb[180].mxu1 }
 0x260   :  { %v5136_v11 = vadd.f32 %v5135_v36, %v5134_v16  ;;  %v5137_v42 = vpop.f32.mrb[182].mxu0  ;;  %v5211_v23 = vpop.f32.mrb[181].mxu1 }
 0x261   :  { %v5138_v43 = vpop.f32.mrb[183].mxu0  ;;  %v5212_v18 = vadd.f32 %v5211_v23, %v5210_v38  ;;  %v5213_v45 = vpop.f32.mrb[182].mxu1 }
 0x262   :  { %v3615_v8 = vadd.f32 %v5136_v11, %v7135_v28  ;;  %v5139_v47 = vadd.f32 %v5138_v43, %v5137_v42  ;;  %v5214_v46 = vpop.f32.mrb[183].mxu1 }
 0x263   :  { %v5215_v56 = vadd.f32 %v5214_v46, %v5213_v45 }
 0x264   :  { %v3618_v12 = vadd.f32 %v5139_v47, %v7137_v22  ;;  %v7195_v3 = vadd.f32 %v5212_v18, %v3615_v8 }
 0x266   :  { %v5140_v63 = vpop.f32.mrb[184].mxu0  ;;  %v7197_v9 = vadd.f32 %v5215_v56, %v3618_v12 }
 0x267   :  { %v5141_v37 = vpop.f32.mrb[185].mxu0  ;;  %v5216_v61 = vpop.f32.mrb[184].mxu1 }
 0x268   :  { %v5142_v40 = vadd.f32 %v5141_v37, %v5140_v63  ;;  %v5143_v31 = vpop.f32.mrb[186].mxu0  ;;  %v5217_v0 = vpop.f32.mrb[185].mxu1 }
 0x269   :  { %v5144_v2 = vpop.f32.mrb[187].mxu0  ;;  %v5218_v1 = vadd.f32 %v5217_v0, %v5216_v61  ;;  %v5219_v7 = vpop.f32.mrb[186].mxu1 }
 0x26a   :  { %v3623_v28 = vadd.f32 %v5142_v40, %v7141_v26  ;;  %v5145_v32 = vadd.f32 %v5144_v2, %v5143_v31  ;;  %v5220_v19 = vpop.f32.mrb[187].mxu1 }
 0x26b   :  { %v5221_v33 = vadd.f32 %v5220_v19, %v5219_v7 }
 0x26c   :  { %v3626_v22 = vadd.f32 %v5145_v32, %v7143_v44  ;;  %v3736_v30 = vadd.f32 %v5218_v1, %v3623_v28 }
 0x26e   :  { %v5146_v27 = vpop.f32.mrb[188].mxu0  ;;  %v7201_v50 = vadd.f32 %v5221_v33, %v3626_v22 }
 0x26f   :  { %v5147_v14 = vpop.f32.mrb[189].mxu0  ;;  %v5222_v60 = vpop.f32.mrb[188].mxu1 }
 0x270   :  { %v5148_v57 = vadd.f32 %v5147_v14, %v5146_v27  ;;  %v5149_v15 = vpop.f32.mrb[190].mxu0  ;;  %v5223_v21 = vpop.f32.mrb[189].mxu1 }
 0x271   :  { %v5150_v24 = vpop.f32.mrb[191].mxu0  ;;  %v5224_v58 = vadd.f32 %v5223_v21, %v5222_v60  ;;  %v5225_v17 = vpop.f32.mrb[190].mxu1 }
 0x272   :  { %v3631_v49 = vadd.f32 %v5148_v57, %v7147_v41  ;;  %v5151_v26 = vadd.f32 %v5150_v24, %v5149_v15  ;;  %v5226_v20 = vpop.f32.mrb[191].mxu1 }
 0x273   :  { %v5227_v35 = vadd.f32 %v5226_v20, %v5225_v17 }
 0x274   :  { %v3634_v53 = vadd.f32 %v5151_v26, %v7149_v4  ;;  %v3744_v44 = vadd.f32 %v5224_v58, %v3631_v49 }
 0x276   :  { %v5152_v52 = vpop.f32.mrb[192].mxu0  ;;  %v3747_v16 = vadd.f32 %v5227_v35, %v3634_v53 }
 0x277   :  { %v5153_v36 = vpop.f32.mrb[193].mxu0  ;;  %v5228_v38 = vpop.f32.mrb[192].mxu1 }
 0x278   :  { %v5154_v11 = vadd.f32 %v5153_v36, %v5152_v52  ;;  %v5155_v42 = vpop.f32.mrb[194].mxu0  ;;  %v5229_v23 = vpop.f32.mrb[193].mxu1 }
 0x279   :  { %v5156_v43 = vpop.f32.mrb[195].mxu0  ;;  %v5230_v18 = vadd.f32 %v5229_v23, %v5228_v38  ;;  %v5231_v45 = vpop.f32.mrb[194].mxu1 }
 0x27a   :  { %v3639_v8 = vadd.f32 %v5154_v11, %v7153_v5  ;;  %v5157_v47 = vadd.f32 %v5156_v43, %v5155_v42  ;;  %v5232_v41 = vpop.f32.mrb[195].mxu1 }
 0x27b   :  { %v5233_v46 = vadd.f32 %v5232_v41, %v5231_v45 }
 0x27c   :  { %v3642_v56 = vadd.f32 %v5157_v47, %v7155_v55  ;;  %v3752_v12 = vadd.f32 %v5230_v18, %v3639_v8 }
 0x27e   :  { %v5158_v4 = vpop.f32.mrb[196].mxu0  ;;  %v7207_v63 = vadd.f32 %v5233_v46, %v3642_v56 }
 0x27f   :  { %v5159_v37 = vpop.f32.mrb[197].mxu0  ;;  %v5234_v61 = vpop.f32.mrb[196].mxu1 }
 0x280   :  { %v5160_v40 = vadd.f32 %v5159_v37, %v5158_v4  ;;  %v5161_v31 = vpop.f32.mrb[198].mxu0  ;;  %v5235_v0 = vpop.f32.mrb[197].mxu1 }
 0x281   :  { %v5162_v2 = vpop.f32.mrb[199].mxu0  ;;  %v5236_v1 = vadd.f32 %v5235_v0, %v5234_v61  ;;  %v5237_v7 = vpop.f32.mrb[198].mxu1 }
 0x282   :  { %v3647_v28 = vadd.f32 %v5160_v40, %v7159_v34  ;;  %v5163_v5 = vadd.f32 %v5162_v2, %v5161_v31  ;;  %v5238_v32 = vpop.f32.mrb[199].mxu1 }
 0x283   :  { %v5239_v19 = vadd.f32 %v5238_v32, %v5237_v7 }
 0x284   :  { %v3650_v33 = vadd.f32 %v5163_v5, %v7161_v48  ;;  %v3760_v55 = vadd.f32 %v5236_v1, %v3647_v28 }
 0x286   :  { %v5276_v22 = vpop.f32.mrb[200].mxu0  ;;  %v3763_v27 = vadd.f32 %v5239_v19, %v3650_v33 }
 0x287   :  { %v3809_v14 = vadd.f32 %v5276_v22, %v7171_v25  ;;  %v5288_v60 = vpop.f32.mrb[200].mxu1  ;;  %v3800_v57 = vpop.f32.mrb[201].mxu0 }
 0x288   :  { %v3857_v15 = vadd.f32 %v5288_v60, %v3744_v44  ;;  %v3801_v21 = vadd.f32 %v3800_v57, %v7165_v62  ;;  %v3848_v24 = vpop.f32.mrb[201].mxu1  ;;  %v5277_v58 = vpop.f32.mrb[202].mxu0 }
 0x289   :  { %v3849_v17 = vadd.f32 %v3848_v24, %v3736_v30  ;;  %v3812_v34 = vadd.f32 %v5277_v58, %v7173_v6  ;;  %v5289_v49 = vpop.f32.mrb[202].mxu1  ;;  %v3803_v26 = vpop.f32.mrb[203].mxu0  ;;  %v3881_v53 = vmax.f32 %v3809_v14, 0.0 }
 0x28a   :  { %v3860_v20 = vadd.f32 %v5289_v49, %v3747_v16  ;;  %v3804_v48 = vadd.f32 %v3803_v26, %v7167_v13  ;;  %v3851_v35 = vpop.f32.mrb[203].mxu1  ;;  %v3893_v36 = vmax.f32 %v3857_v15, 0.0  ;;  %v3879_v38 = vmax.f32 %v3801_v21, 0.0 }
 0x28b   :  { %v3882_v52 = vmax.f32 %v3812_v34, 0.0  ;;  %v3852_v25 = vadd.f32 %v3851_v35, %v7201_v50  ;;  %v3891_v62 = vmax.f32 %v3849_v17, 0.0 }
 0x28c   :  { %v3894_v44 = vmax.f32 %v3860_v20, 0.0  ;;  %v3880_v11 = vmax.f32 %v3804_v48, 0.0 }
 0x28d   :  { %v4429_v42 = vpack.c.bf16 %v3882_v52, %v3881_v53  ;;  %v3892_v23 = vmax.f32 %v3852_v25, 0.0 }
 0x28e   :  { %v4459_v30 = vpack.c.bf16 %v3894_v44, %v3893_v36  ;;  %v4424_v43 = vpack.c.bf16 %v3880_v11, %v3879_v38  ;;  %v5280_v6 = vpop.f32.mrb[204].mxu0 }
 0x28f   :  { %4471 = vst [vmem:[%s7257_s2 + $0x8] sm:$0xff] %v4429_v42   ;;  %v4454_v13 = vpack.c.bf16 %v3892_v23, %v3891_v62  ;;  %v3825_v16 = vadd.f32 %v5280_v6, %v7183_v54  ;;  %v5292_v18 = vpop.f32.mrb[204].mxu1  ;;  %v3816_v45 = vpop.f32.mrb[205].mxu0 }
 0x290   :  { %4477 = vst [vmem:[%s7257_s2 + $0x38] sm:$0xff] %v4459_v30   ;;  %4425 = vst [vmem:[%s7257_s2] sm:$0xff] %v4424_v43   ;;  %v3873_v50 = vadd.f32 %v5292_v18, %v3760_v55  ;;  %v3817_v8 = vadd.f32 %v3816_v45, %v7177_v51  ;;  %v3864_v47 = vpop.f32.mrb[205].mxu1  ;;  %v5281_v41 = vpop.f32.mrb[206].mxu0 }
 0x291   :  { %4476 = vst [vmem:[%s7257_s2 + $0x30] sm:$0xff] %v4454_v13   ;;  %v3865_v54 = vadd.f32 %v3864_v47, %v3752_v12  ;;  %v3828_v46 = vadd.f32 %v5281_v41, %v7185_v10  ;;  %v5293_v56 = vpop.f32.mrb[206].mxu1  ;;  %v3819_v4 = vpop.f32.mrb[207].mxu0  ;;  %v3885_v31 = vmax.f32 %v3825_v16, 0.0 }
 0x292   :  { %v3876_v37 = vadd.f32 %v5293_v56, %v3763_v27  ;;  %v3820_v61 = vadd.f32 %v3819_v4, %v7179_v59  ;;  %v3867_v40 = vpop.f32.mrb[207].mxu1  ;;  %v3897_v51 = vmax.f32 %v3873_v50, 0.0  ;;  %v3883_v1 = vmax.f32 %v3817_v8, 0.0 }
 0x293   :  { %v3886_v0 = vmax.f32 %v3828_v46, 0.0  ;;  %v3868_v2 = vadd.f32 %v3867_v40, %v7207_v63  ;;  %v3895_v5 = vmax.f32 %v3865_v54, 0.0 }
 0x294   :  { %v3898_v7 = vmax.f32 %v3876_v37, 0.0  ;;  %v3884_v28 = vmax.f32 %v3820_v61, 0.0 }
 0x295   :  { %v4439_v32 = vpack.c.bf16 %v3886_v0, %v3885_v31  ;;  %v3896_v19 = vmax.f32 %v3868_v2, 0.0 }
 0x296   :  { %v4469_v12 = vpack.c.bf16 %v3898_v7, %v3897_v51  ;;  %v4434_v33 = vpack.c.bf16 %v3884_v28, %v3883_v1  ;;  %v5284_v10 = vpop.f32.mrb[208].mxu0 }
 0x297   :  { %4473 = vst [vmem:[%s7257_s2 + $0x18] sm:$0xff] %v4439_v32   ;;  %v4464_v59 = vpack.c.bf16 %v3896_v19, %v3895_v5  ;;  %v3841_v55 = vadd.f32 %v5284_v10, %v7195_v3  ;;  %v3832_v22 = vpop.f32.mrb[209].mxu0 }
 0x298   :  { %4479 = vst [vmem:[%s7257_s2 + $0x48] sm:$0xff] %v4469_v12   ;;  %4472 = vst [vmem:[%s7257_s2 + $0x10] sm:$0xff] %v4434_v33   ;;  %v3833_v63 = vadd.f32 %v3832_v22, %v7189_v39  ;;  %v5285_v27 = vpop.f32.mrb[210].mxu0 }
 0x299   :  { %4478 = vst [vmem:[%s7257_s2 + $0x40] sm:$0xff] %v4464_v59   ;;  %v3844_v14 = vadd.f32 %v5285_v27, %v7197_v9  ;;  %v3835_v60 = vpop.f32.mrb[211].mxu0  ;;  %v3889_v57 = vmax.f32 %v3841_v55, 0.0 }
 0x29a   :  { %v3836_v3 = vadd.f32 %v3835_v60, %v7191_v29  ;;  %v3887_v21 = vmax.f32 %v3833_v63, 0.0 }
 0x29b   :  { %v3890_v15 = vmax.f32 %v3844_v14, 0.0 }
 0x29c   :  { %v3888_v24 = vmax.f32 %v3836_v3, 0.0 }
 0x29d   :  { %v4449_v58 = vpack.c.bf16 %v3890_v15, %v3889_v57 }
 0x29e   :  { %v4444_v17 = vpack.c.bf16 %v3888_v24, %v3887_v21 }
 0x29f   :  { %4475 = vst [vmem:[%s7257_s2 + $0x28] sm:$0xff] %v4449_v58  }
 0x2a0   :  { %4474 = vst [vmem:[%s7257_s2 + $0x20] sm:$0xff] %v4444_v17  }

// kernel: ae2d_forward.16
= control target key start
LH: loop header
LB: loop body
LE: loop exit
PB: predicated region body
PF: predicated region fallthrough
CT: control target
= control target key end

     0   :  { %s2663_s1 = inlined_call_operand.vmem [shape: bf16[768,128], index: 1, kind: input, shape index: {}]   ;;  %s2664_s0 = inlined_call_operand.vmem [shape: bf16[208,768], index: 0, kind: input, shape index: {}]   ;;  %s2665_s2 = inlined_call_operand.vmem [shape: bf16[208,128], index: 2, kind: output, shape index: {}]  }
   0x1   :  { %v1988_v0 = vld [vmem:[%s2663_s1 + $0x40] sm:$0xff]   ;;  %v1990_v2 = vld [vmem:[%s2663_s1 + $0x48] sm:$0xff]   ;;  %v1992_v4 = vld [vmem:[%s2663_s1 + $0x50] sm:$0xff]  }
   0x2   :  { %v1989_v1 = vld [vmem:[%s2663_s1] sm:$0xff]   ;;  %1690 = vmatprep.subr.bf16.mxu0 %v1988_v0  ;;  %1972 = vmatprep.subr.bf16.mxu1 %v1988_v0  ;;  %v1991_v3 = vld [vmem:[%s2663_s1 + $0x8] sm:$0xff]   ;;  %v1993_v5 = vld [vmem:[%s2663_s1 + $0x10] sm:$0xff]  }
   0x3   :  { %1691 = vmatpush3.bf16.msra.mxu0 %v1989_v1  ;;  %1980 = vmatpush3.bf16.msra.mxu1 %v1989_v1  ;;  %v1994_v6 = vld [vmem:[%s2663_s1 + $0x58] sm:$0xff]   ;;  %v1996_v8 = vld [vmem:[%s2663_s1 + $0x60] sm:$0xff]   ;;  %v1998_v10 = vld [vmem:[%s2663_s1 + $0x68] sm:$0xff]  }
   0x4   :  { %1692 = vmatprep.subr.bf16.mxu0 %v1990_v2  ;;  %1973 = vmatprep.subr.bf16.mxu1 %v1990_v2  ;;  %v1995_v7 = vld [vmem:[%s2663_s1 + $0x18] sm:$0xff]   ;;  %v1997_v9 = vld [vmem:[%s2663_s1 + $0x20] sm:$0xff]   ;;  %v2009_v12 = vld [vmem:[%s2664_s0 + $0x154] ss:$24 sps:$4 sm:$0xff]  }
   0x5   :  { %v2006_v11 = vld [vmem:[%s2664_s0 + $0x4] ss:$24 sps:$4 sm:$0xff]   ;;  %v1999_v13 = vld [vmem:[%s2663_s1 + $0x28] sm:$0xff]   ;;  %v2000_v14 = vld [vmem:[%s2663_s1 + $0x70] sm:$0xff]   ;;  %952 = vmatprep.mubr.bf16.mxu1 %v2009_v12 }
   0x6   :  { %896 = vmatprep.mubr.bf16.mxu0 %v2006_v11  ;;  %v2001_v15 = vld [vmem:[%s2663_s1 + $0x30] sm:$0xff]   ;;  %v2002_v16 = vld [vmem:[%s2663_s1 + $0x78] sm:$0xff]   ;;  %v2010_v18 = vld [vmem:[%s2663_s1 + $0x140] sm:$0xff]  }
   0x7   :  { %1693 = vmatpush3.bf16.msra.mxu0 %v1991_v3  ;;  %1981 = vmatpush3.bf16.msra.mxu1 %v1991_v3  ;;  %v2003_v17 = vld [vmem:[%s2663_s1 + $0x38] sm:$0xff]   ;;  %v2007_v20 = vld [vmem:[%s2664_s0 + $0x150] ss:$24 sps:$4 sm:$0xff]   ;;  %v2012_v21 = vld [vmem:[%s2663_s1 + $0xc0] sm:$0xff]  }
   0x8   :  { %1694 = vmatprep.subr.bf16.mxu0 %v1992_v4  ;;  %1974 = vmatprep.subr.bf16.mxu1 %v1992_v4  ;;  %v2004_v19 = vld [vmem:[%s2664_s0] ss:$24 sps:$4 sm:$0xff]   ;;  %v2013_v23 = vld [vmem:[%s2664_s0 + $0x34] ss:$24 sps:$4 sm:$0xff]   ;;  %v2015_v24 = vld [vmem:[%s2664_s0 + $0x184] ss:$24 sps:$4 sm:$0xff]  }
   0x9   :  { %v2011_v22 = vld [vmem:[%s2663_s1 + $0x100] sm:$0xff]   ;;  %v2018_v26 = vld [vmem:[%s2663_s1 + $0x148] sm:$0xff]   ;;  %v2024_v32 = vld [vmem:[%s2663_s1 + $0x150] sm:$0xff]  }
   0xa   :  { %v2017_v25 = vld [vmem:[%s2663_s1 + $0x80] sm:$0xff]   ;;  %v2022_v27 = vld [vmem:[%s2663_s1 + $0xc8] sm:$0xff]   ;;  %v2032_v34 = vld [vmem:[%s2663_s1 + $0xd0] sm:$0xff]  }
   0xb   :  { %1695 = vmatpush3.bf16.msra.mxu0 %v1993_v5  ;;  %1982 = vmatpush3.bf16.msra.mxu1 %v1993_v5  ;;  %v2021_v28 = vld [vmem:[%s2663_s1 + $0x108] sm:$0xff]   ;;  %v2020_v31 = vld [vmem:[%s2664_s0 + $0x180] ss:$24 sps:$4 sm:$0xff]   ;;  %v2025_v33 = vld [vmem:[%s2664_s0 + $0x64] ss:$24 sps:$4 sm:$0xff]  }
   0xc   :  { %1696 = vmatprep.subr.bf16.mxu0 %v1994_v6  ;;  %1975 = vmatprep.subr.bf16.mxu1 %v1994_v6  ;;  %v2023_v29 = vld [vmem:[%s2663_s1 + $0x88] sm:$0xff]   ;;  %v2029_v36 = vld [vmem:[%s2663_s1 + $0x110] sm:$0xff]   ;;  %v2034_v38 = vld [vmem:[%s2663_s1 + $0x158] sm:$0xff]  }
   0xd   :  { %v2019_v30 = vld [vmem:[%s2664_s0 + $0x30] ss:$24 sps:$4 sm:$0xff]   ;;  %v2027_v35 = vld [vmem:[%s2664_s0 + $0x1b4] ss:$24 sps:$4 sm:$0xff]   ;;  %v2042_v39 = vld [vmem:[%s2663_s1 + $0xd8] sm:$0xff]  }
   0xe   :  { %v2033_v37 = vld [vmem:[%s2663_s1 + $0x90] sm:$0xff]   ;;  %v2035_v40 = vld [vmem:[%s2663_s1 + $0x118] sm:$0xff]   ;;  %v2044_v44 = vld [vmem:[%s2663_s1 + $0x160] sm:$0xff]  }
   0xf   :  { %1697 = vmatpush3.bf16.msra.mxu0 %v1995_v7  ;;  %1983 = vmatpush3.bf16.msra.mxu1 %v1995_v7  ;;  %v2043_v41 = vld [vmem:[%s2663_s1 + $0x98] sm:$0xff]   ;;  %v2031_v43 = vld [vmem:[%s2664_s0 + $0x1b0] ss:$24 sps:$4 sm:$0xff]   ;;  %v2046_v45 = vld [vmem:[%s2663_s1 + $0xe0] sm:$0xff]  }
  0x10   :  { %1698 = vmatprep.subr.bf16.mxu0 %v1996_v8  ;;  %1976 = vmatprep.subr.bf16.mxu1 %v1996_v8  ;;  %v2030_v42 = vld [vmem:[%s2664_s0 + $0x60] ss:$24 sps:$4 sm:$0xff]   ;;  %v2036_v46 = vld [vmem:[%s2664_s0 + $0x94] ss:$24 sps:$4 sm:$0xff]   ;;  %v2038_v47 = vld [vmem:[%s2664_s0 + $0x1e4] ss:$24 sps:$4 sm:$0xff]  }
  0x11   :  { %v2045_v48 = vld [vmem:[%s2663_s1 + $0x120] sm:$0xff]   ;;  %v2054_v50 = vld [vmem:[%s2663_s1 + $0x168] sm:$0xff]   ;;  %v2064_v58 = vld [vmem:[%s2663_s1 + $0xf0] sm:$0xff]  }
  0x12   :  { %v2051_v49 = vld [vmem:[%s2663_s1 + $0xa0] sm:$0xff]   ;;  %v2055_v51 = vld [vmem:[%s2663_s1 + $0xe8] sm:$0xff]   ;;  %v2065_v59 = vld [vmem:[%s2663_s1 + $0xb0] sm:$0xff]  }
  0x13   :  { %1699 = vmatpush3.bf16.msra.mxu0 %v1997_v9  ;;  %1984 = vmatpush3.bf16.msra.mxu1 %v1997_v9  ;;  %v2040_v52 = vld [vmem:[%s2664_s0 + $0x90] ss:$24 sps:$4 sm:$0xff]   ;;  %v2041_v55 = vld [vmem:[%s2664_s0 + $0x1e0] ss:$24 sps:$4 sm:$0xff]   ;;  %v2047_v56 = vld [vmem:[%s2664_s0 + $0xc4] ss:$24 sps:$4 sm:$0xff]  }
  0x14   :  { %1700 = vmatprep.subr.bf16.mxu0 %v1998_v10  ;;  %1977 = vmatprep.subr.bf16.mxu1 %v1998_v10  ;;  %v2056_v53 = vld [vmem:[%s2663_s1 + $0x128] sm:$0xff]   ;;  %v2066_v60 = vld [vmem:[%s2663_s1 + $0x170] sm:$0xff]   ;;  %v2052_v62 = vld [vmem:[%s2664_s0 + $0xc0] ss:$24 sps:$4 sm:$0xff]  }
  0x15   :  { %v2057_v54 = vld [vmem:[%s2663_s1 + $0xa8] sm:$0xff]   ;;  %v2067_v61 = vld [vmem:[%s2663_s1 + $0x130] sm:$0xff]   ;;  %v2068_v0 = vld [vmem:[%s2663_s1 + $0xf8] sm:$0xff]  }
  0x16   :  { %v2049_v57 = vld [vmem:[%s2664_s0 + $0x214] ss:$24 sps:$4 sm:$0xff]   ;;  %v2053_v63 = vld [vmem:[%s2664_s0 + $0x210] ss:$24 sps:$4 sm:$0xff]   ;;  %v2069_v1 = vld [vmem:[%s2663_s1 + $0xb8] sm:$0xff]  }
  0x17   :  { %1701 = vmatpush3.bf16.msra.mxu0 %v1999_v13  ;;  %1985 = vmatpush3.bf16.msra.mxu1 %v1999_v13  ;;  %v2058_v2 = vld [vmem:[%s2664_s0 + $0xf4] ss:$24 sps:$4 sm:$0xff]   ;;  %v2060_v3 = vld [vmem:[%s2664_s0 + $0x244] ss:$24 sps:$4 sm:$0xff]   ;;  %v2062_v6 = vld [vmem:[%s2664_s0 + $0xf0] ss:$24 sps:$4 sm:$0xff]  }
  0x18   :  { %1702 = vmatprep.subr.bf16.mxu0 %v2000_v14  ;;  %1978 = vmatprep.subr.bf16.mxu1 %v2000_v14  ;;  %v2076_v4 = vld [vmem:[%s2663_s1 + $0x178] sm:$0xff]   ;;  %v2074_v9 = vld [vmem:[%s2664_s0 + $0xc] ss:$24 sps:$4 sm:$0xff]   ;;  %v2072_v10 = vld [vmem:[%s2664_s0 + $0x8] ss:$24 sps:$4 sm:$0xff]  }
  0x19   :  { %v2077_v5 = vld [vmem:[%s2663_s1 + $0x138] sm:$0xff]   ;;  %v2082_v13 = vld [vmem:[%s2664_s0 + $0x14] ss:$24 sps:$4 sm:$0xff]   ;;  %v2080_v14 = vld [vmem:[%s2664_s0 + $0x10] ss:$24 sps:$4 sm:$0xff]  }
  0x1a   :  { %v2063_v7 = vld [vmem:[%s2664_s0 + $0x240] ss:$24 sps:$4 sm:$0xff]   ;;  %v2070_v8 = vld [vmem:[%s2664_s0 + $0x124] ss:$24 sps:$4 sm:$0xff]  }
  0x1b   :  { %1703 = vmatpush3.bf16.msra.mxu0 %v2001_v15  ;;  %1986 = vmatpush3.bf16.msra.mxu1 %v2001_v15  ;;  %v2075_v11 = vld [vmem:[%s2664_s0 + $0x120] ss:$24 sps:$4 sm:$0xff]   ;;  %v2078_v12 = vld [vmem:[%s2664_s0 + $0x3c] ss:$24 sps:$4 sm:$0xff]  }
  0x1c   :  { %1704 = vmatprep.subr.bf16.mxu0 %v2002_v16  ;;  %1979 = vmatprep.subr.bf16.mxu1 %v2002_v16  ;;  %v2083_v15 = vld [vmem:[%s2664_s0 + $0x38] ss:$24 sps:$4 sm:$0xff]   ;;  %v2084_v16 = vld [vmem:[%s2664_s0 + $0x6c] ss:$24 sps:$4 sm:$0xff]  }
  0x1f   :  { %1705 = vmatpush3.bf16.msra.mxu0 %v2003_v17  ;;  %1987 = vmatpush3.bf16.msra.mxu1 %v2003_v17  ;;  %v2086_v17 = vld [vmem:[%s2664_s0 + $0x44] ss:$24 sps:$4 sm:$0xff]  }
  0x20   :  { %1878 = vmatprep.subr.bf16.mxu0 %v2010_v18  ;;  %1784 = vmatprep.subr.bf16.mxu1 %v2012_v21  ;;  %v2088_v18 = vld [vmem:[%s2664_s0 + $0x68] ss:$24 sps:$4 sm:$0xff]   ;;  %v2092_v21 = vld [vmem:[%s2664_s0 + $0x74] ss:$24 sps:$4 sm:$0xff]  }
  0x22   :  { %897 = vmatmul.mubr.bf16.vlgmr.msra.gmra.mrb[0].mxu0 %v2004_v19  ;;  %953 = vmatmul.mubr.bf16.vlgmr.msra.gmra.mrb[0].mxu1 %v2007_v20  ;;  %v2089_v19 = vld [vmem:[%s2664_s0 + $0x40] ss:$24 sps:$4 sm:$0xff]   ;;  %v2090_v20 = vld [vmem:[%s2664_s0 + $0x9c] ss:$24 sps:$4 sm:$0xff]  }
  0x23   :  { %1879 = vmatpush3.bf16.msra.mxu0 %v2011_v22  ;;  %904 = vmatprep.mubr.bf16.mxu0 %v2013_v23  ;;  %v2094_v22 = vld [vmem:[%s2664_s0 + $0x98] ss:$24 sps:$4 sm:$0xff]  }
  0x24   :  { %960 = vmatprep.mubr.bf16.mxu1 %v2015_v24  ;;  %1785 = vmatpush3.bf16.msra.mxu1 %v2017_v25  ;;  %v2095_v23 = vld [vmem:[%s2664_s0 + $0x70] ss:$24 sps:$4 sm:$0xff]   ;;  %v2096_v24 = vld [vmem:[%s2664_s0 + $0xcc] ss:$24 sps:$4 sm:$0xff]  }
  0x25   :  { %1880 = vmatprep.subr.bf16.mxu0 %v2018_v26  ;;  %1786 = vmatprep.subr.bf16.mxu1 %v2022_v27  ;;  %v2098_v25 = vld [vmem:[%s2664_s0 + $0xa4] ss:$24 sps:$4 sm:$0xff]   ;;  %v2100_v26 = vld [vmem:[%s2664_s0 + $0xc8] ss:$24 sps:$4 sm:$0xff]  }
  0x26   :  { %v2101_v27 = vld [vmem:[%s2664_s0 + $0xa0] ss:$24 sps:$4 sm:$0xff]  }
  0x27   :  { %1881 = vmatpush3.bf16.msra.mxu0 %v2021_v28  ;;  %v2102_v28 = vld [vmem:[%s2664_s0 + $0xfc] ss:$24 sps:$4 sm:$0xff]  }
  0x28   :  { %1787 = vmatpush3.bf16.msra.mxu1 %v2023_v29  ;;  %1882 = vmatprep.subr.bf16.mxu0 %v2024_v32  ;;  %v2104_v29 = vld [vmem:[%s2664_s0 + $0xd4] ss:$24 sps:$4 sm:$0xff]  }
  0x29   :  { %1788 = vmatprep.subr.bf16.mxu1 %v2032_v34  ;;  %v2108_v32 = vld [vmem:[%s2664_s0 + $0x12c] ss:$24 sps:$4 sm:$0xff]   ;;  %v2112_v34 = vld [vmem:[%s2664_s0 + $0x128] ss:$24 sps:$4 sm:$0xff]  }
  0x2a   :  { %905 = vmatmul.mubr.bf16.gmra.mrb[4].mxu0 %v2019_v30  ;;  %961 = vmatmul.mubr.bf16.gmra.mrb[4].mxu1 %v2020_v31  ;;  %v2106_v30 = vld [vmem:[%s2664_s0 + $0xf8] ss:$24 sps:$4 sm:$0xff]  }
  0x2b   :  { %912 = vmatprep.mubr.bf16.mxu0 %v2025_v33  ;;  %968 = vmatprep.mubr.bf16.mxu1 %v2027_v35  ;;  %v2107_v31 = vld [vmem:[%s2664_s0 + $0xd0] ss:$24 sps:$4 sm:$0xff]   ;;  %v2110_v33 = vld [vmem:[%s2664_s0 + $0x104] ss:$24 sps:$4 sm:$0xff]   ;;  %v2113_v35 = vld [vmem:[%s2664_s0 + $0x100] ss:$24 sps:$4 sm:$0xff]  }
  0x2c   :  { %1883 = vmatpush3.bf16.msra.mxu0 %v2029_v36  ;;  %1789 = vmatpush3.bf16.msra.mxu1 %v2033_v37  ;;  %v2114_v36 = vld [vmem:[%s2664_s0 + $0x15c] ss:$24 sps:$4 sm:$0xff]  }
  0x2d   :  { %1884 = vmatprep.subr.bf16.mxu0 %v2034_v38  ;;  %1790 = vmatprep.subr.bf16.mxu1 %v2042_v39  ;;  %v2116_v37 = vld [vmem:[%s2664_s0 + $0x134] ss:$24 sps:$4 sm:$0xff]   ;;  %v2118_v38 = vld [vmem:[%s2664_s0 + $0x158] ss:$24 sps:$4 sm:$0xff]  }
  0x2e   :  { %v2119_v39 = vld [vmem:[%s2664_s0 + $0x130] ss:$24 sps:$4 sm:$0xff]  }
  0x30   :  { %1885 = vmatpush3.bf16.msra.mxu0 %v2035_v40  ;;  %1791 = vmatpush3.bf16.msra.mxu1 %v2043_v41  ;;  %v2120_v40 = vld [vmem:[%s2664_s0 + $0x18c] ss:$24 sps:$4 sm:$0xff]  }
  0x31   :  { %1886 = vmatprep.subr.bf16.mxu0 %v2044_v44  ;;  %1792 = vmatprep.subr.bf16.mxu1 %v2046_v45  ;;  %v2122_v41 = vld [vmem:[%s2664_s0 + $0x164] ss:$24 sps:$4 sm:$0xff]   ;;  %v2128_v45 = vld [vmem:[%s2664_s0 + $0x194] ss:$24 sps:$4 sm:$0xff]  }
  0x32   :  { %913 = vmatmul.mubr.bf16.gmra.mrb[8].mxu0 %v2030_v42  ;;  %969 = vmatmul.mubr.bf16.gmra.mrb[8].mxu1 %v2031_v43  ;;  %v2124_v42 = vld [vmem:[%s2664_s0 + $0x188] ss:$24 sps:$4 sm:$0xff]   ;;  %v2126_v44 = vld [vmem:[%s2664_s0 + $0x1bc] ss:$24 sps:$4 sm:$0xff]  }
  0x33   :  { %920 = vmatprep.mubr.bf16.mxu0 %v2036_v46  ;;  %976 = vmatprep.mubr.bf16.mxu1 %v2038_v47  ;;  %v2125_v43 = vld [vmem:[%s2664_s0 + $0x160] ss:$24 sps:$4 sm:$0xff]   ;;  %v2131_v47 = vld [vmem:[%s2664_s0 + $0x190] ss:$24 sps:$4 sm:$0xff]  }
  0x34   :  { %1887 = vmatpush3.bf16.msra.mxu0 %v2045_v48  ;;  %1793 = vmatpush3.bf16.msra.mxu1 %v2051_v49  ;;  %v2130_v46 = vld [vmem:[%s2664_s0 + $0x1b8] ss:$24 sps:$4 sm:$0xff]   ;;  %v2132_v48 = vld [vmem:[%s2664_s0 + $0x1ec] ss:$24 sps:$4 sm:$0xff]  }
  0x35   :  { %1888 = vmatprep.subr.bf16.mxu0 %v2054_v50  ;;  %1794 = vmatprep.subr.bf16.mxu1 %v2055_v51  ;;  %v2134_v49 = vld [vmem:[%s2664_s0 + $0x1c4] ss:$24 sps:$4 sm:$0xff]   ;;  %v2136_v50 = vld [vmem:[%s2664_s0 + $0x1e8] ss:$24 sps:$4 sm:$0xff]  }
  0x36   :  { %v2137_v51 = vld [vmem:[%s2664_s0 + $0x1c0] ss:$24 sps:$4 sm:$0xff]  }
  0x38   :  { %1889 = vmatpush3.bf16.msra.mxu0 %v2056_v53  ;;  %1795 = vmatpush3.bf16.msra.mxu1 %v2057_v54  ;;  %v2140_v53 = vld [vmem:[%s2664_s0 + $0x1f4] ss:$24 sps:$4 sm:$0xff]   ;;  %v2142_v54 = vld [vmem:[%s2664_s0 + $0x218] ss:$24 sps:$4 sm:$0xff]  }
  0x39   :  { %1796 = vmatprep.subr.bf16.mxu1 %v2064_v58  ;;  %1890 = vmatprep.subr.bf16.mxu0 %v2066_v60  ;;  %v2148_v58 = vld [vmem:[%s2664_s0 + $0x248] ss:$24 sps:$4 sm:$0xff]   ;;  %v2150_v60 = vld [vmem:[%s2664_s0 + $0x254] ss:$24 sps:$4 sm:$0xff]  }
  0x3a   :  { %921 = vmatmul.mubr.bf16.gmra.mrb[12].mxu0 %v2040_v52  ;;  %977 = vmatmul.mubr.bf16.gmra.mrb[12].mxu1 %v2041_v55  ;;  %v2138_v52 = vld [vmem:[%s2664_s0 + $0x21c] ss:$24 sps:$4 sm:$0xff]   ;;  %v2143_v55 = vld [vmem:[%s2664_s0 + $0x1f0] ss:$24 sps:$4 sm:$0xff]  }
  0x3b   :  { %928 = vmatprep.mubr.bf16.mxu0 %v2047_v56  ;;  %984 = vmatprep.mubr.bf16.mxu1 %v2049_v57  ;;  %v2144_v56 = vld [vmem:[%s2664_s0 + $0x24c] ss:$24 sps:$4 sm:$0xff]  }
  0x3c   :  { %1797 = vmatpush3.bf16.msra.mxu1 %v2065_v59  ;;  %1891 = vmatpush3.bf16.msra.mxu0 %v2067_v61  ;;  %v2146_v57 = vld [vmem:[%s2664_s0 + $0x224] ss:$24 sps:$4 sm:$0xff]   ;;  %v2149_v59 = vld [vmem:[%s2664_s0 + $0x220] ss:$24 sps:$4 sm:$0xff]   ;;  %v2152_v61 = vld [vmem:[%s2664_s0 + $0x250] ss:$24 sps:$4 sm:$0xff]  }
  0x3d   :  { %1798 = vmatprep.subr.bf16.mxu1 %v2068_v0  ;;  %1892 = vmatprep.subr.bf16.mxu0 %v2076_v4 }
  0x40   :  { %1799 = vmatpush3.bf16.msra.mxu1 %v2069_v1  ;;  %1893 = vmatpush3.bf16.msra.mxu0 %v2077_v5 }
  0x42   :  { %929 = vmatmul.mubr.bf16.gmra.mrb[16].mxu0 %v2052_v62  ;;  %985 = vmatmul.mubr.bf16.gmra.mrb[16].mxu1 %v2053_v63 }
  0x43   :  { %936 = vmatprep.mubr.bf16.mxu0 %v2058_v2  ;;  %992 = vmatprep.mubr.bf16.mxu1 %v2060_v3 }
  0x4a   :  { %937 = vmatmul.mubr.bf16.gmra.mrb[20].mxu0 %v2062_v6  ;;  %993 = vmatmul.mubr.bf16.gmra.mrb[20].mxu1 %v2063_v7 }
  0x4b   :  { %944 = vmatprep.mubr.bf16.mxu0 %v2070_v8  ;;  %1033 = vmatprep.mubr.bf16.mxu1 %v2074_v9 }
  0x52   :  { %945 = vmatmul.mubr.bf16.gmra.mrb[24].mxu0 %v2075_v11  ;;  %1034 = vmatmul.mubr.bf16.vlgmr.msra.gmra.mrb[24].mxu1 %v2072_v10 }
  0x53   :  { %1041 = vmatprep.mubr.bf16.mxu1 %v2078_v12  ;;  %1170 = vmatprep.mubr.bf16.mxu0 %v2082_v13 }
  0x5a   :  { %1042 = vmatmul.mubr.bf16.gmra.mrb[28].mxu1 %v2083_v15  ;;  %1171 = vmatmul.mubr.bf16.vlgmr.msra.gmra.mrb[28].mxu0 %v2080_v14 }
  0x5b   :  { %1049 = vmatprep.mubr.bf16.mxu1 %v2084_v16  ;;  %1178 = vmatprep.mubr.bf16.mxu0 %v2086_v17 }
  0x62   :  { %1050 = vmatmul.mubr.bf16.gmra.mrb[32].mxu1 %v2088_v18  ;;  %1179 = vmatmul.mubr.bf16.gmra.mrb[32].mxu0 %v2089_v19 }
  0x63   :  { %1057 = vmatprep.mubr.bf16.mxu1 %v2090_v20  ;;  %1186 = vmatprep.mubr.bf16.mxu0 %v2092_v21 }
  0x6a   :  { %1058 = vmatmul.mubr.bf16.gmra.mrb[36].mxu1 %v2094_v22  ;;  %1187 = vmatmul.mubr.bf16.gmra.mrb[36].mxu0 %v2095_v23 }
  0x6b   :  { %1065 = vmatprep.mubr.bf16.mxu1 %v2096_v24  ;;  %1194 = vmatprep.mubr.bf16.mxu0 %v2098_v25 }
  0x72   :  { %1066 = vmatmul.mubr.bf16.gmra.mrb[40].mxu1 %v2100_v26  ;;  %1195 = vmatmul.mubr.bf16.gmra.mrb[40].mxu0 %v2101_v27 }
  0x73   :  { %1073 = vmatprep.mubr.bf16.mxu1 %v2102_v28  ;;  %1202 = vmatprep.mubr.bf16.mxu0 %v2104_v29 }
  0x7a   :  { %1074 = vmatmul.mubr.bf16.gmra.mrb[44].mxu1 %v2106_v30  ;;  %1203 = vmatmul.mubr.bf16.gmra.mrb[44].mxu0 %v2107_v31 }
  0x7b   :  { %1081 = vmatprep.mubr.bf16.mxu1 %v2108_v32  ;;  %1210 = vmatprep.mubr.bf16.mxu0 %v2110_v33 }
  0x82   :  { %1082 = vmatmul.mubr.bf16.gmra.mrb[48].mxu1 %v2112_v34  ;;  %1211 = vmatmul.mubr.bf16.gmra.mrb[48].mxu0 %v2113_v35 }
  0x83   :  { %1089 = vmatprep.mubr.bf16.mxu1 %v2114_v36  ;;  %1218 = vmatprep.mubr.bf16.mxu0 %v2116_v37 }
  0x8a   :  { %1090 = vmatmul.mubr.bf16.gmra.mrb[52].mxu1 %v2118_v38  ;;  %1219 = vmatmul.mubr.bf16.gmra.mrb[52].mxu0 %v2119_v39 }
  0x8b   :  { %1097 = vmatprep.mubr.bf16.mxu1 %v2120_v40  ;;  %1226 = vmatprep.mubr.bf16.mxu0 %v2122_v41 }
  0x92   :  { %1098 = vmatmul.mubr.bf16.gmra.mrb[56].mxu1 %v2124_v42  ;;  %1227 = vmatmul.mubr.bf16.gmra.mrb[56].mxu0 %v2125_v43 }
  0x93   :  { %1105 = vmatprep.mubr.bf16.mxu1 %v2126_v44  ;;  %1234 = vmatprep.mubr.bf16.mxu0 %v2128_v45 }
  0x9a   :  { %1106 = vmatmul.mubr.bf16.gmra.mrb[60].mxu1 %v2130_v46  ;;  %1235 = vmatmul.mubr.bf16.gmra.mrb[60].mxu0 %v2131_v47 }
  0x9b   :  { %1113 = vmatprep.mubr.bf16.mxu1 %v2132_v48  ;;  %1242 = vmatprep.mubr.bf16.mxu0 %v2134_v49 }
  0xa2   :  { %1114 = vmatmul.mubr.bf16.gmra.mrb[64].mxu1 %v2136_v50  ;;  %1243 = vmatmul.mubr.bf16.gmra.mrb[64].mxu0 %v2137_v51 }
  0xa3   :  { %1121 = vmatprep.mubr.bf16.mxu1 %v2138_v52  ;;  %1250 = vmatprep.mubr.bf16.mxu0 %v2140_v53 }
  0xaa   :  { %1122 = vmatmul.mubr.bf16.gmra.mrb[68].mxu1 %v2142_v54  ;;  %1251 = vmatmul.mubr.bf16.gmra.mrb[68].mxu0 %v2143_v55 }
  0xab   :  { %1129 = vmatprep.mubr.bf16.mxu1 %v2144_v56  ;;  %1258 = vmatprep.mubr.bf16.mxu0 %v2146_v57 }
  0xb2   :  { %1130 = vmatmul.mubr.bf16.gmra.mrb[72].mxu1 %v2148_v58  ;;  %1259 = vmatmul.mubr.bf16.gmra.mrb[72].mxu0 %v2149_v59 }
  0xb3   :  { %1266 = vmatprep.mubr.bf16.mxu0 %v2150_v60 }
  0xba   :  { %1267 = vmatmul.mubr.bf16.gmra.mrb[76].mxu0 %v2152_v61 }
  0xf5   :  { %v1706_v62 = vpop.f32.mrb[0].mxu0  ;;  %v1748_v63 = vpop.f32.mrb[0].mxu1 }
  0xf6   :  { %v1707_v0 = vpop.f32.mrb[1].mxu0  ;;  %v1749_v1 = vpop.f32.mrb[1].mxu1 }
  0xf7   :  { %v2546_v2 = vadd.f32 %v1707_v0, %v1706_v62  ;;  %v1709_v3 = vpop.f32.mrb[2].mxu0  ;;  %v2548_v4 = vadd.f32 %v1749_v1, %v1748_v63  ;;  %v1751_v5 = vpop.f32.mrb[2].mxu1 }
  0xf8   :  { %v1710_v6 = vpop.f32.mrb[3].mxu0  ;;  %v1752_v7 = vpop.f32.mrb[3].mxu1 }
  0xf9   :  { %v2550_v8 = vadd.f32 %v1710_v6, %v1709_v3  ;;  %v2552_v9 = vadd.f32 %v1752_v7, %v1751_v5 }
  0xfd   :  { %v1712_v10 = vpop.f32.mrb[4].mxu0  ;;  %v1754_v11 = vpop.f32.mrb[4].mxu1 }
  0xfe   :  { %v1713_v12 = vpop.f32.mrb[5].mxu0  ;;  %v1755_v13 = vpop.f32.mrb[5].mxu1 }
  0xff   :  { %v2554_v14 = vadd.f32 %v1713_v12, %v1712_v10  ;;  %v1715_v15 = vpop.f32.mrb[6].mxu0  ;;  %v2556_v16 = vadd.f32 %v1755_v13, %v1754_v11  ;;  %v1757_v17 = vpop.f32.mrb[6].mxu1 }
 0x100   :  { %v1716_v18 = vpop.f32.mrb[7].mxu0  ;;  %v1758_v19 = vpop.f32.mrb[7].mxu1 }
 0x101   :  { %v2558_v20 = vadd.f32 %v1716_v18, %v1715_v15  ;;  %v2560_v21 = vadd.f32 %v1758_v19, %v1757_v17 }
 0x105   :  { %v1718_v22 = vpop.f32.mrb[8].mxu0  ;;  %v1760_v23 = vpop.f32.mrb[8].mxu1 }
 0x106   :  { %v1719_v24 = vpop.f32.mrb[9].mxu0  ;;  %v1761_v25 = vpop.f32.mrb[9].mxu1 }
 0x107   :  { %v2562_v26 = vadd.f32 %v1719_v24, %v1718_v22  ;;  %v1721_v27 = vpop.f32.mrb[10].mxu0  ;;  %v2564_v28 = vadd.f32 %v1761_v25, %v1760_v23  ;;  %v1763_v29 = vpop.f32.mrb[10].mxu1 }
 0x108   :  { %v1722_v30 = vpop.f32.mrb[11].mxu0  ;;  %v1764_v31 = vpop.f32.mrb[11].mxu1 }
 0x109   :  { %v2566_v32 = vadd.f32 %v1722_v30, %v1721_v27  ;;  %v2568_v33 = vadd.f32 %v1764_v31, %v1763_v29 }
 0x10d   :  { %v1724_v34 = vpop.f32.mrb[12].mxu0  ;;  %v1766_v35 = vpop.f32.mrb[12].mxu1 }
 0x10e   :  { %v1725_v36 = vpop.f32.mrb[13].mxu0  ;;  %v1767_v37 = vpop.f32.mrb[13].mxu1 }
 0x10f   :  { %v2570_v38 = vadd.f32 %v1725_v36, %v1724_v34  ;;  %v1727_v39 = vpop.f32.mrb[14].mxu0  ;;  %v2572_v40 = vadd.f32 %v1767_v37, %v1766_v35  ;;  %v1769_v41 = vpop.f32.mrb[14].mxu1 }
 0x110   :  { %v1728_v42 = vpop.f32.mrb[15].mxu0  ;;  %v1770_v43 = vpop.f32.mrb[15].mxu1 }
 0x111   :  { %v2574_v44 = vadd.f32 %v1728_v42, %v1727_v39  ;;  %v2576_v45 = vadd.f32 %v1770_v43, %v1769_v41 }
 0x115   :  { %v1730_v46 = vpop.f32.mrb[16].mxu0  ;;  %v1772_v47 = vpop.f32.mrb[16].mxu1 }
 0x116   :  { %v1731_v48 = vpop.f32.mrb[17].mxu0  ;;  %v1773_v49 = vpop.f32.mrb[17].mxu1 }
 0x117   :  { %v2578_v50 = vadd.f32 %v1731_v48, %v1730_v46  ;;  %v1733_v51 = vpop.f32.mrb[18].mxu0  ;;  %v2580_v52 = vadd.f32 %v1773_v49, %v1772_v47  ;;  %v1775_v53 = vpop.f32.mrb[18].mxu1 }
 0x118   :  { %v1734_v54 = vpop.f32.mrb[19].mxu0  ;;  %v1776_v55 = vpop.f32.mrb[19].mxu1 }
 0x119   :  { %v2582_v56 = vadd.f32 %v1734_v54, %v1733_v51  ;;  %v2584_v57 = vadd.f32 %v1776_v55, %v1775_v53 }
 0x11d   :  { %v1736_v58 = vpop.f32.mrb[20].mxu0  ;;  %v1778_v59 = vpop.f32.mrb[20].mxu1 }
 0x11e   :  { %v1737_v60 = vpop.f32.mrb[21].mxu0  ;;  %v1779_v61 = vpop.f32.mrb[21].mxu1 }
 0x11f   :  { %v2586_v62 = vadd.f32 %v1737_v60, %v1736_v58  ;;  %v1739_v63 = vpop.f32.mrb[22].mxu0  ;;  %v2588_v0 = vadd.f32 %v1779_v61, %v1778_v59  ;;  %v1781_v1 = vpop.f32.mrb[22].mxu1 }
 0x120   :  { %v1740_v3 = vpop.f32.mrb[23].mxu0  ;;  %v1782_v5 = vpop.f32.mrb[23].mxu1 }
 0x121   :  { %v2590_v6 = vadd.f32 %v1740_v3, %v1739_v63  ;;  %v2592_v7 = vadd.f32 %v1782_v5, %v1781_v1 }
 0x125   :  { %v1742_v10 = vpop.f32.mrb[24].mxu0  ;;  %v1800_v11 = vpop.f32.mrb[24].mxu1 }
 0x126   :  { %v1743_v12 = vpop.f32.mrb[25].mxu0  ;;  %v1801_v13 = vpop.f32.mrb[25].mxu1 }
 0x127   :  { %v2594_v15 = vadd.f32 %v1743_v12, %v1742_v10  ;;  %v1802_v17 = vadd.f32 %v1801_v13, %v1800_v11  ;;  %v1745_v18 = vpop.f32.mrb[26].mxu0  ;;  %v1803_v19 = vpop.f32.mrb[26].mxu1 }
 0x128   :  { %v1746_v22 = vpop.f32.mrb[27].mxu0  ;;  %v1804_v23 = vpop.f32.mrb[27].mxu1 }
 0x129   :  { %v1036_v24 = vadd.f32 %v1802_v17, %v2546_v2  ;;  %v2597_v25 = vadd.f32 %v1746_v22, %v1745_v18  ;;  %v1805_v27 = vadd.f32 %v1804_v23, %v1803_v19 }
 0x12b   :  { %v1039_v29 = vadd.f32 %v1805_v27, %v2550_v8 }
 0x12d   :  { %v1806_v30 = vpop.f32.mrb[28].mxu1  ;;  %v1894_v31 = vpop.f32.mrb[28].mxu0 }
 0x12e   :  { %v1807_v34 = vpop.f32.mrb[29].mxu1  ;;  %v1895_v35 = vpop.f32.mrb[29].mxu0 }
 0x12f   :  { %v1808_v36 = vadd.f32 %v1807_v34, %v1806_v30  ;;  %v1896_v37 = vadd.f32 %v1895_v35, %v1894_v31  ;;  %v1809_v39 = vpop.f32.mrb[30].mxu1  ;;  %v1897_v41 = vpop.f32.mrb[30].mxu0 }
 0x130   :  { %v1810_v42 = vpop.f32.mrb[31].mxu1  ;;  %v1898_v43 = vpop.f32.mrb[31].mxu0 }
 0x131   :  { %v1044_v46 = vadd.f32 %v1808_v36, %v2554_v14  ;;  %v1173_v47 = vadd.f32 %v1896_v37, %v1036_v24  ;;  %v1811_v48 = vadd.f32 %v1810_v42, %v1809_v39  ;;  %v1899_v2 = vadd.f32 %v1898_v43, %v1897_v41 }
 0x133   :  { %v1047_v49 = vadd.f32 %v1811_v48, %v2558_v20  ;;  %v1176_v51 = vadd.f32 %v1899_v2, %v1039_v29  ;;  %v1275_v53 = vmax.f32 %v1173_v47, 0.0 }
 0x135   :  { %v1276_v8 = vmax.f32 %v1176_v51, 0.0  ;;  %v1812_v54 = vpop.f32.mrb[32].mxu1  ;;  %v1900_v55 = vpop.f32.mrb[32].mxu0 }
 0x136   :  { %v1813_v58 = vpop.f32.mrb[33].mxu1  ;;  %v1901_v59 = vpop.f32.mrb[33].mxu0 }
 0x137   :  { %v1616_v60 = vpack.c.bf16 %v1276_v8, %v1275_v53  ;;  %v1814_v61 = vadd.f32 %v1813_v58, %v1812_v54  ;;  %v1902_v63 = vadd.f32 %v1901_v59, %v1900_v55  ;;  %v1815_v1 = vpop.f32.mrb[34].mxu1  ;;  %v1903_v3 = vpop.f32.mrb[34].mxu0 }
 0x138   :  { %v1816_v5 = vpop.f32.mrb[35].mxu1  ;;  %v1904_v10 = vpop.f32.mrb[35].mxu0 }
 0x139   :  { %1617 = vst [vmem:[%s2665_s2] sm:$0xff] %v1616_v60   ;;  %v1052_v14 = vadd.f32 %v1814_v61, %v2562_v26  ;;  %v1181_v20 = vadd.f32 %v1902_v63, %v1044_v46  ;;  %v1817_v11 = vadd.f32 %v1816_v5, %v1815_v1  ;;  %v1905_v12 = vadd.f32 %v1904_v10, %v1903_v3 }
 0x13b   :  { %v1055_v13 = vadd.f32 %v1817_v11, %v2566_v32  ;;  %v1184_v17 = vadd.f32 %v1905_v12, %v1047_v49  ;;  %v1277_v18 = vmax.f32 %v1181_v20, 0.0 }
 0x13d   :  { %v1278_v19 = vmax.f32 %v1184_v17, 0.0  ;;  %v1818_v22 = vpop.f32.mrb[36].mxu1  ;;  %v1906_v23 = vpop.f32.mrb[36].mxu0 }
 0x13e   :  { %v1819_v24 = vpop.f32.mrb[37].mxu1  ;;  %v1907_v27 = vpop.f32.mrb[37].mxu0 }
 0x13f   :  { %v1621_v29 = vpack.c.bf16 %v1278_v19, %v1277_v18  ;;  %v1820_v30 = vadd.f32 %v1819_v24, %v1818_v22  ;;  %v1908_v31 = vadd.f32 %v1907_v27, %v1906_v23  ;;  %v1821_v34 = vpop.f32.mrb[38].mxu1  ;;  %v1909_v35 = vpop.f32.mrb[38].mxu0 }
 0x140   :  { %v1822_v36 = vpop.f32.mrb[39].mxu1  ;;  %v1910_v37 = vpop.f32.mrb[39].mxu0 }
 0x141   :  { %1678 = vst [vmem:[%s2665_s2 + $0x8] sm:$0xff] %v1621_v29   ;;  %v1060_v26 = vadd.f32 %v1820_v30, %v2570_v38  ;;  %v1189_v32 = vadd.f32 %v1908_v31, %v1052_v14  ;;  %v1823_v39 = vadd.f32 %v1822_v36, %v1821_v34  ;;  %v1911_v41 = vadd.f32 %v1910_v37, %v1909_v35 }
 0x143   :  { %v1063_v42 = vadd.f32 %v1823_v39, %v2574_v44  ;;  %v1192_v43 = vadd.f32 %v1911_v41, %v1055_v13  ;;  %v1279_v46 = vmax.f32 %v1189_v32, 0.0 }
 0x145   :  { %v1280_v47 = vmax.f32 %v1192_v43, 0.0  ;;  %v1824_v48 = vpop.f32.mrb[40].mxu1  ;;  %v1912_v2 = vpop.f32.mrb[40].mxu0 }
 0x146   :  { %v1825_v49 = vpop.f32.mrb[41].mxu1  ;;  %v1913_v51 = vpop.f32.mrb[41].mxu0 }
 0x147   :  { %v1626_v53 = vpack.c.bf16 %v1280_v47, %v1279_v46  ;;  %v1826_v8 = vadd.f32 %v1825_v49, %v1824_v48  ;;  %v1914_v54 = vadd.f32 %v1913_v51, %v1912_v2  ;;  %v1827_v55 = vpop.f32.mrb[42].mxu1  ;;  %v1915_v58 = vpop.f32.mrb[42].mxu0 }
 0x148   :  { %v1828_v59 = vpop.f32.mrb[43].mxu1  ;;  %v1916_v60 = vpop.f32.mrb[43].mxu0 }
 0x149   :  { %1679 = vst [vmem:[%s2665_s2 + $0x10] sm:$0xff] %v1626_v53   ;;  %v1068_v38 = vadd.f32 %v1826_v8, %v2578_v50  ;;  %v1197_v44 = vadd.f32 %v1914_v54, %v1060_v26  ;;  %v1829_v61 = vadd.f32 %v1828_v59, %v1827_v55  ;;  %v1917_v63 = vadd.f32 %v1916_v60, %v1915_v58 }
 0x14b   :  { %v1071_v1 = vadd.f32 %v1829_v61, %v2582_v56  ;;  %v1200_v3 = vadd.f32 %v1917_v63, %v1063_v42  ;;  %v1281_v5 = vmax.f32 %v1197_v44, 0.0 }
 0x14d   :  { %v1282_v10 = vmax.f32 %v1200_v3, 0.0  ;;  %v1830_v14 = vpop.f32.mrb[44].mxu1  ;;  %v1918_v20 = vpop.f32.mrb[44].mxu0 }
 0x14e   :  { %v1831_v11 = vpop.f32.mrb[45].mxu1  ;;  %v1919_v12 = vpop.f32.mrb[45].mxu0 }
 0x14f   :  { %v1631_v13 = vpack.c.bf16 %v1282_v10, %v1281_v5  ;;  %v1832_v17 = vadd.f32 %v1831_v11, %v1830_v14  ;;  %v1920_v18 = vadd.f32 %v1919_v12, %v1918_v20  ;;  %v1833_v19 = vpop.f32.mrb[46].mxu1  ;;  %v1921_v22 = vpop.f32.mrb[46].mxu0 }
 0x150   :  { %v1834_v23 = vpop.f32.mrb[47].mxu1  ;;  %v1922_v24 = vpop.f32.mrb[47].mxu0 }
 0x151   :  { %1680 = vst [vmem:[%s2665_s2 + $0x18] sm:$0xff] %v1631_v13   ;;  %v1076_v50 = vadd.f32 %v1832_v17, %v2586_v62  ;;  %v1205_v56 = vadd.f32 %v1920_v18, %v1068_v38  ;;  %v1835_v27 = vadd.f32 %v1834_v23, %v1833_v19  ;;  %v1923_v29 = vadd.f32 %v1922_v24, %v1921_v22 }
 0x153   :  { %v1079_v30 = vadd.f32 %v1835_v27, %v2590_v6  ;;  %v1208_v31 = vadd.f32 %v1923_v29, %v1071_v1  ;;  %v1283_v34 = vmax.f32 %v1205_v56, 0.0 }
 0x155   :  { %v1284_v35 = vmax.f32 %v1208_v31, 0.0  ;;  %v1836_v36 = vpop.f32.mrb[48].mxu1  ;;  %v1924_v37 = vpop.f32.mrb[48].mxu0 }
 0x156   :  { %v1837_v26 = vpop.f32.mrb[49].mxu1  ;;  %v1925_v32 = vpop.f32.mrb[49].mxu0 }
 0x157   :  { %v1636_v39 = vpack.c.bf16 %v1284_v35, %v1283_v34  ;;  %v1838_v41 = vadd.f32 %v1837_v26, %v1836_v36  ;;  %v1926_v42 = vadd.f32 %v1925_v32, %v1924_v37  ;;  %v1839_v43 = vpop.f32.mrb[50].mxu1  ;;  %v1927_v46 = vpop.f32.mrb[50].mxu0 }
 0x158   :  { %v1840_v47 = vpop.f32.mrb[51].mxu1  ;;  %v1928_v48 = vpop.f32.mrb[51].mxu0 }
 0x159   :  { %1681 = vst [vmem:[%s2665_s2 + $0x20] sm:$0xff] %v1636_v39   ;;  %v1084_v62 = vadd.f32 %v1838_v41, %v2594_v15  ;;  %v1213_v6 = vadd.f32 %v1926_v42, %v1076_v50  ;;  %v1841_v2 = vadd.f32 %v1840_v47, %v1839_v43  ;;  %v1929_v49 = vadd.f32 %v1928_v48, %v1927_v46 }
 0x15b   :  { %v1087_v51 = vadd.f32 %v1841_v2, %v2597_v25  ;;  %v1216_v53 = vadd.f32 %v1929_v49, %v1079_v30  ;;  %v1285_v8 = vmax.f32 %v1213_v6, 0.0 }
 0x15d   :  { %v1286_v54 = vmax.f32 %v1216_v53, 0.0  ;;  %v1842_v55 = vpop.f32.mrb[52].mxu1  ;;  %v1930_v58 = vpop.f32.mrb[52].mxu0 }
 0x15e   :  { %v1843_v59 = vpop.f32.mrb[53].mxu1  ;;  %v1931_v60 = vpop.f32.mrb[53].mxu0 }
 0x15f   :  { %v1641_v38 = vpack.c.bf16 %v1286_v54, %v1285_v8  ;;  %v1844_v44 = vadd.f32 %v1843_v59, %v1842_v55  ;;  %v1932_v61 = vadd.f32 %v1931_v60, %v1930_v58  ;;  %v1845_v63 = vpop.f32.mrb[54].mxu1  ;;  %v1933_v1 = vpop.f32.mrb[54].mxu0 }
 0x160   :  { %v1846_v3 = vpop.f32.mrb[55].mxu1  ;;  %v1934_v5 = vpop.f32.mrb[55].mxu0 }
 0x161   :  { %1682 = vst [vmem:[%s2665_s2 + $0x28] sm:$0xff] %v1641_v38   ;;  %v1092_v15 = vadd.f32 %v1844_v44, %v2548_v4  ;;  %v1221_v25 = vadd.f32 %v1932_v61, %v1084_v62  ;;  %v1847_v10 = vadd.f32 %v1846_v3, %v1845_v63  ;;  %v1935_v14 = vadd.f32 %v1934_v5, %v1933_v1 }
 0x163   :  { %v1095_v20 = vadd.f32 %v1847_v10, %v2552_v9  ;;  %v1224_v11 = vadd.f32 %v1935_v14, %v1087_v51  ;;  %v1287_v12 = vmax.f32 %v1221_v25, 0.0 }
 0x165   :  { %v1288_v13 = vmax.f32 %v1224_v11, 0.0  ;;  %v1848_v17 = vpop.f32.mrb[56].mxu1  ;;  %v1936_v18 = vpop.f32.mrb[56].mxu0 }
 0x166   :  { %v1849_v19 = vpop.f32.mrb[57].mxu1  ;;  %v1937_v22 = vpop.f32.mrb[57].mxu0 }
 0x167   :  { %v1646_v23 = vpack.c.bf16 %v1288_v13, %v1287_v12  ;;  %v1850_v24 = vadd.f32 %v1849_v19, %v1848_v17  ;;  %v1938_v50 = vadd.f32 %v1937_v22, %v1936_v18  ;;  %v1851_v56 = vpop.f32.mrb[58].mxu1  ;;  %v1939_v27 = vpop.f32.mrb[58].mxu0 }
 0x168   :  { %v1852_v29 = vpop.f32.mrb[59].mxu1  ;;  %v1940_v30 = vpop.f32.mrb[59].mxu0 }
 0x169   :  { %1683 = vst [vmem:[%s2665_s2 + $0x30] sm:$0xff] %v1646_v23   ;;  %v1100_v4 = vadd.f32 %v1850_v24, %v2556_v16  ;;  %v1229_v9 = vadd.f32 %v1938_v50, %v1092_v15  ;;  %v1853_v31 = vadd.f32 %v1852_v29, %v1851_v56  ;;  %v1941_v34 = vadd.f32 %v1940_v30, %v1939_v27 }
 0x16b   :  { %v1103_v35 = vadd.f32 %v1853_v31, %v2560_v21  ;;  %v1232_v36 = vadd.f32 %v1941_v34, %v1095_v20  ;;  %v1289_v37 = vmax.f32 %v1229_v9, 0.0 }
 0x16d   :  { %v1290_v26 = vmax.f32 %v1232_v36, 0.0  ;;  %v1854_v32 = vpop.f32.mrb[60].mxu1  ;;  %v1942_v39 = vpop.f32.mrb[60].mxu0 }
 0x16e   :  { %v1855_v41 = vpop.f32.mrb[61].mxu1  ;;  %v1943_v42 = vpop.f32.mrb[61].mxu0 }
 0x16f   :  { %v1651_v43 = vpack.c.bf16 %v1290_v26, %v1289_v37  ;;  %v1856_v46 = vadd.f32 %v1855_v41, %v1854_v32  ;;  %v1944_v47 = vadd.f32 %v1943_v42, %v1942_v39  ;;  %v1857_v48 = vpop.f32.mrb[62].mxu1  ;;  %v1945_v62 = vpop.f32.mrb[62].mxu0 }
 0x170   :  { %v1858_v6 = vpop.f32.mrb[63].mxu1  ;;  %v1946_v2 = vpop.f32.mrb[63].mxu0 }
 0x171   :  { %1684 = vst [vmem:[%s2665_s2 + $0x38] sm:$0xff] %v1651_v43   ;;  %v1108_v16 = vadd.f32 %v1856_v46, %v2564_v28  ;;  %v1237_v21 = vadd.f32 %v1944_v47, %v1100_v4  ;;  %v1859_v49 = vadd.f32 %v1858_v6, %v1857_v48  ;;  %v1947_v51 = vadd.f32 %v1946_v2, %v1945_v62 }
 0x173   :  { %v1111_v53 = vadd.f32 %v1859_v49, %v2568_v33  ;;  %v1240_v8 = vadd.f32 %v1947_v51, %v1103_v35  ;;  %v1291_v54 = vmax.f32 %v1237_v21, 0.0 }
 0x175   :  { %v1292_v55 = vmax.f32 %v1240_v8, 0.0  ;;  %v1860_v58 = vpop.f32.mrb[64].mxu1  ;;  %v1948_v59 = vpop.f32.mrb[64].mxu0 }
 0x176   :  { %v1861_v60 = vpop.f32.mrb[65].mxu1  ;;  %v1949_v38 = vpop.f32.mrb[65].mxu0 }
 0x177   :  { %v1656_v44 = vpack.c.bf16 %v1292_v55, %v1291_v54  ;;  %v1862_v61 = vadd.f32 %v1861_v60, %v1860_v58  ;;  %v1950_v63 = vadd.f32 %v1949_v38, %v1948_v59  ;;  %v1863_v1 = vpop.f32.mrb[66].mxu1  ;;  %v1951_v3 = vpop.f32.mrb[66].mxu0 }
 0x178   :  { %v1864_v5 = vpop.f32.mrb[67].mxu1  ;;  %v1952_v15 = vpop.f32.mrb[67].mxu0 }
 0x179   :  { %1685 = vst [vmem:[%s2665_s2 + $0x40] sm:$0xff] %v1656_v44   ;;  %v1116_v28 = vadd.f32 %v1862_v61, %v2572_v40  ;;  %v1245_v33 = vadd.f32 %v1950_v63, %v1108_v16  ;;  %v1865_v25 = vadd.f32 %v1864_v5, %v1863_v1  ;;  %v1953_v10 = vadd.f32 %v1952_v15, %v1951_v3 }
 0x17b   :  { %v1119_v14 = vadd.f32 %v1865_v25, %v2576_v45  ;;  %v1248_v20 = vadd.f32 %v1953_v10, %v1111_v53  ;;  %v1293_v11 = vmax.f32 %v1245_v33, 0.0 }
 0x17d   :  { %v1294_v12 = vmax.f32 %v1248_v20, 0.0  ;;  %v1866_v13 = vpop.f32.mrb[68].mxu1  ;;  %v1954_v17 = vpop.f32.mrb[68].mxu0 }
 0x17e   :  { %v1867_v18 = vpop.f32.mrb[69].mxu1  ;;  %v1955_v19 = vpop.f32.mrb[69].mxu0 }
 0x17f   :  { %v1661_v22 = vpack.c.bf16 %v1294_v12, %v1293_v11  ;;  %v1868_v23 = vadd.f32 %v1867_v18, %v1866_v13  ;;  %v1956_v24 = vadd.f32 %v1955_v19, %v1954_v17  ;;  %v1869_v50 = vpop.f32.mrb[70].mxu1  ;;  %v1957_v56 = vpop.f32.mrb[70].mxu0 }
 0x180   :  { %v1870_v27 = vpop.f32.mrb[71].mxu1  ;;  %v1958_v29 = vpop.f32.mrb[71].mxu0 }
 0x181   :  { %1686 = vst [vmem:[%s2665_s2 + $0x48] sm:$0xff] %v1661_v22   ;;  %v1124_v40 = vadd.f32 %v1868_v23, %v2580_v52  ;;  %v1253_v45 = vadd.f32 %v1956_v24, %v1116_v28  ;;  %v1871_v30 = vadd.f32 %v1870_v27, %v1869_v50  ;;  %v1959_v4 = vadd.f32 %v1958_v29, %v1957_v56 }
 0x183   :  { %v1127_v9 = vadd.f32 %v1871_v30, %v2584_v57  ;;  %v1256_v31 = vadd.f32 %v1959_v4, %v1119_v14  ;;  %v1295_v34 = vmax.f32 %v1253_v45, 0.0 }
 0x185   :  { %v1296_v35 = vmax.f32 %v1256_v31, 0.0  ;;  %v1872_v36 = vpop.f32.mrb[72].mxu1  ;;  %v1960_v37 = vpop.f32.mrb[72].mxu0 }
 0x186   :  { %v1873_v26 = vpop.f32.mrb[73].mxu1  ;;  %v1961_v32 = vpop.f32.mrb[73].mxu0 }
 0x187   :  { %v1666_v39 = vpack.c.bf16 %v1296_v35, %v1295_v34  ;;  %v1874_v41 = vadd.f32 %v1873_v26, %v1872_v36  ;;  %v1962_v42 = vadd.f32 %v1961_v32, %v1960_v37  ;;  %v1875_v43 = vpop.f32.mrb[74].mxu1  ;;  %v1963_v46 = vpop.f32.mrb[74].mxu0 }
 0x188   :  { %v1876_v47 = vpop.f32.mrb[75].mxu1  ;;  %v1964_v48 = vpop.f32.mrb[75].mxu0 }
 0x189   :  { %1687 = vst [vmem:[%s2665_s2 + $0x50] sm:$0xff] %v1666_v39   ;;  %v1132_v52 = vadd.f32 %v1874_v41, %v2588_v0  ;;  %v1261_v57 = vadd.f32 %v1962_v42, %v1124_v40  ;;  %v1877_v62 = vadd.f32 %v1876_v47, %v1875_v43  ;;  %v1965_v6 = vadd.f32 %v1964_v48, %v1963_v46 }
 0x18b   :  { %v1135_v2 = vadd.f32 %v1877_v62, %v2592_v7  ;;  %v1264_v16 = vadd.f32 %v1965_v6, %v1127_v9  ;;  %v1297_v21 = vmax.f32 %v1261_v57, 0.0 }
 0x18d   :  { %v1298_v49 = vmax.f32 %v1264_v16, 0.0  ;;  %v1966_v51 = vpop.f32.mrb[76].mxu0 }
 0x18e   :  { %v1967_v53 = vpop.f32.mrb[77].mxu0 }
 0x18f   :  { %v1671_v8 = vpack.c.bf16 %v1298_v49, %v1297_v21  ;;  %v1968_v54 = vadd.f32 %v1967_v53, %v1966_v51  ;;  %v1969_v55 = vpop.f32.mrb[78].mxu0 }
 0x190   :  { %v1970_v58 = vpop.f32.mrb[79].mxu0 }
 0x191   :  { %1688 = vst [vmem:[%s2665_s2 + $0x58] sm:$0xff] %v1671_v8   ;;  %v1269_v59 = vadd.f32 %v1968_v54, %v1132_v52  ;;  %v1971_v0 = vadd.f32 %v1970_v58, %v1969_v55 }
 0x193   :  { %v1272_v60 = vadd.f32 %v1971_v0, %v1135_v2  ;;  %v1299_v38 = vmax.f32 %v1269_v59, 0.0 }
 0x195   :  { %v1300_v44 = vmax.f32 %v1272_v60, 0.0 }
 0x197   :  { %v1676_v61 = vpack.c.bf16 %v1300_v44, %v1299_v38 }
 0x199   :  { %1689 = vst [vmem:[%s2665_s2 + $0x60] sm:$0xff] %v1676_v61  }

// kernel: ae2d_forward.17
= control target key start
LH: loop header
LB: loop body
LE: loop exit
PB: predicated region body
PF: predicated region fallthrough
CT: control target
= control target key end

     0   :  { %s1338_s9 = smov 0   ;;  %s1340_s10 = smov 0   ;;  %s1610_s0 = inlined_call_operand.vmem [shape: bf16[64,384], index: 0, kind: input, shape index: {}]   ;;  %s1611_s1 = inlined_call_operand.vmem [shape: bf16[384,512], index: 1, kind: input, shape index: {}]   ;;  %s1612_s2 = inlined_call_operand.vmem [shape: bf16[64,512], index: 2, kind: output, shape index: {}]  }
   0x1   :  { %s1342_s11 = smov 0  }
   0x2 LB: > { %s1076_s12 = sadd.s32 4294967295, %s1320_s11   ;;  %s1355_s13 = sadd.s32 1, %s1320_s11   ;;  %s1320_s11 = sphi %s1342_s11, %s1616_s11   ;;  %s1316_s10 = sphi %s1340_s10, %s1615_s10   ;;  %s1312_s9 = sphi %s1338_s9, %s1614_s9  }
   0x3   : > { %s37_s14 = ssub.s32 %s1320_s11, %s1355_s13  ;;  %s40_s15 = sadd.s32 1, %s1316_s10 }
   0x4   : > { %p38_p0 = scmp.eq.s32.totalorder %s37_s14, 0  ;;  %p47_p1 = scmp.ne.s32.totalorder %s1316_s10, %s1312_s9 }
   0x5   : > { %p48_p2 = scmp.eq.s32.totalorder %s1320_s11, 0  ;;  %p77_p3 = scmp.eq.s32.totalorder %s1076_s12, 1 }
   0x6   : > { %s1366_s16 = scalar_select %p38_p0, %s1316_s10, %s40_s15  }
   0x7   : > { %p49_p4 = por %p48_p2, %p47_p1  ;;  %p1368_p5 = por %p77_p3, %p47_p1 }
   0x8   : > { %p1079_p6 = scmp.ge.s32.totalorder %s1320_s11, 2 }
   0xa   : > { %102 = sbr.rel (%p1079_p6) target bundleno = 45 (0x2d), region = 20 }
  0x11   : > { %105 = sbr.rel (!%p49_p4) target bundleno = 45 (0x2d), region = 24  ;;  %s107_s18 = sand.u32 (%p49_p4), 1, %s1316_s10  }
  0x12   : > { %s1157_s19 = sshll.u32 (%p49_p4), %s1320_s11, 3  ;;  %s1183_s20 = smul.u32 (%p49_p4), 384, %s107_s18 }
  0x13   : > { %s1378_s23 = scalar_lea.vmem (%p49_p4), %s1611_s1, %s1157_s19 }
  0x14   : > { %v234_v0 = vld [vmem:[%s1378_s23] sm:$0xff] (%p49_p4)  ;;  %v236_v1 = vld [vmem:[%s1378_s23 + $0x10] sm:$0xff] (%p49_p4)  ;;  %s1386_s24 = scalar_lea.vmem (%p49_p4), [#allocation2], %s1183_s20 }
  0x15   : > { %v238_v2 = vld [vmem:[%s1378_s23 + $0x20] sm:$0xff] (%p49_p4)  ;;  %v240_v3 = vld [vmem:[%s1378_s23 + $0x30] sm:$0xff] (%p49_p4)  ;;  %235 = vst [vmem:[%s1386_s24] sm:$0xff] (%p49_p4), %v234_v0  ;;  %237 = vst [vmem:[%s1386_s24 + $0x8] sm:$0xff] (%p49_p4), %v236_v1 }
  0x16   : > { %v242_v4 = vld [vmem:[%s1378_s23 + $0x40] sm:$0xff] (%p49_p4)  ;;  %v244_v5 = vld [vmem:[%s1378_s23 + $0x50] sm:$0xff] (%p49_p4)  ;;  %239 = vst [vmem:[%s1386_s24 + $0x10] sm:$0xff] (%p49_p4), %v238_v2  ;;  %241 = vst [vmem:[%s1386_s24 + $0x18] sm:$0xff] (%p49_p4), %v240_v3 }
  0x17   : > { %243 = vst [vmem:[%s1386_s24 + $0x20] sm:$0xff] (%p49_p4), %v242_v4  ;;  %245 = vst [vmem:[%s1386_s24 + $0x28] sm:$0xff] (%p49_p4), %v244_v5  ;;  %v246_v6 = vld [vmem:[%s1378_s23 + $0x60] sm:$0xff] (%p49_p4)  ;;  %v248_v7 = vld [vmem:[%s1378_s23 + $0x70] sm:$0xff] (%p49_p4) }
  0x18   : > { %v250_v8 = vld [vmem:[%s1378_s23 + $0x80] sm:$0xff]  ;;  %247 = vst [vmem:[%s1386_s24 + $0x30] sm:$0xff] %v246_v6  ;;  %249 = vst [vmem:[%s1386_s24 + $0x38] sm:$0xff] %v248_v7  ;;  %v252_v9 = vld [vmem:[%s1378_s23 + $0x90] sm:$0xff] }
  0x19   : > { %251 = vst [vmem:[%s1386_s24 + $0x40] sm:$0xff] %v250_v8  ;;  %v254_v10 = vld [vmem:[%s1378_s23 + $0xa0] sm:$0xff]  ;;  %v256_v11 = vld [vmem:[%s1378_s23 + $0xb0] sm:$0xff]  ;;  %253 = vst [vmem:[%s1386_s24 + $0x48] sm:$0xff] %v252_v9 }
  0x1a   : > { %255 = vst [vmem:[%s1386_s24 + $0x50] sm:$0xff] %v254_v10  ;;  %257 = vst [vmem:[%s1386_s24 + $0x58] sm:$0xff] %v256_v11  ;;  %v258_v12 = vld [vmem:[%s1378_s23 + $0xc0] sm:$0xff]  ;;  %v260_v13 = vld [vmem:[%s1378_s23 + $0xd0] sm:$0xff] }
  0x1b   : > { %v262_v14 = vld [vmem:[%s1378_s23 + $0xe0] sm:$0xff]  ;;  %259 = vst [vmem:[%s1386_s24 + $0x60] sm:$0xff] %v258_v12  ;;  %261 = vst [vmem:[%s1386_s24 + $0x68] sm:$0xff] %v260_v13  ;;  %v264_v15 = vld [vmem:[%s1378_s23 + $0xf0] sm:$0xff] }
  0x1c   : > { %263 = vst [vmem:[%s1386_s24 + $0x70] sm:$0xff] %v262_v14  ;;  %v266_v16 = vld [vmem:[%s1378_s23 + $0x100] sm:$0xff]  ;;  %v268_v17 = vld [vmem:[%s1378_s23 + $0x110] sm:$0xff]  ;;  %265 = vst [vmem:[%s1386_s24 + $0x78] sm:$0xff] %v264_v15 }
  0x1d   : > { %267 = vst [vmem:[%s1386_s24 + $0x80] sm:$0xff] %v266_v16  ;;  %269 = vst [vmem:[%s1386_s24 + $0x88] sm:$0xff] %v268_v17  ;;  %v270_v18 = vld [vmem:[%s1378_s23 + $0x120] sm:$0xff]  ;;  %v272_v19 = vld [vmem:[%s1378_s23 + $0x130] sm:$0xff] }
  0x1e   : > { %v274_v20 = vld [vmem:[%s1378_s23 + $0x140] sm:$0xff]  ;;  %271 = vst [vmem:[%s1386_s24 + $0x90] sm:$0xff] %v270_v18  ;;  %273 = vst [vmem:[%s1386_s24 + $0x98] sm:$0xff] %v272_v19  ;;  %v276_v21 = vld [vmem:[%s1378_s23 + $0x150] sm:$0xff] }
  0x1f   : > { %275 = vst [vmem:[%s1386_s24 + $0xa0] sm:$0xff] %v274_v20  ;;  %v278_v22 = vld [vmem:[%s1378_s23 + $0x160] sm:$0xff]  ;;  %v280_v23 = vld [vmem:[%s1378_s23 + $0x170] sm:$0xff]  ;;  %277 = vst [vmem:[%s1386_s24 + $0xa8] sm:$0xff] %v276_v21 }
  0x20   : > { %279 = vst [vmem:[%s1386_s24 + $0xb0] sm:$0xff] %v278_v22  ;;  %281 = vst [vmem:[%s1386_s24 + $0xb8] sm:$0xff] %v280_v23  ;;  %v282_v24 = vld [vmem:[%s1378_s23 + $0x180] sm:$0xff]  ;;  %v284_v25 = vld [vmem:[%s1378_s23 + $0x190] sm:$0xff] }
  0x21   : > { %v286_v26 = vld [vmem:[%s1378_s23 + $0x1a0] sm:$0xff]  ;;  %283 = vst [vmem:[%s1386_s24 + $0xc0] sm:$0xff] %v282_v24  ;;  %285 = vst [vmem:[%s1386_s24 + $0xc8] sm:$0xff] %v284_v25  ;;  %v288_v27 = vld [vmem:[%s1378_s23 + $0x1b0] sm:$0xff] }
  0x22   : > { %287 = vst [vmem:[%s1386_s24 + $0xd0] sm:$0xff] %v286_v26  ;;  %v290_v28 = vld [vmem:[%s1378_s23 + $0x1c0] sm:$0xff]  ;;  %v292_v29 = vld [vmem:[%s1378_s23 + $0x1d0] sm:$0xff]  ;;  %289 = vst [vmem:[%s1386_s24 + $0xd8] sm:$0xff] %v288_v27 }
  0x23   : > { %291 = vst [vmem:[%s1386_s24 + $0xe0] sm:$0xff] %v290_v28  ;;  %293 = vst [vmem:[%s1386_s24 + $0xe8] sm:$0xff] %v292_v29  ;;  %v294_v30 = vld [vmem:[%s1378_s23 + $0x1e0] sm:$0xff]  ;;  %v296_v31 = vld [vmem:[%s1378_s23 + $0x1f0] sm:$0xff] }
  0x24   : > { %v298_v32 = vld [vmem:[%s1378_s23 + $0x200] sm:$0xff]  ;;  %295 = vst [vmem:[%s1386_s24 + $0xf0] sm:$0xff] %v294_v30  ;;  %297 = vst [vmem:[%s1386_s24 + $0xf8] sm:$0xff] %v296_v31  ;;  %v300_v33 = vld [vmem:[%s1378_s23 + $0x210] sm:$0xff] }
  0x25   : > { %299 = vst [vmem:[%s1386_s24 + $0x100] sm:$0xff] %v298_v32  ;;  %v302_v34 = vld [vmem:[%s1378_s23 + $0x220] sm:$0xff]  ;;  %v304_v35 = vld [vmem:[%s1378_s23 + $0x230] sm:$0xff]  ;;  %301 = vst [vmem:[%s1386_s24 + $0x108] sm:$0xff] %v300_v33 }
  0x26   : > { %303 = vst [vmem:[%s1386_s24 + $0x110] sm:$0xff] %v302_v34  ;;  %305 = vst [vmem:[%s1386_s24 + $0x118] sm:$0xff] %v304_v35  ;;  %v306_v36 = vld [vmem:[%s1378_s23 + $0x240] sm:$0xff]  ;;  %v308_v37 = vld [vmem:[%s1378_s23 + $0x250] sm:$0xff] }
  0x27   : > { %v310_v38 = vld [vmem:[%s1378_s23 + $0x260] sm:$0xff]  ;;  %307 = vst [vmem:[%s1386_s24 + $0x120] sm:$0xff] %v306_v36  ;;  %309 = vst [vmem:[%s1386_s24 + $0x128] sm:$0xff] %v308_v37  ;;  %v312_v39 = vld [vmem:[%s1378_s23 + $0x270] sm:$0xff] }
  0x28   : > { %311 = vst [vmem:[%s1386_s24 + $0x130] sm:$0xff] %v310_v38  ;;  %v314_v40 = vld [vmem:[%s1378_s23 + $0x280] sm:$0xff]  ;;  %v316_v41 = vld [vmem:[%s1378_s23 + $0x290] sm:$0xff]  ;;  %313 = vst [vmem:[%s1386_s24 + $0x138] sm:$0xff] %v312_v39 }
  0x29   : > { %315 = vst [vmem:[%s1386_s24 + $0x140] sm:$0xff] %v314_v40  ;;  %317 = vst [vmem:[%s1386_s24 + $0x148] sm:$0xff] %v316_v41  ;;  %v318_v42 = vld [vmem:[%s1378_s23 + $0x2a0] sm:$0xff]  ;;  %v320_v43 = vld [vmem:[%s1378_s23 + $0x2b0] sm:$0xff] }
  0x2a   : > { %v322_v44 = vld [vmem:[%s1378_s23 + $0x2c0] sm:$0xff]  ;;  %319 = vst [vmem:[%s1386_s24 + $0x150] sm:$0xff] %v318_v42  ;;  %321 = vst [vmem:[%s1386_s24 + $0x158] sm:$0xff] %v320_v43  ;;  %v324_v45 = vld [vmem:[%s1378_s23 + $0x2d0] sm:$0xff] }
  0x2b   : > { %323 = vst [vmem:[%s1386_s24 + $0x160] sm:$0xff] %v322_v44  ;;  %v326_v46 = vld [vmem:[%s1378_s23 + $0x2e0] sm:$0xff]  ;;  %v328_v47 = vld [vmem:[%s1378_s23 + $0x2f0] sm:$0xff]  ;;  %325 = vst [vmem:[%s1386_s24 + $0x168] sm:$0xff] %v324_v45 }
  0x2c   : > { %327 = vst [vmem:[%s1386_s24 + $0x170] sm:$0xff] %v326_v46  ;;  %329 = vst [vmem:[%s1386_s24 + $0x178] sm:$0xff] %v328_v47 }
  0x2d PF: > { %p1082_p7 = scmp.ge.s32.totalorder %s1320_s11, 1  ;;  %p334_p8 = scmp.lt.s32.totalorder %s1320_s11, 3 }
  0x2f   : > { %p335_p9 = pnand %p1082_p7, %p334_p8 }
  0x30   : > { %s341_s25 = sand.u32 (!%p335_p9), 1, %s1312_s9   ;;  %v1322_v48 = vmov (!%p335_p9), 0   ;;  %v1285_v49 = vld [vmem:[%s1610_s0 + $0x4] ss:$12 sps:$4 sm:$0xff] (!%p335_p9)   ;;  %v1282_v25 = vld [vmem:[%s1610_s0 + $0x8] ss:$12 sps:$4 sm:$0xff] (!%p335_p9)  }
  0x31   : > { %338 = sbr.rel (%p335_p9) target bundleno = 372 (0x174), region = 62  ;;  %837 = vmatprep.mubr.bf16.mxu0 (!%p335_p9), %v1322_v48  ;;  %764 = vmatprep.mubr.bf16.mxu1 (!%p335_p9), %v1285_v49  ;;  %v1286_v30 = vld [vmem:[%s1610_s0 + $0x20] ss:$12 sps:$4 sm:$0xff] (!%p335_p9)   ;;  %v1290_v35 = vld [vmem:[%s1610_s0 + $0x38] ss:$12 sps:$4 sm:$0xff] (!%p335_p9)   ;;  %s1083_s4 = sshll.u32 (!%p335_p9), %s341_s25, 6 }
  0x32   : > { %s1184_s26 = smul.u32 (!%p335_p9), 384, %s341_s25  ;;  %v1283_v37 = vld [vmem:[%s1610_s0] ss:$12 sps:$4 sm:$0xff] (!%p335_p9)   ;;  %v1287_v38 = vld [vmem:[%s1610_s0 + $0x1c] ss:$12 sps:$4 sm:$0xff] (!%p335_p9)   ;;  %s1575_s5 = scalar_lea.vmem (!%p335_p9), [#allocation3], %s1083_s4 }
  0x33   : > { %v1294_v39 = vld [vmem:[%s1610_s0 + $0x50] ss:$12 sps:$4 sm:$0xff] (!%p335_p9)   ;;  %v1289_v40 = vld [vmem:[%s1610_s0 + $0x18] ss:$12 sps:$4 sm:$0xff] (!%p335_p9)   ;;  %v1291_v41 = vld [vmem:[%s1610_s0 + $0x34] ss:$12 sps:$4 sm:$0xff] (!%p335_p9)  }
  0x34   : > { %s1487_s29 = scalar_lea.vmem (!%p335_p9), [#allocation2], %s1184_s26  ;;  %v1293_v42 = vld [vmem:[%s1610_s0 + $0x30] ss:$12 sps:$4 sm:$0xff] (!%p335_p9)   ;;  %v1295_v43 = vld [vmem:[%s1610_s0 + $0x4c] ss:$12 sps:$4 sm:$0xff] (!%p335_p9)  }
  0x35   : > { %v1210_v50 = vld [vmem:[%s1487_s29 + $0x4] ss:$8 sps:$4 sm:$0xff] (!%p335_p9)   ;;  %v1212_v51 = vld [vmem:[%s1487_s29] ss:$8 sps:$4 sm:$0xff] (!%p335_p9)   ;;  %v1213_v52 = vld [vmem:[%s1487_s29 + $0x14] ss:$8 sps:$4 sm:$0xff] (!%p335_p9)  }
  0x36   : > { %732 = vmatprep.subr.bf16.mxu1 (!%p335_p9), %v1210_v50  ;;  %v1215_v53 = vld [vmem:[%s1487_s29 + $0x10] ss:$8 sps:$4 sm:$0xff] (!%p335_p9)   ;;  %v1216_v54 = vld [vmem:[%s1487_s29 + $0x24] ss:$8 sps:$4 sm:$0xff] (!%p335_p9)   ;;  %v1218_v55 = vld [vmem:[%s1487_s29 + $0x20] ss:$8 sps:$4 sm:$0xff] (!%p335_p9)  }
  0x37   : > { %733 = vmatpush1.bf16.msra.mxu1 (!%p335_p9), %v1212_v51  ;;  %v1219_v56 = vld [vmem:[%s1487_s29 + $0x34] ss:$8 sps:$4 sm:$0xff] (!%p335_p9)   ;;  %v1221_v57 = vld [vmem:[%s1487_s29 + $0x30] ss:$8 sps:$4 sm:$0xff] (!%p335_p9)   ;;  %v1234_v58 = vld [vmem:[%s1487_s29 + $0x104] ss:$8 sps:$4 sm:$0xff] (!%p335_p9)  }
  0x38   : > { %734 = vmatprep.subr.bf16.mxu1 %v1213_v52  ;;  %v1236_v59 = vld [vmem:[%s1487_s29 + $0x100] ss:$8 sps:$4 sm:$0xff]   ;;  %v1222_v60 = vld [vmem:[%s1487_s29 + $0x44] ss:$8 sps:$4 sm:$0xff]   ;;  %805 = vmatprep.subr.bf16.mxu0 %v1234_v58  ;;  %v1240_v61 = vld [vmem:[%s1487_s29 + $0x114] ss:$8 sps:$4 sm:$0xff]  }
  0x39   : > { %806 = vmatpush1.bf16.msra.mxu0 %v1236_v59  ;;  %v1242_v62 = vld [vmem:[%s1487_s29 + $0x110] ss:$8 sps:$4 sm:$0xff]   ;;  %v1224_v63 = vld [vmem:[%s1487_s29 + $0x40] ss:$8 sps:$4 sm:$0xff]   ;;  %v1225_v0 = vld [vmem:[%s1487_s29 + $0x54] ss:$8 sps:$4 sm:$0xff]  }
  0x3a   : > { %807 = vmatprep.subr.bf16.mxu0 %v1240_v61  ;;  %v1246_v1 = vld [vmem:[%s1487_s29 + $0x124] ss:$8 sps:$4 sm:$0xff]   ;;  %v1248_v2 = vld [vmem:[%s1487_s29 + $0x120] ss:$8 sps:$4 sm:$0xff]   ;;  %v1227_v3 = vld [vmem:[%s1487_s29 + $0x50] ss:$8 sps:$4 sm:$0xff]  }
  0x3b   : > { %735 = vmatpush1.bf16.msra.mxu1 %v1215_v53  ;;  %v1252_v4 = vld [vmem:[%s1487_s29 + $0x134] ss:$8 sps:$4 sm:$0xff]   ;;  %v1228_v5 = vld [vmem:[%s1487_s29 + $0x64] ss:$8 sps:$4 sm:$0xff]   ;;  %v1254_v6 = vld [vmem:[%s1487_s29 + $0x130] ss:$8 sps:$4 sm:$0xff]  }
  0x3c   : > { %736 = vmatprep.subr.bf16.mxu1 %v1216_v54  ;;  %v1230_v7 = vld [vmem:[%s1487_s29 + $0x60] ss:$8 sps:$4 sm:$0xff]   ;;  %v1258_v8 = vld [vmem:[%s1487_s29 + $0x144] ss:$8 sps:$4 sm:$0xff]   ;;  %v1231_v9 = vld [vmem:[%s1487_s29 + $0x74] ss:$8 sps:$4 sm:$0xff]  }
  0x3d   : > { %808 = vmatpush1.bf16.msra.mxu0 %v1242_v62  ;;  %v1260_v10 = vld [vmem:[%s1487_s29 + $0x140] ss:$8 sps:$4 sm:$0xff]   ;;  %v1233_v11 = vld [vmem:[%s1487_s29 + $0x70] ss:$8 sps:$4 sm:$0xff]   ;;  %v1264_v12 = vld [vmem:[%s1487_s29 + $0x154] ss:$8 sps:$4 sm:$0xff]  }
  0x3e   : > { %809 = vmatprep.subr.bf16.mxu0 %v1246_v1  ;;  %v1237_v13 = vld [vmem:[%s1487_s29 + $0x84] ss:$8 sps:$4 sm:$0xff]   ;;  %v1266_v14 = vld [vmem:[%s1487_s29 + $0x150] ss:$8 sps:$4 sm:$0xff]   ;;  %v1239_v15 = vld [vmem:[%s1487_s29 + $0x80] ss:$8 sps:$4 sm:$0xff]  }
  0x3f   : > { %737 = vmatpush1.bf16.msra.mxu1 %v1218_v55  ;;  %v1270_v16 = vld [vmem:[%s1487_s29 + $0x164] ss:$8 sps:$4 sm:$0xff]   ;;  %v1243_v17 = vld [vmem:[%s1487_s29 + $0x94] ss:$8 sps:$4 sm:$0xff]   ;;  %v1245_v18 = vld [vmem:[%s1487_s29 + $0x90] ss:$8 sps:$4 sm:$0xff]  }
  0x40   : > { %738 = vmatprep.subr.bf16.mxu1 %v1219_v56  ;;  %v1272_v19 = vld [vmem:[%s1487_s29 + $0x160] ss:$8 sps:$4 sm:$0xff]   ;;  %v1276_v20 = vld [vmem:[%s1487_s29 + $0x174] ss:$8 sps:$4 sm:$0xff]   ;;  %v1249_v21 = vld [vmem:[%s1487_s29 + $0xa4] ss:$8 sps:$4 sm:$0xff]  }
  0x41   : > { %810 = vmatpush1.bf16.msra.mxu0 %v1248_v2  ;;  %v1278_v22 = vld [vmem:[%s1487_s29 + $0x170] ss:$8 sps:$4 sm:$0xff]   ;;  %v1251_v23 = vld [vmem:[%s1487_s29 + $0xa0] ss:$8 sps:$4 sm:$0xff]   ;;  %v1255_v24 = vld [vmem:[%s1487_s29 + $0xb4] ss:$8 sps:$4 sm:$0xff]  }
  0x42   : > { %811 = vmatprep.subr.bf16.mxu0 %v1252_v4  ;;  %v1257_v26 = vld [vmem:[%s1487_s29 + $0xb0] ss:$8 sps:$4 sm:$0xff]   ;;  %v1261_v27 = vld [vmem:[%s1487_s29 + $0xc4] ss:$8 sps:$4 sm:$0xff]   ;;  %v1263_v28 = vld [vmem:[%s1487_s29 + $0xc0] ss:$8 sps:$4 sm:$0xff]  }
  0x43   : > { %739 = vmatpush1.bf16.msra.mxu1 %v1221_v57  ;;  %v1267_v29 = vld [vmem:[%s1487_s29 + $0xd4] ss:$8 sps:$4 sm:$0xff]   ;;  %v1269_v31 = vld [vmem:[%s1487_s29 + $0xd0] ss:$8 sps:$4 sm:$0xff]   ;;  %v1273_v32 = vld [vmem:[%s1487_s29 + $0xe4] ss:$8 sps:$4 sm:$0xff]  }
  0x44   : > { %740 = vmatprep.subr.bf16.mxu1 %v1222_v60  ;;  %v1275_v33 = vld [vmem:[%s1487_s29 + $0xe0] ss:$8 sps:$4 sm:$0xff]   ;;  %v1279_v34 = vld [vmem:[%s1487_s29 + $0xf4] ss:$8 sps:$4 sm:$0xff]   ;;  %v1281_v36 = vld [vmem:[%s1487_s29 + $0xf0] ss:$8 sps:$4 sm:$0xff]  }
  0x45   : > { %812 = vmatpush1.bf16.msra.mxu0 %v1254_v6  ;;  %v1297_v44 = vld [vmem:[%s1610_s0 + $0x48] ss:$12 sps:$4 sm:$0xff]   ;;  %s1166_s9 = sshll.u32 (%p1368_p5), %s1076_s12, 3 }
  0x46   : > { %813 = vmatprep.subr.bf16.mxu0 %v1258_v8  ;;  %s959_s7 = scalar_lea.vmem (%p1368_p5), %s1612_s2, %s1166_s9 }
  0x47   : > { %741 = vmatpush1.bf16.msra.mxu1 %v1224_v63 }
  0x48   : > { %742 = vmatprep.subr.bf16.mxu1 %v1225_v0 }
  0x49   : > { %814 = vmatpush1.bf16.msra.mxu0 %v1260_v10 }
  0x4a   : > { %815 = vmatprep.subr.bf16.mxu0 %v1264_v12 }
  0x4b   : > { %743 = vmatpush1.bf16.msra.mxu1 %v1227_v3 }
  0x4c   : > { %744 = vmatprep.subr.bf16.mxu1 %v1228_v5 }
  0x4d   : > { %816 = vmatpush1.bf16.msra.mxu0 %v1266_v14 }
  0x4e   : > { %817 = vmatprep.subr.bf16.mxu0 %v1270_v16 }
  0x4f   : > { %745 = vmatpush1.bf16.msra.mxu1 %v1230_v7 }
  0x50   : > { %746 = vmatprep.subr.bf16.mxu1 %v1231_v9 }
  0x51   : > { %818 = vmatpush1.bf16.msra.mxu0 %v1272_v19 }
  0x52   : > { %819 = vmatprep.subr.bf16.mxu0 %v1276_v20 }
  0x53   : > { %747 = vmatpush1.bf16.msra.mxu1 %v1233_v11 }
  0x54   : > { %748 = vmatprep.subr.bf16.mxu1 %v1237_v13 }
  0x55   : > { %820 = vmatpush1.bf16.msra.mxu0 %v1278_v22 }
  0x57   : > { %749 = vmatpush1.bf16.msra.mxu1 %v1239_v15 }
  0x58   : > { %750 = vmatprep.subr.bf16.mxu1 %v1243_v17  ;;  %838 = vmatmul.mubr.bf16.vlgmr.msra.gmra.mrb[0].mxu0 %v1282_v25 }
  0x59   : > { %847 = vmatprep.mubr.bf16.mxu0 %v1322_v48 }
  0x5b   : > { %751 = vmatpush1.bf16.msra.mxu1 %v1245_v18 }
  0x5c   : > { %752 = vmatprep.subr.bf16.mxu1 %v1249_v21 }
  0x5f   : > { %753 = vmatpush1.bf16.msra.mxu1 %v1251_v23 }
  0x60   : > { %754 = vmatprep.subr.bf16.mxu1 %v1255_v24  ;;  %848 = vmatmul.mubr.bf16.gmra.mrb[4].mxu0 %v1286_v30 }
  0x61   : > { %857 = vmatprep.mubr.bf16.mxu0 %v1322_v48 }
  0x63   : > { %755 = vmatpush1.bf16.msra.mxu1 %v1257_v26 }
  0x64   : > { %756 = vmatprep.subr.bf16.mxu1 %v1261_v27 }
  0x67   : > { %757 = vmatpush1.bf16.msra.mxu1 %v1263_v28 }
  0x68   : > { %758 = vmatprep.subr.bf16.mxu1 %v1267_v29  ;;  %858 = vmatmul.mubr.bf16.gmra.mrb[8].mxu0 %v1290_v35 }
  0x69   : > { %867 = vmatprep.mubr.bf16.mxu0 %v1322_v48 }
  0x6b   : > { %759 = vmatpush1.bf16.msra.mxu1 %v1269_v31 }
  0x6c   : > { %760 = vmatprep.subr.bf16.mxu1 %v1273_v32 }
  0x6f   : > { %761 = vmatpush1.bf16.msra.mxu1 %v1275_v33 }
  0x70   : > { %762 = vmatprep.subr.bf16.mxu1 %v1279_v34  ;;  %868 = vmatmul.mubr.bf16.gmra.mrb[12].mxu0 %v1294_v39 }
  0x73   : > { %763 = vmatpush1.bf16.msra.mxu1 %v1281_v36 }
  0x76   : > { %765 = vmatmul.mubr.bf16.vlgmr.msra.gmra.mrb[0].mxu1 %v1283_v37 }
  0x77   : > { %774 = vmatprep.mubr.bf16.mxu1 %v1287_v38 }
  0x7e   : > { %775 = vmatmul.mubr.bf16.gmra.mrb[4].mxu1 %v1289_v40 }
  0x7f   : > { %784 = vmatprep.mubr.bf16.mxu1 %v1291_v41 }
  0x86   : > { %785 = vmatmul.mubr.bf16.gmra.mrb[8].mxu1 %v1293_v42 }
  0x87   : > { %794 = vmatprep.mubr.bf16.mxu1 %v1295_v43 }
  0x8e   : > { %795 = vmatmul.mubr.bf16.gmra.mrb[12].mxu1 %v1297_v44 }
 0x12b   : > { %v839_v45 = vpop.f32.mrb[0].mxu0 }
 0x12c   : > { %v841_v46 = vpop.f32.mrb[1].mxu0 }
 0x12d   : > { %v843_v47 = vpop.f32.mrb[2].mxu0 }
 0x12e   : > { %v845_v48 = vpop.f32.mrb[3].mxu0 }
 0x133   : > { %v849_v49 = vpop.f32.mrb[4].mxu0 }
 0x134   : > { %v851_v50 = vpop.f32.mrb[5].mxu0 }
 0x135   : > { %v853_v51 = vpop.f32.mrb[6].mxu0 }
 0x136   : > { %v855_v52 = vpop.f32.mrb[7].mxu0 }
 0x13b   : > { %v859_v53 = vpop.f32.mrb[8].mxu0 }
 0x13c   : > { %v861_v54 = vpop.f32.mrb[9].mxu0 }
 0x13d   : > { %v863_v55 = vpop.f32.mrb[10].mxu0 }
 0x13e   : > { %v865_v56 = vpop.f32.mrb[11].mxu0 }
 0x143   : > { %v869_v1 = vpop.f32.mrb[12].mxu0 }
 0x144   : > { %v871_v4 = vpop.f32.mrb[13].mxu0 }
 0x145   : > { %v873_v6 = vpop.f32.mrb[14].mxu0 }
 0x146   : > { %v875_v9 = vpop.f32.mrb[15].mxu0 }
 0x149   : > { %v766_v57 = vpop.f32.mrb[0].mxu1 }
 0x14a   : > { %v840_v58 = vadd.f32 %v839_v45, %v766_v57  ;;  %v768_v59 = vpop.f32.mrb[1].mxu1 }
 0x14b   : > { %v842_v60 = vadd.f32 %v841_v46, %v768_v59  ;;  %v770_v61 = vpop.f32.mrb[2].mxu1 }
 0x14c   : > { %v878_v62 = vmax.f32 %v840_v58, 0.0  ;;  %v844_v63 = vadd.f32 %v843_v47, %v770_v61  ;;  %v772_v0 = vpop.f32.mrb[3].mxu1 }
 0x14d   : > { %v879_v2 = vmax.f32 %v842_v60, 0.0  ;;  %v846_v3 = vadd.f32 %v845_v48, %v772_v0 }
 0x14e   : > { %v880_v5 = vmax.f32 %v844_v63, 0.0 }
 0x14f   : > { %v1158_v7 = vpack.c.bf16 %v879_v2, %v878_v62  ;;  %v881_v8 = vmax.f32 %v846_v3, 0.0 }
 0x151   : > { %942 = vst [vmem:[%s1575_s5] sm:$0xff] %v1158_v7  ;;  %v1159_v10 = vpack.c.bf16 %v881_v8, %v880_v5  ;;  %v776_v11 = vpop.f32.mrb[4].mxu1 }
 0x152   : > { %v850_v12 = vadd.f32 %v849_v49, %v776_v11  ;;  %v778_v13 = vpop.f32.mrb[5].mxu1 }
 0x153   : > { %943 = vst [vmem:[%s1575_s5 + $0x8] sm:$0xff] %v1159_v10  ;;  %v852_v14 = vadd.f32 %v851_v50, %v778_v13  ;;  %v780_v15 = vpop.f32.mrb[6].mxu1 }
 0x154   : > { %v882_v16 = vmax.f32 %v850_v12, 0.0  ;;  %v854_v17 = vadd.f32 %v853_v51, %v780_v15  ;;  %v782_v18 = vpop.f32.mrb[7].mxu1 }
 0x155   : > { %v883_v19 = vmax.f32 %v852_v14, 0.0  ;;  %v856_v20 = vadd.f32 %v855_v52, %v782_v18 }
 0x156   : > { %v884_v21 = vmax.f32 %v854_v17, 0.0 }
 0x157   : > { %v1160_v22 = vpack.c.bf16 %v883_v19, %v882_v16  ;;  %v885_v23 = vmax.f32 %v856_v20, 0.0 }
 0x159   : > { %944 = vst [vmem:[%s1575_s5 + $0x10] sm:$0xff] %v1160_v22  ;;  %v1161_v24 = vpack.c.bf16 %v885_v23, %v884_v21  ;;  %v786_v25 = vpop.f32.mrb[8].mxu1 }
 0x15a   : > { %v860_v26 = vadd.f32 %v859_v53, %v786_v25  ;;  %v788_v27 = vpop.f32.mrb[9].mxu1  ;;  %v1001_v53 = vld [vmem:[%s1575_s5] sm:$0xff] (%p1368_p5) }
 0x15b   : > { %945 = vst [vmem:[%s1575_s5 + $0x18] sm:$0xff] %v1161_v24  ;;  %v862_v28 = vadd.f32 %v861_v54, %v788_v27  ;;  %v790_v29 = vpop.f32.mrb[10].mxu1  ;;  %v1003_v54 = vld [vmem:[%s1575_s5 + $0x8] sm:$0xff] (%p1368_p5)  ;;  %1002 = vst [vmem:[%s959_s7] sm:$0xff] (%p1368_p5), %v1001_v53 }
 0x15c   : > { %v886_v30 = vmax.f32 %v860_v26, 0.0  ;;  %v864_v31 = vadd.f32 %v863_v55, %v790_v29  ;;  %v792_v32 = vpop.f32.mrb[11].mxu1  ;;  %1004 = vst [vmem:[%s959_s7 + $0x10] sm:$0xff] (%p1368_p5), %v1003_v54 }
 0x15d   : > { %v887_v33 = vmax.f32 %v862_v28, 0.0  ;;  %v866_v34 = vadd.f32 %v865_v56, %v792_v32 }
 0x15e   : > { %v888_v35 = vmax.f32 %v864_v31, 0.0 }
 0x15f   : > { %v1162_v36 = vpack.c.bf16 %v887_v33, %v886_v30  ;;  %v889_v37 = vmax.f32 %v866_v34, 0.0 }
 0x160   : > { %v1005_v55 = vld [vmem:[%s1575_s5 + $0x10] sm:$0xff] (%p1368_p5) }
 0x161   : > { %946 = vst [vmem:[%s1575_s5 + $0x20] sm:$0xff] %v1162_v36  ;;  %v1163_v38 = vpack.c.bf16 %v889_v37, %v888_v35  ;;  %v796_v39 = vpop.f32.mrb[12].mxu1  ;;  %1006 = vst [vmem:[%s959_s7 + $0x20] sm:$0xff] (%p1368_p5), %v1005_v55 }
 0x162   : > { %v870_v40 = vadd.f32 %v869_v1, %v796_v39  ;;  %v798_v41 = vpop.f32.mrb[13].mxu1  ;;  %v1007_v56 = vld [vmem:[%s1575_s5 + $0x18] sm:$0xff] (%p1368_p5) }
 0x163   : > { %947 = vst [vmem:[%s1575_s5 + $0x28] sm:$0xff] %v1163_v38  ;;  %v872_v42 = vadd.f32 %v871_v4, %v798_v41  ;;  %v800_v43 = vpop.f32.mrb[14].mxu1  ;;  %1008 = vst [vmem:[%s959_s7 + $0x30] sm:$0xff] (%p1368_p5), %v1007_v56 }
 0x164   : > { %v890_v44 = vmax.f32 %v870_v40, 0.0  ;;  %v874_v45 = vadd.f32 %v873_v6, %v800_v43  ;;  %v802_v46 = vpop.f32.mrb[15].mxu1 }
 0x165   : > { %v891_v47 = vmax.f32 %v872_v42, 0.0  ;;  %v876_v48 = vadd.f32 %v875_v9, %v802_v46  ;;  %956 = sbr.rel (!%p1368_p5) target bundleno = 372 (0x174), region = 70 }
 0x166   : > { %v892_v49 = vmax.f32 %v874_v45, 0.0 }
 0x167   : > { %v1164_v50 = vpack.c.bf16 %v891_v47, %v890_v44  ;;  %v893_v51 = vmax.f32 %v876_v48, 0.0 }
 0x168   : > { %v1009_v57 = vld [vmem:[%s1575_s5 + $0x20] sm:$0xff] (%p1368_p5) }
 0x169   : > { %948 = vst [vmem:[%s1575_s5 + $0x30] sm:$0xff] %v1164_v50  ;;  %v1165_v52 = vpack.c.bf16 %v893_v51, %v892_v49  ;;  %1010 = vst [vmem:[%s959_s7 + $0x40] sm:$0xff] (%p1368_p5), %v1009_v57 }
 0x16a   : > { %v1011_v58 = vld [vmem:[%s1575_s5 + $0x28] sm:$0xff] (%p1368_p5) }
 0x16b   : > { %949 = vst [vmem:[%s1575_s5 + $0x38] sm:$0xff] %v1165_v52  ;;  %1012 = vst [vmem:[%s959_s7 + $0x50] sm:$0xff] (%p1368_p5), %v1011_v58 }
 0x170   : > { %v1013_v59 = vld [vmem:[%s1575_s5 + $0x30] sm:$0xff] }
 0x171   : > { %1014 = vst [vmem:[%s959_s7 + $0x60] sm:$0xff] %v1013_v59 }
 0x172   : > { %v1015_v60 = vld [vmem:[%s1575_s5 + $0x38] sm:$0xff] }
 0x173   : > { %1016 = vst [vmem:[%s959_s7 + $0x70] sm:$0xff] %v1015_v60 }
 0x174 PF: > { %p9_p10 = scmp.ge.s32.totalorder %s1355_s13, 4   ;;  %s1614_s9 = smov %s1316_s10 }
 0x175   : > { %s1615_s10 = smov %s1366_s16  ;;  %s1616_s11 = smov %s1355_s13 }
 0x176   :  { %11 = sbr.rel (!%p9_p10) target bundleno = 2 (0x2), region = 139 }

// kernel: ae2d_forward.18
= control target key start
LH: loop header
LB: loop body
LE: loop exit
PB: predicated region body
PF: predicated region fallthrough
CT: control target
= control target key end

     0   :  { %s1052_s9 = smov 0   ;;  %s1054_s10 = smov 0   ;;  %s1272_s0 = inlined_call_operand.vmem [shape: bf16[64,128], index: 0, kind: input, shape index: {}]   ;;  %s1273_s1 = inlined_call_operand.vmem [shape: bf16[128,1024], index: 1, kind: input, shape index: {}]   ;;  %s1274_s2 = inlined_call_operand.vmem [shape: bf16[64,1024], index: 2, kind: output, shape index: {}]  }
   0x1   :  { %s1056_s11 = smov 0  }
   0x2 LB: > { %s850_s12 = sadd.s32 4294967295, %s1034_s11   ;;  %s1069_s13 = sadd.s32 1, %s1034_s11   ;;  %s1034_s11 = sphi %s1056_s11, %s1278_s11   ;;  %s1030_s10 = sphi %s1054_s10, %s1277_s10   ;;  %s1026_s9 = sphi %s1052_s9, %s1276_s9  }
   0x3   : > { %s37_s14 = ssub.s32 %s1034_s11, %s1069_s13  ;;  %s40_s15 = sadd.s32 1, %s1030_s10 }
   0x4   : > { %p38_p0 = scmp.eq.s32.totalorder %s37_s14, 0  ;;  %p47_p1 = scmp.ne.s32.totalorder %s1030_s10, %s1026_s9 }
   0x5   : > { %p48_p2 = scmp.eq.s32.totalorder %s1034_s11, 0  ;;  %p77_p3 = scmp.eq.s32.totalorder %s850_s12, 1 }
   0x6   : > { %s1080_s16 = scalar_select %p38_p0, %s1030_s10, %s40_s15  }
   0x7   : > { %p49_p4 = por %p48_p2, %p47_p1  ;;  %p1082_p5 = por %p77_p3, %p47_p1 }
   0x8   : > { %p853_p6 = scmp.ge.s32.totalorder %s1034_s11, 2 }
   0xa   : > { %102 = sbr.rel (%p853_p6) target bundleno = 37 (0x25), region = 20 }
  0x11   : > { %105 = sbr.rel (!%p49_p4) target bundleno = 37 (0x25), region = 24  ;;  %s107_s18 = sand.u32 (%p49_p4), 1, %s1030_s10  }
  0x12   : > { %s917_s19 = sshll.u32 (%p49_p4), %s1034_s11, 4  ;;  %s854_s20 = sshll.u32 (%p49_p4), %s107_s18, 8 }
  0x13   : > { %s1092_s23 = scalar_lea.vmem (%p49_p4), %s1273_s1, %s917_s19  ;;  %s1097_s24 = scalar_lea.vmem (%p49_p4), [#allocation2], %s854_s20 }
  0x14   : > { %v125_v0 = vld [vmem:[%s1092_s23] sm:$0xff] (%p49_p4)  ;;  %v127_v1 = vld [vmem:[%s1092_s23 + $0x8] sm:$0xff] (%p49_p4) }
  0x15   : > { %v129_v2 = vld [vmem:[%s1092_s23 + $0x20] sm:$0xff] (%p49_p4)  ;;  %126 = vst [vmem:[%s1097_s24] sm:$0xff] (%p49_p4), %v125_v0  ;;  %128 = vst [vmem:[%s1097_s24 + $0x8] sm:$0xff] (%p49_p4), %v127_v1  ;;  %v131_v3 = vld [vmem:[%s1092_s23 + $0x28] sm:$0xff] (%p49_p4) }
  0x16   : > { %130 = vst [vmem:[%s1097_s24 + $0x10] sm:$0xff] (%p49_p4), %v129_v2  ;;  %v133_v4 = vld [vmem:[%s1092_s23 + $0x40] sm:$0xff] (%p49_p4)  ;;  %v135_v5 = vld [vmem:[%s1092_s23 + $0x48] sm:$0xff] (%p49_p4)  ;;  %132 = vst [vmem:[%s1097_s24 + $0x18] sm:$0xff] (%p49_p4), %v131_v3 }
  0x17   : > { %134 = vst [vmem:[%s1097_s24 + $0x20] sm:$0xff] (%p49_p4), %v133_v4  ;;  %136 = vst [vmem:[%s1097_s24 + $0x28] sm:$0xff] (%p49_p4), %v135_v5  ;;  %v137_v6 = vld [vmem:[%s1092_s23 + $0x60] sm:$0xff] (%p49_p4)  ;;  %v139_v7 = vld [vmem:[%s1092_s23 + $0x68] sm:$0xff] (%p49_p4) }
  0x18   : > { %v141_v8 = vld [vmem:[%s1092_s23 + $0x80] sm:$0xff]  ;;  %138 = vst [vmem:[%s1097_s24 + $0x30] sm:$0xff] %v137_v6  ;;  %140 = vst [vmem:[%s1097_s24 + $0x38] sm:$0xff] %v139_v7  ;;  %v143_v9 = vld [vmem:[%s1092_s23 + $0x88] sm:$0xff] }
  0x19   : > { %142 = vst [vmem:[%s1097_s24 + $0x40] sm:$0xff] %v141_v8  ;;  %v145_v10 = vld [vmem:[%s1092_s23 + $0xa0] sm:$0xff]  ;;  %v147_v11 = vld [vmem:[%s1092_s23 + $0xa8] sm:$0xff]  ;;  %144 = vst [vmem:[%s1097_s24 + $0x48] sm:$0xff] %v143_v9 }
  0x1a   : > { %146 = vst [vmem:[%s1097_s24 + $0x50] sm:$0xff] %v145_v10  ;;  %148 = vst [vmem:[%s1097_s24 + $0x58] sm:$0xff] %v147_v11  ;;  %v149_v12 = vld [vmem:[%s1092_s23 + $0xc0] sm:$0xff]  ;;  %v151_v13 = vld [vmem:[%s1092_s23 + $0xc8] sm:$0xff] }
  0x1b   : > { %v153_v14 = vld [vmem:[%s1092_s23 + $0xe0] sm:$0xff]  ;;  %150 = vst [vmem:[%s1097_s24 + $0x60] sm:$0xff] %v149_v12  ;;  %152 = vst [vmem:[%s1097_s24 + $0x68] sm:$0xff] %v151_v13  ;;  %v155_v15 = vld [vmem:[%s1092_s23 + $0xe8] sm:$0xff] }
  0x1c   : > { %154 = vst [vmem:[%s1097_s24 + $0x70] sm:$0xff] %v153_v14  ;;  %v157_v16 = vld [vmem:[%s1092_s23 + $0x100] sm:$0xff]  ;;  %v159_v17 = vld [vmem:[%s1092_s23 + $0x108] sm:$0xff]  ;;  %156 = vst [vmem:[%s1097_s24 + $0x78] sm:$0xff] %v155_v15 }
  0x1d   : > { %158 = vst [vmem:[%s1097_s24 + $0x80] sm:$0xff] %v157_v16  ;;  %160 = vst [vmem:[%s1097_s24 + $0x88] sm:$0xff] %v159_v17  ;;  %v161_v18 = vld [vmem:[%s1092_s23 + $0x120] sm:$0xff]  ;;  %v163_v19 = vld [vmem:[%s1092_s23 + $0x128] sm:$0xff] }
  0x1e   : > { %v165_v20 = vld [vmem:[%s1092_s23 + $0x140] sm:$0xff]  ;;  %162 = vst [vmem:[%s1097_s24 + $0x90] sm:$0xff] %v161_v18  ;;  %164 = vst [vmem:[%s1097_s24 + $0x98] sm:$0xff] %v163_v19  ;;  %v167_v21 = vld [vmem:[%s1092_s23 + $0x148] sm:$0xff] }
  0x1f   : > { %166 = vst [vmem:[%s1097_s24 + $0xa0] sm:$0xff] %v165_v20  ;;  %v169_v22 = vld [vmem:[%s1092_s23 + $0x160] sm:$0xff]  ;;  %v171_v23 = vld [vmem:[%s1092_s23 + $0x168] sm:$0xff]  ;;  %168 = vst [vmem:[%s1097_s24 + $0xa8] sm:$0xff] %v167_v21 }
  0x20   : > { %170 = vst [vmem:[%s1097_s24 + $0xb0] sm:$0xff] %v169_v22  ;;  %172 = vst [vmem:[%s1097_s24 + $0xb8] sm:$0xff] %v171_v23  ;;  %v173_v24 = vld [vmem:[%s1092_s23 + $0x180] sm:$0xff]  ;;  %v175_v25 = vld [vmem:[%s1092_s23 + $0x188] sm:$0xff] }
  0x21   : > { %v177_v26 = vld [vmem:[%s1092_s23 + $0x1a0] sm:$0xff]  ;;  %174 = vst [vmem:[%s1097_s24 + $0xc0] sm:$0xff] %v173_v24  ;;  %176 = vst [vmem:[%s1097_s24 + $0xc8] sm:$0xff] %v175_v25  ;;  %v179_v27 = vld [vmem:[%s1092_s23 + $0x1a8] sm:$0xff] }
  0x22   : > { %178 = vst [vmem:[%s1097_s24 + $0xd0] sm:$0xff] %v177_v26  ;;  %v181_v28 = vld [vmem:[%s1092_s23 + $0x1c0] sm:$0xff]  ;;  %v183_v29 = vld [vmem:[%s1092_s23 + $0x1c8] sm:$0xff]  ;;  %180 = vst [vmem:[%s1097_s24 + $0xd8] sm:$0xff] %v179_v27 }
  0x23   : > { %182 = vst [vmem:[%s1097_s24 + $0xe0] sm:$0xff] %v181_v28  ;;  %184 = vst [vmem:[%s1097_s24 + $0xe8] sm:$0xff] %v183_v29  ;;  %v185_v30 = vld [vmem:[%s1092_s23 + $0x1e0] sm:$0xff]  ;;  %v187_v31 = vld [vmem:[%s1092_s23 + $0x1e8] sm:$0xff] }
  0x24   : > { %186 = vst [vmem:[%s1097_s24 + $0xf0] sm:$0xff] %v185_v30  ;;  %188 = vst [vmem:[%s1097_s24 + $0xf8] sm:$0xff] %v187_v31 }
  0x25 PF: > { %p857_p7 = scmp.ge.s32.totalorder %s1034_s11, 1  ;;  %p193_p8 = scmp.lt.s32.totalorder %s1034_s11, 3 }
  0x27   : > { %p194_p9 = pnand %p857_p7, %p193_p8 }
  0x28   : > { %s200_s25 = sand.u32 (!%p194_p9), 1, %s1026_s9   ;;  %v1036_v32 = vmov (!%p194_p9), 0   ;;  %v1008_v1 = vld [vmem:[%s1272_s0] sm:$0xff] (!%p194_p9)   ;;  %v1009_v2 = vld [vmem:[%s1272_s0 + $0x8] sm:$0xff] (!%p194_p9)   ;;  %v1010_v3 = vld [vmem:[%s1272_s0 + $0x10] sm:$0xff] (!%p194_p9)  }
  0x29   : > { %197 = sbr.rel (%p194_p9) target bundleno = 328 (0x148), region = 47  ;;  %s858_s26 = sshll.u32 (!%p194_p9), %s200_s25, 8  ;;  %479 = vmatprep.mubr.bf16.mxu0 (!%p194_p9), %v1036_v32  ;;  %552 = vmatprep.mubr.bf16.mxu1 (!%p194_p9), %v1036_v32  ;;  %v1011_v4 = vld [vmem:[%s1272_s0 + $0x18] sm:$0xff] (!%p194_p9)  }
  0x2a   : > { %s1167_s27 = scalar_lea.vmem (!%p194_p9), [#allocation2], %s858_s26  ;;  %s859_s8 = sshll.u32 (!%p194_p9), %s200_s25, 7 }
  0x2b   : > { %v960_v33 = vld [vmem:[%s1167_s27 + $0x4] ss:$16 sps:$4 sm:$0xff] (!%p194_p9)   ;;  %v962_v34 = vld [vmem:[%s1167_s27 + $0xc] ss:$16 sps:$4 sm:$0xff] (!%p194_p9)   ;;  %v964_v35 = vld [vmem:[%s1167_s27] ss:$16 sps:$4 sm:$0xff] (!%p194_p9)  }
  0x2c   : > { %447 = vmatprep.subr.bf16.mxu0 (!%p194_p9), %v960_v33  ;;  %v965_v36 = vld [vmem:[%s1167_s27 + $0x8] ss:$16 sps:$4 sm:$0xff] (!%p194_p9)   ;;  %520 = vmatprep.subr.bf16.mxu1 (!%p194_p9), %v962_v34  ;;  %v966_v37 = vld [vmem:[%s1167_s27 + $0x24] ss:$16 sps:$4 sm:$0xff] (!%p194_p9)   ;;  %v968_v38 = vld [vmem:[%s1167_s27 + $0x2c] ss:$16 sps:$4 sm:$0xff] (!%p194_p9)  }
  0x2d   : > { %448 = vmatpush1.bf16.msra.mxu0 (!%p194_p9), %v964_v35  ;;  %521 = vmatpush1.bf16.msra.mxu1 (!%p194_p9), %v965_v36  ;;  %v970_v39 = vld [vmem:[%s1167_s27 + $0x20] ss:$16 sps:$4 sm:$0xff] (!%p194_p9)   ;;  %v971_v40 = vld [vmem:[%s1167_s27 + $0x28] ss:$16 sps:$4 sm:$0xff] (!%p194_p9)   ;;  %v972_v41 = vld [vmem:[%s1167_s27 + $0x44] ss:$16 sps:$4 sm:$0xff] (!%p194_p9)  }
  0x2e   : > { %449 = vmatprep.subr.bf16.mxu0 (!%p194_p9), %v966_v37  ;;  %522 = vmatprep.subr.bf16.mxu1 (!%p194_p9), %v968_v38  ;;  %v974_v42 = vld [vmem:[%s1167_s27 + $0x4c] ss:$16 sps:$4 sm:$0xff] (!%p194_p9)   ;;  %v976_v43 = vld [vmem:[%s1167_s27 + $0x40] ss:$16 sps:$4 sm:$0xff] (!%p194_p9)   ;;  %v977_v44 = vld [vmem:[%s1167_s27 + $0x48] ss:$16 sps:$4 sm:$0xff] (!%p194_p9)  }
  0x2f   : > { %v978_v45 = vld [vmem:[%s1167_s27 + $0x64] ss:$16 sps:$4 sm:$0xff] (!%p194_p9)   ;;  %v980_v46 = vld [vmem:[%s1167_s27 + $0x6c] ss:$16 sps:$4 sm:$0xff] (!%p194_p9)   ;;  %v982_v47 = vld [vmem:[%s1167_s27 + $0x60] ss:$16 sps:$4 sm:$0xff] (!%p194_p9)  }
  0x30   : > { %v983_v48 = vld [vmem:[%s1167_s27 + $0x68] ss:$16 sps:$4 sm:$0xff]   ;;  %v984_v49 = vld [vmem:[%s1167_s27 + $0x84] ss:$16 sps:$4 sm:$0xff]   ;;  %v986_v50 = vld [vmem:[%s1167_s27 + $0x8c] ss:$16 sps:$4 sm:$0xff]  }
  0x31   : > { %450 = vmatpush1.bf16.msra.mxu0 %v970_v39  ;;  %523 = vmatpush1.bf16.msra.mxu1 %v971_v40  ;;  %v988_v51 = vld [vmem:[%s1167_s27 + $0x80] ss:$16 sps:$4 sm:$0xff]   ;;  %v989_v52 = vld [vmem:[%s1167_s27 + $0x88] ss:$16 sps:$4 sm:$0xff]   ;;  %v990_v53 = vld [vmem:[%s1167_s27 + $0xa4] ss:$16 sps:$4 sm:$0xff]  }
  0x32   : > { %451 = vmatprep.subr.bf16.mxu0 %v972_v41  ;;  %524 = vmatprep.subr.bf16.mxu1 %v974_v42  ;;  %v992_v54 = vld [vmem:[%s1167_s27 + $0xac] ss:$16 sps:$4 sm:$0xff]   ;;  %v994_v55 = vld [vmem:[%s1167_s27 + $0xa0] ss:$16 sps:$4 sm:$0xff]   ;;  %v995_v56 = vld [vmem:[%s1167_s27 + $0xa8] ss:$16 sps:$4 sm:$0xff]  }
  0x33   : > { %v996_v57 = vld [vmem:[%s1167_s27 + $0xc4] ss:$16 sps:$4 sm:$0xff]   ;;  %v998_v58 = vld [vmem:[%s1167_s27 + $0xcc] ss:$16 sps:$4 sm:$0xff]   ;;  %v1000_v59 = vld [vmem:[%s1167_s27 + $0xc0] ss:$16 sps:$4 sm:$0xff]  }
  0x34   : > { %v1001_v60 = vld [vmem:[%s1167_s27 + $0xc8] ss:$16 sps:$4 sm:$0xff]   ;;  %v1002_v61 = vld [vmem:[%s1167_s27 + $0xe4] ss:$16 sps:$4 sm:$0xff]   ;;  %v1004_v62 = vld [vmem:[%s1167_s27 + $0xec] ss:$16 sps:$4 sm:$0xff]  }
  0x35   : > { %452 = vmatpush1.bf16.msra.mxu0 %v976_v43  ;;  %525 = vmatpush1.bf16.msra.mxu1 %v977_v44  ;;  %v1006_v63 = vld [vmem:[%s1167_s27 + $0xe0] ss:$16 sps:$4 sm:$0xff]   ;;  %v1007_v0 = vld [vmem:[%s1167_s27 + $0xe8] ss:$16 sps:$4 sm:$0xff]   ;;  %s1221_s14 = scalar_lea.vmem [#allocation3], %s859_s8  ;;  %s934_s9 = sshll.u32 (%p1082_p5), %s850_s12, 4 }
  0x36   : > { %453 = vmatprep.subr.bf16.mxu0 %v978_v45  ;;  %526 = vmatprep.subr.bf16.mxu1 %v980_v46  ;;  %s746_s17 = scalar_lea.vmem (%p1082_p5), %s1274_s2, %s934_s9 }
  0x39   : > { %454 = vmatpush1.bf16.msra.mxu0 %v982_v47  ;;  %527 = vmatpush1.bf16.msra.mxu1 %v983_v48 }
  0x3a   : > { %455 = vmatprep.subr.bf16.mxu0 %v984_v49  ;;  %528 = vmatprep.subr.bf16.mxu1 %v986_v50 }
  0x3d   : > { %456 = vmatpush1.bf16.msra.mxu0 %v988_v51  ;;  %529 = vmatpush1.bf16.msra.mxu1 %v989_v52 }
  0x3e   : > { %457 = vmatprep.subr.bf16.mxu0 %v990_v53  ;;  %530 = vmatprep.subr.bf16.mxu1 %v992_v54 }
  0x41   : > { %458 = vmatpush1.bf16.msra.mxu0 %v994_v55  ;;  %531 = vmatpush1.bf16.msra.mxu1 %v995_v56 }
  0x42   : > { %459 = vmatprep.subr.bf16.mxu0 %v996_v57  ;;  %532 = vmatprep.subr.bf16.mxu1 %v998_v58 }
  0x45   : > { %460 = vmatpush1.bf16.msra.mxu0 %v1000_v59  ;;  %533 = vmatpush1.bf16.msra.mxu1 %v1001_v60 }
  0x46   : > { %461 = vmatprep.subr.bf16.mxu0 %v1002_v61  ;;  %534 = vmatprep.subr.bf16.mxu1 %v1004_v62 }
  0x49   : > { %462 = vmatpush1.bf16.msra.mxu0 %v1006_v63  ;;  %535 = vmatpush1.bf16.msra.mxu1 %v1007_v0 }
  0x4c   : > { %480 = vmatmul.mubr.bf16.vlgmr.msra.gmra.mrb[0].mxu0 %v1008_v1  ;;  %553 = vmatmul.mubr.bf16.vlgmr.msra.gmra.mrb[0].mxu1 %v1008_v1 }
  0x4d   : > { %489 = vmatprep.mubr.bf16.mxu0 %v1036_v32  ;;  %562 = vmatprep.mubr.bf16.mxu1 %v1036_v32 }
  0x54   : > { %490 = vmatmul.mubr.bf16.gmra.mrb[4].mxu0 %v1009_v2  ;;  %563 = vmatmul.mubr.bf16.gmra.mrb[4].mxu1 %v1009_v2 }
  0x55   : > { %499 = vmatprep.mubr.bf16.mxu0 %v1036_v32  ;;  %572 = vmatprep.mubr.bf16.mxu1 %v1036_v32 }
  0x5c   : > { %500 = vmatmul.mubr.bf16.gmra.mrb[8].mxu0 %v1010_v3  ;;  %573 = vmatmul.mubr.bf16.gmra.mrb[8].mxu1 %v1010_v3 }
  0x5d   : > { %509 = vmatprep.mubr.bf16.mxu0 %v1036_v32  ;;  %582 = vmatprep.mubr.bf16.mxu1 %v1036_v32 }
  0x64   : > { %510 = vmatmul.mubr.bf16.gmra.mrb[12].mxu0 %v1011_v4  ;;  %583 = vmatmul.mubr.bf16.gmra.mrb[12].mxu1 %v1011_v4 }
 0x11f   : > { %v481_v5 = vpop.f32.mrb[0].mxu0  ;;  %v554_v6 = vpop.f32.mrb[0].mxu1 }
 0x120   : > { %v593_v7 = vmax.f32 %v481_v5, 0.0  ;;  %v595_v8 = vmax.f32 %v554_v6, 0.0  ;;  %v483_v9 = vpop.f32.mrb[1].mxu0  ;;  %v556_v10 = vpop.f32.mrb[1].mxu1 }
 0x121   : > { %v594_v11 = vmax.f32 %v483_v9, 0.0  ;;  %v596_v12 = vmax.f32 %v556_v10, 0.0  ;;  %v485_v13 = vpop.f32.mrb[2].mxu0  ;;  %v558_v14 = vpop.f32.mrb[2].mxu1 }
 0x122   : > { %v597_v15 = vmax.f32 %v485_v13, 0.0  ;;  %v599_v16 = vmax.f32 %v558_v14, 0.0  ;;  %v487_v17 = vpop.f32.mrb[3].mxu0  ;;  %v560_v18 = vpop.f32.mrb[3].mxu1 }
 0x123   : > { %v918_v19 = vpack.c.bf16 %v594_v11, %v593_v7  ;;  %v919_v20 = vpack.c.bf16 %v596_v12, %v595_v8  ;;  %v598_v21 = vmax.f32 %v487_v17, 0.0  ;;  %v600_v22 = vmax.f32 %v560_v18, 0.0 }
 0x125   : > { %721 = vst [vmem:[%s1221_s14] sm:$0xff] %v918_v19  ;;  %722 = vst [vmem:[%s1221_s14 + $0x8] sm:$0xff] %v919_v20  ;;  %v920_v23 = vpack.c.bf16 %v598_v21, %v597_v15  ;;  %v921_v24 = vpack.c.bf16 %v600_v22, %v599_v16 }
 0x127   : > { %723 = vst [vmem:[%s1221_s14 + $0x10] sm:$0xff] %v920_v23  ;;  %724 = vst [vmem:[%s1221_s14 + $0x18] sm:$0xff] %v921_v24  ;;  %v491_v25 = vpop.f32.mrb[4].mxu0  ;;  %v564_v26 = vpop.f32.mrb[4].mxu1 }
 0x128   : > { %v601_v27 = vmax.f32 %v491_v25, 0.0  ;;  %v603_v28 = vmax.f32 %v564_v26, 0.0  ;;  %v493_v29 = vpop.f32.mrb[5].mxu0  ;;  %v566_v30 = vpop.f32.mrb[5].mxu1 }
 0x129   : > { %v602_v31 = vmax.f32 %v493_v29, 0.0  ;;  %v604_v32 = vmax.f32 %v566_v30, 0.0  ;;  %v495_v33 = vpop.f32.mrb[6].mxu0  ;;  %v568_v34 = vpop.f32.mrb[6].mxu1 }
 0x12a   : > { %v605_v35 = vmax.f32 %v495_v33, 0.0  ;;  %v607_v36 = vmax.f32 %v568_v34, 0.0  ;;  %v497_v37 = vpop.f32.mrb[7].mxu0  ;;  %v570_v38 = vpop.f32.mrb[7].mxu1 }
 0x12b   : > { %v922_v39 = vpack.c.bf16 %v602_v31, %v601_v27  ;;  %v923_v40 = vpack.c.bf16 %v604_v32, %v603_v28  ;;  %v606_v41 = vmax.f32 %v497_v37, 0.0  ;;  %v608_v42 = vmax.f32 %v570_v38, 0.0 }
 0x12c   : > { %v759_v21 = vld [vmem:[%s1221_s14] sm:$0xff] (%p1082_p5)  ;;  %v761_v22 = vld [vmem:[%s1221_s14 + $0x8] sm:$0xff] (%p1082_p5) }
 0x12d   : > { %725 = vst [vmem:[%s1221_s14 + $0x20] sm:$0xff] %v922_v39  ;;  %726 = vst [vmem:[%s1221_s14 + $0x28] sm:$0xff] %v923_v40  ;;  %v924_v43 = vpack.c.bf16 %v606_v41, %v605_v35  ;;  %v925_v44 = vpack.c.bf16 %v608_v42, %v607_v36 }
 0x12e   : > { %v763_v23 = vld [vmem:[%s1221_s14 + $0x10] sm:$0xff] (%p1082_p5)  ;;  %v765_v24 = vld [vmem:[%s1221_s14 + $0x18] sm:$0xff] (%p1082_p5)  ;;  %760 = vst [vmem:[%s746_s17] sm:$0xff] (%p1082_p5), %v759_v21  ;;  %762 = vst [vmem:[%s746_s17 + $0x8] sm:$0xff] (%p1082_p5), %v761_v22 }
 0x12f   : > { %727 = vst [vmem:[%s1221_s14 + $0x30] sm:$0xff] %v924_v43  ;;  %728 = vst [vmem:[%s1221_s14 + $0x38] sm:$0xff] %v925_v44  ;;  %v501_v45 = vpop.f32.mrb[8].mxu0  ;;  %v574_v46 = vpop.f32.mrb[8].mxu1 }
 0x130   : > { %v609_v47 = vmax.f32 %v501_v45, 0.0  ;;  %v611_v48 = vmax.f32 %v574_v46, 0.0  ;;  %v503_v49 = vpop.f32.mrb[9].mxu0  ;;  %v576_v50 = vpop.f32.mrb[9].mxu1  ;;  %764 = vst [vmem:[%s746_s17 + $0x20] sm:$0xff] (%p1082_p5), %v763_v23  ;;  %766 = vst [vmem:[%s746_s17 + $0x28] sm:$0xff] (%p1082_p5), %v765_v24 }
 0x131   : > { %v610_v51 = vmax.f32 %v503_v49, 0.0  ;;  %v612_v52 = vmax.f32 %v576_v50, 0.0  ;;  %v505_v53 = vpop.f32.mrb[10].mxu0  ;;  %v578_v54 = vpop.f32.mrb[10].mxu1 }
 0x132   : > { %v613_v55 = vmax.f32 %v505_v53, 0.0  ;;  %v615_v56 = vmax.f32 %v578_v54, 0.0  ;;  %v507_v57 = vpop.f32.mrb[11].mxu0  ;;  %v580_v58 = vpop.f32.mrb[11].mxu1 }
 0x133   : > { %v926_v59 = vpack.c.bf16 %v610_v51, %v609_v47  ;;  %v927_v60 = vpack.c.bf16 %v612_v52, %v611_v48  ;;  %v614_v61 = vmax.f32 %v507_v57, 0.0  ;;  %v616_v62 = vmax.f32 %v580_v58, 0.0 }
 0x134   : > { %v767_v25 = vld [vmem:[%s1221_s14 + $0x20] sm:$0xff] (%p1082_p5)  ;;  %v769_v26 = vld [vmem:[%s1221_s14 + $0x28] sm:$0xff] (%p1082_p5) }
 0x135   : > { %729 = vst [vmem:[%s1221_s14 + $0x40] sm:$0xff] %v926_v59  ;;  %730 = vst [vmem:[%s1221_s14 + $0x48] sm:$0xff] %v927_v60  ;;  %v928_v63 = vpack.c.bf16 %v614_v61, %v613_v55  ;;  %v929_v0 = vpack.c.bf16 %v616_v62, %v615_v56 }
 0x136   : > { %768 = vst [vmem:[%s746_s17 + $0x40] sm:$0xff] (%p1082_p5), %v767_v25  ;;  %770 = vst [vmem:[%s746_s17 + $0x48] sm:$0xff] (%p1082_p5), %v769_v26  ;;  %v771_v27 = vld [vmem:[%s1221_s14 + $0x30] sm:$0xff] (%p1082_p5)  ;;  %v773_v28 = vld [vmem:[%s1221_s14 + $0x38] sm:$0xff] (%p1082_p5) }
 0x137   : > { %731 = vst [vmem:[%s1221_s14 + $0x50] sm:$0xff] %v928_v63  ;;  %732 = vst [vmem:[%s1221_s14 + $0x58] sm:$0xff] %v929_v0  ;;  %v511_v1 = vpop.f32.mrb[12].mxu0  ;;  %v584_v2 = vpop.f32.mrb[12].mxu1 }
 0x138   : > { %v617_v3 = vmax.f32 %v511_v1, 0.0  ;;  %v619_v4 = vmax.f32 %v584_v2, 0.0  ;;  %v513_v5 = vpop.f32.mrb[13].mxu0  ;;  %v586_v6 = vpop.f32.mrb[13].mxu1  ;;  %772 = vst [vmem:[%s746_s17 + $0x60] sm:$0xff] (%p1082_p5), %v771_v27  ;;  %774 = vst [vmem:[%s746_s17 + $0x68] sm:$0xff] (%p1082_p5), %v773_v28 }
 0x139   : > { %v618_v7 = vmax.f32 %v513_v5, 0.0  ;;  %v620_v8 = vmax.f32 %v586_v6, 0.0  ;;  %v515_v9 = vpop.f32.mrb[14].mxu0  ;;  %v588_v10 = vpop.f32.mrb[14].mxu1  ;;  %743 = sbr.rel (!%p1082_p5) target bundleno = 328 (0x148), region = 55 }
 0x13a   : > { %v621_v11 = vmax.f32 %v515_v9, 0.0  ;;  %v623_v12 = vmax.f32 %v588_v10, 0.0  ;;  %v517_v13 = vpop.f32.mrb[15].mxu0  ;;  %v590_v14 = vpop.f32.mrb[15].mxu1 }
 0x13b   : > { %v930_v15 = vpack.c.bf16 %v618_v7, %v617_v3  ;;  %v931_v16 = vpack.c.bf16 %v620_v8, %v619_v4  ;;  %v622_v17 = vmax.f32 %v517_v13, 0.0  ;;  %v624_v18 = vmax.f32 %v590_v14, 0.0 }
 0x13c   : > { %v775_v29 = vld [vmem:[%s1221_s14 + $0x40] sm:$0xff] (%p1082_p5)  ;;  %v777_v30 = vld [vmem:[%s1221_s14 + $0x48] sm:$0xff] (%p1082_p5) }
 0x13d   : > { %733 = vst [vmem:[%s1221_s14 + $0x60] sm:$0xff] %v930_v15  ;;  %734 = vst [vmem:[%s1221_s14 + $0x68] sm:$0xff] %v931_v16  ;;  %v932_v19 = vpack.c.bf16 %v622_v17, %v621_v11  ;;  %v933_v20 = vpack.c.bf16 %v624_v18, %v623_v12 }
 0x13e   : > { %776 = vst [vmem:[%s746_s17 + $0x80] sm:$0xff] (%p1082_p5), %v775_v29  ;;  %v779_v31 = vld [vmem:[%s1221_s14 + $0x50] sm:$0xff] (%p1082_p5)  ;;  %v781_v32 = vld [vmem:[%s1221_s14 + $0x58] sm:$0xff] (%p1082_p5)  ;;  %778 = vst [vmem:[%s746_s17 + $0x88] sm:$0xff] (%p1082_p5), %v777_v30 }
 0x13f   : > { %735 = vst [vmem:[%s1221_s14 + $0x70] sm:$0xff] %v932_v19  ;;  %736 = vst [vmem:[%s1221_s14 + $0x78] sm:$0xff] %v933_v20 }
 0x140   : > { %780 = vst [vmem:[%s746_s17 + $0xa0] sm:$0xff] %v779_v31  ;;  %782 = vst [vmem:[%s746_s17 + $0xa8] sm:$0xff] %v781_v32 }
 0x144   : > { %v783_v33 = vld [vmem:[%s1221_s14 + $0x60] sm:$0xff]  ;;  %v785_v34 = vld [vmem:[%s1221_s14 + $0x68] sm:$0xff] }
 0x145   : > { %784 = vst [vmem:[%s746_s17 + $0xc0] sm:$0xff] %v783_v33  ;;  %786 = vst [vmem:[%s746_s17 + $0xc8] sm:$0xff] %v785_v34 }
 0x146   : > { %v787_v35 = vld [vmem:[%s1221_s14 + $0x70] sm:$0xff]  ;;  %v789_v36 = vld [vmem:[%s1221_s14 + $0x78] sm:$0xff] }
 0x147   : > { %788 = vst [vmem:[%s746_s17 + $0xe0] sm:$0xff] %v787_v35  ;;  %790 = vst [vmem:[%s746_s17 + $0xe8] sm:$0xff] %v789_v36 }
 0x148 PF: > { %p9_p10 = scmp.ge.s32.totalorder %s1069_s13, 4   ;;  %s1276_s9 = smov %s1030_s10 }
 0x149   : > { %s1277_s10 = smov %s1080_s16  ;;  %s1278_s11 = smov %s1069_s13 }
 0x14a   :  { %11 = sbr.rel (!%p9_p10) target bundleno = 2 (0x2), region = 109 }

// kernel: ae2d_forward.19
= control target key start
LH: loop header
LB: loop body
LE: loop exit
PB: predicated region body
PF: predicated region fallthrough
CT: control target
= control target key end

     0   :  { %s1571_s9 = smov 0   ;;  %s1573_s10 = smov 0   ;;  %s1948_s0 = inlined_call_operand.vmem [shape: bf16[8,128], index: 0, kind: input, shape index: {}]   ;;  %s1949_s1 = inlined_call_operand.vmem [shape: bf16[128,4608], index: 1, kind: input, shape index: {}]   ;;  %s1950_s2 = inlined_call_operand.vmem [shape: f32[8,4608], index: 2, kind: output, shape index: {}]  }
   0x1   :  { %s1575_s11 = smov 0  }
   0x2 LB: > { %s1254_s12 = sadd.s32 4294967295, %s1553_s11   ;;  %s1588_s13 = sadd.s32 1, %s1553_s11   ;;  %s1553_s11 = sphi %s1575_s11, %s1953_s11   ;;  %s1549_s10 = sphi %s1573_s10, %s1952_s10   ;;  %s1545_s9 = sphi %s1571_s9, %s1951_s9  }
   0x3   : > { %s37_s14 = ssub.s32 %s1553_s11, %s1588_s13  ;;  %s40_s15 = sadd.s32 1, %s1549_s10 }
   0x4   : > { %p38_p0 = scmp.eq.s32.totalorder %s37_s14, 0  ;;  %p47_p1 = scmp.ne.s32.totalorder %s1549_s10, %s1545_s9 }
   0x5   : > { %p48_p2 = scmp.eq.s32.totalorder %s1553_s11, 0  ;;  %p1257_p4 = scmp.ge.s32.totalorder %s1553_s11, 3 }
   0x6   : > { %s1597_s16 = scalar_select %p38_p0, %s1549_s10, %s40_s15  }
   0x7   : > { %p49_p3 = por %p48_p2, %p47_p1  ;;  %102 = sbr.rel (%p1257_p4) target bundleno = 67 (0x43), region = 20 }
   0xe   : > { %105 = sbr.rel (!%p49_p3) target bundleno = 67 (0x43), region = 24  ;;  %s107_s17 = sand.u32 (%p49_p3), 1, %s1549_s10  }
   0xf   : > { %s1359_s18 = smul.u32 (%p49_p3), 48, %s1553_s11 }
  0x10   : > { %s1360_s19 = smul.u32 (%p49_p3), 768, %s107_s17 }
  0x11   : > { %s1605_s22 = scalar_lea.vmem (%p49_p3), %s1949_s1, %s1359_s18 }
  0x12   : > { %v125_v0 = vld [vmem:[%s1605_s22] sm:$0xff] (%p49_p3)  ;;  %v127_v1 = vld [vmem:[%s1605_s22 + $0x8] sm:$0xff] (%p49_p3)  ;;  %v129_v2 = vld [vmem:[%s1605_s22 + $0x10] sm:$0xff] (%p49_p3)  ;;  %s1610_s23 = scalar_lea.vmem (%p49_p3), [#allocation2], %s1360_s19 }
  0x13   : > { %126 = vst [vmem:[%s1610_s23] sm:$0xff] (%p49_p3), %v125_v0  ;;  %128 = vst [vmem:[%s1610_s23 + $0x8] sm:$0xff] (%p49_p3), %v127_v1  ;;  %v131_v3 = vld [vmem:[%s1605_s22 + $0x18] sm:$0xff] (%p49_p3)  ;;  %v133_v4 = vld [vmem:[%s1605_s22 + $0x20] sm:$0xff] (%p49_p3) }
  0x14   : > { %130 = vst [vmem:[%s1610_s23 + $0x10] sm:$0xff] (%p49_p3), %v129_v2  ;;  %v135_v5 = vld [vmem:[%s1605_s22 + $0x28] sm:$0xff] (%p49_p3)  ;;  %132 = vst [vmem:[%s1610_s23 + $0x18] sm:$0xff] (%p49_p3), %v131_v3  ;;  %v137_v6 = vld [vmem:[%s1605_s22 + $0x90] sm:$0xff] (%p49_p3) }
  0x15   : > { %134 = vst [vmem:[%s1610_s23 + $0x20] sm:$0xff] %v133_v4  ;;  %136 = vst [vmem:[%s1610_s23 + $0x28] sm:$0xff] %v135_v5  ;;  %v139_v7 = vld [vmem:[%s1605_s22 + $0x98] sm:$0xff]  ;;  %v141_v8 = vld [vmem:[%s1605_s22 + $0xa0] sm:$0xff] }
  0x16   : > { %138 = vst [vmem:[%s1610_s23 + $0x30] sm:$0xff] %v137_v6  ;;  %140 = vst [vmem:[%s1610_s23 + $0x38] sm:$0xff] %v139_v7  ;;  %v143_v9 = vld [vmem:[%s1605_s22 + $0xa8] sm:$0xff]  ;;  %v145_v10 = vld [vmem:[%s1605_s22 + $0xb0] sm:$0xff] }
  0x17   : > { %142 = vst [vmem:[%s1610_s23 + $0x40] sm:$0xff] %v141_v8  ;;  %v147_v11 = vld [vmem:[%s1605_s22 + $0xb8] sm:$0xff]  ;;  %144 = vst [vmem:[%s1610_s23 + $0x48] sm:$0xff] %v143_v9  ;;  %v149_v12 = vld [vmem:[%s1605_s22 + $0x120] sm:$0xff] }
  0x18   : > { %146 = vst [vmem:[%s1610_s23 + $0x50] sm:$0xff] %v145_v10  ;;  %148 = vst [vmem:[%s1610_s23 + $0x58] sm:$0xff] %v147_v11  ;;  %v151_v13 = vld [vmem:[%s1605_s22 + $0x128] sm:$0xff]  ;;  %v153_v14 = vld [vmem:[%s1605_s22 + $0x130] sm:$0xff] }
  0x19   : > { %150 = vst [vmem:[%s1610_s23 + $0x60] sm:$0xff] %v149_v12  ;;  %152 = vst [vmem:[%s1610_s23 + $0x68] sm:$0xff] %v151_v13  ;;  %v155_v15 = vld [vmem:[%s1605_s22 + $0x138] sm:$0xff]  ;;  %v157_v16 = vld [vmem:[%s1605_s22 + $0x140] sm:$0xff] }
  0x1a   : > { %154 = vst [vmem:[%s1610_s23 + $0x70] sm:$0xff] %v153_v14  ;;  %v159_v17 = vld [vmem:[%s1605_s22 + $0x148] sm:$0xff]  ;;  %156 = vst [vmem:[%s1610_s23 + $0x78] sm:$0xff] %v155_v15  ;;  %v161_v18 = vld [vmem:[%s1605_s22 + $0x1b0] sm:$0xff] }
  0x1b   : > { %158 = vst [vmem:[%s1610_s23 + $0x80] sm:$0xff] %v157_v16  ;;  %160 = vst [vmem:[%s1610_s23 + $0x88] sm:$0xff] %v159_v17  ;;  %v163_v19 = vld [vmem:[%s1605_s22 + $0x1b8] sm:$0xff]  ;;  %v165_v20 = vld [vmem:[%s1605_s22 + $0x1c0] sm:$0xff] }
  0x1c   : > { %162 = vst [vmem:[%s1610_s23 + $0x90] sm:$0xff] %v161_v18  ;;  %164 = vst [vmem:[%s1610_s23 + $0x98] sm:$0xff] %v163_v19  ;;  %v167_v21 = vld [vmem:[%s1605_s22 + $0x1c8] sm:$0xff]  ;;  %v169_v22 = vld [vmem:[%s1605_s22 + $0x1d0] sm:$0xff] }
  0x1d   : > { %166 = vst [vmem:[%s1610_s23 + $0xa0] sm:$0xff] %v165_v20  ;;  %v171_v23 = vld [vmem:[%s1605_s22 + $0x1d8] sm:$0xff]  ;;  %168 = vst [vmem:[%s1610_s23 + $0xa8] sm:$0xff] %v167_v21  ;;  %v173_v24 = vld [vmem:[%s1605_s22 + $0x240] sm:$0xff] }
  0x1e   : > { %170 = vst [vmem:[%s1610_s23 + $0xb0] sm:$0xff] %v169_v22  ;;  %172 = vst [vmem:[%s1610_s23 + $0xb8] sm:$0xff] %v171_v23  ;;  %v175_v25 = vld [vmem:[%s1605_s22 + $0x248] sm:$0xff]  ;;  %v177_v26 = vld [vmem:[%s1605_s22 + $0x250] sm:$0xff] }
  0x1f   : > { %174 = vst [vmem:[%s1610_s23 + $0xc0] sm:$0xff] %v173_v24  ;;  %176 = vst [vmem:[%s1610_s23 + $0xc8] sm:$0xff] %v175_v25  ;;  %v179_v27 = vld [vmem:[%s1605_s22 + $0x258] sm:$0xff]  ;;  %v181_v28 = vld [vmem:[%s1605_s22 + $0x260] sm:$0xff] }
  0x20   : > { %178 = vst [vmem:[%s1610_s23 + $0xd0] sm:$0xff] %v177_v26  ;;  %v183_v29 = vld [vmem:[%s1605_s22 + $0x268] sm:$0xff]  ;;  %180 = vst [vmem:[%s1610_s23 + $0xd8] sm:$0xff] %v179_v27  ;;  %v185_v30 = vld [vmem:[%s1605_s22 + $0x2d0] sm:$0xff] }
  0x21   : > { %182 = vst [vmem:[%s1610_s23 + $0xe0] sm:$0xff] %v181_v28  ;;  %184 = vst [vmem:[%s1610_s23 + $0xe8] sm:$0xff] %v183_v29  ;;  %v187_v31 = vld [vmem:[%s1605_s22 + $0x2d8] sm:$0xff]  ;;  %v189_v32 = vld [vmem:[%s1605_s22 + $0x2e0] sm:$0xff] }
  0x22   : > { %186 = vst [vmem:[%s1610_s23 + $0xf0] sm:$0xff] %v185_v30  ;;  %188 = vst [vmem:[%s1610_s23 + $0xf8] sm:$0xff] %v187_v31  ;;  %v191_v33 = vld [vmem:[%s1605_s22 + $0x2e8] sm:$0xff]  ;;  %v193_v34 = vld [vmem:[%s1605_s22 + $0x2f0] sm:$0xff] }
  0x23   : > { %190 = vst [vmem:[%s1610_s23 + $0x100] sm:$0xff] %v189_v32  ;;  %v195_v35 = vld [vmem:[%s1605_s22 + $0x2f8] sm:$0xff]  ;;  %192 = vst [vmem:[%s1610_s23 + $0x108] sm:$0xff] %v191_v33  ;;  %v197_v36 = vld [vmem:[%s1605_s22 + $0x360] sm:$0xff] }
  0x24   : > { %194 = vst [vmem:[%s1610_s23 + $0x110] sm:$0xff] %v193_v34  ;;  %196 = vst [vmem:[%s1610_s23 + $0x118] sm:$0xff] %v195_v35  ;;  %v199_v37 = vld [vmem:[%s1605_s22 + $0x368] sm:$0xff]  ;;  %v201_v38 = vld [vmem:[%s1605_s22 + $0x370] sm:$0xff] }
  0x25   : > { %198 = vst [vmem:[%s1610_s23 + $0x120] sm:$0xff] %v197_v36  ;;  %200 = vst [vmem:[%s1610_s23 + $0x128] sm:$0xff] %v199_v37  ;;  %v203_v39 = vld [vmem:[%s1605_s22 + $0x378] sm:$0xff]  ;;  %v205_v40 = vld [vmem:[%s1605_s22 + $0x380] sm:$0xff] }
  0x26   : > { %202 = vst [vmem:[%s1610_s23 + $0x130] sm:$0xff] %v201_v38  ;;  %v207_v41 = vld [vmem:[%s1605_s22 + $0x388] sm:$0xff]  ;;  %204 = vst [vmem:[%s1610_s23 + $0x138] sm:$0xff] %v203_v39  ;;  %v209_v42 = vld [vmem:[%s1605_s22 + $0x3f0] sm:$0xff] }
  0x27   : > { %206 = vst [vmem:[%s1610_s23 + $0x140] sm:$0xff] %v205_v40  ;;  %208 = vst [vmem:[%s1610_s23 + $0x148] sm:$0xff] %v207_v41  ;;  %v211_v43 = vld [vmem:[%s1605_s22 + $0x3f8] sm:$0xff]  ;;  %v213_v44 = vld [vmem:[%s1605_s22 + $0x400] sm:$0xff] }
  0x28   : > { %210 = vst [vmem:[%s1610_s23 + $0x150] sm:$0xff] %v209_v42  ;;  %212 = vst [vmem:[%s1610_s23 + $0x158] sm:$0xff] %v211_v43  ;;  %v215_v45 = vld [vmem:[%s1605_s22 + $0x408] sm:$0xff]  ;;  %v217_v46 = vld [vmem:[%s1605_s22 + $0x410] sm:$0xff] }
  0x29   : > { %214 = vst [vmem:[%s1610_s23 + $0x160] sm:$0xff] %v213_v44  ;;  %v219_v47 = vld [vmem:[%s1605_s22 + $0x418] sm:$0xff]  ;;  %216 = vst [vmem:[%s1610_s23 + $0x168] sm:$0xff] %v215_v45  ;;  %v221_v48 = vld [vmem:[%s1605_s22 + $0x480] sm:$0xff] }
  0x2a   : > { %218 = vst [vmem:[%s1610_s23 + $0x170] sm:$0xff] %v217_v46  ;;  %220 = vst [vmem:[%s1610_s23 + $0x178] sm:$0xff] %v219_v47  ;;  %v223_v49 = vld [vmem:[%s1605_s22 + $0x488] sm:$0xff]  ;;  %v225_v50 = vld [vmem:[%s1605_s22 + $0x490] sm:$0xff] }
  0x2b   : > { %222 = vst [vmem:[%s1610_s23 + $0x180] sm:$0xff] %v221_v48  ;;  %224 = vst [vmem:[%s1610_s23 + $0x188] sm:$0xff] %v223_v49  ;;  %v227_v51 = vld [vmem:[%s1605_s22 + $0x498] sm:$0xff]  ;;  %v229_v52 = vld [vmem:[%s1605_s22 + $0x4a0] sm:$0xff] }
  0x2c   : > { %226 = vst [vmem:[%s1610_s23 + $0x190] sm:$0xff] %v225_v50  ;;  %v231_v53 = vld [vmem:[%s1605_s22 + $0x4a8] sm:$0xff]  ;;  %228 = vst [vmem:[%s1610_s23 + $0x198] sm:$0xff] %v227_v51  ;;  %v233_v54 = vld [vmem:[%s1605_s22 + $0x510] sm:$0xff] }
  0x2d   : > { %230 = vst [vmem:[%s1610_s23 + $0x1a0] sm:$0xff] %v229_v52  ;;  %232 = vst [vmem:[%s1610_s23 + $0x1a8] sm:$0xff] %v231_v53  ;;  %v235_v55 = vld [vmem:[%s1605_s22 + $0x518] sm:$0xff]  ;;  %v237_v56 = vld [vmem:[%s1605_s22 + $0x520] sm:$0xff] }
  0x2e   : > { %234 = vst [vmem:[%s1610_s23 + $0x1b0] sm:$0xff] %v233_v54  ;;  %236 = vst [vmem:[%s1610_s23 + $0x1b8] sm:$0xff] %v235_v55  ;;  %v239_v57 = vld [vmem:[%s1605_s22 + $0x528] sm:$0xff]  ;;  %v241_v58 = vld [vmem:[%s1605_s22 + $0x530] sm:$0xff] }
  0x2f   : > { %238 = vst [vmem:[%s1610_s23 + $0x1c0] sm:$0xff] %v237_v56  ;;  %v243_v59 = vld [vmem:[%s1605_s22 + $0x538] sm:$0xff]  ;;  %240 = vst [vmem:[%s1610_s23 + $0x1c8] sm:$0xff] %v239_v57  ;;  %v245_v60 = vld [vmem:[%s1605_s22 + $0x5a0] sm:$0xff] }
  0x30   : > { %242 = vst [vmem:[%s1610_s23 + $0x1d0] sm:$0xff] %v241_v58  ;;  %244 = vst [vmem:[%s1610_s23 + $0x1d8] sm:$0xff] %v243_v59  ;;  %v247_v61 = vld [vmem:[%s1605_s22 + $0x5a8] sm:$0xff]  ;;  %v249_v62 = vld [vmem:[%s1605_s22 + $0x5b0] sm:$0xff] }
  0x31   : > { %246 = vst [vmem:[%s1610_s23 + $0x1e0] sm:$0xff] %v245_v60  ;;  %248 = vst [vmem:[%s1610_s23 + $0x1e8] sm:$0xff] %v247_v61  ;;  %v251_v63 = vld [vmem:[%s1605_s22 + $0x5b8] sm:$0xff]  ;;  %v253_v0 = vld [vmem:[%s1605_s22 + $0x5c0] sm:$0xff] }
  0x32   : > { %250 = vst [vmem:[%s1610_s23 + $0x1f0] sm:$0xff] %v249_v62  ;;  %v255_v1 = vld [vmem:[%s1605_s22 + $0x5c8] sm:$0xff]  ;;  %252 = vst [vmem:[%s1610_s23 + $0x1f8] sm:$0xff] %v251_v63  ;;  %v257_v2 = vld [vmem:[%s1605_s22 + $0x630] sm:$0xff] }
  0x33   : > { %254 = vst [vmem:[%s1610_s23 + $0x200] sm:$0xff] %v253_v0  ;;  %256 = vst [vmem:[%s1610_s23 + $0x208] sm:$0xff] %v255_v1  ;;  %v259_v3 = vld [vmem:[%s1605_s22 + $0x638] sm:$0xff]  ;;  %v261_v4 = vld [vmem:[%s1605_s22 + $0x640] sm:$0xff] }
  0x34   : > { %258 = vst [vmem:[%s1610_s23 + $0x210] sm:$0xff] %v257_v2  ;;  %260 = vst [vmem:[%s1610_s23 + $0x218] sm:$0xff] %v259_v3  ;;  %v263_v5 = vld [vmem:[%s1605_s22 + $0x648] sm:$0xff]  ;;  %v265_v6 = vld [vmem:[%s1605_s22 + $0x650] sm:$0xff] }
  0x35   : > { %262 = vst [vmem:[%s1610_s23 + $0x220] sm:$0xff] %v261_v4  ;;  %v267_v7 = vld [vmem:[%s1605_s22 + $0x658] sm:$0xff]  ;;  %264 = vst [vmem:[%s1610_s23 + $0x228] sm:$0xff] %v263_v5  ;;  %v269_v8 = vld [vmem:[%s1605_s22 + $0x6c0] sm:$0xff] }
  0x36   : > { %266 = vst [vmem:[%s1610_s23 + $0x230] sm:$0xff] %v265_v6  ;;  %268 = vst [vmem:[%s1610_s23 + $0x238] sm:$0xff] %v267_v7  ;;  %v271_v9 = vld [vmem:[%s1605_s22 + $0x6c8] sm:$0xff]  ;;  %v273_v10 = vld [vmem:[%s1605_s22 + $0x6d0] sm:$0xff] }
  0x37   : > { %270 = vst [vmem:[%s1610_s23 + $0x240] sm:$0xff] %v269_v8  ;;  %272 = vst [vmem:[%s1610_s23 + $0x248] sm:$0xff] %v271_v9  ;;  %v275_v11 = vld [vmem:[%s1605_s22 + $0x6d8] sm:$0xff]  ;;  %v277_v12 = vld [vmem:[%s1605_s22 + $0x6e0] sm:$0xff] }
  0x38   : > { %274 = vst [vmem:[%s1610_s23 + $0x250] sm:$0xff] %v273_v10  ;;  %v279_v13 = vld [vmem:[%s1605_s22 + $0x6e8] sm:$0xff]  ;;  %276 = vst [vmem:[%s1610_s23 + $0x258] sm:$0xff] %v275_v11  ;;  %v281_v14 = vld [vmem:[%s1605_s22 + $0x750] sm:$0xff] }
  0x39   : > { %278 = vst [vmem:[%s1610_s23 + $0x260] sm:$0xff] %v277_v12  ;;  %280 = vst [vmem:[%s1610_s23 + $0x268] sm:$0xff] %v279_v13  ;;  %v283_v15 = vld [vmem:[%s1605_s22 + $0x758] sm:$0xff]  ;;  %v285_v16 = vld [vmem:[%s1605_s22 + $0x760] sm:$0xff] }
  0x3a   : > { %282 = vst [vmem:[%s1610_s23 + $0x270] sm:$0xff] %v281_v14  ;;  %284 = vst [vmem:[%s1610_s23 + $0x278] sm:$0xff] %v283_v15  ;;  %v287_v17 = vld [vmem:[%s1605_s22 + $0x768] sm:$0xff]  ;;  %v289_v18 = vld [vmem:[%s1605_s22 + $0x770] sm:$0xff] }
  0x3b   : > { %286 = vst [vmem:[%s1610_s23 + $0x280] sm:$0xff] %v285_v16  ;;  %v291_v19 = vld [vmem:[%s1605_s22 + $0x778] sm:$0xff]  ;;  %288 = vst [vmem:[%s1610_s23 + $0x288] sm:$0xff] %v287_v17  ;;  %v293_v20 = vld [vmem:[%s1605_s22 + $0x7e0] sm:$0xff] }
  0x3c   : > { %290 = vst [vmem:[%s1610_s23 + $0x290] sm:$0xff] %v289_v18  ;;  %292 = vst [vmem:[%s1610_s23 + $0x298] sm:$0xff] %v291_v19  ;;  %v295_v21 = vld [vmem:[%s1605_s22 + $0x7e8] sm:$0xff]  ;;  %v297_v22 = vld [vmem:[%s1605_s22 + $0x7f0] sm:$0xff] }
  0x3d   : > { %294 = vst [vmem:[%s1610_s23 + $0x2a0] sm:$0xff] %v293_v20  ;;  %296 = vst [vmem:[%s1610_s23 + $0x2a8] sm:$0xff] %v295_v21  ;;  %v299_v23 = vld [vmem:[%s1605_s22 + $0x7f8] sm:$0xff]  ;;  %v301_v24 = vld [vmem:[%s1605_s22 + $0x800] sm:$0xff] }
  0x3e   : > { %298 = vst [vmem:[%s1610_s23 + $0x2b0] sm:$0xff] %v297_v22  ;;  %v303_v25 = vld [vmem:[%s1605_s22 + $0x808] sm:$0xff]  ;;  %300 = vst [vmem:[%s1610_s23 + $0x2b8] sm:$0xff] %v299_v23  ;;  %v305_v26 = vld [vmem:[%s1605_s22 + $0x870] sm:$0xff] }
  0x3f   : > { %302 = vst [vmem:[%s1610_s23 + $0x2c0] sm:$0xff] %v301_v24  ;;  %304 = vst [vmem:[%s1610_s23 + $0x2c8] sm:$0xff] %v303_v25  ;;  %v307_v27 = vld [vmem:[%s1605_s22 + $0x878] sm:$0xff]  ;;  %v309_v28 = vld [vmem:[%s1605_s22 + $0x880] sm:$0xff] }
  0x40   : > { %306 = vst [vmem:[%s1610_s23 + $0x2d0] sm:$0xff] %v305_v26  ;;  %308 = vst [vmem:[%s1610_s23 + $0x2d8] sm:$0xff] %v307_v27  ;;  %v311_v29 = vld [vmem:[%s1605_s22 + $0x888] sm:$0xff]  ;;  %v313_v30 = vld [vmem:[%s1605_s22 + $0x890] sm:$0xff] }
  0x41   : > { %310 = vst [vmem:[%s1610_s23 + $0x2e0] sm:$0xff] %v309_v28  ;;  %v315_v31 = vld [vmem:[%s1605_s22 + $0x898] sm:$0xff]  ;;  %312 = vst [vmem:[%s1610_s23 + $0x2e8] sm:$0xff] %v311_v29 }
  0x42   : > { %314 = vst [vmem:[%s1610_s23 + $0x2f0] sm:$0xff] %v313_v30  ;;  %316 = vst [vmem:[%s1610_s23 + $0x2f8] sm:$0xff] %v315_v31 }
  0x43 PF: > { %p1259_p5 = scmp.ge.s32.totalorder %s1553_s11, 1  ;;  %p321_p6 = scmp.lt.s32.totalorder %s1553_s11, 4 }
  0x45   : > { %p322_p7 = pnand %p1259_p5, %p321_p6 }
  0x46   : > { %s328_s24 = sand.u32 (!%p322_p7), 1, %s1545_s9   ;;  %v1555_v32 = vmov (!%p322_p7), 0   ;;  %v1845_v3 = vld [vmem:[%s1948_s0] sm:$0xf] (!%p322_p7)  ;;  %s350_s29 = smul.u32 (!%p322_p7), 12, %s1254_s12 }
  0x47   : > { %325 = sbr.rel (%p322_p7) target bundleno = 387 (0x183), region = 47  ;;  %966 = vmatprep.mubr.bf16.mxu0 (!%p322_p7), %v1555_v32  ;;  %1007 = vmatprep.mubr.bf16.mxu1 (!%p322_p7), %v1555_v32 }
  0x48   : > { %s1361_s25 = smul.u32 (!%p322_p7), 768, %s328_s24  ;;  %p351_p8 = scmp.lt.s32.totalorder (!%p322_p7), %s350_s29, 35 }
  0x4a   : > { %s1806_s26 = scalar_lea.vmem (!%p322_p7), [#allocation2], %s1361_s25 }
  0x4b   : > { %v1387_v33 = vld [vmem:[%s1806_s26 + $0x4] ss:$48 sps:$4 sm:$0xff] (!%p322_p7)   ;;  %v1389_v34 = vld [vmem:[%s1806_s26 + $0xc] ss:$48 sps:$4 sm:$0xff] (!%p322_p7)   ;;  %v1391_v35 = vld [vmem:[%s1806_s26] ss:$48 sps:$4 sm:$0xff] (!%p322_p7)  }
  0x4c   : > { %934 = vmatprep.subr.bf16.mxu0 (!%p322_p7), %v1387_v33  ;;  %v1392_v36 = vld [vmem:[%s1806_s26 + $0x8] ss:$48 sps:$4 sm:$0xff] (!%p322_p7)   ;;  %975 = vmatprep.subr.bf16.mxu1 (!%p322_p7), %v1389_v34  ;;  %v1393_v37 = vld [vmem:[%s1806_s26 + $0x64] ss:$48 sps:$4 sm:$0xff] (!%p322_p7)   ;;  %v1395_v38 = vld [vmem:[%s1806_s26 + $0x6c] ss:$48 sps:$4 sm:$0xff] (!%p322_p7)  }
  0x4d   : > { %935 = vmatpush1.bf16.msra.mxu0 (!%p322_p7), %v1391_v35  ;;  %976 = vmatpush1.bf16.msra.mxu1 (!%p322_p7), %v1392_v36  ;;  %v1397_v39 = vld [vmem:[%s1806_s26 + $0x60] ss:$48 sps:$4 sm:$0xff] (!%p322_p7)   ;;  %v1398_v40 = vld [vmem:[%s1806_s26 + $0x68] ss:$48 sps:$4 sm:$0xff] (!%p322_p7)   ;;  %v1399_v41 = vld [vmem:[%s1806_s26 + $0xc4] ss:$48 sps:$4 sm:$0xff] (!%p322_p7)  }
  0x4e   : > { %936 = vmatprep.subr.bf16.mxu0 %v1393_v37  ;;  %977 = vmatprep.subr.bf16.mxu1 %v1395_v38  ;;  %v1401_v42 = vld [vmem:[%s1806_s26 + $0xcc] ss:$48 sps:$4 sm:$0xff]   ;;  %v1403_v43 = vld [vmem:[%s1806_s26 + $0xc0] ss:$48 sps:$4 sm:$0xff]   ;;  %v1404_v44 = vld [vmem:[%s1806_s26 + $0xc8] ss:$48 sps:$4 sm:$0xff]  }
  0x4f   : > { %v1405_v45 = vld [vmem:[%s1806_s26 + $0x124] ss:$48 sps:$4 sm:$0xff]   ;;  %v1407_v46 = vld [vmem:[%s1806_s26 + $0x12c] ss:$48 sps:$4 sm:$0xff]   ;;  %v1409_v47 = vld [vmem:[%s1806_s26 + $0x120] ss:$48 sps:$4 sm:$0xff]  }
  0x50   : > { %v1410_v48 = vld [vmem:[%s1806_s26 + $0x128] ss:$48 sps:$4 sm:$0xff]   ;;  %v1411_v49 = vld [vmem:[%s1806_s26 + $0x184] ss:$48 sps:$4 sm:$0xff]   ;;  %v1413_v50 = vld [vmem:[%s1806_s26 + $0x18c] ss:$48 sps:$4 sm:$0xff]  }
  0x51   : > { %937 = vmatpush1.bf16.msra.mxu0 %v1397_v39  ;;  %978 = vmatpush1.bf16.msra.mxu1 %v1398_v40  ;;  %v1415_v51 = vld [vmem:[%s1806_s26 + $0x180] ss:$48 sps:$4 sm:$0xff]   ;;  %v1416_v52 = vld [vmem:[%s1806_s26 + $0x188] ss:$48 sps:$4 sm:$0xff]   ;;  %v1417_v53 = vld [vmem:[%s1806_s26 + $0x1e4] ss:$48 sps:$4 sm:$0xff]  }
  0x52   : > { %938 = vmatprep.subr.bf16.mxu0 %v1399_v41  ;;  %979 = vmatprep.subr.bf16.mxu1 %v1401_v42  ;;  %v1419_v54 = vld [vmem:[%s1806_s26 + $0x1ec] ss:$48 sps:$4 sm:$0xff]   ;;  %v1421_v55 = vld [vmem:[%s1806_s26 + $0x1e0] ss:$48 sps:$4 sm:$0xff]   ;;  %v1422_v56 = vld [vmem:[%s1806_s26 + $0x1e8] ss:$48 sps:$4 sm:$0xff]  }
  0x53   : > { %v1423_v57 = vld [vmem:[%s1806_s26 + $0x244] ss:$48 sps:$4 sm:$0xff]   ;;  %v1425_v58 = vld [vmem:[%s1806_s26 + $0x24c] ss:$48 sps:$4 sm:$0xff]   ;;  %v1427_v59 = vld [vmem:[%s1806_s26 + $0x240] ss:$48 sps:$4 sm:$0xff]  }
  0x54   : > { %v1428_v60 = vld [vmem:[%s1806_s26 + $0x248] ss:$48 sps:$4 sm:$0xff]   ;;  %v1429_v61 = vld [vmem:[%s1806_s26 + $0x2a4] ss:$48 sps:$4 sm:$0xff]   ;;  %v1431_v62 = vld [vmem:[%s1806_s26 + $0x2ac] ss:$48 sps:$4 sm:$0xff]  }
  0x55   : > { %939 = vmatpush1.bf16.msra.mxu0 %v1403_v43  ;;  %980 = vmatpush1.bf16.msra.mxu1 %v1404_v44  ;;  %v1433_v63 = vld [vmem:[%s1806_s26 + $0x2a0] ss:$48 sps:$4 sm:$0xff]   ;;  %v1434_v0 = vld [vmem:[%s1806_s26 + $0x2a8] ss:$48 sps:$4 sm:$0xff]   ;;  %v1437_v1 = vld [vmem:[%s1806_s26 + $0x14] ss:$48 sps:$4 sm:$0xff]  }
  0x56   : > { %940 = vmatprep.subr.bf16.mxu0 %v1405_v45  ;;  %981 = vmatprep.subr.bf16.mxu1 %v1407_v46  ;;  %v1440_v2 = vld [vmem:[%s1806_s26 + $0x1c] ss:$48 sps:$4 sm:$0xff]   ;;  %v1435_v4 = vld [vmem:[%s1806_s26 + $0x10] ss:$48 sps:$4 sm:$0xff]   ;;  %v1438_v5 = vld [vmem:[%s1806_s26 + $0x18] ss:$48 sps:$4 sm:$0xff]  }
  0x57   : > { %v1443_v6 = vld [vmem:[%s1806_s26 + $0x74] ss:$48 sps:$4 sm:$0xff]   ;;  %v1446_v7 = vld [vmem:[%s1806_s26 + $0x7c] ss:$48 sps:$4 sm:$0xff]   ;;  %v1441_v8 = vld [vmem:[%s1806_s26 + $0x70] ss:$48 sps:$4 sm:$0xff]  }
  0x58   : > { %v1444_v9 = vld [vmem:[%s1806_s26 + $0x78] ss:$48 sps:$4 sm:$0xff]   ;;  %v1449_v10 = vld [vmem:[%s1806_s26 + $0xd4] ss:$48 sps:$4 sm:$0xff]   ;;  %v1452_v11 = vld [vmem:[%s1806_s26 + $0xdc] ss:$48 sps:$4 sm:$0xff]  }
  0x59   : > { %941 = vmatpush1.bf16.msra.mxu0 %v1409_v47  ;;  %982 = vmatpush1.bf16.msra.mxu1 %v1410_v48  ;;  %v1447_v12 = vld [vmem:[%s1806_s26 + $0xd0] ss:$48 sps:$4 sm:$0xff]   ;;  %v1450_v13 = vld [vmem:[%s1806_s26 + $0xd8] ss:$48 sps:$4 sm:$0xff]   ;;  %v1455_v14 = vld [vmem:[%s1806_s26 + $0x134] ss:$48 sps:$4 sm:$0xff]  }
  0x5a   : > { %942 = vmatprep.subr.bf16.mxu0 %v1411_v49  ;;  %983 = vmatprep.subr.bf16.mxu1 %v1413_v50  ;;  %v1458_v15 = vld [vmem:[%s1806_s26 + $0x13c] ss:$48 sps:$4 sm:$0xff]   ;;  %v1453_v16 = vld [vmem:[%s1806_s26 + $0x130] ss:$48 sps:$4 sm:$0xff]   ;;  %v1456_v17 = vld [vmem:[%s1806_s26 + $0x138] ss:$48 sps:$4 sm:$0xff]  }
  0x5b   : > { %v1461_v18 = vld [vmem:[%s1806_s26 + $0x194] ss:$48 sps:$4 sm:$0xff]   ;;  %v1464_v19 = vld [vmem:[%s1806_s26 + $0x19c] ss:$48 sps:$4 sm:$0xff]   ;;  %v1459_v20 = vld [vmem:[%s1806_s26 + $0x190] ss:$48 sps:$4 sm:$0xff]  }
  0x5c   : > { %v1462_v21 = vld [vmem:[%s1806_s26 + $0x198] ss:$48 sps:$4 sm:$0xff]   ;;  %v1467_v22 = vld [vmem:[%s1806_s26 + $0x1f4] ss:$48 sps:$4 sm:$0xff]   ;;  %v1470_v23 = vld [vmem:[%s1806_s26 + $0x1fc] ss:$48 sps:$4 sm:$0xff]  }
  0x5d   : > { %943 = vmatpush1.bf16.msra.mxu0 %v1415_v51  ;;  %984 = vmatpush1.bf16.msra.mxu1 %v1416_v52  ;;  %v1465_v24 = vld [vmem:[%s1806_s26 + $0x1f0] ss:$48 sps:$4 sm:$0xff]   ;;  %v1468_v25 = vld [vmem:[%s1806_s26 + $0x1f8] ss:$48 sps:$4 sm:$0xff]   ;;  %v1473_v26 = vld [vmem:[%s1806_s26 + $0x254] ss:$48 sps:$4 sm:$0xff]  }
  0x5e   : > { %944 = vmatprep.subr.bf16.mxu0 %v1417_v53  ;;  %985 = vmatprep.subr.bf16.mxu1 %v1419_v54  ;;  %v1476_v27 = vld [vmem:[%s1806_s26 + $0x25c] ss:$48 sps:$4 sm:$0xff]   ;;  %v1471_v28 = vld [vmem:[%s1806_s26 + $0x250] ss:$48 sps:$4 sm:$0xff]   ;;  %v1474_v29 = vld [vmem:[%s1806_s26 + $0x258] ss:$48 sps:$4 sm:$0xff]  }
  0x5f   : > { %v1479_v30 = vld [vmem:[%s1806_s26 + $0x2b4] ss:$48 sps:$4 sm:$0xff]   ;;  %v1482_v31 = vld [vmem:[%s1806_s26 + $0x2bc] ss:$48 sps:$4 sm:$0xff]   ;;  %v1477_v33 = vld [vmem:[%s1806_s26 + $0x2b0] ss:$48 sps:$4 sm:$0xff]  }
  0x60   : > { %v1480_v34 = vld [vmem:[%s1806_s26 + $0x2b8] ss:$48 sps:$4 sm:$0xff]   ;;  %v1485_v35 = vld [vmem:[%s1806_s26 + $0x24] ss:$48 sps:$4 sm:$0xff]   ;;  %v1488_v36 = vld [vmem:[%s1806_s26 + $0x2c] ss:$48 sps:$4 sm:$0xff]  }
  0x61   : > { %945 = vmatpush1.bf16.msra.mxu0 %v1421_v55  ;;  %986 = vmatpush1.bf16.msra.mxu1 %v1422_v56  ;;  %v1483_v37 = vld [vmem:[%s1806_s26 + $0x20] ss:$48 sps:$4 sm:$0xff]   ;;  %v1486_v38 = vld [vmem:[%s1806_s26 + $0x28] ss:$48 sps:$4 sm:$0xff]   ;;  %v1491_v39 = vld [vmem:[%s1806_s26 + $0x84] ss:$48 sps:$4 sm:$0xff]  }
  0x62   : > { %946 = vmatprep.subr.bf16.mxu0 %v1423_v57  ;;  %987 = vmatprep.subr.bf16.mxu1 %v1425_v58  ;;  %v1494_v40 = vld [vmem:[%s1806_s26 + $0x8c] ss:$48 sps:$4 sm:$0xff]   ;;  %v1489_v41 = vld [vmem:[%s1806_s26 + $0x80] ss:$48 sps:$4 sm:$0xff]   ;;  %v1492_v42 = vld [vmem:[%s1806_s26 + $0x88] ss:$48 sps:$4 sm:$0xff]  }
  0x63   : > { %v1497_v43 = vld [vmem:[%s1806_s26 + $0xe4] ss:$48 sps:$4 sm:$0xff]   ;;  %v1500_v44 = vld [vmem:[%s1806_s26 + $0xec] ss:$48 sps:$4 sm:$0xff]   ;;  %v1495_v45 = vld [vmem:[%s1806_s26 + $0xe0] ss:$48 sps:$4 sm:$0xff]  }
  0x64   : > { %v1498_v46 = vld [vmem:[%s1806_s26 + $0xe8] ss:$48 sps:$4 sm:$0xff]   ;;  %v1503_v47 = vld [vmem:[%s1806_s26 + $0x144] ss:$48 sps:$4 sm:$0xff]   ;;  %v1506_v48 = vld [vmem:[%s1806_s26 + $0x14c] ss:$48 sps:$4 sm:$0xff]  }
  0x65   : > { %947 = vmatpush1.bf16.msra.mxu0 %v1427_v59  ;;  %988 = vmatpush1.bf16.msra.mxu1 %v1428_v60  ;;  %v1501_v49 = vld [vmem:[%s1806_s26 + $0x140] ss:$48 sps:$4 sm:$0xff]   ;;  %v1504_v50 = vld [vmem:[%s1806_s26 + $0x148] ss:$48 sps:$4 sm:$0xff]   ;;  %v1512_v51 = vld [vmem:[%s1806_s26 + $0x1ac] ss:$48 sps:$4 sm:$0xff]  }
  0x66   : > { %948 = vmatprep.subr.bf16.mxu0 %v1429_v61  ;;  %989 = vmatprep.subr.bf16.mxu1 %v1431_v62  ;;  %v1507_v52 = vld [vmem:[%s1806_s26 + $0x1a0] ss:$48 sps:$4 sm:$0xff]   ;;  %v1510_v53 = vld [vmem:[%s1806_s26 + $0x1a8] ss:$48 sps:$4 sm:$0xff]   ;;  %v1515_v54 = vld [vmem:[%s1806_s26 + $0x204] ss:$48 sps:$4 sm:$0xff]  }
  0x67   : > { %v1518_v55 = vld [vmem:[%s1806_s26 + $0x20c] ss:$48 sps:$4 sm:$0xff]   ;;  %v1513_v56 = vld [vmem:[%s1806_s26 + $0x200] ss:$48 sps:$4 sm:$0xff]   ;;  %v1516_v57 = vld [vmem:[%s1806_s26 + $0x208] ss:$48 sps:$4 sm:$0xff]  }
  0x68   : > { %v1521_v58 = vld [vmem:[%s1806_s26 + $0x264] ss:$48 sps:$4 sm:$0xff]   ;;  %v1524_v59 = vld [vmem:[%s1806_s26 + $0x26c] ss:$48 sps:$4 sm:$0xff]   ;;  %v1519_v60 = vld [vmem:[%s1806_s26 + $0x260] ss:$48 sps:$4 sm:$0xff]  }
  0x69   : > { %949 = vmatpush1.bf16.msra.mxu0 %v1433_v63  ;;  %990 = vmatpush1.bf16.msra.mxu1 %v1434_v0  ;;  %v1522_v61 = vld [vmem:[%s1806_s26 + $0x268] ss:$48 sps:$4 sm:$0xff]   ;;  %v1527_v62 = vld [vmem:[%s1806_s26 + $0x2c4] ss:$48 sps:$4 sm:$0xff]   ;;  %v1530_v63 = vld [vmem:[%s1806_s26 + $0x2cc] ss:$48 sps:$4 sm:$0xff]  }
  0x6a   : > { %1016 = vmatprep.subr.bf16.mxu0 %v1437_v1  ;;  %1057 = vmatprep.subr.bf16.mxu1 %v1440_v2  ;;  %v1525_v0 = vld [vmem:[%s1806_s26 + $0x2c0] ss:$48 sps:$4 sm:$0xff]   ;;  %v1528_v1 = vld [vmem:[%s1806_s26 + $0x2c8] ss:$48 sps:$4 sm:$0xff]   ;;  %s1955_s29 = smov (!%p351_p8, %s350_s29), 35 }
  0x6b   : > { %s1260_s30 = sshll.u32 %s1955_s29, 3 }
  0x6c   : > { %967 = vmatmul.mubr.bf16.vlgmr.msra.gmra.mrb[0].mxu0 %v1845_v3  ;;  %1008 = vmatmul.mubr.bf16.vlgmr.msra.gmra.mrb[0].mxu1 %v1845_v3  ;;  %s1924_s5 = scalar_lea.vmem %s1950_s2, %s1260_s30 }
  0x6d   : > { %1017 = vmatpush1.bf16.msra.mxu0 %v1435_v4  ;;  %1058 = vmatpush1.bf16.msra.mxu1 %v1438_v5 }
  0x6e   : > { %1018 = vmatprep.subr.bf16.mxu0 %v1443_v6  ;;  %1059 = vmatprep.subr.bf16.mxu1 %v1446_v7 }
  0x6f   : > { %1048 = vmatprep.mubr.bf16.mxu0 %v1555_v32  ;;  %1089 = vmatprep.mubr.bf16.mxu1 %v1555_v32 }
  0x71   : > { %1019 = vmatpush1.bf16.msra.mxu0 %v1441_v8  ;;  %1060 = vmatpush1.bf16.msra.mxu1 %v1444_v9 }
  0x72   : > { %1020 = vmatprep.subr.bf16.mxu0 %v1449_v10  ;;  %1061 = vmatprep.subr.bf16.mxu1 %v1452_v11 }
  0x75   : > { %1021 = vmatpush1.bf16.msra.mxu0 %v1447_v12  ;;  %1062 = vmatpush1.bf16.msra.mxu1 %v1450_v13 }
  0x76   : > { %1022 = vmatprep.subr.bf16.mxu0 %v1455_v14  ;;  %1063 = vmatprep.subr.bf16.mxu1 %v1458_v15 }
  0x79   : > { %1023 = vmatpush1.bf16.msra.mxu0 %v1453_v16  ;;  %1064 = vmatpush1.bf16.msra.mxu1 %v1456_v17 }
  0x7a   : > { %1024 = vmatprep.subr.bf16.mxu0 %v1461_v18  ;;  %1065 = vmatprep.subr.bf16.mxu1 %v1464_v19 }
  0x7d   : > { %1025 = vmatpush1.bf16.msra.mxu0 %v1459_v20  ;;  %1066 = vmatpush1.bf16.msra.mxu1 %v1462_v21 }
  0x7e   : > { %1026 = vmatprep.subr.bf16.mxu0 %v1467_v22  ;;  %1067 = vmatprep.subr.bf16.mxu1 %v1470_v23 }
  0x81   : > { %1027 = vmatpush1.bf16.msra.mxu0 %v1465_v24  ;;  %1068 = vmatpush1.bf16.msra.mxu1 %v1468_v25 }
  0x82   : > { %1028 = vmatprep.subr.bf16.mxu0 %v1473_v26  ;;  %1069 = vmatprep.subr.bf16.mxu1 %v1476_v27 }
  0x85   : > { %1029 = vmatpush1.bf16.msra.mxu0 %v1471_v28  ;;  %1070 = vmatpush1.bf16.msra.mxu1 %v1474_v29 }
  0x86   : > { %1030 = vmatprep.subr.bf16.mxu0 %v1479_v30  ;;  %1071 = vmatprep.subr.bf16.mxu1 %v1482_v31 }
  0x89   : > { %1031 = vmatpush1.bf16.msra.mxu0 %v1477_v33  ;;  %1072 = vmatpush1.bf16.msra.mxu1 %v1480_v34 }
  0x8a   : > { %1098 = vmatprep.subr.bf16.mxu0 %v1485_v35  ;;  %1139 = vmatprep.subr.bf16.mxu1 %v1488_v36 }
  0x8c   : > { %1049 = vmatmul.mubr.bf16.vlgmr.msra.gmra.mrb[4].mxu0 %v1845_v3  ;;  %1090 = vmatmul.mubr.bf16.vlgmr.msra.gmra.mrb[4].mxu1 %v1845_v3 }
  0x8d   : > { %1099 = vmatpush1.bf16.msra.mxu0 %v1483_v37  ;;  %1140 = vmatpush1.bf16.msra.mxu1 %v1486_v38 }
  0x8e   : > { %1100 = vmatprep.subr.bf16.mxu0 %v1491_v39  ;;  %1141 = vmatprep.subr.bf16.mxu1 %v1494_v40 }
  0x8f   : > { %1130 = vmatprep.mubr.bf16.mxu0 %v1555_v32  ;;  %1171 = vmatprep.mubr.bf16.mxu1 %v1555_v32  ;;  %v1509_v32 = vld [vmem:[%s1806_s26 + $0x1a4] ss:$48 sps:$4 sm:$0xff]  }
  0x91   : > { %1101 = vmatpush1.bf16.msra.mxu0 %v1489_v41  ;;  %1142 = vmatpush1.bf16.msra.mxu1 %v1492_v42 }
  0x92   : > { %1102 = vmatprep.subr.bf16.mxu0 %v1497_v43  ;;  %1143 = vmatprep.subr.bf16.mxu1 %v1500_v44 }
  0x95   : > { %1103 = vmatpush1.bf16.msra.mxu0 %v1495_v45  ;;  %1144 = vmatpush1.bf16.msra.mxu1 %v1498_v46 }
  0x96   : > { %1104 = vmatprep.subr.bf16.mxu0 %v1503_v47  ;;  %1145 = vmatprep.subr.bf16.mxu1 %v1506_v48 }
  0x99   : > { %1105 = vmatpush1.bf16.msra.mxu0 %v1501_v49  ;;  %1146 = vmatpush1.bf16.msra.mxu1 %v1504_v50 }
  0x9a   : > { %1106 = vmatprep.subr.bf16.mxu0 %v1509_v32  ;;  %1147 = vmatprep.subr.bf16.mxu1 %v1512_v51 }
  0x9d   : > { %1107 = vmatpush1.bf16.msra.mxu0 %v1507_v52  ;;  %1148 = vmatpush1.bf16.msra.mxu1 %v1510_v53 }
  0x9e   : > { %1108 = vmatprep.subr.bf16.mxu0 %v1515_v54  ;;  %1149 = vmatprep.subr.bf16.mxu1 %v1518_v55 }
  0xa1   : > { %1109 = vmatpush1.bf16.msra.mxu0 %v1513_v56  ;;  %1150 = vmatpush1.bf16.msra.mxu1 %v1516_v57 }
  0xa2   : > { %1110 = vmatprep.subr.bf16.mxu0 %v1521_v58  ;;  %1151 = vmatprep.subr.bf16.mxu1 %v1524_v59 }
  0xa5   : > { %1111 = vmatpush1.bf16.msra.mxu0 %v1519_v60  ;;  %1152 = vmatpush1.bf16.msra.mxu1 %v1522_v61 }
  0xa6   : > { %1112 = vmatprep.subr.bf16.mxu0 %v1527_v62  ;;  %1153 = vmatprep.subr.bf16.mxu1 %v1530_v63 }
  0xa9   : > { %1113 = vmatpush1.bf16.msra.mxu0 %v1525_v0  ;;  %1154 = vmatpush1.bf16.msra.mxu1 %v1528_v1 }
  0xac   : > { %1131 = vmatmul.mubr.bf16.vlgmr.msra.gmra.mrb[8].mxu0 %v1845_v3  ;;  %1172 = vmatmul.mubr.bf16.vlgmr.msra.gmra.mrb[8].mxu1 %v1845_v3 }
 0x13f   : > { %v968_v2 = vpop.f32.mrb[0].mxu0  ;;  %v1009_v4 = vpop.f32.mrb[0].mxu1 }
 0x140   : > { %1180 = vst [vmem:[%s1924_s5] sm:$0xff] %v968_v2  ;;  %1182 = vst [vmem:[%s1924_s5 + $0x10] sm:$0xff] %v1009_v4  ;;  %v970_v3 = vpop.f32.mrb[1].mxu0  ;;  %v1011_v5 = vpop.f32.mrb[1].mxu1 }
 0x141   : > { %1181 = vst [vmem:[%s1924_s5 + $0x8] sm:$0xff] %v970_v3  ;;  %1183 = vst [vmem:[%s1924_s5 + $0x18] sm:$0xff] %v1011_v5  ;;  %v972_v6 = vpop.f32.mrb[2].mxu0  ;;  %v1013_v7 = vpop.f32.mrb[2].mxu1 }
 0x142   : > { %v973_v8 = vpop.f32.mrb[3].mxu0  ;;  %v1014_v9 = vpop.f32.mrb[3].mxu1 }
 0x15f   : > { %v1050_v10 = vpop.f32.mrb[4].mxu0  ;;  %v1091_v11 = vpop.f32.mrb[4].mxu1 }
 0x160   : > { %1184 = vst [vmem:[%s1924_s5 + $0x20] sm:$0xff] %v1050_v10  ;;  %1186 = vst [vmem:[%s1924_s5 + $0x30] sm:$0xff] %v1091_v11  ;;  %v1052_v12 = vpop.f32.mrb[5].mxu0  ;;  %v1093_v13 = vpop.f32.mrb[5].mxu1 }
 0x161   : > { %1185 = vst [vmem:[%s1924_s5 + $0x28] sm:$0xff] %v1052_v12  ;;  %1187 = vst [vmem:[%s1924_s5 + $0x38] sm:$0xff] %v1093_v13  ;;  %v1054_v14 = vpop.f32.mrb[6].mxu0  ;;  %v1095_v15 = vpop.f32.mrb[6].mxu1 }
 0x162   : > { %v1055_v16 = vpop.f32.mrb[7].mxu0  ;;  %v1096_v17 = vpop.f32.mrb[7].mxu1 }
 0x17f   : > { %v1132_v18 = vpop.f32.mrb[8].mxu0  ;;  %v1173_v19 = vpop.f32.mrb[8].mxu1 }
 0x180   : > { %1188 = vst [vmem:[%s1924_s5 + $0x40] sm:$0xff] %v1132_v18  ;;  %1190 = vst [vmem:[%s1924_s5 + $0x50] sm:$0xff] %v1173_v19  ;;  %v1134_v20 = vpop.f32.mrb[9].mxu0  ;;  %v1175_v21 = vpop.f32.mrb[9].mxu1 }
 0x181   : > { %1189 = vst [vmem:[%s1924_s5 + $0x48] sm:$0xff] %v1134_v20  ;;  %1191 = vst [vmem:[%s1924_s5 + $0x58] sm:$0xff] %v1175_v21  ;;  %v1136_v22 = vpop.f32.mrb[10].mxu0  ;;  %v1177_v23 = vpop.f32.mrb[10].mxu1 }
 0x182   : > { %v1137_v24 = vpop.f32.mrb[11].mxu0  ;;  %v1178_v25 = vpop.f32.mrb[11].mxu1 }
 0x183 PF: > { %p9_p9 = scmp.ge.s32.totalorder %s1588_s13, 5   ;;  %s1951_s9 = smov %s1549_s10 }
 0x184   : > { %s1952_s10 = smov %s1597_s16  ;;  %s1953_s11 = smov %s1588_s13 }
 0x185   :  { %11 = sbr.rel (!%p9_p9) target bundleno = 2 (0x2), region = 86 }

</bundles_post_ra>
